<compile_context>
chip_gen: v5e
topology: v5e:2x2
jax: 0.10.0
libtpu: 0.0.40
codegen_flags: <defaults>
</compile_context>

<pallas_src>
import functools

import jax
import jax.numpy as jnp
from jax.experimental import pallas as pl
from jax.experimental.pallas import tpu as pltpu


_VMEM_LIMIT = 32 * 1024 * 1024  # explicit scoped-VMEM limit, safe on v5e/v6e/v7x


# ---------------------------------------------------------------------------
# Kernel 1: conv1 as im2col matmul + bias + LeakyReLU(0.1), row-tiled.
# ---------------------------------------------------------------------------
def _conv1_lrelu_kernel(p_ref, w_ref, b_ref, o_ref):
    y = jnp.dot(p_ref[...], w_ref[...], preferred_element_type=jnp.float32)
    y = y + b_ref[...]
    o_ref[...] = jnp.where(y >= 0.0, y, 0.1 * y).astype(o_ref.dtype)


def conv1_lrelu(patches, w, b, *, block_m=256):
    """patches (M,16) bf16, w (16,64) bf16, b (64,) -> (M,64) bf16."""
    m, k = patches.shape
    n_out = w.shape[1]
    # Pad M to a multiple of block_m instead of falling back to a full-M block
    # (a full-M fc-sized block can exceed v7x's 64 MiB VMEM at larger batch).
    m_pad = pl.cdiv(m, block_m) * block_m
    if m_pad != m:
        patches = jnp.pad(patches, ((0, m_pad - m), (0, 0)))
    out = pl.pallas_call(
        _conv1_lrelu_kernel,
        out_shape=jax.ShapeDtypeStruct((m_pad, n_out), jnp.bfloat16),
        grid=(m_pad // block_m,),
        in_specs=[
            pl.BlockSpec((block_m, k), lambda i: (i, 0)),
            pl.BlockSpec((k, n_out), lambda i: (0, 0)),
            pl.BlockSpec((1, n_out), lambda i: (0, 0)),
        ],
        out_specs=pl.BlockSpec((block_m, n_out), lambda i: (i, 0)),
        compiler_params=pltpu.CompilerParams(
            dimension_semantics=("parallel",),       # both TCs get work on v7x
            vmem_limit_bytes=_VMEM_LIMIT),
    )(patches, w, b.reshape(1, n_out).astype(jnp.float32))
    return out[:m]


# ---------------------------------------------------------------------------
# Kernel 2: conv2 (4 space-to-depth taps) + BatchNorm2d + LeakyReLU, fused.
# ---------------------------------------------------------------------------
def _conv2_bn_lrelu_kernel(x_ref, w_ref, b_ref, g_ref, beta_ref, o_ref, *, n_img):
    m = n_img * 64  # padded 8x8 output grid per image (7x7 valid)
    acc = jnp.zeros((m, 128), jnp.float32)
    # 4x4 stride-2 conv == 2x2 stride-1 conv on the (8,8,256) space-to-depth
    # view; tap (dh, dw) is just a row-shifted static slice of the 2-D view.
    for dh in range(2):
        for dw in range(2):
            tap = x_ref[pl.ds(dh * 8 + dw, m), :]
            acc = acc + jnp.dot(tap, w_ref[dh * 2 + dw],
                                preferred_element_type=jnp.float32)
    acc = acc + b_ref[...]
    # Training-mode BN over the valid spatial positions (single pass:
    # sum and sum-of-squares); padded rows (oh==7 or ow==7) are masked out.
    r = jax.lax.broadcasted_iota(jnp.int32, (m, 128), 0)
    valid = jnp.logical_and((r & 7) < 7, ((r >> 3) & 7) < 7).astype(jnp.float32)
    cnt = float(n_img * 49)
    s1 = jnp.sum(acc * valid, axis=0, keepdims=True)
    s2 = jnp.sum(acc * acc * valid, axis=0, keepdims=True)
    mean = s1 / cnt
    var = s2 / cnt - mean * mean
    y = (acc - mean) * jax.lax.rsqrt(var + 1e-5) * g_ref[...] + beta_ref[...]
    o_ref[...] = jnp.where(y >= 0.0, y, 0.1 * y).astype(o_ref.dtype)


def conv2_bn_lrelu(s2d, w_taps, b, g, beta, *, n_img):
    """s2d (n*64+16, 256) bf16, w_taps (4,256,128) bf16 -> (n*64, 128) bf16."""
    vmem = pl.BlockSpec(memory_space=pltpu.MemorySpace.VMEM)
    return pl.pallas_call(
        functools.partial(_conv2_bn_lrelu_kernel, n_img=n_img),
        out_shape=jax.ShapeDtypeStruct((n_img * 64, 128), jnp.bfloat16),
        in_specs=[vmem] * 5,
        out_specs=vmem,
        compiler_params=pltpu.CompilerParams(vmem_limit_bytes=_VMEM_LIMIT),
    )(s2d, w_taps,
      b.reshape(1, 128).astype(jnp.float32),
      g.reshape(1, 128).astype(jnp.float32),
      beta.reshape(1, 128).astype(jnp.float32))


# ---------------------------------------------------------------------------
# Kernel 3: fc1 + BatchNorm + LeakyReLU + fc2 + sigmoid-on-column-0, fused.
# ---------------------------------------------------------------------------
def _fc_bn_head_kernel(x_ref, w1_ref, b1_ref, g_ref, beta_ref, w2_ref, b2_ref,
                       o_ref, *, n_img):
    h = jnp.dot(x_ref[...], w1_ref[...], preferred_element_type=jnp.float32)
    h = h + b1_ref[...]
    # Training-mode per-feature BN over the batch (single pass) + LeakyReLU.
    s1 = jnp.sum(h, axis=0, keepdims=True)
    s2 = jnp.sum(h * h, axis=0, keepdims=True)
    mean = s1 / n_img
    var = s2 / n_img - mean * mean
    z = (h - mean) * jax.lax.rsqrt(var + 1e-5) * g_ref[...] + beta_ref[...]
    z = jnp.where(z >= 0.0, z, 0.1 * z)
    # Final Linear(128, 1 + cc_dim) + sigmoid applied to column 0 only.
    y = jnp.dot(z.astype(w2_ref.dtype), w2_ref[...],
                preferred_element_type=jnp.float32) + b2_ref[...]
    col = jax.lax.broadcasted_iota(jnp.int32, y.shape, 1)
    sig = pl.reciprocal(1.0 + jnp.exp(-y), approx=True)   # divide on the EUP
    o_ref[...] = jnp.where(col == 0, sig, y)


def fc_bn_head(x, w1, b1, g, beta, w2, b2, *, n_img):
    n_out = w2.shape[1]
    vmem = pl.BlockSpec(memory_space=pltpu.MemorySpace.VMEM)
    return pl.pallas_call(
        functools.partial(_fc_bn_head_kernel, n_img=n_img),
        out_shape=jax.ShapeDtypeStruct((n_img, n_out), jnp.float32),
        in_specs=[vmem] * 7,
        out_specs=vmem,
        compiler_params=pltpu.CompilerParams(vmem_limit_bytes=_VMEM_LIMIT),
    )(x, w1,
      b1.reshape(1, -1).astype(jnp.float32),
      g.reshape(1, -1).astype(jnp.float32),
      beta.reshape(1, -1).astype(jnp.float32),
      w2, b2.reshape(1, -1).astype(jnp.float32))


# ---------------------------------------------------------------------------
# Plain-JAX glue: conv1 im2col, static weight re-layouts, forward wrapper
# ---------------------------------------------------------------------------
def _im2col(x_nhwc, ksize, stride, pad):
    n, h, w, c = x_nhwc.shape
    xp = jnp.pad(x_nhwc, ((0, 0), (pad, pad), (pad, pad), (0, 0)))
    ho = (h + 2 * pad - ksize) // stride + 1
    wo = (w + 2 * pad - ksize) // stride + 1
    taps = []
    for kh in range(ksize):
        for kw in range(ksize):
            taps.append(
                xp[:, kh:kh + stride * ho:stride, kw:kw + stride * wo:stride, :])
    patches = jnp.stack(taps, axis=3)                  # (n, ho, wo, k*k, c)
    return patches.reshape(n * ho * wo, ksize * ksize * c), ho, wo


def discriminator_forward(x_nchw, p, cc_dim=2, dc_dim=1):
    n = x_nchw.shape[0]
    bf16 = jnp.bfloat16
    x = jnp.transpose(x_nchw, (0, 2, 3, 1))            # NCHW -> NHWC

    # ---- Conv2d(1, 64, 4, 2, 1) + LeakyReLU(0.1) --------------------------
    p1, ho1, wo1 = _im2col(x, 4, 2, 1)                 # (n*196, 16)
    w1m = jnp.transpose(p["conv1_w"], (2, 3, 1, 0)).reshape(16, 64).astype(bf16)
    y1 = conv1_lrelu(p1.astype(bf16), w1m, p["conv1_b"])
    y1 = y1.reshape(n, ho1, wo1, 64)                   # (n, 14, 14, 64) bf16

    # ---- Conv2d(64, 128, 4, 2, 1) + BatchNorm2d(128) + LeakyReLU (fused) ---
    # Space-to-depth view of the padded conv1 output: (n,16,16,64) ->
    # (n*64, 256); same byte count as the activation (no 16x im2col blow-up).
    y1p = jnp.pad(y1, ((0, 0), (1, 1), (1, 1), (0, 0)))              # (n,16,16,64)
    s2d = (y1p.reshape(n, 8, 2, 8, 2, 64)
              .transpose(0, 1, 3, 2, 4, 5)
              .reshape(n * 64, 256))
    s2d = jnp.pad(s2d, ((0, 16), (0, 0)))              # slack rows for tap shifts
    w2s = (jnp.transpose(p["conv2_w"].reshape(128, 64, 2, 2, 2, 2),
                         (2, 4, 3, 5, 1, 0))
              .reshape(4, 256, 128).astype(bf16))      # (dh*2+dw, rh*128+rw*64+c, o)
    y2 = conv2_bn_lrelu(s2d, w2s, p["conv2_b"], p["bn2_g"], p["bn2_b"], n_img=n)

    # ---- Linear(6272,128) + BN + LeakyReLU + Linear(128,1+cc) + head (fused)
    # fc1 weight is permuted once to the kernel's (h, w, c) flatten order with
    # zero rows for the padded h==7 / w==7 positions, so y2 is fed in its
    # natural layout (free reshape, no runtime transpose).
    w1fc = jnp.zeros((8, 8, 128, 128), jnp.float32)
    w1fc = w1fc.at[:7, :7].set(
        jnp.transpose(p["fc1_w"].reshape(128, 128, 7, 7), (2, 3, 1, 0)))
    w1fc = w1fc.reshape(8 * 8 * 128, 128).astype(bf16)
    w2fc = p["fc2_w"].T.astype(bf16)                   # (128, 1 + cc_dim)

    out = fc_bn_head(y2.reshape(n, 8 * 8 * 128), w1fc, p["fc1_b"],
                     p["bnf_g"], p["bnf_b"], w2fc, p["fc2_b"], n_img=n)

    # TODO(synk): the original module applies F.softmax to columns
    # [cc_dim+1 : cc_dim+1+dc_dim] == [3:4] of an (n, 3) tensor -> empty
    # slice -> no-op; reproduced as a no-op.
    # TODO(synk): the module's second norm is nn.BatchNorm2d applied to a 2-D
    # (n, 128) tensor; implemented as per-feature training-mode BN (the
    # evident intent of the code).
    return out


# ---------------------------------------------------------------------------
# Pure-JAX reference (f32, highest precision) for sanity checking
# ---------------------------------------------------------------------------
def reference_forward(x, p):
    hp = jax.lax.Precision.HIGHEST

    def lrelu(v):
        return jnp.where(v >= 0.0, v, 0.1 * v)

    def conv(v, w, b):
        y = jax.lax.conv_general_dilated(
            v, w, window_strides=(2, 2), padding=[(1, 1), (1, 1)],
            dimension_numbers=("NCHW", "OIHW", "NCHW"), precision=hp)
        return y + b[None, :, None, None]

    y = lrelu(conv(x, p["conv1_w"], p["conv1_b"]))
    y = conv(y, p["conv2_w"], p["conv2_b"])
    m = jnp.mean(y, axis=(0, 2, 3), keepdims=True)
    v = jnp.mean((y - m) ** 2, axis=(0, 2, 3), keepdims=True)
    y = (y - m) * jax.lax.rsqrt(v + 1e-5)
    y = y * p["bn2_g"][None, :, None, None] + p["bn2_b"][None, :, None, None]
    y = lrelu(y)
    h = jnp.dot(y.reshape(x.shape[0], -1), p["fc1_w"].T, precision=hp) + p["fc1_b"]
    m = jnp.mean(h, axis=0, keepdims=True)
    v = jnp.mean((h - m) ** 2, axis=0, keepdims=True)
    h = lrelu((h - m) * jax.lax.rsqrt(v + 1e-5) * p["bnf_g"] + p["bnf_b"])
    o = jnp.dot(h, p["fc2_w"].T, precision=hp) + p["fc2_b"]
    return o.at[:, 0].set(jax.nn.sigmoid(o[:, 0]))


# ---------------------------------------------------------------------------
if __name__ == "__main__":
    cc_dim, dc_dim = 2, 1
    n = 8
    key = jax.random.PRNGKey(0)
    ks = jax.random.split(key, 9)

    x = jax.random.normal(ks[0], (n, 1, 28, 28), jnp.float32)

    params = dict(
        conv1_w=0.10 * jax.random.normal(ks[1], (64, 1, 4, 4), jnp.float32),
        conv1_b=0.10 * jax.random.normal(ks[2], (64,), jnp.float32),
        conv2_w=0.05 * jax.random.normal(ks[3], (128, 64, 4, 4), jnp.float32),
        conv2_b=0.05 * jax.random.normal(ks[4], (128,), jnp.float32),
        bn2_g=jnp.ones((128,), jnp.float32),
        bn2_b=jnp.zeros((128,), jnp.float32),
        fc1_w=0.02 * jax.random.normal(ks[5], (128, 128 * 7 * 7), jnp.float32),
        fc1_b=0.02 * jax.random.normal(ks[6], (128,), jnp.float32),
        bnf_g=jnp.ones((128,), jnp.float32),
        bnf_b=jnp.zeros((128,), jnp.float32),
        fc2_w=0.10 * jax.random.normal(ks[7], (1 + cc_dim, 128), jnp.float32),
        fc2_b=0.10 * jax.random.normal(ks[8], (1 + cc_dim,), jnp.float32),
    )

    out = jax.block_until_ready(jax.jit(discriminator_forward)(x, params))
    ref = jax.block_until_ready(jax.jit(reference_forward)(x, params))

    assert out.shape == (n, 1 + cc_dim), out.shape
    max_err = float(jnp.max(jnp.abs(out - ref)))
    assert bool(jnp.allclose(out, ref, atol=5e-2, rtol=5e-2)), (max_err, out, ref)

    print("KERNEL_OK")
</pallas_src>

<mosaic_0001>
module attributes {stable_mosaic.version = 11 : i64} {
  func.func @_conv1_lrelu_kernel(%arg0: i32, %arg1: memref<256x16xbf16, #tpu.memory_space<vmem>>, %arg2: memref<16x64xbf16, #tpu.memory_space<vmem>>, %arg3: memref<1x64xf32, #tpu.memory_space<vmem>>, %arg4: memref<256x64xbf16, #tpu.memory_space<vmem>>) attributes {dimension_semantics = [#tpu.dimension_semantics<parallel>], iteration_bounds = array<i64: 7>, scalar_prefetch = 0 : i64, scratch_operands = 0 : i64, tpu.core_type = #tpu.core_type<tc>, window_params = [{transform_indices = @transform_0, window_bounds = array<i64: 256, 16>}, {pipeline_mode = #tpu.pipeline_mode<synchronous>, transform_indices = @transform_1, window_bounds = array<i64: 16, 64>}, {pipeline_mode = #tpu.pipeline_mode<synchronous>, transform_indices = @transform_2, window_bounds = array<i64: 1, 64>}, {transform_indices = @transform_3, window_bounds = array<i64: 256, 64>}]} {
    %c0 = arith.constant 0 : index
    %c0_0 = arith.constant 0 : index
    %0 = vector.load %arg1[%c0, %c0_0] : memref<256x16xbf16, #tpu.memory_space<vmem>>, vector<256x16xbf16>
    %c0_1 = arith.constant 0 : index
    %c0_2 = arith.constant 0 : index
    %1 = vector.load %arg2[%c0_1, %c0_2] : memref<16x64xbf16, #tpu.memory_space<vmem>>, vector<16x64xbf16>
    %cst = arith.constant dense<0.000000e+00> : vector<256x64xf32>
    %2 = tpu.matmul %0, %1, %cst {dimension_numbers = #tpu.dot_dimension_numbers<[1], [0], [0], [1], [0, 0, 1, 1], [], []>} : vector<256x16xbf16>, vector<16x64xbf16>, vector<256x64xf32> -> vector<256x64xf32>
    %c0_3 = arith.constant 0 : index
    %c0_4 = arith.constant 0 : index
    %3 = vector.load %arg3[%c0_3, %c0_4] : memref<1x64xf32, #tpu.memory_space<vmem>>, vector<1x64xf32>
    %4 = vector.broadcast %3 : vector<1x64xf32> to vector<256x64xf32>
    %5 = arith.addf %2, %4 : vector<256x64xf32>
    %cst_5 = arith.constant 0.000000e+00 : f32
    %6 = vector.broadcast %cst_5 : f32 to vector<256x64xf32>
    %7 = arith.cmpf oge, %5, %6 : vector<256x64xf32>
    %cst_6 = arith.constant 1.000000e-01 : f32
    %8 = vector.broadcast %cst_6 : f32 to vector<256x64xf32>
    %9 = arith.mulf %8, %5 : vector<256x64xf32>
    %10 = arith.select %7, %5, %9 : vector<256x64xi1>, vector<256x64xf32>
    %11 = arith.truncf %10 : vector<256x64xf32> to vector<256x64xbf16>
    %c0_7 = arith.constant 0 : index
    %c0_8 = arith.constant 0 : index
    %12 = vector.load %arg4[%c0_7, %c0_8] : memref<256x64xbf16, #tpu.memory_space<vmem>>, vector<256x64xbf16>
    tpu.vector_store %arg4[%c0_7, %c0_8], %11 {strides = array<i32>} : memref<256x64xbf16, #tpu.memory_space<vmem>>, vector<256x64xbf16>,
    return
  }
  func.func @transform_0(%arg0: i32) -> (i32, i32) {
    %c0_i32 = arith.constant 0 : i32
    %c0_i32_0 = arith.constant 0 : i32
    return %arg0, %c0_i32 : i32, i32
  }
  func.func @transform_1(%arg0: i32) -> (i32, i32) {
    %c0_i32 = arith.constant 0 : i32
    %c0_i32_0 = arith.constant 0 : i32
    %c0_i32_1 = arith.constant 0 : i32
    return %c0_i32, %c0_i32_0 : i32, i32
  }
  func.func @transform_2(%arg0: i32) -> (i32, i32) {
    %c0_i32 = arith.constant 0 : i32
    %c0_i32_0 = arith.constant 0 : i32
    %c0_i32_1 = arith.constant 0 : i32
    return %c0_i32, %c0_i32_0 : i32, i32
  }
  func.func @transform_3(%arg0: i32) -> (i32, i32) {
    %c0_i32 = arith.constant 0 : i32
    %c0_i32_0 = arith.constant 0 : i32
    return %arg0, %c0_i32 : i32, i32
  }
}

module attributes {stable_mosaic.version = 11 : i64} {
  func.func @_conv2_bn_lrelu_kernel(%arg0: memref<528x256xbf16, #tpu.memory_space<vmem>>, %arg1: memref<4x256x128xbf16, #tpu.memory_space<vmem>>, %arg2: memref<1x128xf32, #tpu.memory_space<vmem>>, %arg3: memref<1x128xf32, #tpu.memory_space<vmem>>, %arg4: memref<1x128xf32, #tpu.memory_space<vmem>>, %arg5: memref<512x128xbf16, #tpu.memory_space<vmem>>) attributes {dimension_semantics = [], scalar_prefetch = 0 : i64, scratch_operands = 0 : i64, tpu.core_type = #tpu.core_type<tc>} {
    %cst = arith.constant 0.000000e+00 : f32
    %0 = vector.broadcast %cst : f32 to vector<512x128xf32>
    %c0 = arith.constant 0 : index
    %c0_0 = arith.constant 0 : index
    %1 = vector.load %arg0[%c0, %c0_0] : memref<528x256xbf16, #tpu.memory_space<vmem>>, vector<512x256xbf16>
    %c0_1 = arith.constant 0 : index
    %c0_2 = arith.constant 0 : index
    %c0_3 = arith.constant 0 : index
    %2 = vector.load %arg1[%c0_1, %c0_2, %c0_3] : memref<4x256x128xbf16, #tpu.memory_space<vmem>>, vector<1x256x128xbf16>
    %3 = vector.shape_cast %2 : vector<1x256x128xbf16> to vector<256x128xbf16>
    %cst_4 = arith.constant dense<0.000000e+00> : vector<512x128xf32>
    %4 = tpu.matmul %1, %3, %cst_4 {dimension_numbers = #tpu.dot_dimension_numbers<[1], [0], [0], [1], [0, 0, 1, 1], [], []>} : vector<512x256xbf16>, vector<256x128xbf16>, vector<512x128xf32> -> vector<512x128xf32>
    %5 = arith.addf %0, %4 : vector<512x128xf32>
    %c1 = arith.constant 1 : index
    %c0_5 = arith.constant 0 : index
    %6 = vector.load %arg0[%c1, %c0_5] : memref<528x256xbf16, #tpu.memory_space<vmem>>, vector<512x256xbf16>
    %c1_6 = arith.constant 1 : index
    %c0_7 = arith.constant 0 : index
    %c0_8 = arith.constant 0 : index
    %7 = vector.load %arg1[%c1_6, %c0_7, %c0_8] : memref<4x256x128xbf16, #tpu.memory_space<vmem>>, vector<1x256x128xbf16>
    %8 = vector.shape_cast %7 : vector<1x256x128xbf16> to vector<256x128xbf16>
    %cst_9 = arith.constant dense<0.000000e+00> : vector<512x128xf32>
    %9 = tpu.matmul %6, %8, %cst_9 {dimension_numbers = #tpu.dot_dimension_numbers<[1], [0], [0], [1], [0, 0, 1, 1], [], []>} : vector<512x256xbf16>, vector<256x128xbf16>, vector<512x128xf32> -> vector<512x128xf32>
    %10 = arith.addf %5, %9 : vector<512x128xf32>
    %c8 = arith.constant 8 : index
    %c0_10 = arith.constant 0 : index
    %11 = vector.load %arg0[%c8, %c0_10] : memref<528x256xbf16, #tpu.memory_space<vmem>>, vector<512x256xbf16>
    %c2 = arith.constant 2 : index
    %c0_11 = arith.constant 0 : index
    %c0_12 = arith.constant 0 : index
    %12 = vector.load %arg1[%c2, %c0_11, %c0_12] : memref<4x256x128xbf16, #tpu.memory_space<vmem>>, vector<1x256x128xbf16>
    %13 = vector.shape_cast %12 : vector<1x256x128xbf16> to vector<256x128xbf16>
    %cst_13 = arith.constant dense<0.000000e+00> : vector<512x128xf32>
    %14 = tpu.matmul %11, %13, %cst_13 {dimension_numbers = #tpu.dot_dimension_numbers<[1], [0], [0], [1], [0, 0, 1, 1], [], []>} : vector<512x256xbf16>, vector<256x128xbf16>, vector<512x128xf32> -> vector<512x128xf32>
    %15 = arith.addf %10, %14 : vector<512x128xf32>
    %c9 = arith.constant 9 : index
    %c0_14 = arith.constant 0 : index
    %16 = vector.load %arg0[%c9, %c0_14] : memref<528x256xbf16, #tpu.memory_space<vmem>>, vector<512x256xbf16>
    %c3 = arith.constant 3 : index
    %c0_15 = arith.constant 0 : index
    %c0_16 = arith.constant 0 : index
    %17 = vector.load %arg1[%c3, %c0_15, %c0_16] : memref<4x256x128xbf16, #tpu.memory_space<vmem>>, vector<1x256x128xbf16>
    %18 = vector.shape_cast %17 : vector<1x256x128xbf16> to vector<256x128xbf16>
    %cst_17 = arith.constant dense<0.000000e+00> : vector<512x128xf32>
    %19 = tpu.matmul %16, %18, %cst_17 {dimension_numbers = #tpu.dot_dimension_numbers<[1], [0], [0], [1], [0, 0, 1, 1], [], []>} : vector<512x256xbf16>, vector<256x128xbf16>, vector<512x128xf32> -> vector<512x128xf32>
    %20 = arith.addf %15, %19 : vector<512x128xf32>
    %c0_18 = arith.constant 0 : index
    %c0_19 = arith.constant 0 : index
    %21 = vector.load %arg2[%c0_18, %c0_19] : memref<1x128xf32, #tpu.memory_space<vmem>>, vector<1x128xf32>
    %22 = vector.broadcast %21 : vector<1x128xf32> to vector<512x128xf32>
    %23 = arith.addf %20, %22 : vector<512x128xf32>
    %24 = tpu.iota {dimensions = array<i32: 0>} : vector<512x128xi32>
    %c7_i32 = arith.constant 7 : i32
    %25 = vector.broadcast %c7_i32 : i32 to vector<512x128xi32>
    %26 = arith.andi %24, %25 : vector<512x128xi32>
    %c7_i32_20 = arith.constant 7 : i32
    %27 = vector.broadcast %c7_i32_20 : i32 to vector<512x128xi32>
    %28 = arith.cmpi slt, %26, %27 : vector<512x128xi32>
    %c3_i32 = arith.constant 3 : i32
    %29 = vector.broadcast %c3_i32 : i32 to vector<512x128xi32>
    %30 = arith.shrsi %24, %29 : vector<512x128xi32>
    %c7_i32_21 = arith.constant 7 : i32
    %31 = vector.broadcast %c7_i32_21 : i32 to vector<512x128xi32>
    %32 = arith.andi %30, %31 : vector<512x128xi32>
    %c7_i32_22 = arith.constant 7 : i32
    %33 = vector.broadcast %c7_i32_22 : i32 to vector<512x128xi32>
    %34 = arith.cmpi slt, %32, %33 : vector<512x128xi32>
    %35 = arith.andi %28, %34 : vector<512x128xi1>
    %36 = arith.extui %35 : vector<512x128xi1> to vector<512x128xi32>
    %37 = arith.sitofp %36 : vector<512x128xi32> to vector<512x128xf32>
    %38 = arith.mulf %23, %37 : vector<512x128xf32>
    %cst_23 = arith.constant dense<0.000000e+00> : vector<128xf32>
    %39 = vector.multi_reduction <add>, %38, %cst_23 [0] : vector<512x128xf32> to vector<128xf32>
    %40 = vector.shape_cast %39 : vector<128xf32> to vector<1x128xf32>
    %41 = arith.mulf %23, %23 : vector<512x128xf32>
    %42 = arith.mulf %41, %37 : vector<512x128xf32>
    %cst_24 = arith.constant dense<0.000000e+00> : vector<128xf32>
    %43 = vector.multi_reduction <add>, %42, %cst_24 [0] : vector<512x128xf32> to vector<128xf32>
    %44 = vector.shape_cast %43 : vector<128xf32> to vector<1x128xf32>
    %cst_25 = arith.constant 3.920000e+02 : f32
    %45 = vector.broadcast %cst_25 : f32 to vector<1x128xf32>
    %46 = arith.divf %40, %45 : vector<1x128xf32>
    %cst_26 = arith.constant 3.920000e+02 : f32
    %47 = vector.broadcast %cst_26 : f32 to vector<1x128xf32>
    %48 = arith.divf %44, %47 : vector<1x128xf32>
    %49 = arith.mulf %46, %46 : vector<1x128xf32>
    %50 = arith.subf %48, %49 : vector<1x128xf32>
    %51 = vector.broadcast %46 : vector<1x128xf32> to vector<512x128xf32>
    %52 = arith.subf %23, %51 : vector<512x128xf32>
    %cst_27 = arith.constant 9.99999974E-6 : f32
    %53 = vector.broadcast %cst_27 : f32 to vector<1x128xf32>
    %54 = arith.addf %50, %53 : vector<1x128xf32>
    %55 = math.rsqrt %54 : vector<1x128xf32>
    %56 = vector.broadcast %55 : vector<1x128xf32> to vector<512x128xf32>
    %57 = arith.mulf %52, %56 : vector<512x128xf32>
    %c0_28 = arith.constant 0 : index
    %c0_29 = arith.constant 0 : index
    %58 = vector.load %arg3[%c0_28, %c0_29] : memref<1x128xf32, #tpu.memory_space<vmem>>, vector<1x128xf32>
    %59 = vector.broadcast %58 : vector<1x128xf32> to vector<512x128xf32>
    %60 = arith.mulf %57, %59 : vector<512x128xf32>
    %c0_30 = arith.constant 0 : index
    %c0_31 = arith.constant 0 : index
    %61 = vector.load %arg4[%c0_30, %c0_31] : memref<1x128xf32, #tpu.memory_space<vmem>>, vector<1x128xf32>
    %62 = vector.broadcast %61 : vector<1x128xf32> to vector<512x128xf32>
    %63 = arith.addf %60, %62 : vector<512x128xf32>
    %cst_32 = arith.constant 0.000000e+00 : f32
    %64 = vector.broadcast %cst_32 : f32 to vector<512x128xf32>
    %65 = arith.cmpf oge, %63, %64 : vector<512x128xf32>
    %cst_33 = arith.constant 1.000000e-01 : f32
    %66 = vector.broadcast %cst_33 : f32 to vector<512x128xf32>
    %67 = arith.mulf %66, %63 : vector<512x128xf32>
    %68 = arith.select %65, %63, %67 : vector<512x128xi1>, vector<512x128xf32>
    %69 = arith.truncf %68 : vector<512x128xf32> to vector<512x128xbf16>
    %c0_34 = arith.constant 0 : index
    %c0_35 = arith.constant 0 : index
    %70 = vector.load %arg5[%c0_34, %c0_35] : memref<512x128xbf16, #tpu.memory_space<vmem>>, vector<512x128xbf16>
    tpu.vector_store %arg5[%c0_34, %c0_35], %69 {strides = array<i32>} : memref<512x128xbf16, #tpu.memory_space<vmem>>, vector<512x128xbf16>,
    return
  }
}

module attributes {stable_mosaic.version = 11 : i64} {
  func.func @_fc_bn_head_kernel(%arg0: memref<8x8192xbf16, #tpu.memory_space<vmem>>, %arg1: memref<8192x128xbf16, #tpu.memory_space<vmem>>, %arg2: memref<1x128xf32, #tpu.memory_space<vmem>>, %arg3: memref<1x128xf32, #tpu.memory_space<vmem>>, %arg4: memref<1x128xf32, #tpu.memory_space<vmem>>, %arg5: memref<128x3xbf16, #tpu.memory_space<vmem>>, %arg6: memref<1x3xf32, #tpu.memory_space<vmem>>, %arg7: memref<8x3xf32, #tpu.memory_space<vmem>>) attributes {dimension_semantics = [], scalar_prefetch = 0 : i64, scratch_operands = 0 : i64, tpu.core_type = #tpu.core_type<tc>} {
    %c0 = arith.constant 0 : index
    %c0_0 = arith.constant 0 : index
    %0 = vector.load %arg0[%c0, %c0_0] : memref<8x8192xbf16, #tpu.memory_space<vmem>>, vector<8x8192xbf16>
    %c0_1 = arith.constant 0 : index
    %c0_2 = arith.constant 0 : index
    %1 = vector.load %arg1[%c0_1, %c0_2] : memref<8192x128xbf16, #tpu.memory_space<vmem>>, vector<8192x128xbf16>
    %cst = arith.constant dense<0.000000e+00> : vector<8x128xf32>
    %2 = tpu.matmul %0, %1, %cst {dimension_numbers = #tpu.dot_dimension_numbers<[1], [0], [0], [1], [0, 0, 1, 1], [], []>} : vector<8x8192xbf16>, vector<8192x128xbf16>, vector<8x128xf32> -> vector<8x128xf32>
    %c0_3 = arith.constant 0 : index
    %c0_4 = arith.constant 0 : index
    %3 = vector.load %arg2[%c0_3, %c0_4] : memref<1x128xf32, #tpu.memory_space<vmem>>, vector<1x128xf32>
    %4 = vector.broadcast %3 : vector<1x128xf32> to vector<8x128xf32>
    %5 = arith.addf %2, %4 : vector<8x128xf32>
    %cst_5 = arith.constant dense<0.000000e+00> : vector<128xf32>
    %6 = vector.multi_reduction <add>, %5, %cst_5 [0] : vector<8x128xf32> to vector<128xf32>
    %7 = vector.shape_cast %6 : vector<128xf32> to vector<1x128xf32>
    %8 = arith.mulf %5, %5 : vector<8x128xf32>
    %cst_6 = arith.constant dense<0.000000e+00> : vector<128xf32>
    %9 = vector.multi_reduction <add>, %8, %cst_6 [0] : vector<8x128xf32> to vector<128xf32>
    %10 = vector.shape_cast %9 : vector<128xf32> to vector<1x128xf32>
    %cst_7 = arith.constant 8.000000e+00 : f32
    %11 = vector.broadcast %cst_7 : f32 to vector<1x128xf32>
    %12 = arith.divf %7, %11 : vector<1x128xf32>
    %cst_8 = arith.constant 8.000000e+00 : f32
    %13 = vector.broadcast %cst_8 : f32 to vector<1x128xf32>
    %14 = arith.divf %10, %13 : vector<1x128xf32>
    %15 = arith.mulf %12, %12 : vector<1x128xf32>
    %16 = arith.subf %14, %15 : vector<1x128xf32>
    %17 = vector.broadcast %12 : vector<1x128xf32> to vector<8x128xf32>
    %18 = arith.subf %5, %17 : vector<8x128xf32>
    %cst_9 = arith.constant 9.99999974E-6 : f32
    %19 = vector.broadcast %cst_9 : f32 to vector<1x128xf32>
    %20 = arith.addf %16, %19 : vector<1x128xf32>
    %21 = math.rsqrt %20 : vector<1x128xf32>
    %22 = vector.broadcast %21 : vector<1x128xf32> to vector<8x128xf32>
    %23 = arith.mulf %18, %22 : vector<8x128xf32>
    %c0_10 = arith.constant 0 : index
    %c0_11 = arith.constant 0 : index
    %24 = vector.load %arg3[%c0_10, %c0_11] : memref<1x128xf32, #tpu.memory_space<vmem>>, vector<1x128xf32>
    %25 = vector.broadcast %24 : vector<1x128xf32> to vector<8x128xf32>
    %26 = arith.mulf %23, %25 : vector<8x128xf32>
    %c0_12 = arith.constant 0 : index
    %c0_13 = arith.constant 0 : index
    %27 = vector.load %arg4[%c0_12, %c0_13] : memref<1x128xf32, #tpu.memory_space<vmem>>, vector<1x128xf32>
    %28 = vector.broadcast %27 : vector<1x128xf32> to vector<8x128xf32>
    %29 = arith.addf %26, %28 : vector<8x128xf32>
    %cst_14 = arith.constant 0.000000e+00 : f32
    %30 = vector.broadcast %cst_14 : f32 to vector<8x128xf32>
    %31 = arith.cmpf oge, %29, %30 : vector<8x128xf32>
    %cst_15 = arith.constant 1.000000e-01 : f32
    %32 = vector.broadcast %cst_15 : f32 to vector<8x128xf32>
    %33 = arith.mulf %32, %29 : vector<8x128xf32>
    %34 = arith.select %31, %29, %33 : vector<8x128xi1>, vector<8x128xf32>
    %35 = arith.truncf %34 : vector<8x128xf32> to vector<8x128xbf16>
    %c0_16 = arith.constant 0 : index
    %c0_17 = arith.constant 0 : index
    %36 = vector.load %arg5[%c0_16, %c0_17] : memref<128x3xbf16, #tpu.memory_space<vmem>>, vector<128x3xbf16>
    %cst_18 = arith.constant dense<0.000000e+00> : vector<8x3xf32>
    %37 = tpu.matmul %35, %36, %cst_18 {dimension_numbers = #tpu.dot_dimension_numbers<[1], [0], [0], [1], [0, 0, 1, 1], [], []>} : vector<8x128xbf16>, vector<128x3xbf16>, vector<8x3xf32> -> vector<8x3xf32>
    %c0_19 = arith.constant 0 : index
    %c0_20 = arith.constant 0 : index
    %38 = vector.load %arg6[%c0_19, %c0_20] : memref<1x3xf32, #tpu.memory_space<vmem>>, vector<1x3xf32>
    %39 = vector.broadcast %38 : vector<1x3xf32> to vector<8x3xf32>
    %40 = arith.addf %37, %39 : vector<8x3xf32>
    %41 = tpu.iota {dimensions = array<i32: 1>} : vector<8x3xi32>
    %cst_21 = arith.constant 0.000000e+00 : f32
    %42 = vector.broadcast %cst_21 : f32 to vector<8x3xf32>
    %43 = arith.subf %42, %40 : vector<8x3xf32>
    %44 = math.exp %43 : vector<8x3xf32>
    %cst_22 = arith.constant 1.000000e+00 : f32
    %45 = vector.broadcast %cst_22 : f32 to vector<8x3xf32>
    %46 = arith.addf %45, %44 : vector<8x3xf32>
    %47 = tpu.reciprocal %46 {approx = true} : vector<8x3xf32> -> vector<8x3xf32>
    %c0_i32 = arith.constant 0 : i32
    %48 = vector.broadcast %c0_i32 : i32 to vector<8x3xi32>
    %49 = arith.cmpi eq, %41, %48 : vector<8x3xi32>
    %50 = arith.select %49, %47, %40 : vector<8x3xi1>, vector<8x3xf32>
    %c0_23 = arith.constant 0 : index
    %c0_24 = arith.constant 0 : index
    %51 = vector.load %arg7[%c0_23, %c0_24] : memref<8x3xf32, #tpu.memory_space<vmem>>, vector<8x3xf32>
    tpu.vector_store %arg7[%c0_23, %c0_24], %50 {strides = array<i32>} : memref<8x3xf32, #tpu.memory_space<vmem>>, vector<8x3xf32>,
    return
  }
}

</mosaic_0001>

<bundles_post_ra>
// kernel: discriminator_forward.3
= control target key start
LH: loop header
LB: loop body
LE: loop exit
PB: predicated region body
PF: predicated region fallthrough
CT: control target
= control target key end

     0   :  { %s806_s12 = smov 0   ;;  %s952_s0 = inlined_call_operand.vmem [shape: bf16[1792,16], index: 0, kind: input, shape index: {}]   ;;  %s953_s1 = inlined_call_operand.vmem [shape: bf16[16,64], index: 1, kind: input, shape index: {}]   ;;  %s954_s2 = inlined_call_operand.vmem [shape: f32[1,64], index: 2, kind: input, shape index: {}]   ;;  %s955_s3 = inlined_call_operand.vmem [shape: bf16[1792,64], index: 3, kind: output, shape index: {}]  }
   0x1 LB: > { %s654_s13 = sadd.s32 4294967295, %s784_s12   ;;  %p658_p0 = scmp.ge.s32.totalorder %s784_s12, 1  ;;  %s784_s12 = sphi %s806_s12, %s13_s12  }
   0x2   : > { %p138_p1 = scmp.lt.s32.totalorder %s784_s12, 8 }
   0x4   : > { %p139_p2 = pnand %p658_p0, %p138_p1 }
   0x5   : > { %s659_s16 = sshll.u32 (!%p139_p2), %s654_s13, 5 }
   0x6   : > { %142 = sbr.rel (%p139_p2) target bundleno = 214 (0xd6), region = 32  ;;  %p163_p3 = scmp.lt.s32.totalorder (!%p139_p2), %s659_s16, 223 }
   0xb   : > { %v765_v0 = vld [vmem:[%s953_s1] sm:$0xff]  ;;  %s957_s16 = smov (!%p163_p3, %s659_s16), 223  ;;  %vm299_vm0 = vcmask 130048   ;;  %vm565_vm3 = vcmask 519168  }
   0xc   : > { %355 = vmatpush.bf16.msra.mxu0 %v765_v0  ;;  %766 = vmatpush.bf16.msra.mxu1 %v765_v0  ;;  %s660_s17 = sshll.u32 %s957_s16, 2  ;;  %v844_v17 = vld [vmem:[%s954_s2] ss:$0 sm:$0xff] }
   0xd   : > { %767 = vmatpush.bf16.msra.mxu2 %v765_v0  ;;  %768 = vmatpush.bf16.msra.mxu3 %v765_v0  ;;  %s166_s20 = scalar_lea.vmem %s952_s0, %s660_s17  ;;  %s853_s25 = scalar_lea.vmem %s955_s3, %s660_s17 }
   0xe   : > { %v749_v1 = vld [vmem:[%s166_s20] sm:$0xff]  ;;  %v750_v5 = vld [vmem:[%s166_s20 + $0x8] sm:$0xff]  ;;  %v751_v9 = vld [vmem:[%s166_s20 + $0x10] sm:$0xff] }
   0xf   : > { %v753_v2 = vld [vmem:[%s166_s20 + $0x20] sm:$0xff]  ;;  %731 = vmatmul.msk.bf16.vlgmr.msra.gmra.mxu0 %vm299_vm0, %v749_v1  ;;  %v754_v6 = vld [vmem:[%s166_s20 + $0x28] sm:$0xff]  ;;  %v755_v10 = vld [vmem:[%s166_s20 + $0x30] sm:$0xff] }
  0x10   : > { %v757_v3 = vld [vmem:[%s166_s20 + $0x40] sm:$0xff]  ;;  %735 = vmatmul.msk.bf16.vlgmr.msra.gmra.mxu1 %vm299_vm0, %v753_v2  ;;  %v758_v7 = vld [vmem:[%s166_s20 + $0x48] sm:$0xff]  ;;  %v759_v11 = vld [vmem:[%s166_s20 + $0x50] sm:$0xff] }
  0x11   : > { %v761_v4 = vld [vmem:[%s166_s20 + $0x60] sm:$0xff]  ;;  %739 = vmatmul.msk.bf16.vlgmr.msra.gmra.mxu2 %vm299_vm0, %v757_v3  ;;  %v762_v8 = vld [vmem:[%s166_s20 + $0x68] sm:$0xff]  ;;  %v763_v12 = vld [vmem:[%s166_s20 + $0x70] sm:$0xff] }
  0x12   : > { %743 = vmatmul.msk.bf16.vlgmr.msra.gmra.mxu3 %vm299_vm0, %v761_v4  ;;  %v752_v13 = vld [vmem:[%s166_s20 + $0x18] sm:$0xff] }
  0x13   : > { %v756_v14 = vld [vmem:[%s166_s20 + $0x38] sm:$0xff] }
  0x14   : > { %v760_v15 = vld [vmem:[%s166_s20 + $0x58] sm:$0xff] }
  0x15   : > { %v764_v16 = vld [vmem:[%s166_s20 + $0x78] sm:$0xff] }
  0x1f   : > { %732 = vmatmul.msk.bf16.gmra.mxu0 %vm299_vm0, %v750_v5 }
  0x20   : > { %736 = vmatmul.msk.bf16.gmra.mxu1 %vm299_vm0, %v754_v6 }
  0x21   : > { %740 = vmatmul.msk.bf16.gmra.mxu2 %vm299_vm0, %v758_v7 }
  0x22   : > { %744 = vmatmul.msk.bf16.gmra.mxu3 %vm299_vm0, %v762_v8 }
  0x2f   : > { %733 = vmatmul.msk.bf16.gmra.mxu0 %vm299_vm0, %v751_v9 }
  0x30   : > { %737 = vmatmul.msk.bf16.gmra.mxu1 %vm299_vm0, %v755_v10 }
  0x31   : > { %741 = vmatmul.msk.bf16.gmra.mxu2 %vm299_vm0, %v759_v11 }
  0x32   : > { %745 = vmatmul.msk.bf16.gmra.mxu3 %vm299_vm0, %v763_v12 }
  0x3f   : > { %734 = vmatmul.msk.bf16.gmra.mxu0 %vm299_vm0, %v752_v13 }
  0x40   : > { %738 = vmatmul.msk.bf16.gmra.mxu1 %vm299_vm0, %v756_v14 }
  0x41   : > { %742 = vmatmul.msk.bf16.gmra.mxu2 %vm299_vm0, %v760_v15 }
  0x42   : > { %746 = vmatmul.msk.bf16.gmra.mxu3 %vm299_vm0, %v764_v16 }
  0x8c   : > { %v357_v18 = vpop.f32.mrf.mxu0 }
  0x8d   : > { %v377_v19 = vpop.f32.mrf.mxu1  ;;  %v358_v20 = vadd.f32 %v844_v17, %v357_v18 }
  0x8e   : > { %v378_v21 = vadd.f32 %v844_v17, %v377_v19 }
  0x8f   : > { %vm437_vm1 = vcmp.ge.f32.partialorder %v358_v20, 0.0  ;;  %v469_v22 = vmul.f32 0.1, %v358_v20 }
  0x90   : > { %vm445_vm2 = vcmp.ge.f32.partialorder %v378_v21, 0.0  ;;  %v477_v23 = vmul.f32 0.1, %v378_v21 }
  0x91   : > { %v501_v24 = vsel %vm437_vm1, %v358_v20, %v469_v22 }
  0x92   : > { %v509_v25 = vsel %vm445_vm2, %v378_v21, %v477_v23  ;;  %v533_v26 = vpack.c.bf16 %v501_v24, %v501_v24 }
  0x93   : > { %v541_v27 = vpack.c.bf16 %v509_v25, %v509_v25 }
  0x94   : > { %v397_v28 = vpop.f32.mrf.mxu2  ;;  %566 = vst.msk [vmem:[%s853_s25] sm:$0xf] %vm565_vm3, %v533_v26  ;;  %v359_v32 = vpop.f32.mrf.mxu0 }
  0x95   : > { %v417_v29 = vpop.f32.mrf.mxu3  ;;  %v398_v30 = vadd.f32 %v844_v17, %v397_v28  ;;  %v379_v33 = vpop.f32.mrf.mxu1  ;;  %574 = vst.msk [vmem:[%s853_s25 + $0x20] sm:$0xf] %vm565_vm3, %v541_v27  ;;  %v360_v34 = vadd.f32 %v844_v17, %v359_v32 }
  0x96   : > { %v418_v31 = vadd.f32 %v844_v17, %v417_v29  ;;  %v380_v35 = vadd.f32 %v844_v17, %v379_v33 }
  0x97   : > { %vm453_vm4 = vcmp.ge.f32.partialorder %v398_v30, 0.0  ;;  %v485_v36 = vmul.f32 0.1, %v398_v30  ;;  %vm438_vm6 = vcmp.ge.f32.partialorder %v360_v34, 0.0  ;;  %v470_v38 = vmul.f32 0.1, %v360_v34 }
  0x98   : > { %vm461_vm5 = vcmp.ge.f32.partialorder %v418_v31, 0.0  ;;  %v493_v37 = vmul.f32 0.1, %v418_v31  ;;  %vm446_vm7 = vcmp.ge.f32.partialorder %v380_v35, 0.0  ;;  %v478_v39 = vmul.f32 0.1, %v380_v35 }
  0x99   : > { %v517_v40 = vsel %vm453_vm4, %v398_v30, %v485_v36  ;;  %v502_v44 = vsel %vm438_vm6, %v360_v34, %v470_v38 }
  0x9a   : > { %v525_v41 = vsel %vm461_vm5, %v418_v31, %v493_v37  ;;  %v549_v42 = vpack.c.bf16 %v517_v40, %v517_v40  ;;  %v510_v45 = vsel %vm446_vm7, %v380_v35, %v478_v39  ;;  %v534_v46 = vpack.c.bf16 %v502_v44, %v502_v44 }
  0x9b   : > { %v557_v43 = vpack.c.bf16 %v525_v41, %v525_v41  ;;  %v542_v47 = vpack.c.bf16 %v510_v45, %v510_v45 }
  0x9c   : > { %582 = vst.msk [vmem:[%s853_s25 + $0x40] sm:$0xf] %vm565_vm3, %v549_v42  ;;  %v399_v48 = vpop.f32.mrf.mxu2  ;;  %v362_v52 = vpop.f32.mrf.mxu0 }
  0x9d   : > { %v419_v49 = vpop.f32.mrf.mxu3  ;;  %590 = vst.msk [vmem:[%s853_s25 + $0x60] sm:$0xf] %vm565_vm3, %v557_v43  ;;  %v400_v50 = vadd.f32 %v844_v17, %v399_v48  ;;  %v382_v53 = vpop.f32.mrf.mxu1  ;;  %v363_v54 = vadd.f32 %v844_v17, %v362_v52 }
  0x9e   : > { %v420_v51 = vadd.f32 %v844_v17, %v419_v49  ;;  %567 = vst.msk [vmem:[%s853_s25 + $0x4] sm:$0xf] %vm565_vm3, %v534_v46  ;;  %v383_v55 = vadd.f32 %v844_v17, %v382_v53 }
  0x9f   : > { %575 = vst.msk [vmem:[%s853_s25 + $0x24] sm:$0xf] %vm565_vm3, %v542_v47  ;;  %vm454_vm8 = vcmp.ge.f32.partialorder %v400_v50, 0.0  ;;  %v486_v56 = vmul.f32 0.1, %v400_v50  ;;  %vm439_vm10 = vcmp.ge.f32.partialorder %v363_v54, 0.0 }
  0xa0   : > { %vm462_vm9 = vcmp.ge.f32.partialorder %v420_v51, 0.0  ;;  %v494_v57 = vmul.f32 0.1, %v420_v51  ;;  %v471_v58 = vmul.f32 0.1, %v363_v54  ;;  %vm447_vm11 = vcmp.ge.f32.partialorder %v383_v55, 0.0 }
  0xa1   : > { %v518_v59 = vsel %vm454_vm8, %v400_v50, %v486_v56  ;;  %v479_v60 = vmul.f32 0.1, %v383_v55 }
  0xa2   : > { %v550_v61 = vpack.c.bf16 %v518_v59, %v518_v59  ;;  %v526_v62 = vsel %vm462_vm9, %v420_v51, %v494_v57  ;;  %v503_v63 = vsel %vm439_vm10, %v363_v54, %v471_v58 }
  0xa3   : > { %v558_v0 = vpack.c.bf16 %v526_v62, %v526_v62  ;;  %v535_v1 = vpack.c.bf16 %v503_v63, %v503_v63  ;;  %v511_v2 = vsel %vm447_vm11, %v383_v55, %v479_v60 }
  0xa4   : > { %583 = vst.msk [vmem:[%s853_s25 + $0x44] sm:$0xf] %vm565_vm3, %v550_v61  ;;  %v543_v3 = vpack.c.bf16 %v511_v2, %v511_v2  ;;  %v402_v4 = vpop.f32.mrf.mxu2  ;;  %v364_v8 = vpop.f32.mrf.mxu0 }
  0xa5   : > { %v422_v5 = vpop.f32.mrf.mxu3  ;;  %591 = vst.msk [vmem:[%s853_s25 + $0x64] sm:$0xf] %vm565_vm3, %v558_v0  ;;  %v403_v6 = vadd.f32 %v844_v17, %v402_v4  ;;  %v384_v9 = vpop.f32.mrf.mxu1  ;;  %v365_v10 = vadd.f32 %v844_v17, %v364_v8 }
  0xa6   : > { %v423_v7 = vadd.f32 %v844_v17, %v422_v5  ;;  %568 = vst.msk [vmem:[%s853_s25 + $0x8] sm:$0xf] %vm565_vm3, %v535_v1  ;;  %v385_v11 = vadd.f32 %v844_v17, %v384_v9 }
  0xa7   : > { %576 = vst.msk [vmem:[%s853_s25 + $0x28] sm:$0xf] %vm565_vm3, %v543_v3  ;;  %vm455_vm12 = vcmp.ge.f32.partialorder %v403_v6, 0.0  ;;  %v487_v12 = vmul.f32 0.1, %v403_v6  ;;  %vm440_vm14 = vcmp.ge.f32.partialorder %v365_v10, 0.0 }
  0xa8   : > { %vm463_vm13 = vcmp.ge.f32.partialorder %v423_v7, 0.0  ;;  %v495_v13 = vmul.f32 0.1, %v423_v7  ;;  %v472_v14 = vmul.f32 0.1, %v365_v10  ;;  %vm448_vm15 = vcmp.ge.f32.partialorder %v385_v11, 0.0 }
  0xa9   : > { %v519_v15 = vsel %vm455_vm12, %v403_v6, %v487_v12  ;;  %v480_v16 = vmul.f32 0.1, %v385_v11 }
  0xaa   : > { %v551_v18 = vpack.c.bf16 %v519_v15, %v519_v15  ;;  %v527_v19 = vsel %vm463_vm13, %v423_v7, %v495_v13  ;;  %v504_v20 = vsel %vm440_vm14, %v365_v10, %v472_v14 }
  0xab   : > { %v559_v21 = vpack.c.bf16 %v527_v19, %v527_v19  ;;  %v536_v22 = vpack.c.bf16 %v504_v20, %v504_v20  ;;  %v512_v23 = vsel %vm448_vm15, %v385_v11, %v480_v16 }
  0xac   : > { %584 = vst.msk [vmem:[%s853_s25 + $0x48] sm:$0xf] %vm565_vm3, %v551_v18  ;;  %v544_v24 = vpack.c.bf16 %v512_v23, %v512_v23  ;;  %v404_v25 = vpop.f32.mrf.mxu2  ;;  %v367_v29 = vpop.f32.mrf.mxu0 }
  0xad   : > { %v424_v26 = vpop.f32.mrf.mxu3  ;;  %592 = vst.msk [vmem:[%s853_s25 + $0x68] sm:$0xf] %vm565_vm3, %v559_v21  ;;  %v405_v27 = vadd.f32 %v844_v17, %v404_v25  ;;  %v387_v30 = vpop.f32.mrf.mxu1  ;;  %v368_v31 = vadd.f32 %v844_v17, %v367_v29 }
  0xae   : > { %v425_v28 = vadd.f32 %v844_v17, %v424_v26  ;;  %569 = vst.msk [vmem:[%s853_s25 + $0xc] sm:$0xf] %vm565_vm3, %v536_v22  ;;  %v388_v32 = vadd.f32 %v844_v17, %v387_v30 }
  0xaf   : > { %577 = vst.msk [vmem:[%s853_s25 + $0x2c] sm:$0xf] %vm565_vm3, %v544_v24  ;;  %vm456_vm0 = vcmp.ge.f32.partialorder %v405_v27, 0.0  ;;  %v488_v33 = vmul.f32 0.1, %v405_v27  ;;  %vm441_vm2 = vcmp.ge.f32.partialorder %v368_v31, 0.0 }
  0xb0   : > { %vm464_vm1 = vcmp.ge.f32.partialorder %v425_v28, 0.0  ;;  %v496_v34 = vmul.f32 0.1, %v425_v28  ;;  %v473_v35 = vmul.f32 0.1, %v368_v31  ;;  %vm449_vm4 = vcmp.ge.f32.partialorder %v388_v32, 0.0 }
  0xb1   : > { %v520_v36 = vsel %vm456_vm0, %v405_v27, %v488_v33  ;;  %v481_v37 = vmul.f32 0.1, %v388_v32 }
  0xb2   : > { %v552_v38 = vpack.c.bf16 %v520_v36, %v520_v36  ;;  %v528_v39 = vsel %vm464_vm1, %v425_v28, %v496_v34  ;;  %v505_v40 = vsel %vm441_vm2, %v368_v31, %v473_v35 }
  0xb3   : > { %v560_v41 = vpack.c.bf16 %v528_v39, %v528_v39  ;;  %v537_v42 = vpack.c.bf16 %v505_v40, %v505_v40  ;;  %v513_v43 = vsel %vm449_vm4, %v388_v32, %v481_v37 }
  0xb4   : > { %585 = vst.msk [vmem:[%s853_s25 + $0x4c] sm:$0xf] %vm565_vm3, %v552_v38  ;;  %v545_v44 = vpack.c.bf16 %v513_v43, %v513_v43  ;;  %v407_v45 = vpop.f32.mrf.mxu2  ;;  %v369_v49 = vpop.f32.mrf.mxu0 }
  0xb5   : > { %v427_v46 = vpop.f32.mrf.mxu3  ;;  %593 = vst.msk [vmem:[%s853_s25 + $0x6c] sm:$0xf] %vm565_vm3, %v560_v41  ;;  %v408_v47 = vadd.f32 %v844_v17, %v407_v45  ;;  %v389_v50 = vpop.f32.mrf.mxu1  ;;  %v370_v51 = vadd.f32 %v844_v17, %v369_v49 }
  0xb6   : > { %v428_v48 = vadd.f32 %v844_v17, %v427_v46  ;;  %570 = vst.msk [vmem:[%s853_s25 + $0x10] sm:$0xf] %vm565_vm3, %v537_v42  ;;  %v390_v52 = vadd.f32 %v844_v17, %v389_v50 }
  0xb7   : > { %578 = vst.msk [vmem:[%s853_s25 + $0x30] sm:$0xf] %vm565_vm3, %v545_v44  ;;  %vm457_vm5 = vcmp.ge.f32.partialorder %v408_v47, 0.0  ;;  %v489_v53 = vmul.f32 0.1, %v408_v47  ;;  %vm442_vm7 = vcmp.ge.f32.partialorder %v370_v51, 0.0 }
  0xb8   : > { %vm465_vm6 = vcmp.ge.f32.partialorder %v428_v48, 0.0  ;;  %v497_v54 = vmul.f32 0.1, %v428_v48  ;;  %v474_v55 = vmul.f32 0.1, %v370_v51  ;;  %vm450_vm8 = vcmp.ge.f32.partialorder %v390_v52, 0.0 }
  0xb9   : > { %v521_v56 = vsel %vm457_vm5, %v408_v47, %v489_v53  ;;  %v482_v57 = vmul.f32 0.1, %v390_v52 }
  0xba   : > { %v553_v58 = vpack.c.bf16 %v521_v56, %v521_v56  ;;  %v529_v59 = vsel %vm465_vm6, %v428_v48, %v497_v54  ;;  %v506_v60 = vsel %vm442_vm7, %v370_v51, %v474_v55 }
  0xbb   : > { %v561_v61 = vpack.c.bf16 %v529_v59, %v529_v59  ;;  %v538_v62 = vpack.c.bf16 %v506_v60, %v506_v60  ;;  %v514_v63 = vsel %vm450_vm8, %v390_v52, %v482_v57 }
  0xbc   : > { %586 = vst.msk [vmem:[%s853_s25 + $0x50] sm:$0xf] %vm565_vm3, %v553_v58  ;;  %v546_v0 = vpack.c.bf16 %v514_v63, %v514_v63  ;;  %v409_v1 = vpop.f32.mrf.mxu2  ;;  %v372_v5 = vpop.f32.mrf.mxu0 }
  0xbd   : > { %v429_v2 = vpop.f32.mrf.mxu3  ;;  %594 = vst.msk [vmem:[%s853_s25 + $0x70] sm:$0xf] %vm565_vm3, %v561_v61  ;;  %v410_v3 = vadd.f32 %v844_v17, %v409_v1  ;;  %v392_v6 = vpop.f32.mrf.mxu1  ;;  %v373_v7 = vadd.f32 %v844_v17, %v372_v5 }
  0xbe   : > { %v430_v4 = vadd.f32 %v844_v17, %v429_v2  ;;  %571 = vst.msk [vmem:[%s853_s25 + $0x14] sm:$0xf] %vm565_vm3, %v538_v62  ;;  %v393_v8 = vadd.f32 %v844_v17, %v392_v6 }
  0xbf   : > { %579 = vst.msk [vmem:[%s853_s25 + $0x34] sm:$0xf] %vm565_vm3, %v546_v0  ;;  %vm458_vm9 = vcmp.ge.f32.partialorder %v410_v3, 0.0  ;;  %v490_v9 = vmul.f32 0.1, %v410_v3  ;;  %vm443_vm11 = vcmp.ge.f32.partialorder %v373_v7, 0.0 }
  0xc0   : > { %vm466_vm10 = vcmp.ge.f32.partialorder %v430_v4, 0.0  ;;  %v498_v10 = vmul.f32 0.1, %v430_v4  ;;  %v475_v11 = vmul.f32 0.1, %v373_v7  ;;  %vm451_vm12 = vcmp.ge.f32.partialorder %v393_v8, 0.0 }
  0xc1   : > { %v522_v12 = vsel %vm458_vm9, %v410_v3, %v490_v9  ;;  %v483_v13 = vmul.f32 0.1, %v393_v8 }
  0xc2   : > { %v554_v14 = vpack.c.bf16 %v522_v12, %v522_v12  ;;  %v530_v15 = vsel %vm466_vm10, %v430_v4, %v498_v10  ;;  %v507_v16 = vsel %vm443_vm11, %v373_v7, %v475_v11 }
  0xc3   : > { %v562_v18 = vpack.c.bf16 %v530_v15, %v530_v15  ;;  %v539_v19 = vpack.c.bf16 %v507_v16, %v507_v16  ;;  %v515_v20 = vsel %vm451_vm12, %v393_v8, %v483_v13 }
  0xc4   : > { %587 = vst.msk [vmem:[%s853_s25 + $0x54] sm:$0xf] %vm565_vm3, %v554_v14  ;;  %v547_v21 = vpack.c.bf16 %v515_v20, %v515_v20  ;;  %v412_v22 = vpop.f32.mrf.mxu2  ;;  %v374_v26 = vpop.f32.mrf.mxu0 }
  0xc5   : > { %v432_v23 = vpop.f32.mrf.mxu3  ;;  %595 = vst.msk [vmem:[%s853_s25 + $0x74] sm:$0xf] %vm565_vm3, %v562_v18  ;;  %v413_v24 = vadd.f32 %v844_v17, %v412_v22  ;;  %v394_v27 = vpop.f32.mrf.mxu1  ;;  %v375_v28 = vadd.f32 %v844_v17, %v374_v26 }
  0xc6   : > { %v433_v25 = vadd.f32 %v844_v17, %v432_v23  ;;  %572 = vst.msk [vmem:[%s853_s25 + $0x18] sm:$0xf] %vm565_vm3, %v539_v19  ;;  %v395_v29 = vadd.f32 %v844_v17, %v394_v27 }
  0xc7   : > { %580 = vst.msk [vmem:[%s853_s25 + $0x38] sm:$0xf] %vm565_vm3, %v547_v21  ;;  %vm459_vm13 = vcmp.ge.f32.partialorder %v413_v24, 0.0  ;;  %v491_v30 = vmul.f32 0.1, %v413_v24  ;;  %vm444_vm15 = vcmp.ge.f32.partialorder %v375_v28, 0.0 }
  0xc8   : > { %vm467_vm14 = vcmp.ge.f32.partialorder %v433_v25, 0.0  ;;  %v499_v31 = vmul.f32 0.1, %v433_v25  ;;  %v476_v32 = vmul.f32 0.1, %v375_v28  ;;  %vm452_vm0 = vcmp.ge.f32.partialorder %v395_v29, 0.0 }
  0xc9   : > { %v523_v33 = vsel %vm459_vm13, %v413_v24, %v491_v30  ;;  %v484_v34 = vmul.f32 0.1, %v395_v29 }
  0xca   : > { %v555_v35 = vpack.c.bf16 %v523_v33, %v523_v33  ;;  %v531_v36 = vsel %vm467_vm14, %v433_v25, %v499_v31  ;;  %v508_v37 = vsel %vm444_vm15, %v375_v28, %v476_v32 }
  0xcb   : > { %v563_v38 = vpack.c.bf16 %v531_v36, %v531_v36  ;;  %v540_v39 = vpack.c.bf16 %v508_v37, %v508_v37  ;;  %v516_v40 = vsel %vm452_vm0, %v395_v29, %v484_v34 }
  0xcc   : > { %588 = vst.msk [vmem:[%s853_s25 + $0x58] sm:$0xf] %vm565_vm3, %v555_v35  ;;  %v548_v41 = vpack.c.bf16 %v516_v40, %v516_v40  ;;  %v414_v42 = vpop.f32.mrf.mxu2 }
  0xcd   : > { %v434_v43 = vpop.f32.mrf.mxu3  ;;  %596 = vst.msk [vmem:[%s853_s25 + $0x78] sm:$0xf] %vm565_vm3, %v563_v38  ;;  %v415_v44 = vadd.f32 %v844_v17, %v414_v42 }
  0xce   : > { %v435_v45 = vadd.f32 %v844_v17, %v434_v43  ;;  %573 = vst.msk [vmem:[%s853_s25 + $0x1c] sm:$0xf] %vm565_vm3, %v540_v39 }
  0xcf   : > { %581 = vst.msk [vmem:[%s853_s25 + $0x3c] sm:$0xf] %vm565_vm3, %v548_v41  ;;  %vm460_vm1 = vcmp.ge.f32.partialorder %v415_v44, 0.0  ;;  %v492_v46 = vmul.f32 0.1, %v415_v44 }
  0xd0   : > { %vm468_vm2 = vcmp.ge.f32.partialorder %v435_v45, 0.0  ;;  %v500_v47 = vmul.f32 0.1, %v435_v45 }
  0xd1   : > { %v524_v48 = vsel %vm460_vm1, %v415_v44, %v492_v46 }
  0xd2   : > { %v556_v49 = vpack.c.bf16 %v524_v48, %v524_v48  ;;  %v532_v50 = vsel %vm468_vm2, %v435_v45, %v500_v47 }
  0xd3   : > { %v564_v51 = vpack.c.bf16 %v532_v50, %v532_v50 }
  0xd4   : > { %589 = vst.msk [vmem:[%s853_s25 + $0x5c] sm:$0xf] %vm565_vm3, %v556_v49 }
  0xd5   : > { %597 = vst.msk [vmem:[%s853_s25 + $0x7c] sm:$0xf] %vm565_vm3, %v564_v51 }
  0xd6 PF: > { %s13_s12 = sadd.s32 1, %s784_s12  }
  0xd7   : > { %p10_p4 = scmp.ge.s32.totalorder %s13_s12, 9  }
  0xd9   :  { %12 = sbr.rel (!%p10_p4) target bundleno = 1 (0x1), region = 62 }

// kernel: discriminator_forward.4
= control target key start
LH: loop header
LB: loop body
LE: loop exit
PB: predicated region body
PF: predicated region fallthrough
CT: control target
= control target key end

     0   :  { %vm411_vm0 = vsmask.f32 7424  ;;  %s12184_s1 = inlined_call_operand.vmem [shape: bf16[4,256,128], index: 1, kind: input, shape index: {}]   ;;  %s12185_s0 = inlined_call_operand.vmem [shape: bf16[528,256], index: 0, kind: input, shape index: {}]   ;;  %s12186_s2 = inlined_call_operand.vmem [shape: f32[1,128], index: 2, kind: input, shape index: {}]   ;;  %s12187_s3 = inlined_call_operand.vmem [shape: f32[1,128], index: 3, kind: input, shape index: {}]   ;;  %s12188_s4 = inlined_call_operand.vmem [shape: f32[1,128], index: 4, kind: input, shape index: {}]   ;;  %s12189_s5 = inlined_call_operand.vmem [shape: bf16[512,128], index: 5, kind: output, shape index: {}]  }
   0x1   :  { %v6312_v0 = vld [vmem:[%s12184_s1 + $0xb8] sm:$0xff]  ;;  %v6311_v4 = vld [vmem:[%s12184_s1 + $0xb0] sm:$0xff]  ;;  %v6310_v8 = vld [vmem:[%s12184_s1 + $0xa8] sm:$0xff] }
   0x2   :  { %v6320_v1 = vld [vmem:[%s12184_s1 + $0xf8] sm:$0xff]  ;;  %1092 = vmatpush.bf16.msra.mxu0 %v6312_v0  ;;  %v6319_v5 = vld [vmem:[%s12184_s1 + $0xf0] sm:$0xff]  ;;  %v6318_v9 = vld [vmem:[%s12184_s1 + $0xe8] sm:$0xff] }
   0x3   :  { %v6296_v2 = vld [vmem:[%s12184_s1 + $0x38] sm:$0xff]  ;;  %1261 = vmatpush.bf16.msra.mxu1 %v6320_v1  ;;  %v6295_v6 = vld [vmem:[%s12184_s1 + $0x30] sm:$0xff]  ;;  %v6294_v10 = vld [vmem:[%s12184_s1 + $0x28] sm:$0xff] }
   0x4   :  { %v6304_v3 = vld [vmem:[%s12184_s1 + $0x78] sm:$0xff]  ;;  %1590 = vmatpush.bf16.msra.mxu2 %v6296_v2  ;;  %v6303_v7 = vld [vmem:[%s12184_s1 + $0x70] sm:$0xff]  ;;  %v6302_v11 = vld [vmem:[%s12184_s1 + $0x68] sm:$0xff] }
   0x5   :  { %1759 = vmatpush.bf16.msra.mxu3 %v6304_v3  ;;  %v6309_v12 = vld [vmem:[%s12184_s1 + $0xa0] sm:$0xff]  ;;  %v6705_v17 = vld [vmem:[%s12185_s0 + $0x8] sm:$0xff]  ;;  %v6710_v18 = vld [vmem:[%s12185_s0 + $0x10] sm:$0xff] }
   0x6   :  { %1093 = vmatpush.bf16.msra.mxu0 %v6311_v4  ;;  %v6317_v13 = vld [vmem:[%s12184_s1 + $0xe0] sm:$0xff]  ;;  %v6715_v19 = vld [vmem:[%s12185_s0 + $0x18] sm:$0xff]  ;;  %v12251_v22 = vunpack.c.l.b16 %v6705_v17  ;;  %v12245_v23 = vunpack.c.h.b16 %v6705_v17  ;;  %v12248_v24 = vunpack.c.l.b16 %v6710_v18  ;;  %v12244_v29 = vunpack.c.h.b16 %v6710_v18  ;;  %v6307_v35 = vld [vmem:[%s12184_s1 + $0x90] sm:$0xff] }
   0x7   :  { %1262 = vmatpush.bf16.msra.mxu1 %v6319_v5  ;;  %v6293_v14 = vld [vmem:[%s12184_s1 + $0x20] sm:$0xff]  ;;  %v12243_v25 = vunpack.c.l.b16 %v6715_v19  ;;  %v6308_v26 = vld [vmem:[%s12184_s1 + $0x98] sm:$0xff]  ;;  %v12237_v30 = vunpack.c.h.b16 %v6715_v19  ;;  %v6315_v36 = vld [vmem:[%s12184_s1 + $0xd0] sm:$0xff] }
   0x8   :  { %1591 = vmatpush.bf16.msra.mxu2 %v6295_v6  ;;  %v6301_v15 = vld [vmem:[%s12184_s1 + $0x60] sm:$0xff]  ;;  %v6316_v27 = vld [vmem:[%s12184_s1 + $0xd8] sm:$0xff]  ;;  %v6291_v40 = vld [vmem:[%s12184_s1 + $0x10] sm:$0xff] }
   0x9   :  { %1760 = vmatpush.bf16.msra.mxu3 %v6303_v7  ;;  %v20_v16 = vld [vmem:[%s12185_s0] sm:$0xff]  ;;  %v6292_v32 = vld [vmem:[%s12184_s1 + $0x18] sm:$0xff]  ;;  %v6747_v34 = vpack.c.b16 %v12243_v25, %v12248_v24  ;;  %v6760_v38 = vpack.c.b16 %v12237_v30, %v12244_v29  ;;  %v6299_v41 = vld [vmem:[%s12184_s1 + $0x50] sm:$0xff] }
   0xa   :  { %1094 = vmatpush.bf16.msra.mxu0 %v6310_v8  ;;  %v215_v20 = vunpack.c.l.b16 %v20_v16  ;;  %v216_v21 = vunpack.c.h.b16 %v20_v16  ;;  %v6300_v33 = vld [vmem:[%s12184_s1 + $0x58] sm:$0xff]  ;;  %v6306_v44 = vld [vmem:[%s12184_s1 + $0x88] sm:$0xff]  ;;  %v6305_v52 = vld [vmem:[%s12184_s1 + $0x80] sm:$0xff] }
   0xb   :  { %1263 = vmatpush.bf16.msra.mxu1 %v6318_v9  ;;  %v420_v43 = vshll.u32 %v6747_v34, 16  ;;  %v6314_v45 = vld [vmem:[%s12184_s1 + $0xc8] sm:$0xff]  ;;  %v432_v49 = vshll.u32 %v6760_v38, 16  ;;  %v6313_v53 = vld [vmem:[%s12184_s1 + $0xc0] sm:$0xff]  ;;  %v6408_v62 = vld [vmem:[%s12184_s1 + $0x1b8] sm:$0xff] }
   0xc   :  { %1592 = vmatpush.bf16.msra.mxu2 %v6294_v10  ;;  %v6729_v28 = vpack.c.b16 %v12251_v22, %v215_v20  ;;  %v6735_v31 = vpack.c.b16 %v12245_v23, %v216_v21  ;;  %v6290_v50 = vld [vmem:[%s12184_s1 + $0x8] sm:$0xff]  ;;  %v6794_v58 = vld [vmem:[%s12185_s0 + $0x20] sm:$0xff]  ;;  %v6416_v63 = vld [vmem:[%s12184_s1 + $0x1f8] sm:$0xff]  ;;  %v436_v10 = vshrl.u32 %v6747_v34, 16 }
   0xd   :  { %1761 = vmatpush.bf16.msra.mxu3 %v6302_v11  ;;  %v6298_v51 = vld [vmem:[%s12184_s1 + $0x48] sm:$0xff]  ;;  %v422_v55 = vrot.slane %v420_v43, 1  ;;  %v434_v57 = vrot.slane %v432_v49, 1  ;;  %v6289_v60 = vld [vmem:[%s12184_s1] sm:$0xff]  ;;  %v12240_v0 = vunpack.c.l.b16 %v6794_v58  ;;  %v12236_v4 = vunpack.c.h.b16 %v6794_v58  ;;  %v6328_v6 = vld [vmem:[%s12184_s1 + $0x138] sm:$0xff] }
   0xe   :  { %1095 = vmatpush.bf16.msra.mxu0 %v6309_v12  ;;  %v415_v37 = vshll.u32 %v6729_v28, 16  ;;  %v427_v39 = vshll.u32 %v6735_v31, 16  ;;  %v413_v42 = vshrl.u32 %v6729_v28, 16  ;;  %v425_v47 = vshrl.u32 %v6735_v31, 16  ;;  %v6799_v59 = vld [vmem:[%s12185_s0 + $0x28] sm:$0xff]  ;;  %v6297_v61 = vld [vmem:[%s12184_s1 + $0x40] sm:$0xff] }
   0xf   :  { %1264 = vmatpush.bf16.msra.mxu1 %v6317_v13  ;;  %v12235_v1 = vunpack.c.l.b16 %v6799_v59  ;;  %v12229_v5 = vunpack.c.h.b16 %v6799_v59  ;;  %v6336_v7 = vld [vmem:[%s12184_s1 + $0x178] sm:$0xff]  ;;  %v444_v12 = vshrl.u32 %v6760_v38, 16  ;;  %v6840_v21 = vld [vmem:[%s12185_s0 + $0x30] sm:$0xff]  ;;  %v7266_v22 = vld [vmem:[%s12185_s0 + $0x100] sm:$0xff] }
  0x10   :  { %1593 = vmatpush.bf16.msra.mxu2 %v6293_v14  ;;  %v417_v46 = vrot.slane %v415_v37, 1  ;;  %v429_v48 = vrot.slane %v427_v39, 1  ;;  %v438_v14 = vor.u32 %v436_v10, %v422_v55  ;;  %v6907_v10 = vld [vmem:[%s12185_s0 + $0x58] sm:$0xff]  ;;  %v7228_v25 = vld [vmem:[%s12185_s0 + $0xf0] sm:$0xff]  ;;  %12510 = vst [vmem:[#allocation8_spill] sm:$0xff] %v7266_v22 }
  0x11   :  { %1762 = vmatpush.bf16.msra.mxu3 %v6301_v15  ;;  %v349_v8 = vpack.c.b16 %v12235_v1, %v12240_v0  ;;  %v350_v9 = vpack.c.b16 %v12229_v5, %v12236_v4  ;;  %v446_v16 = vor.u32 %v444_v12, %v434_v57  ;;  %v7190_v1 = vld [vmem:[%s12185_s0 + $0xe0] sm:$0xff]  ;;  %12507 = vst [vmem:[#allocation5_spill] sm:$0xff] %v7228_v25 }
  0x12   :  { %1096 = vmatpush.bf16.msra.mxu0 %v6308_v26  ;;  %v418_v54 = vor.u32 %v417_v46, %v413_v42  ;;  %v430_v56 = vor.u32 %v429_v48, %v425_v47  ;;  %v6845_v26 = vld [vmem:[%s12185_s0 + $0x38] sm:$0xff]  ;;  %v6871_v46 = vld [vmem:[%s12185_s0 + $0x48] sm:$0xff]  ;;  %12505 = vst [vmem:[#allocation3_spill] sm:$0xff] %v7190_v1 }
  0x13   :  { %1265 = vmatpush.bf16.msra.mxu1 %v6316_v27  ;;  %v440_v11 = vshll.u32 %v349_v8, 16  ;;  %v448_v13 = vshll.u32 %v350_v9, 16  ;;  %v12230_v27 = vunpack.c.l.b16 %v6840_v21  ;;  %v452_v39 = vshrl.u32 %v349_v8, 16 }
  0x14   :  { %1594 = vmatpush.bf16.msra.mxu2 %v6292_v32  ;;  %v423_v2 = vsel %vm411_vm0, %v418_v54, %v422_v55  ;;  %v435_v3 = vsel %vm411_vm0, %v430_v56, %v434_v57  ;;  %v12219_v48 = vunpack.c.l.b16 %v6871_v46  ;;  %v6407_v55 = vld [vmem:[%s12184_s1 + $0x1b0] sm:$0xff] }
  0x15   :  { %1763 = vmatpush.bf16.msra.mxu3 %v6300_v33  ;;  %v442_v15 = vrot.slane %v440_v11, 1  ;;  %v450_v20 = vrot.slane %v448_v13, 1  ;;  %v12228_v33 = vunpack.c.h.b16 %v6840_v21  ;;  %v6415_v56 = vld [vmem:[%s12184_s1 + $0x1f0] sm:$0xff] }
  0x16   :  { %1097 = vmatpush.bf16.msra.mxu0 %v6307_v35  ;;  %v12221_v35 = vunpack.c.h.b16 %v6845_v26  ;;  %v6327_v57 = vld [vmem:[%s12184_s1 + $0x130] sm:$0xff] }
  0x17   :  { %1266 = vmatpush.bf16.msra.mxu1 %v6315_v36  ;;  %v451_v32 = vsel %vm411_vm0, %v446_v16, %v450_v20  ;;  %v454_v43 = vor.u32 %v452_v39, %v442_v15  ;;  %v12205_v16 = vunpack.c.h.b16 %v6907_v10 }
  0x18   :  { %1595 = vmatpush.bf16.msra.mxu2 %v6291_v40  ;;  %v352_v37 = vpack.c.b16 %v12221_v35, %v12228_v33 }
  0x19   :  { %1764 = vmatpush.bf16.msra.mxu3 %v6299_v41  ;;  %v460_v41 = vshrl.u32 %v350_v9, 16 }
  0x1a   :  { %1098 = vmatpush.bf16.msra.mxu0 %v6306_v44  ;;  %v464_v42 = vshll.u32 %v352_v37, 16 }
  0x1b   :  { %1267 = vmatpush.bf16.msra.mxu1 %v6314_v45  ;;  %v462_v45 = vor.u32 %v460_v41, %v450_v20 }
  0x1c   :  { %1596 = vmatpush.bf16.msra.mxu2 %v6290_v50  ;;  %v12213_v50 = vunpack.c.h.b16 %v6871_v46 }
  0x1d   :  { %1765 = vmatpush.bf16.msra.mxu3 %v6298_v51 }
  0x1e   :  { %1099 = vmatpush.bf16.msra.mxu0 %v6305_v52 }
  0x1f   :  { %1268 = vmatpush.bf16.msra.mxu1 %v6313_v53 }
  0x20   :  { %1597 = vmatpush.bf16.msra.mxu2 %v6289_v60  ;;  %v6335_v60 = vld [vmem:[%s12184_s1 + $0x170] sm:$0xff] }
  0x21   :  { %1766 = vmatpush.bf16.msra.mxu3 %v6297_v61  ;;  %1100 = vmatmul.bf16.vlgmr.msra.gmra.mxu0 %v423_v2 }
  0x22   :  { %1269 = vmatmul.bf16.vlgmr.msra.gmra.mxu1 %v435_v3  ;;  %2189 = vmatpush.bf16.msrb.mxu0 %v6328_v6 }
  0x23   :  { %1598 = vmatmul.bf16.vlgmr.msra.gmra.mxu2 %v6729_v28  ;;  %2358 = vmatpush.bf16.msrb.mxu1 %v6336_v7  ;;  %v12227_v28 = vunpack.c.l.b16 %v6845_v26 }
  0x24   :  { %3630 = vmatpush.bf16.msrb.mxu2 %v6408_v62  ;;  %1767 = vmatmul.bf16.vlgmr.msra.gmra.mxu3 %v6735_v31  ;;  %v443_v31 = vsel %vm411_vm0, %v438_v14, %v442_v15  ;;  %v12209_v14 = vunpack.c.l.b16 %v6907_v10 }
  0x25   :  { %3799 = vmatpush.bf16.msrb.mxu3 %v6416_v63  ;;  %v351_v36 = vpack.c.b16 %v12227_v28, %v12230_v27  ;;  %v476_v63 = vshrl.u32 %v352_v37, 16  ;;  %v7152_v28 = vld [vmem:[%s12185_s0 + $0xd0] sm:$0xff] }
  0x26   :  { %2190 = vmatpush.bf16.msrb.mxu0 %v6327_v57  ;;  %v12234_v33 = vunpack.c.h.b16 %v7152_v28 }
  0x27   :  { %v456_v40 = vshll.u32 %v351_v36, 16  ;;  %v468_v61 = vshrl.u32 %v351_v36, 16  ;;  %2359 = vmatpush.bf16.msrb.mxu1 %v6335_v60 }
  0x28   :  { %3631 = vmatpush.bf16.msrb.mxu2 %v6407_v55 }
  0x29   :  { %v458_v44 = vrot.slane %v456_v40, 1  ;;  %3800 = vmatpush.bf16.msrb.mxu3 %v6415_v56 }
  0x2b   :  { %v459_v51 = vsel %vm411_vm0, %v454_v43, %v458_v44  ;;  %v470_v3 = vor.u32 %v468_v61, %v458_v44 }
  0x31   :  { %1105 = vmatmul.bf16.gmra.mxu0 %v443_v31 }
  0x32   :  { %1274 = vmatmul.bf16.gmra.mxu1 %v451_v32 }
  0x33   :  { %1603 = vmatmul.bf16.gmra.mxu2 %v6747_v34  ;;  %v466_v34 = vrot.slane %v464_v42, 1 }
  0x34   :  { %1772 = vmatmul.bf16.gmra.mxu3 %v6760_v38  ;;  %v6866_v38 = vld [vmem:[%s12185_s0 + $0x40] sm:$0xff] }
  0x35   :  { %v12226_v47 = vunpack.c.l.b16 %v6866_v38  ;;  %v12220_v49 = vunpack.c.h.b16 %v6866_v38  ;;  %v467_v52 = vsel %vm411_vm0, %v462_v45, %v466_v34  ;;  %v478_v7 = vor.u32 %v476_v63, %v466_v34 }
  0x37   :  { %v353_v53 = vpack.c.b16 %v12219_v48, %v12226_v47  ;;  %v354_v54 = vpack.c.b16 %v12213_v50, %v12220_v49  ;;  %v7102_v48 = vld [vmem:[%s12185_s0 + $0xc0] sm:$0xff] }
  0x39   :  { %v472_v62 = vshll.u32 %v353_v53, 16  ;;  %v480_v2 = vshll.u32 %v354_v54, 16  ;;  %v484_v32 = vshrl.u32 %v353_v53, 16  ;;  %v492_v40 = vshrl.u32 %v354_v54, 16 }
  0x3b   :  { %v474_v6 = vrot.slane %v472_v62, 1 }
  0x3d   :  { %v475_v11 = vsel %vm411_vm0, %v470_v3, %v474_v6  ;;  %v486_v42 = vor.u32 %v484_v32, %v474_v6  ;;  %v6955_v32 = vld [vmem:[%s12185_s0 + $0x78] sm:$0xff] }
  0x41   :  { %1110 = vmatmul.bf16.gmra.mxu0 %v459_v51 }
  0x42   :  { %1279 = vmatmul.bf16.gmra.mxu1 %v467_v52 }
  0x43   :  { %1608 = vmatmul.bf16.gmra.mxu2 %v349_v8  ;;  %v482_v8 = vrot.slane %v480_v2, 1 }
  0x44   :  { %1777 = vmatmul.bf16.gmra.mxu3 %v350_v9  ;;  %v6902_v9 = vld [vmem:[%s12185_s0 + $0x50] sm:$0xff] }
  0x45   :  { %v483_v12 = vsel %vm411_vm0, %v478_v7, %v482_v8  ;;  %v12216_v13 = vunpack.c.l.b16 %v6902_v9  ;;  %v12210_v15 = vunpack.c.h.b16 %v6902_v9  ;;  %v494_v44 = vor.u32 %v492_v40, %v482_v8 }
  0x46   :  { %v12195_v40 = vunpack.c.l.b16 %v6955_v32 }
  0x47   :  { %v355_v20 = vpack.c.b16 %v12209_v14, %v12216_v13  ;;  %v356_v31 = vpack.c.b16 %v12205_v16, %v12210_v15 }
  0x49   :  { %v488_v39 = vshll.u32 %v355_v20, 16  ;;  %v496_v41 = vshll.u32 %v356_v31, 16  ;;  %v500_v62 = vshrl.u32 %v355_v20, 16  ;;  %v508_v2 = vshrl.u32 %v356_v31, 16 }
  0x4b   :  { %v490_v43 = vrot.slane %v488_v39, 1  ;;  %v498_v45 = vrot.slane %v496_v41, 1 }
  0x4d   :  { %v491_v56 = vsel %vm411_vm0, %v486_v42, %v490_v43  ;;  %v499_v57 = vsel %vm411_vm0, %v494_v44, %v498_v45  ;;  %v502_v6 = vor.u32 %v500_v62, %v490_v43  ;;  %v510_v8 = vor.u32 %v508_v2, %v498_v45 }
  0x4e   :  { %v12193_v42 = vunpack.c.h.b16 %v6955_v32 }
  0x51   :  { %1115 = vmatmul.bf16.gmra.mxu0 %v475_v11 }
  0x52   :  { %1284 = vmatmul.bf16.gmra.mxu1 %v483_v12  ;;  %v6950_v12 = vld [vmem:[%s12185_s0 + $0x70] sm:$0xff] }
  0x53   :  { %1613 = vmatmul.bf16.gmra.mxu2 %v351_v36  ;;  %v6926_v36 = vld [vmem:[%s12185_s0 + $0x60] sm:$0xff]  ;;  %v12198_v39 = vunpack.c.l.b16 %v6950_v12  ;;  %v12196_v41 = vunpack.c.h.b16 %v6950_v12 }
  0x54   :  { %1782 = vmatmul.bf16.gmra.mxu3 %v352_v37  ;;  %v6931_v37 = vld [vmem:[%s12185_s0 + $0x68] sm:$0xff]  ;;  %v12208_v34 = vunpack.c.l.b16 %v6926_v36  ;;  %v12204_v52 = vunpack.c.h.b16 %v6926_v36 }
  0x55   :  { %v12203_v51 = vunpack.c.l.b16 %v6931_v37  ;;  %v12197_v55 = vunpack.c.h.b16 %v6931_v37  ;;  %v359_v43 = vpack.c.b16 %v12195_v40, %v12198_v39  ;;  %v360_v44 = vpack.c.b16 %v12193_v42, %v12196_v41 }
  0x57   :  { %v357_v60 = vpack.c.b16 %v12203_v51, %v12208_v34  ;;  %v358_v61 = vpack.c.b16 %v12197_v55, %v12204_v52  ;;  %v528_v62 = vshll.u32 %v360_v44, 16 }
  0x59   :  { %v504_v63 = vshll.u32 %v357_v60, 16  ;;  %v512_v3 = vshll.u32 %v358_v61, 16  ;;  %v516_v45 = vshrl.u32 %v357_v60, 16 }
  0x5b   :  { %v506_v7 = vrot.slane %v504_v63, 1  ;;  %v514_v11 = vrot.slane %v512_v3, 1 }
  0x5d   :  { %v518_v63 = vor.u32 %v516_v45, %v506_v7 }
  0x61   :  { %1120 = vmatmul.bf16.gmra.mxu0 %v491_v56  ;;  %v520_v56 = vshll.u32 %v359_v43, 16 }
  0x62   :  { %1289 = vmatmul.bf16.gmra.mxu1 %v499_v57  ;;  %v524_v57 = vshrl.u32 %v358_v61, 16 }
  0x63   :  { %1618 = vmatmul.bf16.gmra.mxu2 %v353_v53  ;;  %v507_v53 = vsel %vm411_vm0, %v502_v6, %v506_v7  ;;  %v522_v2 = vrot.slane %v520_v56, 1  ;;  %v530_v6 = vrot.slane %v528_v62, 1  ;;  %v6406_v62 = vld [vmem:[%s12184_s1 + $0x1a8] sm:$0xff] }
  0x64   :  { %1787 = vmatmul.bf16.gmra.mxu3 %v354_v54  ;;  %v515_v54 = vsel %vm411_vm0, %v510_v8, %v514_v11  ;;  %v526_v3 = vor.u32 %v524_v57, %v514_v11  ;;  %3632 = vmatpush.bf16.msrb.mxu2 %v6406_v62  ;;  %v7010_v62 = vld [vmem:[%s12185_s0 + $0x90] sm:$0xff] }
  0x65   :  { %v523_v11 = vsel %vm411_vm0, %v518_v63, %v522_v2  ;;  %v6414_v63 = vld [vmem:[%s12184_s1 + $0x1e8] sm:$0xff] }
  0x66   :  { %v531_v45 = vsel %vm411_vm0, %v526_v3, %v530_v6  ;;  %3801 = vmatpush.bf16.msrb.mxu3 %v6414_v63  ;;  %v532_v3 = vshrl.u32 %v359_v43, 16  ;;  %v7015_v63 = vld [vmem:[%s12185_s0 + $0x98] sm:$0xff] }
  0x71   :  { %1125 = vmatmul.bf16.gmra.mxu0 %v507_v53 }
  0x72   :  { %1294 = vmatmul.bf16.gmra.mxu1 %v515_v54 }
  0x73   :  { %1623 = vmatmul.bf16.gmra.mxu2 %v355_v20  ;;  %v6974_v20 = vld [vmem:[%s12185_s0 + $0x80] sm:$0xff] }
  0x74   :  { %1792 = vmatmul.bf16.gmra.mxu3 %v356_v31  ;;  %v6979_v31 = vld [vmem:[%s12185_s0 + $0x88] sm:$0xff]  ;;  %v12194_v8 = vunpack.c.l.b16 %v6974_v20  ;;  %v12192_v54 = vunpack.c.h.b16 %v6974_v20 }
  0x75   :  { %v12190_v53 = vunpack.c.l.b16 %v6979_v31  ;;  %v12191_v7 = vunpack.c.h.b16 %v6979_v31 }
  0x77   :  { %v361_v56 = vpack.c.b16 %v12190_v53, %v12194_v8  ;;  %v362_v57 = vpack.c.b16 %v12191_v7, %v12192_v54  ;;  %v6326_v7 = vld [vmem:[%s12184_s1 + $0x128] sm:$0xff] }
  0x78   :  { %2191 = vmatpush.bf16.msrb.mxu0 %v6326_v7  ;;  %v12199_v7 = vunpack.c.h.b16 %v7015_v63 }
  0x79   :  { %v544_v53 = vshll.u32 %v362_v57, 16 }
  0x7b   :  { %v546_v8 = vrot.slane %v544_v53, 1  ;;  %v12201_v53 = vunpack.c.h.b16 %v7010_v62 }
  0x81   :  { %1130 = vmatmul.bf16.gmra.mxu0 %v523_v11  ;;  %v536_v11 = vshll.u32 %v361_v56, 16 }
  0x82   :  { %1299 = vmatmul.bf16.gmra.mxu1 %v531_v45  ;;  %v540_v45 = vshrl.u32 %v360_v44, 16 }
  0x83   :  { %1628 = vmatmul.bf16.gmra.mxu2 %v357_v60  ;;  %v6334_v60 = vld [vmem:[%s12184_s1 + $0x168] sm:$0xff]  ;;  %v538_v54 = vrot.slane %v536_v11, 1  ;;  %v548_v11 = vshrl.u32 %v361_v56, 16 }
  0x84   :  { %1797 = vmatmul.bf16.gmra.mxu3 %v358_v61  ;;  %v534_v61 = vor.u32 %v532_v3, %v522_v2  ;;  %v542_v42 = vor.u32 %v540_v45, %v530_v6  ;;  %2360 = vmatpush.bf16.msrb.mxu1 %v6334_v60  ;;  %v12202_v2 = vunpack.c.l.b16 %v7010_v62  ;;  %v12200_v6 = vunpack.c.l.b16 %v7015_v63 }
  0x85   :  { %v556_v60 = vshrl.u32 %v362_v57, 16  ;;  %v550_v55 = vor.u32 %v548_v11, %v538_v54 }
  0x86   :  { %v539_v40 = vsel %vm411_vm0, %v534_v61, %v538_v54  ;;  %v547_v41 = vsel %vm411_vm0, %v542_v42, %v546_v8  ;;  %v363_v3 = vpack.c.b16 %v12200_v6, %v12202_v2  ;;  %v364_v42 = vpack.c.b16 %v12199_v7, %v12201_v53 }
  0x88   :  { %v552_v45 = vshll.u32 %v363_v3, 16  ;;  %v560_v61 = vshll.u32 %v364_v42, 16  ;;  %v564_v52 = vshrl.u32 %v363_v3, 16  ;;  %v572_v16 = vshrl.u32 %v364_v42, 16 }
  0x8a   :  { %v554_v39 = vrot.slane %v552_v45, 1 }
  0x8c   :  { %v555_v54 = vsel %vm411_vm0, %v550_v55, %v554_v39 }
  0x91   :  { %1135 = vmatmul.bf16.gmra.mxu0 %v539_v40  ;;  %v558_v40 = vor.u32 %v556_v60, %v546_v8 }
  0x92   :  { %1304 = vmatmul.bf16.gmra.mxu1 %v547_v41  ;;  %v562_v41 = vrot.slane %v560_v61, 1 }
  0x93   :  { %1633 = vmatmul.bf16.gmra.mxu2 %v359_v43  ;;  %v7034_v43 = vld [vmem:[%s12185_s0 + $0xa0] sm:$0xff] }
  0x94   :  { %1802 = vmatmul.bf16.gmra.mxu3 %v360_v44  ;;  %v7039_v44 = vld [vmem:[%s12185_s0 + $0xa8] sm:$0xff]  ;;  %v12207_v7 = vunpack.c.l.b16 %v7034_v43  ;;  %v563_v8 = vsel %vm411_vm0, %v558_v40, %v562_v41  ;;  %v12212_v11 = vunpack.c.h.b16 %v7034_v43  ;;  %v574_v14 = vor.u32 %v572_v16, %v562_v41 }
  0x95   :  { %v12206_v6 = vunpack.c.l.b16 %v7039_v44  ;;  %v12211_v45 = vunpack.c.h.b16 %v7039_v44 }
  0x97   :  { %v7051_v61 = vpack.c.b16 %v12206_v6, %v12207_v7  ;;  %v7057_v55 = vpack.c.b16 %v12211_v45, %v12212_v11  ;;  %v7066_v45 = vld [vmem:[%s12185_s0 + $0xb0] sm:$0xff] }
  0x99   :  { %v576_v6 = vshll.u32 %v7057_v55, 16 }
  0x9b   :  { %v578_v15 = vrot.slane %v576_v6, 1 }
  0x9d   :  { %v579_v41 = vsel %vm411_vm0, %v574_v14, %v578_v15 }
  0x9e   :  { %v1101_v53 = vpop.f32.mrf.mxu0 }
  0x9f   :  { %v1270_v2 = vpop.f32.mrf.mxu1 }
  0xa0   :  { %v1271_v60 = vadd.f32 %v1270_v2, %v1101_v53  ;;  %v568_v2 = vshll.u32 %v7051_v61, 16 }
  0xa1   :  { %1140 = vmatmul.bf16.gmra.mxu0 %v555_v54 }
  0xa2   :  { %1309 = vmatmul.bf16.gmra.mxu1 %v563_v8  ;;  %v570_v34 = vrot.slane %v568_v2, 1  ;;  %v12218_v2 = vunpack.c.h.b16 %v7066_v45 }
  0xa3   :  { %1638 = vmatmul.bf16.gmra.mxu2 %v361_v56 }
  0xa4   :  { %1807 = vmatmul.bf16.gmra.mxu3 %v362_v57  ;;  %v566_v57 = vor.u32 %v564_v52, %v554_v39 }
  0xa6   :  { %v1599_v40 = vpop.f32.mrf.mxu2  ;;  %v1103_v54 = vpop.f32.mrf.mxu0 }
  0xa7   :  { %v1768_v51 = vpop.f32.mrf.mxu3  ;;  %v1600_v53 = vadd.f32 %v1599_v40, %v1271_v60  ;;  %v1272_v8 = vpop.f32.mrf.mxu1  ;;  %v7071_v60 = vld [vmem:[%s12185_s0 + $0xb8] sm:$0xff] }
  0xa8   :  { %v1273_v7 = vadd.f32 %v1272_v8, %v1103_v54  ;;  %v571_v54 = vsel %vm411_vm0, %v566_v57, %v570_v34  ;;  %v12214_v52 = vunpack.c.l.b16 %v7071_v60 }
  0xa9   :  { %v7061_v56 = vadd.f32 %v1768_v51, %v1600_v53  ;;  %v12215_v51 = vunpack.c.l.b16 %v7066_v45  ;;  %v12217_v53 = vunpack.c.h.b16 %v7071_v60 }
  0xab   :  { %v7085_v57 = vpack.c.b16 %v12214_v52, %v12215_v51  ;;  %v7091_v14 = vpack.c.b16 %v12217_v53, %v12218_v2 }
  0xae   :  { %v1601_v40 = vpop.f32.mrf.mxu2  ;;  %v1106_v39 = vpop.f32.mrf.mxu0 }
  0xaf   :  { %v1770_v11 = vpop.f32.mrf.mxu3  ;;  %v1602_v16 = vadd.f32 %v1601_v40, %v1273_v7  ;;  %v1275_v6 = vpop.f32.mrf.mxu1 }
  0xb0   :  { %v1276_v8 = vadd.f32 %v1275_v6, %v1106_v39 }
  0xb1   :  { %v7079_v50 = vadd.f32 %v1770_v11, %v1602_v16  ;;  %1145 = vmatmul.bf16.gmra.mxu0 %v571_v54  ;;  %v580_v11 = vshrl.u32 %v7051_v61, 16  ;;  %v584_v54 = vshll.u32 %v7085_v57, 16 }
  0xb2   :  { %1314 = vmatmul.bf16.gmra.mxu1 %v579_v41  ;;  %v588_v41 = vshrl.u32 %v7057_v55, 16 }
  0xb3   :  { %1643 = vmatmul.bf16.gmra.mxu2 %v363_v3  ;;  %v592_v3 = vshll.u32 %v7091_v14, 16  ;;  %v582_v51 = vor.u32 %v580_v11, %v570_v34  ;;  %v586_v13 = vrot.slane %v584_v54, 1 }
  0xb4   :  { %1812 = vmatmul.bf16.gmra.mxu3 %v364_v42  ;;  %v590_v53 = vor.u32 %v588_v41, %v578_v15 }
  0xb5   :  { %v594_v2 = vrot.slane %v592_v3, 1 }
  0xb6   :  { %v1604_v7 = vpop.f32.mrf.mxu2  ;;  %v1108_v39 = vpop.f32.mrf.mxu0 }
  0xb7   :  { %v1773_v40 = vpop.f32.mrf.mxu3  ;;  %v1605_v16 = vadd.f32 %v1604_v7, %v1276_v8  ;;  %v1277_v6 = vpop.f32.mrf.mxu1  ;;  %v7107_v8 = vld [vmem:[%s12185_s0 + $0xc8] sm:$0xff] }
  0xb8   :  { %v1278_v42 = vadd.f32 %v1277_v6, %v1108_v39  ;;  %v587_v39 = vsel %vm411_vm0, %v582_v51, %v586_v13  ;;  %v12223_v34 = vunpack.c.l.b16 %v7107_v8  ;;  %v12224_v6 = vunpack.c.h.b16 %v7102_v48 }
  0xb9   :  { %v7097_v52 = vadd.f32 %v1773_v40, %v1605_v16  ;;  %v12225_v40 = vunpack.c.l.b16 %v7102_v48  ;;  %v595_v16 = vsel %vm411_vm0, %v590_v53, %v594_v2  ;;  %v12222_v41 = vunpack.c.h.b16 %v7107_v8 }
  0xbb   :  { %v7121_v51 = vpack.c.b16 %v12223_v34, %v12225_v40  ;;  %v7129_v53 = vpack.c.b16 %v12222_v41, %v12224_v6 }
  0xbd   :  { %v608_v41 = vshll.u32 %v7129_v53, 16 }
  0xbe   :  { %v1606_v7 = vpop.f32.mrf.mxu2  ;;  %v1111_v11 = vpop.f32.mrf.mxu0 }
  0xbf   :  { %v1775_v49 = vpop.f32.mrf.mxu3  ;;  %v1607_v15 = vadd.f32 %v1606_v7, %v1278_v42  ;;  %v1280_v54 = vpop.f32.mrf.mxu1  ;;  %v6413_v42 = vld [vmem:[%s12184_s1 + $0x1e0] sm:$0xff] }
  0xc0   :  { %v1281_v3 = vadd.f32 %v1280_v54, %v1111_v11  ;;  %3802 = vmatpush.bf16.msrb.mxu3 %v6413_v42  ;;  %v6333_v42 = vld [vmem:[%s12184_s1 + $0x160] sm:$0xff] }
  0xc1   :  { %v7115_v35 = vadd.f32 %v1775_v49, %v1607_v15  ;;  %1150 = vmatmul.bf16.gmra.mxu0 %v587_v39  ;;  %v6405_v49 = vld [vmem:[%s12184_s1 + $0x1a0] sm:$0xff]  ;;  %v600_v39 = vshll.u32 %v7121_v51, 16  ;;  %2361 = vmatpush.bf16.msrb.mxu1 %v6333_v42 }
  0xc2   :  { %1319 = vmatmul.bf16.gmra.mxu1 %v595_v16  ;;  %3633 = vmatpush.bf16.msrb.mxu2 %v6405_v49  ;;  %v604_v16 = vshrl.u32 %v7091_v14, 16  ;;  %v6325_v49 = vld [vmem:[%s12184_s1 + $0x120] sm:$0xff] }
  0xc3   :  { %1648 = vmatmul.bf16.gmra.mxu2 %v7051_v61  ;;  %v602_v47 = vrot.slane %v600_v39, 1  ;;  %2192 = vmatpush.bf16.msrb.mxu0 %v6325_v49 }
  0xc4   :  { %1817 = vmatmul.bf16.gmra.mxu3 %v7057_v55  ;;  %v596_v55 = vshrl.u32 %v7085_v57, 16 }
  0xc6   :  { %v1609_v7 = vpop.f32.mrf.mxu2  ;;  %v1113_v11 = vpop.f32.mrf.mxu0  ;;  %v598_v40 = vor.u32 %v596_v55, %v586_v13  ;;  %v12232_v13 = vunpack.c.l.b16 %v7152_v28 }
  0xc7   :  { %v1778_v61 = vpop.f32.mrf.mxu3  ;;  %v1610_v15 = vadd.f32 %v1609_v7, %v1281_v3  ;;  %v1282_v54 = vpop.f32.mrf.mxu1  ;;  %v606_v3 = vor.u32 %v604_v16, %v594_v2  ;;  %v610_v7 = vrot.slane %v608_v41, 1 }
  0xc8   :  { %v1283_v34 = vadd.f32 %v1282_v54, %v1113_v11  ;;  %v603_v54 = vsel %vm411_vm0, %v598_v40, %v602_v47 }
  0xc9   :  { %v7141_v6 = vadd.f32 %v1778_v61, %v1610_v15  ;;  %v7157_v61 = vld [vmem:[%s12185_s0 + $0xd8] sm:$0xff]  ;;  %v611_v16 = vsel %vm411_vm0, %v606_v3, %v610_v7 }
  0xca   :  { %12504 = vst [vmem:[#allocation2_spill] sm:$0xff] %v7157_v61  ;;  %v12231_v2 = vunpack.c.l.b16 %v7157_v61  ;;  %v12233_v5 = vunpack.c.h.b16 %v7157_v61 }
  0xcc   :  { %v7171_v40 = vpack.c.b16 %v12231_v2, %v12232_v13 }
  0xce   :  { %v1611_v15 = vpop.f32.mrf.mxu2  ;;  %v1116_v55 = vpop.f32.mrf.mxu0 }
  0xcf   :  { %v1780_v11 = vpop.f32.mrf.mxu3  ;;  %v1612_v41 = vadd.f32 %v1611_v15, %v1283_v34  ;;  %v1285_v39 = vpop.f32.mrf.mxu1  ;;  %v7179_v34 = vpack.c.b16 %v12233_v5, %v12234_v33  ;;  %v612_v15 = vshrl.u32 %v7121_v51, 16 }
  0xd0   :  { %v1286_v27 = vadd.f32 %v1285_v39, %v1116_v55  ;;  %v620_v39 = vshrl.u32 %v7129_v53, 16 }
  0xd1   :  { %v7165_v49 = vadd.f32 %v1780_v11, %v1612_v41  ;;  %1155 = vmatmul.bf16.gmra.mxu0 %v603_v54  ;;  %v616_v11 = vshll.u32 %v7171_v40, 16  ;;  %v614_v2 = vor.u32 %v612_v15, %v602_v47 }
  0xd2   :  { %1324 = vmatmul.bf16.gmra.mxu1 %v611_v16  ;;  %v622_v5 = vor.u32 %v620_v39, %v610_v7 }
  0xd3   :  { %1653 = vmatmul.bf16.gmra.mxu2 %v7085_v57  ;;  %v624_v57 = vshll.u32 %v7179_v34, 16  ;;  %v618_v13 = vrot.slane %v616_v11, 1 }
  0xd4   :  { %1822 = vmatmul.bf16.gmra.mxu3 %v7091_v14 }
  0xd5   :  { %v626_v33 = vrot.slane %v624_v57, 1 }
  0xd6   :  { %v1614_v42 = vpop.f32.mrf.mxu2  ;;  %v1118_v41 = vpop.f32.mrf.mxu0 }
  0xd7   :  { %v1783_v3 = vpop.f32.mrf.mxu3  ;;  %v1615_v54 = vadd.f32 %v1614_v42, %v1286_v27  ;;  %v1287_v55 = vpop.f32.mrf.mxu1  ;;  %v7195_v27 = vld [vmem:[%s12185_s0 + $0xe8] sm:$0xff] }
  0xd8   :  { %v1288_v14 = vadd.f32 %v1287_v55, %v1118_v41  ;;  %12506 = vst [vmem:[#allocation4_spill] sm:$0xff] %v7195_v27  ;;  %v619_v41 = vsel %vm411_vm0, %v614_v2, %v618_v13  ;;  %v12238_v47 = vunpack.c.l.b16 %v7195_v27  ;;  %v12242_v55 = vunpack.c.h.b16 %v7190_v1 }
  0xd9   :  { %v7185_v16 = vadd.f32 %v1783_v3, %v1615_v54  ;;  %v12239_v3 = vunpack.c.l.b16 %v7190_v1  ;;  %v627_v54 = vsel %vm411_vm0, %v622_v5, %v626_v33  ;;  %v12241_v39 = vunpack.c.h.b16 %v7195_v27 }
  0xdb   :  { %v7209_v2 = vpack.c.b16 %v12238_v47, %v12239_v3  ;;  %v7217_v5 = vpack.c.b16 %v12241_v39, %v12242_v55 }
  0xde   :  { %v1616_v42 = vpop.f32.mrf.mxu2  ;;  %v1121_v15 = vpop.f32.mrf.mxu0 }
  0xdf   :  { %v1785_v4 = vpop.f32.mrf.mxu3  ;;  %v1617_v7 = vadd.f32 %v1616_v42, %v1288_v14  ;;  %v1290_v11 = vpop.f32.mrf.mxu1  ;;  %v628_v42 = vshrl.u32 %v7171_v40, 16 }
  0xe0   :  { %v1291_v57 = vadd.f32 %v1290_v11, %v1121_v15 }
  0xe1   :  { %v7203_v30 = vadd.f32 %v1785_v4, %v1617_v7  ;;  %1160 = vmatmul.bf16.gmra.mxu0 %v619_v41  ;;  %v632_v41 = vshll.u32 %v7209_v2, 16  ;;  %v630_v3 = vor.u32 %v628_v42, %v618_v13 }
  0xe2   :  { %1329 = vmatmul.bf16.gmra.mxu1 %v627_v54  ;;  %v636_v54 = vshrl.u32 %v7179_v34, 16 }
  0xe3   :  { %1658 = vmatmul.bf16.gmra.mxu2 %v7121_v51  ;;  %v640_v51 = vshll.u32 %v7217_v5, 16  ;;  %v634_v0 = vrot.slane %v632_v41, 1 }
  0xe4   :  { %1827 = vmatmul.bf16.gmra.mxu3 %v7129_v53  ;;  %v638_v39 = vor.u32 %v636_v54, %v626_v33 }
  0xe5   :  { %v642_v55 = vrot.slane %v640_v51, 1 }
  0xe6   :  { %v1619_v4 = vpop.f32.mrf.mxu2  ;;  %v1123_v15 = vpop.f32.mrf.mxu0 }
  0xe7   :  { %v1788_v14 = vpop.f32.mrf.mxu3  ;;  %v1620_v7 = vadd.f32 %v1619_v4, %v1291_v57  ;;  %v1292_v11 = vpop.f32.mrf.mxu1  ;;  %v7233_v57 = vld [vmem:[%s12185_s0 + $0xf8] sm:$0xff] }
  0xe8   :  { %v1293_v53 = vadd.f32 %v1292_v11, %v1123_v15  ;;  %12508 = vst [vmem:[#allocation6_spill] sm:$0xff] %v7233_v57  ;;  %v635_v15 = vsel %vm411_vm0, %v630_v3, %v634_v0  ;;  %v12246_v13 = vunpack.c.l.b16 %v7233_v57  ;;  %v12250_v11 = vunpack.c.h.b16 %v7228_v25 }
  0xe9   :  { %v7223_v47 = vadd.f32 %v1788_v14, %v1620_v7  ;;  %v12247_v14 = vunpack.c.l.b16 %v7228_v25  ;;  %v643_v7 = vsel %vm411_vm0, %v638_v39, %v642_v55  ;;  %v12249_v54 = vunpack.c.h.b16 %v7233_v57 }
  0xeb   :  { %v7247_v3 = vpack.c.b16 %v12246_v13, %v12247_v14  ;;  %v7255_v39 = vpack.c.b16 %v12249_v54, %v12250_v11 }
  0xee   :  { %v1621_v4 = vpop.f32.mrf.mxu2  ;;  %v1126_v42 = vpop.f32.mrf.mxu0 }
  0xef   :  { %v1790_v29 = vpop.f32.mrf.mxu3  ;;  %v1622_v33 = vadd.f32 %v1621_v4, %v1293_v53  ;;  %v1295_v41 = vpop.f32.mrf.mxu1  ;;  %v644_v4 = vshrl.u32 %v7209_v2, 16 }
  0xf0   :  { %v1296_v51 = vadd.f32 %v1295_v41, %v1126_v42 }
  0xf1   :  { %v7241_v23 = vadd.f32 %v1790_v29, %v1622_v33  ;;  %1165 = vmatmul.bf16.gmra.mxu0 %v635_v15  ;;  %v648_v15 = vshll.u32 %v7247_v3, 16  ;;  %v646_v14 = vor.u32 %v644_v4, %v634_v0 }
  0xf2   :  { %1334 = vmatmul.bf16.gmra.mxu1 %v643_v7  ;;  %v652_v7 = vshrl.u32 %v7217_v5, 16 }
  0xf3   :  { %1663 = vmatmul.bf16.gmra.mxu2 %v7171_v40  ;;  %v656_v40 = vshll.u32 %v7255_v39, 16  ;;  %v650_v24 = vrot.slane %v648_v15, 1 }
  0xf4   :  { %1832 = vmatmul.bf16.gmra.mxu3 %v7179_v34  ;;  %v654_v54 = vor.u32 %v652_v7, %v642_v55 }
  0xf5   :  { %v658_v11 = vrot.slane %v656_v40, 1 }
  0xf6   :  { %v1624_v29 = vpop.f32.mrf.mxu2  ;;  %v1128_v42 = vpop.f32.mrf.mxu0 }
  0xf7   :  { %v1793_v53 = vpop.f32.mrf.mxu3  ;;  %v1625_v33 = vadd.f32 %v1624_v29, %v1296_v51  ;;  %v1297_v41 = vpop.f32.mrf.mxu1  ;;  %v7271_v51 = vld [vmem:[%s12185_s0 + $0x108] sm:$0xff] }
  0xf8   :  { %v1298_v34 = vadd.f32 %v1297_v41, %v1128_v42  ;;  %12511 = vst [vmem:[#allocation9_spill] sm:$0xff] %v7271_v51  ;;  %v651_v42 = vsel %vm411_vm0, %v646_v14, %v650_v24  ;;  %v12257_v0 = vunpack.c.l.b16 %v7271_v51  ;;  %v12258_v41 = vunpack.c.h.b16 %v7266_v22 }
  0xf9   :  { %v7261_v13 = vadd.f32 %v1793_v53, %v1625_v33  ;;  %v12259_v53 = vunpack.c.l.b16 %v7266_v22  ;;  %v659_v33 = vsel %vm411_vm0, %v654_v54, %v658_v11  ;;  %v12256_v7 = vunpack.c.h.b16 %v7271_v51  ;;  %v7316_v22 = vld [vmem:[%s12185_s0 + $0x110] sm:$0xff] }
  0xfa   :  { %12514 = vst [vmem:[#allocation12_spill] sm:$0xff] %v7316_v22 }
  0xfb   :  { %12509 = vst [vmem:[#allocation7_spill] sm:$0xff] %v7261_v13  ;;  %v7285_v14 = vpack.c.b16 %v12257_v0, %v12259_v53  ;;  %v7293_v54 = vpack.c.b16 %v12256_v7, %v12258_v41 }
  0xfd   :  { %v672_v7 = vshll.u32 %v7293_v54, 16 }
  0xfe   :  { %v1626_v29 = vpop.f32.mrf.mxu2  ;;  %v1131_v4 = vpop.f32.mrf.mxu0 }
  0xff   :  { %v1795_v57 = vpop.f32.mrf.mxu3  ;;  %v1627_v55 = vadd.f32 %v1626_v29, %v1298_v34  ;;  %v1300_v15 = vpop.f32.mrf.mxu1  ;;  %v6412_v34 = vld [vmem:[%s12184_s1 + $0x1d8] sm:$0xff] }
 0x100   :  { %v1301_v40 = vadd.f32 %v1300_v15, %v1131_v4  ;;  %3803 = vmatpush.bf16.msrb.mxu3 %v6412_v34  ;;  %v6332_v34 = vld [vmem:[%s12184_s1 + $0x158] sm:$0xff] }
 0x101   :  { %v7279_v25 = vadd.f32 %v1795_v57, %v1627_v55  ;;  %1170 = vmatmul.bf16.gmra.mxu0 %v651_v42  ;;  %v6404_v57 = vld [vmem:[%s12184_s1 + $0x198] sm:$0xff]  ;;  %v664_v42 = vshll.u32 %v7285_v14, 16  ;;  %2362 = vmatpush.bf16.msrb.mxu1 %v6332_v34 }
 0x102   :  { %1339 = vmatmul.bf16.gmra.mxu1 %v659_v33  ;;  %3634 = vmatpush.bf16.msrb.mxu2 %v6404_v57  ;;  %v668_v33 = vshrl.u32 %v7255_v39, 16  ;;  %v6324_v57 = vld [vmem:[%s12184_s1 + $0x118] sm:$0xff] }
 0x103   :  { %12512 = vst [vmem:[#allocation10_spill] sm:$0xff] %v7279_v25  ;;  %1668 = vmatmul.bf16.gmra.mxu2 %v7209_v2  ;;  %v666_v51 = vrot.slane %v664_v42, 1  ;;  %2193 = vmatpush.bf16.msrb.mxu0 %v6324_v57 }
 0x104   :  { %1837 = vmatmul.bf16.gmra.mxu3 %v7217_v5  ;;  %v660_v5 = vshrl.u32 %v7247_v3, 16 }
 0x106   :  { %v1629_v29 = vpop.f32.mrf.mxu2  ;;  %v1133_v4 = vpop.f32.mrf.mxu0  ;;  %v662_v53 = vor.u32 %v660_v5, %v650_v24  ;;  %v12267_v24 = vunpack.c.l.b16 %v7316_v22 }
 0x107   :  { %v1798_v2 = vpop.f32.mrf.mxu3  ;;  %v1630_v55 = vadd.f32 %v1629_v29, %v1301_v40  ;;  %v1302_v15 = vpop.f32.mrf.mxu1  ;;  %v670_v40 = vor.u32 %v668_v33, %v658_v11  ;;  %v674_v29 = vrot.slane %v672_v7, 1 }
 0x108   :  { %v1303_v0 = vadd.f32 %v1302_v15, %v1133_v4  ;;  %v667_v15 = vsel %vm411_vm0, %v662_v53, %v666_v51 }
 0x109   :  { %v7305_v41 = vadd.f32 %v1798_v2, %v1630_v55  ;;  %v7321_v2 = vld [vmem:[%s12185_s0 + $0x118] sm:$0xff]  ;;  %v675_v33 = vsel %vm411_vm0, %v670_v40, %v674_v29 }
 0x10a   :  { %12515 = vst [vmem:[#allocation13_spill] sm:$0xff] %v7321_v2  ;;  %v12266_v11 = vunpack.c.l.b16 %v7321_v2  ;;  %v12268_v27 = vunpack.c.h.b16 %v7321_v2  ;;  %v7354_v2 = vld [vmem:[%s12185_s0 + $0x120] sm:$0xff] }
 0x10b   :  { %12513 = vst [vmem:[#allocation11_spill] sm:$0xff] %v7305_v41  ;;  %v12269_v41 = vunpack.c.h.b16 %v7316_v22 }
 0x10c   :  { %v7335_v53 = vpack.c.b16 %v12266_v11, %v12267_v24  ;;  %12518 = vst [vmem:[#allocation16_spill] sm:$0xff] %v7354_v2 }
 0x10e   :  { %v1631_v55 = vpop.f32.mrf.mxu2  ;;  %v1136_v5 = vpop.f32.mrf.mxu0 }
 0x10f   :  { %v1800_v4 = vpop.f32.mrf.mxu3  ;;  %v1632_v7 = vadd.f32 %v1631_v55, %v1303_v0  ;;  %v1305_v42 = vpop.f32.mrf.mxu1  ;;  %v7343_v0 = vpack.c.b16 %v12268_v27, %v12269_v41  ;;  %v676_v55 = vshrl.u32 %v7285_v14, 16 }
 0x110   :  { %v1306_v25 = vadd.f32 %v1305_v42, %v1136_v5  ;;  %v684_v42 = vshrl.u32 %v7293_v54, 16 }
 0x111   :  { %v7329_v57 = vadd.f32 %v1800_v4, %v1632_v7  ;;  %1175 = vmatmul.bf16.gmra.mxu0 %v667_v15  ;;  %v680_v4 = vshll.u32 %v7335_v53, 16  ;;  %v678_v11 = vor.u32 %v676_v55, %v666_v51 }
 0x112   :  { %1344 = vmatmul.bf16.gmra.mxu1 %v675_v33  ;;  %v686_v27 = vor.u32 %v684_v42, %v674_v29 }
 0x113   :  { %12516 = vst [vmem:[#allocation14_spill] sm:$0xff] %v7329_v57  ;;  %1673 = vmatmul.bf16.gmra.mxu2 %v7247_v3  ;;  %v688_v3 = vshll.u32 %v7343_v0, 16  ;;  %v682_v24 = vrot.slane %v680_v4, 1 }
 0x114   :  { %1842 = vmatmul.bf16.gmra.mxu3 %v7255_v39 }
 0x115   :  { %v690_v41 = vrot.slane %v688_v3, 1 }
 0x116   :  { %v1634_v34 = vpop.f32.mrf.mxu2  ;;  %v1138_v7 = vpop.f32.mrf.mxu0 }
 0x117   :  { %v1803_v40 = vpop.f32.mrf.mxu3  ;;  %v1635_v15 = vadd.f32 %v1634_v34, %v1306_v25  ;;  %v1307_v5 = vpop.f32.mrf.mxu1  ;;  %v7359_v25 = vld [vmem:[%s12185_s0 + $0x128] sm:$0xff] }
 0x118   :  { %v1308_v39 = vadd.f32 %v1307_v5, %v1138_v7  ;;  %12519 = vst [vmem:[#allocation17_spill] sm:$0xff] %v7359_v25  ;;  %v683_v7 = vsel %vm411_vm0, %v678_v11, %v682_v24  ;;  %v12274_v51 = vunpack.c.l.b16 %v7359_v25  ;;  %v12279_v5 = vunpack.c.h.b16 %v7354_v2 }
 0x119   :  { %v7349_v33 = vadd.f32 %v1803_v40, %v1635_v15  ;;  %v12275_v40 = vunpack.c.l.b16 %v7354_v2  ;;  %v691_v15 = vsel %vm411_vm0, %v686_v27, %v690_v41  ;;  %v12278_v42 = vunpack.c.h.b16 %v7359_v25  ;;  %v7392_v2 = vld [vmem:[%s12185_s0 + $0x130] sm:$0xff] }
 0x11a   :  { %12522 = vst [vmem:[#allocation20_spill] sm:$0xff] %v7392_v2 }
 0x11b   :  { %12517 = vst [vmem:[#allocation15_spill] sm:$0xff] %v7349_v33  ;;  %v7373_v11 = vpack.c.b16 %v12274_v51, %v12275_v40  ;;  %v7381_v27 = vpack.c.b16 %v12278_v42, %v12279_v5 }
 0x11e   :  { %v1636_v34 = vpop.f32.mrf.mxu2  ;;  %v1141_v55 = vpop.f32.mrf.mxu0 }
 0x11f   :  { %v1805_v22 = vpop.f32.mrf.mxu3  ;;  %v1637_v29 = vadd.f32 %v1636_v34, %v1308_v39  ;;  %v1310_v4 = vpop.f32.mrf.mxu1  ;;  %v692_v34 = vshrl.u32 %v7335_v53, 16 }
 0x120   :  { %v1311_v3 = vadd.f32 %v1310_v4, %v1141_v55 }
 0x121   :  { %v7367_v33 = vadd.f32 %v1805_v22, %v1637_v29  ;;  %1180 = vmatmul.bf16.gmra.mxu0 %v683_v7  ;;  %v696_v7 = vshll.u32 %v7373_v11, 16  ;;  %v694_v40 = vor.u32 %v692_v34, %v682_v24 }
 0x122   :  { %1349 = vmatmul.bf16.gmra.mxu1 %v691_v15  ;;  %v700_v15 = vshrl.u32 %v7343_v0, 16 }
 0x123   :  { %12520 = vst [vmem:[#allocation18_spill] sm:$0xff] %v7367_v33  ;;  %1678 = vmatmul.bf16.gmra.mxu2 %v7285_v14  ;;  %v704_v14 = vshll.u32 %v7381_v27, 16  ;;  %v698_v25 = vrot.slane %v696_v7, 1 }
 0x124   :  { %1847 = vmatmul.bf16.gmra.mxu3 %v7293_v54  ;;  %v702_v42 = vor.u32 %v700_v15, %v690_v41 }
 0x125   :  { %v706_v5 = vrot.slane %v704_v14, 1 }
 0x126   :  { %v1639_v22 = vpop.f32.mrf.mxu2  ;;  %v1143_v55 = vpop.f32.mrf.mxu0 }
 0x127   :  { %v1808_v39 = vpop.f32.mrf.mxu3  ;;  %v1640_v29 = vadd.f32 %v1639_v22, %v1311_v3  ;;  %v1312_v4 = vpop.f32.mrf.mxu1  ;;  %v7397_v3 = vld [vmem:[%s12185_s0 + $0x138] sm:$0xff] }
 0x128   :  { %v1313_v54 = vadd.f32 %v1312_v4, %v1143_v55  ;;  %12523 = vst [vmem:[#allocation21_spill] sm:$0xff] %v7397_v3  ;;  %v699_v55 = vsel %vm411_vm0, %v694_v40, %v698_v25  ;;  %v12282_v24 = vunpack.c.l.b16 %v7397_v3  ;;  %v12287_v4 = vunpack.c.h.b16 %v7392_v2 }
 0x129   :  { %v7387_v51 = vadd.f32 %v1808_v39, %v1640_v29  ;;  %v12283_v39 = vunpack.c.l.b16 %v7392_v2  ;;  %v707_v29 = vsel %vm411_vm0, %v702_v42, %v706_v5  ;;  %v12286_v15 = vunpack.c.h.b16 %v7397_v3  ;;  %v7430_v2 = vld [vmem:[%s12185_s0 + $0x140] sm:$0xff] }
 0x12a   :  { %12526 = vst [vmem:[#allocation24_spill] sm:$0xff] %v7430_v2 }
 0x12b   :  { %12521 = vst [vmem:[#allocation19_spill] sm:$0xff] %v7387_v51  ;;  %v7411_v40 = vpack.c.b16 %v12282_v24, %v12283_v39  ;;  %v7419_v42 = vpack.c.b16 %v12286_v15, %v12287_v4 }
 0x12e   :  { %v1641_v22 = vpop.f32.mrf.mxu2  ;;  %v1146_v34 = vpop.f32.mrf.mxu0 }
 0x12f   :  { %v1810_v33 = vpop.f32.mrf.mxu3  ;;  %v1642_v41 = vadd.f32 %v1641_v22, %v1313_v54  ;;  %v1315_v7 = vpop.f32.mrf.mxu1  ;;  %v708_v22 = vshrl.u32 %v7373_v11, 16 }
 0x130   :  { %v1316_v14 = vadd.f32 %v1315_v7, %v1146_v34 }
 0x131   :  { %v7405_v51 = vadd.f32 %v1810_v33, %v1642_v41  ;;  %1185 = vmatmul.bf16.gmra.mxu0 %v699_v55  ;;  %v712_v55 = vshll.u32 %v7411_v40, 16  ;;  %v710_v39 = vor.u32 %v708_v22, %v698_v25 }
 0x132   :  { %1354 = vmatmul.bf16.gmra.mxu1 %v707_v29  ;;  %v716_v29 = vshrl.u32 %v7381_v27, 16 }
 0x133   :  { %12524 = vst [vmem:[#allocation22_spill] sm:$0xff] %v7405_v51  ;;  %1683 = vmatmul.bf16.gmra.mxu2 %v7335_v53  ;;  %v720_v53 = vshll.u32 %v7419_v42, 16  ;;  %v714_v3 = vrot.slane %v712_v55, 1 }
 0x134   :  { %1852 = vmatmul.bf16.gmra.mxu3 %v7343_v0  ;;  %v718_v15 = vor.u32 %v716_v29, %v706_v5 }
 0x135   :  { %v722_v4 = vrot.slane %v720_v53, 1 }
 0x136   :  { %v1644_v33 = vpop.f32.mrf.mxu2  ;;  %v1148_v34 = vpop.f32.mrf.mxu0 }
 0x137   :  { %v1813_v54 = vpop.f32.mrf.mxu3  ;;  %v1645_v41 = vadd.f32 %v1644_v33, %v1316_v14  ;;  %v1317_v7 = vpop.f32.mrf.mxu1  ;;  %v7435_v14 = vld [vmem:[%s12185_s0 + $0x148] sm:$0xff] }
 0x138   :  { %v1318_v0 = vadd.f32 %v1317_v7, %v1148_v34  ;;  %12527 = vst [vmem:[#allocation25_spill] sm:$0xff] %v7435_v14  ;;  %v715_v34 = vsel %vm411_vm0, %v710_v39, %v714_v3  ;;  %v12291_v25 = vunpack.c.l.b16 %v7435_v14  ;;  %v12292_v7 = vunpack.c.h.b16 %v7430_v2 }
 0x139   :  { %v7425_v24 = vadd.f32 %v1813_v54, %v1645_v41  ;;  %v12293_v54 = vunpack.c.l.b16 %v7430_v2  ;;  %v723_v41 = vsel %vm411_vm0, %v718_v15, %v722_v4  ;;  %v12290_v29 = vunpack.c.h.b16 %v7435_v14  ;;  %v7480_v2 = vld [vmem:[%s12185_s0 + $0x150] sm:$0xff] }
 0x13a   :  { %12530 = vst [vmem:[#allocation28_spill] sm:$0xff] %v7480_v2 }
 0x13b   :  { %12525 = vst [vmem:[#allocation23_spill] sm:$0xff] %v7425_v24  ;;  %v7449_v39 = vpack.c.b16 %v12291_v25, %v12293_v54  ;;  %v7457_v15 = vpack.c.b16 %v12290_v29, %v12292_v7 }
 0x13d   :  { %v736_v29 = vshll.u32 %v7457_v15, 16 }
 0x13e   :  { %v1646_v33 = vpop.f32.mrf.mxu2  ;;  %v1151_v22 = vpop.f32.mrf.mxu0 }
 0x13f   :  { %v1815_v51 = vpop.f32.mrf.mxu3  ;;  %v1647_v5 = vadd.f32 %v1646_v33, %v1318_v0  ;;  %v1320_v55 = vpop.f32.mrf.mxu1  ;;  %v6411_v0 = vld [vmem:[%s12184_s1 + $0x1d0] sm:$0xff] }
 0x140   :  { %v1321_v53 = vadd.f32 %v1320_v55, %v1151_v22  ;;  %3804 = vmatpush.bf16.msrb.mxu3 %v6411_v0  ;;  %v6331_v0 = vld [vmem:[%s12184_s1 + $0x150] sm:$0xff] }
 0x141   :  { %v7443_v24 = vadd.f32 %v1815_v51, %v1647_v5  ;;  %1190 = vmatmul.bf16.gmra.mxu0 %v715_v34  ;;  %v6403_v51 = vld [vmem:[%s12184_s1 + $0x190] sm:$0xff]  ;;  %v728_v34 = vshll.u32 %v7449_v39, 16  ;;  %2363 = vmatpush.bf16.msrb.mxu1 %v6331_v0 }
 0x142   :  { %1359 = vmatmul.bf16.gmra.mxu1 %v723_v41  ;;  %3635 = vmatpush.bf16.msrb.mxu2 %v6403_v51  ;;  %v732_v41 = vshrl.u32 %v7419_v42, 16  ;;  %v6323_v51 = vld [vmem:[%s12184_s1 + $0x110] sm:$0xff] }
 0x143   :  { %12528 = vst [vmem:[#allocation26_spill] sm:$0xff] %v7443_v24  ;;  %1688 = vmatmul.bf16.gmra.mxu2 %v7373_v11  ;;  %v730_v14 = vrot.slane %v728_v34, 1  ;;  %2194 = vmatpush.bf16.msrb.mxu0 %v6323_v51 }
 0x144   :  { %1857 = vmatmul.bf16.gmra.mxu3 %v7381_v27  ;;  %v724_v27 = vshrl.u32 %v7411_v40, 16 }
 0x146   :  { %v1649_v33 = vpop.f32.mrf.mxu2  ;;  %v1153_v22 = vpop.f32.mrf.mxu0  ;;  %v726_v54 = vor.u32 %v724_v27, %v714_v3  ;;  %v12299_v3 = vunpack.c.l.b16 %v7480_v2 }
 0x147   :  { %v1818_v11 = vpop.f32.mrf.mxu3  ;;  %v1650_v5 = vadd.f32 %v1649_v33, %v1321_v53  ;;  %v1322_v55 = vpop.f32.mrf.mxu1  ;;  %v734_v53 = vor.u32 %v732_v41, %v722_v4  ;;  %v738_v33 = vrot.slane %v736_v29, 1 }
 0x148   :  { %v1323_v25 = vadd.f32 %v1322_v55, %v1153_v22  ;;  %v731_v55 = vsel %vm411_vm0, %v726_v54, %v730_v14 }
 0x149   :  { %v7469_v7 = vadd.f32 %v1818_v11, %v1650_v5  ;;  %v7485_v11 = vld [vmem:[%s12185_s0 + $0x158] sm:$0xff]  ;;  %v739_v41 = vsel %vm411_vm0, %v734_v53, %v738_v33 }
 0x14a   :  { %12531 = vst [vmem:[#allocation29_spill] sm:$0xff] %v7485_v11  ;;  %v12298_v4 = vunpack.c.l.b16 %v7485_v11  ;;  %v12300_v24 = vunpack.c.h.b16 %v7485_v11  ;;  %v7518_v11 = vld [vmem:[%s12185_s0 + $0x160] sm:$0xff] }
 0x14b   :  { %12529 = vst [vmem:[#allocation27_spill] sm:$0xff] %v7469_v7  ;;  %v12301_v7 = vunpack.c.h.b16 %v7480_v2 }
 0x14c   :  { %v7499_v54 = vpack.c.b16 %v12298_v4, %v12299_v3  ;;  %12534 = vst [vmem:[#allocation32_spill] sm:$0xff] %v7518_v11 }
 0x14e   :  { %v1651_v5 = vpop.f32.mrf.mxu2  ;;  %v1156_v27 = vpop.f32.mrf.mxu0 }
 0x14f   :  { %v1820_v22 = vpop.f32.mrf.mxu3  ;;  %v1652_v29 = vadd.f32 %v1651_v5, %v1323_v25  ;;  %v1325_v34 = vpop.f32.mrf.mxu1  ;;  %v7507_v25 = vpack.c.b16 %v12300_v24, %v12301_v7  ;;  %v740_v5 = vshrl.u32 %v7449_v39, 16 }
 0x150   :  { %v1326_v57 = vadd.f32 %v1325_v34, %v1156_v27  ;;  %v748_v34 = vshrl.u32 %v7457_v15, 16 }
 0x151   :  { %v7493_v51 = vadd.f32 %v1820_v22, %v1652_v29  ;;  %1195 = vmatmul.bf16.gmra.mxu0 %v731_v55  ;;  %v744_v22 = vshll.u32 %v7499_v54, 16  ;;  %v742_v4 = vor.u32 %v740_v5, %v730_v14 }
 0x152   :  { %1364 = vmatmul.bf16.gmra.mxu1 %v739_v41  ;;  %v750_v24 = vor.u32 %v748_v34, %v738_v33 }
 0x153   :  { %12532 = vst [vmem:[#allocation30_spill] sm:$0xff] %v7493_v51  ;;  %1693 = vmatmul.bf16.gmra.mxu2 %v7411_v40  ;;  %v752_v40 = vshll.u32 %v7507_v25, 16  ;;  %v746_v3 = vrot.slane %v744_v22, 1 }
 0x154   :  { %1862 = vmatmul.bf16.gmra.mxu3 %v7419_v42 }
 0x155   :  { %v754_v7 = vrot.slane %v752_v40, 1 }
 0x156   :  { %v1654_v0 = vpop.f32.mrf.mxu2  ;;  %v1158_v29 = vpop.f32.mrf.mxu0 }
 0x157   :  { %v1823_v53 = vpop.f32.mrf.mxu3  ;;  %v1655_v55 = vadd.f32 %v1654_v0, %v1326_v57  ;;  %v1327_v27 = vpop.f32.mrf.mxu1  ;;  %v7523_v57 = vld [vmem:[%s12185_s0 + $0x168] sm:$0xff] }
 0x158   :  { %v1328_v42 = vadd.f32 %v1327_v27, %v1158_v29  ;;  %12535 = vst [vmem:[#allocation33_spill] sm:$0xff] %v7523_v57  ;;  %v747_v29 = vsel %vm411_vm0, %v742_v4, %v746_v3  ;;  %v12306_v14 = vunpack.c.l.b16 %v7523_v57  ;;  %v12311_v27 = vunpack.c.h.b16 %v7518_v11 }
 0x159   :  { %v7513_v41 = vadd.f32 %v1823_v53, %v1655_v55  ;;  %v12307_v53 = vunpack.c.l.b16 %v7518_v11  ;;  %v755_v55 = vsel %vm411_vm0, %v750_v24, %v754_v7  ;;  %v12310_v34 = vunpack.c.h.b16 %v7523_v57  ;;  %v7556_v11 = vld [vmem:[%s12185_s0 + $0x170] sm:$0xff] }
 0x15a   :  { %12538 = vst [vmem:[#allocation36_spill] sm:$0xff] %v7556_v11 }
 0x15b   :  { %12533 = vst [vmem:[#allocation31_spill] sm:$0xff] %v7513_v41  ;;  %v7537_v4 = vpack.c.b16 %v12306_v14, %v12307_v53  ;;  %v7545_v24 = vpack.c.b16 %v12310_v34, %v12311_v27 }
 0x15e   :  { %v1656_v0 = vpop.f32.mrf.mxu2  ;;  %v1161_v5 = vpop.f32.mrf.mxu0 }
 0x15f   :  { %v1825_v2 = vpop.f32.mrf.mxu3  ;;  %v1657_v33 = vadd.f32 %v1656_v0, %v1328_v42  ;;  %v1330_v22 = vpop.f32.mrf.mxu1  ;;  %v756_v0 = vshrl.u32 %v7499_v54, 16 }
 0x160   :  { %v1331_v40 = vadd.f32 %v1330_v22, %v1161_v5 }
 0x161   :  { %v7531_v41 = vadd.f32 %v1825_v2, %v1657_v33  ;;  %1200 = vmatmul.bf16.gmra.mxu0 %v747_v29  ;;  %v760_v29 = vshll.u32 %v7537_v4, 16  ;;  %v758_v53 = vor.u32 %v756_v0, %v746_v3 }
 0x162   :  { %1369 = vmatmul.bf16.gmra.mxu1 %v755_v55  ;;  %v764_v55 = vshrl.u32 %v7507_v25, 16 }
 0x163   :  { %12536 = vst [vmem:[#allocation34_spill] sm:$0xff] %v7531_v41  ;;  %1698 = vmatmul.bf16.gmra.mxu2 %v7449_v39  ;;  %v768_v39 = vshll.u32 %v7545_v24, 16  ;;  %v762_v57 = vrot.slane %v760_v29, 1 }
 0x164   :  { %1867 = vmatmul.bf16.gmra.mxu3 %v7457_v15  ;;  %v766_v34 = vor.u32 %v764_v55, %v754_v7 }
 0x165   :  { %v770_v27 = vrot.slane %v768_v39, 1 }
 0x166   :  { %v1659_v2 = vpop.f32.mrf.mxu2  ;;  %v1163_v5 = vpop.f32.mrf.mxu0 }
 0x167   :  { %v1828_v42 = vpop.f32.mrf.mxu3  ;;  %v1660_v33 = vadd.f32 %v1659_v2, %v1331_v40  ;;  %v1332_v22 = vpop.f32.mrf.mxu1  ;;  %v7561_v40 = vld [vmem:[%s12185_s0 + $0x178] sm:$0xff] }
 0x168   :  { %v1333_v15 = vadd.f32 %v1332_v22, %v1163_v5  ;;  %12539 = vst [vmem:[#allocation37_spill] sm:$0xff] %v7561_v40  ;;  %v763_v5 = vsel %vm411_vm0, %v758_v53, %v762_v57  ;;  %v12314_v3 = vunpack.c.l.b16 %v7561_v40  ;;  %v12319_v22 = vunpack.c.h.b16 %v7556_v11 }
 0x169   :  { %v7551_v14 = vadd.f32 %v1828_v42, %v1660_v33  ;;  %v12315_v42 = vunpack.c.l.b16 %v7556_v11  ;;  %v771_v33 = vsel %vm411_vm0, %v766_v34, %v770_v27  ;;  %v12318_v55 = vunpack.c.h.b16 %v7561_v40  ;;  %v7594_v11 = vld [vmem:[%s12185_s0 + $0x180] sm:$0xff] }
 0x16a   :  { %12542 = vst [vmem:[#allocation40_spill] sm:$0xff] %v7594_v11 }
 0x16b   :  { %12537 = vst [vmem:[#allocation35_spill] sm:$0xff] %v7551_v14  ;;  %v7575_v53 = vpack.c.b16 %v12314_v3, %v12315_v42  ;;  %v7583_v34 = vpack.c.b16 %v12318_v55, %v12319_v22 }
 0x16e   :  { %v1661_v2 = vpop.f32.mrf.mxu2  ;;  %v1166_v0 = vpop.f32.mrf.mxu0 }
 0x16f   :  { %v1830_v41 = vpop.f32.mrf.mxu3  ;;  %v1662_v7 = vadd.f32 %v1661_v2, %v1333_v15  ;;  %v1335_v29 = vpop.f32.mrf.mxu1  ;;  %v772_v2 = vshrl.u32 %v7537_v4, 16 }
 0x170   :  { %v1336_v39 = vadd.f32 %v1335_v29, %v1166_v0 }
 0x171   :  { %v7569_v14 = vadd.f32 %v1830_v41, %v1662_v7  ;;  %1205 = vmatmul.bf16.gmra.mxu0 %v763_v5  ;;  %v776_v5 = vshll.u32 %v7575_v53, 16  ;;  %v774_v42 = vor.u32 %v772_v2, %v762_v57 }
 0x172   :  { %1374 = vmatmul.bf16.gmra.mxu1 %v771_v33  ;;  %v780_v33 = vshrl.u32 %v7545_v24, 16 }
 0x173   :  { %12540 = vst [vmem:[#allocation38_spill] sm:$0xff] %v7569_v14  ;;  %1703 = vmatmul.bf16.gmra.mxu2 %v7499_v54  ;;  %v784_v54 = vshll.u32 %v7583_v34, 16  ;;  %v778_v40 = vrot.slane %v776_v5, 1 }
 0x174   :  { %1872 = vmatmul.bf16.gmra.mxu3 %v7507_v25  ;;  %v782_v55 = vor.u32 %v780_v33, %v770_v27 }
 0x175   :  { %v786_v22 = vrot.slane %v784_v54, 1 }
 0x176   :  { %v1664_v41 = vpop.f32.mrf.mxu2  ;;  %v1168_v0 = vpop.f32.mrf.mxu0 }
 0x177   :  { %v1833_v15 = vpop.f32.mrf.mxu3  ;;  %v1665_v7 = vadd.f32 %v1664_v41, %v1336_v39  ;;  %v1337_v29 = vpop.f32.mrf.mxu1  ;;  %v7599_v39 = vld [vmem:[%s12185_s0 + $0x188] sm:$0xff] }
 0x178   :  { %v1338_v25 = vadd.f32 %v1337_v29, %v1168_v0  ;;  %12543 = vst [vmem:[#allocation41_spill] sm:$0xff] %v7599_v39  ;;  %v779_v0 = vsel %vm411_vm0, %v774_v42, %v778_v40  ;;  %v12323_v57 = vunpack.c.l.b16 %v7599_v39  ;;  %v12324_v29 = vunpack.c.h.b16 %v7594_v11 }
 0x179   :  { %v7589_v3 = vadd.f32 %v1833_v15, %v1665_v7  ;;  %v12325_v15 = vunpack.c.l.b16 %v7594_v11  ;;  %v787_v7 = vsel %vm411_vm0, %v782_v55, %v786_v22  ;;  %v12322_v33 = vunpack.c.h.b16 %v7599_v39  ;;  %v7644_v11 = vld [vmem:[%s12185_s0 + $0x190] sm:$0xff] }
 0x17a   :  { %12546 = vst [vmem:[#allocation44_spill] sm:$0xff] %v7644_v11 }
 0x17b   :  { %12541 = vst [vmem:[#allocation39_spill] sm:$0xff] %v7589_v3  ;;  %v7613_v42 = vpack.c.b16 %v12323_v57, %v12325_v15  ;;  %v7621_v55 = vpack.c.b16 %v12322_v33, %v12324_v29 }
 0x17d   :  { %v800_v33 = vshll.u32 %v7621_v55, 16 }
 0x17e   :  { %v1666_v41 = vpop.f32.mrf.mxu2  ;;  %v1171_v2 = vpop.f32.mrf.mxu0 }
 0x17f   :  { %v1835_v14 = vpop.f32.mrf.mxu3  ;;  %v1667_v27 = vadd.f32 %v1666_v41, %v1338_v25  ;;  %v1340_v5 = vpop.f32.mrf.mxu1  ;;  %v6410_v25 = vld [vmem:[%s12184_s1 + $0x1c8] sm:$0xff] }
 0x180   :  { %v1341_v54 = vadd.f32 %v1340_v5, %v1171_v2  ;;  %3805 = vmatpush.bf16.msrb.mxu3 %v6410_v25  ;;  %v6330_v25 = vld [vmem:[%s12184_s1 + $0x148] sm:$0xff] }
 0x181   :  { %v7607_v3 = vadd.f32 %v1835_v14, %v1667_v27  ;;  %1210 = vmatmul.bf16.gmra.mxu0 %v779_v0  ;;  %v6402_v14 = vld [vmem:[%s12184_s1 + $0x188] sm:$0xff]  ;;  %v792_v0 = vshll.u32 %v7613_v42, 16  ;;  %2364 = vmatpush.bf16.msrb.mxu1 %v6330_v25 }
 0x182   :  { %1379 = vmatmul.bf16.gmra.mxu1 %v787_v7  ;;  %3636 = vmatpush.bf16.msrb.mxu2 %v6402_v14  ;;  %v796_v7 = vshrl.u32 %v7583_v34, 16  ;;  %v6322_v14 = vld [vmem:[%s12184_s1 + $0x108] sm:$0xff] }
 0x183   :  { %12544 = vst [vmem:[#allocation42_spill] sm:$0xff] %v7607_v3  ;;  %1708 = vmatmul.bf16.gmra.mxu2 %v7537_v4  ;;  %v794_v39 = vrot.slane %v792_v0, 1  ;;  %2195 = vmatpush.bf16.msrb.mxu0 %v6322_v14 }
 0x184   :  { %1877 = vmatmul.bf16.gmra.mxu3 %v7545_v24  ;;  %v788_v24 = vshrl.u32 %v7575_v53, 16 }
 0x186   :  { %v1669_v41 = vpop.f32.mrf.mxu2  ;;  %v1173_v2 = vpop.f32.mrf.mxu0  ;;  %v790_v15 = vor.u32 %v788_v24, %v778_v40  ;;  %v12331_v40 = vunpack.c.l.b16 %v7644_v11 }
 0x187   :  { %v1838_v4 = vpop.f32.mrf.mxu3  ;;  %v1670_v27 = vadd.f32 %v1669_v41, %v1341_v54  ;;  %v1342_v5 = vpop.f32.mrf.mxu1  ;;  %v798_v54 = vor.u32 %v796_v7, %v786_v22  ;;  %v802_v41 = vrot.slane %v800_v33, 1 }
 0x188   :  { %v1343_v57 = vadd.f32 %v1342_v5, %v1173_v2  ;;  %v795_v5 = vsel %vm411_vm0, %v790_v15, %v794_v39 }
 0x189   :  { %v7633_v29 = vadd.f32 %v1838_v4, %v1670_v27  ;;  %v7649_v4 = vld [vmem:[%s12185_s0 + $0x198] sm:$0xff]  ;;  %v803_v7 = vsel %vm411_vm0, %v798_v54, %v802_v41 }
 0x18a   :  { %12547 = vst [vmem:[#allocation45_spill] sm:$0xff] %v7649_v4  ;;  %v12330_v22 = vunpack.c.l.b16 %v7649_v4  ;;  %v12332_v3 = vunpack.c.h.b16 %v7649_v4  ;;  %v7682_v4 = vld [vmem:[%s12185_s0 + $0x1a0] sm:$0xff] }
 0x18b   :  { %12545 = vst [vmem:[#allocation43_spill] sm:$0xff] %v7633_v29  ;;  %v12333_v29 = vunpack.c.h.b16 %v7644_v11 }
 0x18c   :  { %v7663_v15 = vpack.c.b16 %v12330_v22, %v12331_v40  ;;  %12550 = vst [vmem:[#allocation48_spill] sm:$0xff] %v7682_v4 }
 0x18e   :  { %v1671_v27 = vpop.f32.mrf.mxu2  ;;  %v1176_v24 = vpop.f32.mrf.mxu0 }
 0x18f   :  { %v1840_v2 = vpop.f32.mrf.mxu3  ;;  %v1672_v33 = vadd.f32 %v1671_v27, %v1343_v57  ;;  %v1345_v0 = vpop.f32.mrf.mxu1  ;;  %v7671_v57 = vpack.c.b16 %v12332_v3, %v12333_v29  ;;  %v804_v27 = vshrl.u32 %v7613_v42, 16 }
 0x190   :  { %v1346_v51 = vadd.f32 %v1345_v0, %v1176_v24  ;;  %v812_v0 = vshrl.u32 %v7621_v55, 16 }
 0x191   :  { %v7657_v14 = vadd.f32 %v1840_v2, %v1672_v33  ;;  %1215 = vmatmul.bf16.gmra.mxu0 %v795_v5  ;;  %v808_v2 = vshll.u32 %v7663_v15, 16  ;;  %v806_v22 = vor.u32 %v804_v27, %v794_v39 }
 0x192   :  { %1384 = vmatmul.bf16.gmra.mxu1 %v803_v7  ;;  %v814_v3 = vor.u32 %v812_v0, %v802_v41 }
 0x193   :  { %12548 = vst [vmem:[#allocation46_spill] sm:$0xff] %v7657_v14  ;;  %1713 = vmatmul.bf16.gmra.mxu2 %v7575_v53  ;;  %v816_v53 = vshll.u32 %v7671_v57, 16  ;;  %v810_v40 = vrot.slane %v808_v2, 1 }
 0x194   :  { %1882 = vmatmul.bf16.gmra.mxu3 %v7583_v34 }
 0x195   :  { %v818_v29 = vrot.slane %v816_v53, 1 }
 0x196   :  { %v1674_v25 = vpop.f32.mrf.mxu2  ;;  %v1178_v33 = vpop.f32.mrf.mxu0 }
 0x197   :  { %v1843_v54 = vpop.f32.mrf.mxu3  ;;  %v1675_v5 = vadd.f32 %v1674_v25, %v1346_v51  ;;  %v1347_v24 = vpop.f32.mrf.mxu1  ;;  %v7687_v51 = vld [vmem:[%s12185_s0 + $0x1a8] sm:$0xff] }
 0x198   :  { %v1348_v34 = vadd.f32 %v1347_v24, %v1178_v33  ;;  %12551 = vst [vmem:[#allocation49_spill] sm:$0xff] %v7687_v51  ;;  %v811_v33 = vsel %vm411_vm0, %v806_v22, %v810_v40  ;;  %v12338_v39 = vunpack.c.l.b16 %v7687_v51  ;;  %v12343_v24 = vunpack.c.h.b16 %v7682_v4 }
 0x199   :  { %v7677_v7 = vadd.f32 %v1843_v54, %v1675_v5  ;;  %v12339_v54 = vunpack.c.l.b16 %v7682_v4  ;;  %v819_v5 = vsel %vm411_vm0, %v814_v3, %v818_v29  ;;  %v12342_v0 = vunpack.c.h.b16 %v7687_v51  ;;  %v7720_v4 = vld [vmem:[%s12185_s0 + $0x1b0] sm:$0xff] }
 0x19a   :  { %12554 = vst [vmem:[#allocation52_spill] sm:$0xff] %v7720_v4 }
 0x19b   :  { %12549 = vst [vmem:[#allocation47_spill] sm:$0xff] %v7677_v7  ;;  %v7701_v22 = vpack.c.b16 %v12338_v39, %v12339_v54  ;;  %v7709_v3 = vpack.c.b16 %v12342_v0, %v12343_v24 }
 0x19e   :  { %v1676_v25 = vpop.f32.mrf.mxu2  ;;  %v1181_v27 = vpop.f32.mrf.mxu0 }
 0x19f   :  { %v1845_v11 = vpop.f32.mrf.mxu3  ;;  %v1677_v41 = vadd.f32 %v1676_v25, %v1348_v34  ;;  %v1350_v2 = vpop.f32.mrf.mxu1  ;;  %v820_v25 = vshrl.u32 %v7663_v15, 16 }
 0x1a0   :  { %v1351_v53 = vadd.f32 %v1350_v2, %v1181_v27 }
 0x1a1   :  { %v7695_v7 = vadd.f32 %v1845_v11, %v1677_v41  ;;  %1220 = vmatmul.bf16.gmra.mxu0 %v811_v33  ;;  %v824_v33 = vshll.u32 %v7701_v22, 16  ;;  %v822_v54 = vor.u32 %v820_v25, %v810_v40 }
 0x1a2   :  { %1389 = vmatmul.bf16.gmra.mxu1 %v819_v5  ;;  %v828_v5 = vshrl.u32 %v7671_v57, 16 }
 0x1a3   :  { %12552 = vst [vmem:[#allocation50_spill] sm:$0xff] %v7695_v7  ;;  %1718 = vmatmul.bf16.gmra.mxu2 %v7613_v42  ;;  %v832_v42 = vshll.u32 %v7709_v3, 16  ;;  %v826_v51 = vrot.slane %v824_v33, 1 }
 0x1a4   :  { %1887 = vmatmul.bf16.gmra.mxu3 %v7621_v55  ;;  %v830_v0 = vor.u32 %v828_v5, %v818_v29 }
 0x1a5   :  { %v834_v24 = vrot.slane %v832_v42, 1 }
 0x1a6   :  { %v1679_v11 = vpop.f32.mrf.mxu2  ;;  %v1183_v27 = vpop.f32.mrf.mxu0 }
 0x1a7   :  { %v1848_v34 = vpop.f32.mrf.mxu3  ;;  %v1680_v41 = vadd.f32 %v1679_v11, %v1351_v53  ;;  %v1352_v2 = vpop.f32.mrf.mxu1  ;;  %v7725_v53 = vld [vmem:[%s12185_s0 + $0x1b8] sm:$0xff] }
 0x1a8   :  { %v1353_v55 = vadd.f32 %v1352_v2, %v1183_v27  ;;  %12555 = vst [vmem:[#allocation53_spill] sm:$0xff] %v7725_v53  ;;  %v827_v27 = vsel %vm411_vm0, %v822_v54, %v826_v51  ;;  %v12346_v40 = vunpack.c.l.b16 %v7725_v53  ;;  %v12351_v2 = vunpack.c.h.b16 %v7720_v4 }
 0x1a9   :  { %v7715_v39 = vadd.f32 %v1848_v34, %v1680_v41  ;;  %v12347_v34 = vunpack.c.l.b16 %v7720_v4  ;;  %v835_v41 = vsel %vm411_vm0, %v830_v0, %v834_v24  ;;  %v12350_v5 = vunpack.c.h.b16 %v7725_v53  ;;  %v7758_v4 = vld [vmem:[%s12185_s0 + $0x1c0] sm:$0xff] }
 0x1aa   :  { %12558 = vst [vmem:[#allocation56_spill] sm:$0xff] %v7758_v4 }
 0x1ab   :  { %12553 = vst [vmem:[#allocation51_spill] sm:$0xff] %v7715_v39  ;;  %v7739_v54 = vpack.c.b16 %v12346_v40, %v12347_v34  ;;  %v7747_v0 = vpack.c.b16 %v12350_v5, %v12351_v2 }
 0x1ae   :  { %v1681_v11 = vpop.f32.mrf.mxu2  ;;  %v1186_v25 = vpop.f32.mrf.mxu0 }
 0x1af   :  { %v1850_v7 = vpop.f32.mrf.mxu3  ;;  %v1682_v29 = vadd.f32 %v1681_v11, %v1353_v55  ;;  %v1355_v33 = vpop.f32.mrf.mxu1  ;;  %v836_v11 = vshrl.u32 %v7701_v22, 16 }
 0x1b0   :  { %v1356_v42 = vadd.f32 %v1355_v33, %v1186_v25 }
 0x1b1   :  { %v7733_v39 = vadd.f32 %v1850_v7, %v1682_v29  ;;  %1225 = vmatmul.bf16.gmra.mxu0 %v827_v27  ;;  %v840_v27 = vshll.u32 %v7739_v54, 16  ;;  %v838_v34 = vor.u32 %v836_v11, %v826_v51 }
 0x1b2   :  { %1394 = vmatmul.bf16.gmra.mxu1 %v835_v41  ;;  %v844_v41 = vshrl.u32 %v7709_v3, 16 }
 0x1b3   :  { %12556 = vst [vmem:[#allocation54_spill] sm:$0xff] %v7733_v39  ;;  %1723 = vmatmul.bf16.gmra.mxu2 %v7663_v15  ;;  %v848_v15 = vshll.u32 %v7747_v0, 16  ;;  %v842_v53 = vrot.slane %v840_v27, 1 }
 0x1b4   :  { %1892 = vmatmul.bf16.gmra.mxu3 %v7671_v57  ;;  %v846_v5 = vor.u32 %v844_v41, %v834_v24 }
 0x1b5   :  { %v850_v2 = vrot.slane %v848_v15, 1 }
 0x1b6   :  { %v1684_v7 = vpop.f32.mrf.mxu2  ;;  %v1188_v25 = vpop.f32.mrf.mxu0 }
 0x1b7   :  { %v1853_v55 = vpop.f32.mrf.mxu3  ;;  %v1685_v29 = vadd.f32 %v1684_v7, %v1356_v42  ;;  %v1357_v33 = vpop.f32.mrf.mxu1  ;;  %v7763_v42 = vld [vmem:[%s12185_s0 + $0x1c8] sm:$0xff] }
 0x1b8   :  { %v1358_v57 = vadd.f32 %v1357_v33, %v1188_v25  ;;  %12559 = vst [vmem:[#allocation57_spill] sm:$0xff] %v7763_v42  ;;  %v843_v25 = vsel %vm411_vm0, %v838_v34, %v842_v53  ;;  %v12355_v51 = vunpack.c.l.b16 %v7763_v42  ;;  %v12356_v33 = vunpack.c.h.b16 %v7758_v4 }
 0x1b9   :  { %v7753_v40 = vadd.f32 %v1853_v55, %v1685_v29  ;;  %v12357_v55 = vunpack.c.l.b16 %v7758_v4  ;;  %v851_v29 = vsel %vm411_vm0, %v846_v5, %v850_v2  ;;  %v12354_v41 = vunpack.c.h.b16 %v7763_v42  ;;  %v7808_v4 = vld [vmem:[%s12185_s0 + $0x1d0] sm:$0xff] }
 0x1ba   :  { %12562 = vst [vmem:[#allocation60_spill] sm:$0xff] %v7808_v4 }
 0x1bb   :  { %12557 = vst [vmem:[#allocation55_spill] sm:$0xff] %v7753_v40  ;;  %v7777_v34 = vpack.c.b16 %v12355_v51, %v12357_v55  ;;  %v7785_v5 = vpack.c.b16 %v12354_v41, %v12356_v33 }
 0x1bd   :  { %v864_v41 = vshll.u32 %v7785_v5, 16 }
 0x1be   :  { %v1686_v7 = vpop.f32.mrf.mxu2  ;;  %v1191_v11 = vpop.f32.mrf.mxu0 }
 0x1bf   :  { %v1855_v39 = vpop.f32.mrf.mxu3  ;;  %v1687_v24 = vadd.f32 %v1686_v7, %v1358_v57  ;;  %v1360_v27 = vpop.f32.mrf.mxu1  ;;  %v6409_v57 = vld [vmem:[%s12184_s1 + $0x1c0] sm:$0xff] }
 0x1c0   :  { %v1361_v15 = vadd.f32 %v1360_v27, %v1191_v11  ;;  %3806 = vmatpush.bf16.msrb.mxu3 %v6409_v57  ;;  %v6329_v57 = vld [vmem:[%s12184_s1 + $0x140] sm:$0xff] }
 0x1c1   :  { %v7771_v40 = vadd.f32 %v1855_v39, %v1687_v24  ;;  %1230 = vmatmul.bf16.gmra.mxu0 %v843_v25  ;;  %v6401_v39 = vld [vmem:[%s12184_s1 + $0x180] sm:$0xff]  ;;  %v856_v25 = vshll.u32 %v7777_v34, 16  ;;  %2365 = vmatpush.bf16.msrb.mxu1 %v6329_v57 }
 0x1c2   :  { %1399 = vmatmul.bf16.gmra.mxu1 %v851_v29  ;;  %3637 = vmatpush.bf16.msrb.mxu2 %v6401_v39  ;;  %v860_v29 = vshrl.u32 %v7747_v0, 16  ;;  %v6321_v39 = vld [vmem:[%s12184_s1 + $0x100] sm:$0xff] }
 0x1c3   :  { %12560 = vst [vmem:[#allocation58_spill] sm:$0xff] %v7771_v40  ;;  %1728 = vmatmul.bf16.gmra.mxu2 %v7701_v22  ;;  %v858_v42 = vrot.slane %v856_v25, 1  ;;  %2196 = vmatpush.bf16.msrb.mxu0 %v6321_v39 }
 0x1c4   :  { %1897 = vmatmul.bf16.gmra.mxu3 %v7709_v3  ;;  %v852_v3 = vshrl.u32 %v7739_v54, 16 }
 0x1c6   :  { %v1689_v7 = vpop.f32.mrf.mxu2  ;;  %v1193_v11 = vpop.f32.mrf.mxu0  ;;  %v854_v55 = vor.u32 %v852_v3, %v842_v53  ;;  %v12363_v53 = vunpack.c.l.b16 %v7808_v4 }
 0x1c7   :  { %v1858_v22 = vpop.f32.mrf.mxu3  ;;  %v1690_v24 = vadd.f32 %v1689_v7, %v1361_v15  ;;  %v1362_v27 = vpop.f32.mrf.mxu1  ;;  %v862_v15 = vor.u32 %v860_v29, %v850_v2  ;;  %v866_v7 = vrot.slane %v864_v41, 1 }
 0x1c8   :  { %v1363_v51 = vadd.f32 %v1362_v27, %v1193_v11  ;;  %v859_v27 = vsel %vm411_vm0, %v854_v55, %v858_v42 }
 0x1c9   :  { %v7797_v33 = vadd.f32 %v1858_v22, %v1690_v24  ;;  %v7813_v22 = vld [vmem:[%s12185_s0 + $0x1d8] sm:$0xff]  ;;  %v867_v29 = vsel %vm411_vm0, %v862_v15, %v866_v7 }
 0x1ca   :  { %12563 = vst [vmem:[#allocation61_spill] sm:$0xff] %v7813_v22  ;;  %v12362_v2 = vunpack.c.l.b16 %v7813_v22  ;;  %v12364_v40 = vunpack.c.h.b16 %v7813_v22  ;;  %v7846_v22 = vld [vmem:[%s12185_s0 + $0x1e0] sm:$0xff] }
 0x1cb   :  { %12561 = vst [vmem:[#allocation59_spill] sm:$0xff] %v7797_v33  ;;  %v12365_v33 = vunpack.c.h.b16 %v7808_v4 }
 0x1cc   :  { %v7827_v55 = vpack.c.b16 %v12362_v2, %v12363_v53  ;;  %12566 = vst [vmem:[#allocation64_spill] sm:$0xff] %v7846_v22 }
 0x1ce   :  { %v1691_v24 = vpop.f32.mrf.mxu2  ;;  %v1196_v3 = vpop.f32.mrf.mxu0 }
 0x1cf   :  { %v1860_v11 = vpop.f32.mrf.mxu3  ;;  %v1692_v41 = vadd.f32 %v1691_v24, %v1363_v51  ;;  %v1365_v25 = vpop.f32.mrf.mxu1  ;;  %v7835_v51 = vpack.c.b16 %v12364_v40, %v12365_v33  ;;  %v868_v24 = vshrl.u32 %v7777_v34, 16 }
 0x1d0   :  { %v1366_v14 = vadd.f32 %v1365_v25, %v1196_v3  ;;  %v876_v25 = vshrl.u32 %v7785_v5, 16 }
 0x1d1   :  { %v7821_v39 = vadd.f32 %v1860_v11, %v1692_v41  ;;  %1235 = vmatmul.bf16.gmra.mxu0 %v859_v27  ;;  %v872_v11 = vshll.u32 %v7827_v55, 16  ;;  %v870_v2 = vor.u32 %v868_v24, %v858_v42 }
 0x1d2   :  { %1404 = vmatmul.bf16.gmra.mxu1 %v867_v29  ;;  %v878_v40 = vor.u32 %v876_v25, %v866_v7 }
 0x1d3   :  { %12564 = vst [vmem:[#allocation62_spill] sm:$0xff] %v7821_v39  ;;  %1733 = vmatmul.bf16.gmra.mxu2 %v7739_v54  ;;  %v880_v54 = vshll.u32 %v7835_v51, 16  ;;  %v874_v53 = vrot.slane %v872_v11, 1 }
 0x1d4   :  { %1902 = vmatmul.bf16.gmra.mxu3 %v7747_v0 }
 0x1d5   :  { %v882_v33 = vrot.slane %v880_v54, 1 }
 0x1d6   :  { %v1694_v57 = vpop.f32.mrf.mxu2  ;;  %v1198_v41 = vpop.f32.mrf.mxu0 }
 0x1d7   :  { %v1863_v15 = vpop.f32.mrf.mxu3  ;;  %v1695_v27 = vadd.f32 %v1694_v57, %v1366_v14  ;;  %v1367_v3 = vpop.f32.mrf.mxu1  ;;  %v7851_v14 = vld [vmem:[%s12185_s0 + $0x1e8] sm:$0xff] }
 0x1d8   :  { %v1368_v0 = vadd.f32 %v1367_v3, %v1198_v41  ;;  %12567 = vst [vmem:[#allocation65_spill] sm:$0xff] %v7851_v14  ;;  %v875_v41 = vsel %vm411_vm0, %v870_v2, %v874_v53  ;;  %v12370_v42 = vunpack.c.l.b16 %v7851_v14  ;;  %v12375_v3 = vunpack.c.h.b16 %v7846_v22 }
 0x1d9   :  { %v7841_v29 = vadd.f32 %v1863_v15, %v1695_v27  ;;  %v12371_v15 = vunpack.c.l.b16 %v7846_v22  ;;  %v883_v27 = vsel %vm411_vm0, %v878_v40, %v882_v33  ;;  %v12374_v25 = vunpack.c.h.b16 %v7851_v14  ;;  %v7884_v22 = vld [vmem:[%s12185_s0 + $0x1f0] sm:$0xff] }
 0x1da   :  { %12570 = vst [vmem:[#allocation68_spill] sm:$0xff] %v7884_v22 }
 0x1db   :  { %12565 = vst [vmem:[#allocation63_spill] sm:$0xff] %v7841_v29  ;;  %v7865_v2 = vpack.c.b16 %v12370_v42, %v12371_v15  ;;  %v7873_v40 = vpack.c.b16 %v12374_v25, %v12375_v3 }
 0x1de   :  { %v1696_v57 = vpop.f32.mrf.mxu2  ;;  %v1201_v24 = vpop.f32.mrf.mxu0 }
 0x1df   :  { %v1865_v4 = vpop.f32.mrf.mxu3  ;;  %v1697_v7 = vadd.f32 %v1696_v57, %v1368_v0  ;;  %v1370_v11 = vpop.f32.mrf.mxu1  ;;  %v884_v57 = vshrl.u32 %v7827_v55, 16 }
 0x1e0   :  { %v1371_v54 = vadd.f32 %v1370_v11, %v1201_v24 }
 0x1e1   :  { %v7859_v29 = vadd.f32 %v1865_v4, %v1697_v7  ;;  %1240 = vmatmul.bf16.gmra.mxu0 %v875_v41  ;;  %v888_v41 = vshll.u32 %v7865_v2, 16  ;;  %v886_v15 = vor.u32 %v884_v57, %v874_v53 }
 0x1e2   :  { %1409 = vmatmul.bf16.gmra.mxu1 %v883_v27  ;;  %v892_v27 = vshrl.u32 %v7835_v51, 16 }
 0x1e3   :  { %12568 = vst [vmem:[#allocation66_spill] sm:$0xff] %v7859_v29  ;;  %1738 = vmatmul.bf16.gmra.mxu2 %v7777_v34  ;;  %v896_v34 = vshll.u32 %v7873_v40, 16  ;;  %v890_v14 = vrot.slane %v888_v41, 1 }
 0x1e4   :  { %1907 = vmatmul.bf16.gmra.mxu3 %v7785_v5  ;;  %v894_v25 = vor.u32 %v892_v27, %v882_v33 }
 0x1e5   :  { %v898_v3 = vrot.slane %v896_v34, 1 }
 0x1e6   :  { %v1699_v4 = vpop.f32.mrf.mxu2  ;;  %v1203_v24 = vpop.f32.mrf.mxu0 }
 0x1e7   :  { %v1868_v0 = vpop.f32.mrf.mxu3  ;;  %v1700_v7 = vadd.f32 %v1699_v4, %v1371_v54  ;;  %v1372_v11 = vpop.f32.mrf.mxu1  ;;  %v7889_v54 = vld [vmem:[%s12185_s0 + $0x1f8] sm:$0xff] }
 0x1e8   :  { %v1373_v5 = vadd.f32 %v1372_v11, %v1203_v24  ;;  %12571 = vst [vmem:[#allocation69_spill] sm:$0xff] %v7889_v54  ;;  %v891_v24 = vsel %vm411_vm0, %v886_v15, %v890_v14  ;;  %v12378_v53 = vunpack.c.l.b16 %v7889_v54  ;;  %v12383_v11 = vunpack.c.h.b16 %v7884_v22 }
 0x1e9   :  { %v7879_v42 = vadd.f32 %v1868_v0, %v1700_v7  ;;  %v12379_v0 = vunpack.c.l.b16 %v7884_v22  ;;  %v899_v7 = vsel %vm411_vm0, %v894_v25, %v898_v3  ;;  %v12382_v27 = vunpack.c.h.b16 %v7889_v54  ;;  %v116_v22 = vld [vmem:[%s12185_s0 + $0x200] sm:$0x11] }
 0x1eb   :  { %12569 = vst [vmem:[#allocation67_spill] sm:$0xff] %v7879_v42  ;;  %v7903_v15 = vpack.c.b16 %v12378_v53, %v12379_v0  ;;  %v7911_v25 = vpack.c.b16 %v12382_v27, %v12383_v11 }
 0x1ee   :  { %v1701_v4 = vpop.f32.mrf.mxu2  ;;  %v1206_v57 = vpop.f32.mrf.mxu0 }
 0x1ef   :  { %v1870_v29 = vpop.f32.mrf.mxu3  ;;  %v1702_v33 = vadd.f32 %v1701_v4, %v1373_v5  ;;  %v1375_v41 = vpop.f32.mrf.mxu1  ;;  %v900_v4 = vshrl.u32 %v7865_v2, 16 }
 0x1f0   :  { %v1376_v34 = vadd.f32 %v1375_v41, %v1206_v57 }
 0x1f1   :  { %v7897_v42 = vadd.f32 %v1870_v29, %v1702_v33  ;;  %1245 = vmatmul.bf16.gmra.mxu0 %v891_v24  ;;  %v904_v24 = vshll.u32 %v7903_v15, 16  ;;  %v902_v0 = vor.u32 %v900_v4, %v890_v14 }
 0x1f2   :  { %1414 = vmatmul.bf16.gmra.mxu1 %v899_v7  ;;  %v908_v7 = vshrl.u32 %v7873_v40, 16 }
 0x1f3   :  { %12572 = vst [vmem:[#allocation70_spill] sm:$0xff] %v7897_v42  ;;  %1743 = vmatmul.bf16.gmra.mxu2 %v7827_v55  ;;  %v912_v55 = vshll.u32 %v7911_v25, 16  ;;  %v906_v54 = vrot.slane %v904_v24, 1 }
 0x1f4   :  { %1912 = vmatmul.bf16.gmra.mxu3 %v7835_v51  ;;  %v910_v27 = vor.u32 %v908_v7, %v898_v3 }
 0x1f5   :  { %v914_v11 = vrot.slane %v912_v55, 1 }
 0x1f6   :  { %v1704_v29 = vpop.f32.mrf.mxu2  ;;  %v1208_v57 = vpop.f32.mrf.mxu0 }
 0x1f7   :  { %v1873_v5 = vpop.f32.mrf.mxu3  ;;  %v1705_v33 = vadd.f32 %v1704_v29, %v1376_v34  ;;  %v1377_v41 = vpop.f32.mrf.mxu1  ;;  %v907_v34 = vsel %vm411_vm0, %v902_v0, %v906_v54  ;;  %v915_v61 = vsel %vm411_vm0, %v910_v27, %v914_v11 }
 0x1f8   :  { %v1378_v51 = vadd.f32 %v1377_v41, %v1208_v57  ;;  %v343_v57 = vunpack.c.l.b16 %v116_v22 }
 0x1f9   :  { %v7917_v53 = vadd.f32 %v1873_v5, %v1705_v33  ;;  %v344_v5 = vunpack.c.h.b16 %v116_v22 }
 0x1fa   :  { %v409_v3 = vpack.c.b16 %v343_v57, %v343_v57  ;;  %v6337_v57 = vld [vmem:[%s12185_s0 + $0xc] sm:$0xf] }
 0x1fb   :  { %v410_v4 = vpack.c.b16 %v344_v5, %v344_v5  ;;  %v5909_v5 = vld [vmem:[%s12185_s0 + $0x10] sm:$0xf0] }
 0x1fc   :  { %v920_v55 = vshll.u32 %v409_v3, 16 }
 0x1fe   :  { %v1706_v42 = vpop.f32.mrf.mxu2  ;;  %v1211_v13 = vpop.f32.mrf.mxu0 }
 0x1ff   :  { %v1875_v39 = vpop.f32.mrf.mxu3  ;;  %v1707_v29 = vadd.f32 %v1706_v42, %v1378_v51  ;;  %v1380_v1 = vpop.f32.mrf.mxu1  ;;  %v916_v42 = vshrl.u32 %v7903_v15, 16 }
 0x200   :  { %v1381_v33 = vadd.f32 %v1380_v1, %v1211_v13  ;;  %v924_v1 = vshrl.u32 %v7911_v25, 16  ;;  %v928_v13 = vshll.u32 %v410_v4, 16 }
 0x201   :  { %v7924_v14 = vadd.f32 %v1875_v39, %v1707_v29  ;;  %1250 = vmatmul.bf16.gmra.mxu0 %v907_v34  ;;  %v5907_v34 = vld [vmem:[%s12185_s0 + $0x8] sm:$0xf]  ;;  %v6338_v29 = vld [vmem:[%s12185_s0 + $0xc] sm:$0xf0] }
 0x202   :  { %1419 = vmatmul.bf16.gmra.mxu1 %v915_v61  ;;  %v918_v61 = vor.u32 %v916_v42, %v906_v54  ;;  %v926_v51 = vor.u32 %v924_v1, %v914_v11  ;;  %v5908_v42 = vor.u32 %v6338_v29, %v5907_v34 }
 0x203   :  { %12573 = vst [vmem:[#allocation71_spill] sm:$0xff] %v7924_v14  ;;  %1748 = vmatmul.bf16.gmra.mxu2 %v7865_v2  ;;  %v922_v2 = vrot.slane %v920_v55, 1  ;;  %v5912_v55 = vor.u32 %v6337_v57, %v5909_v5  ;;  %v12577_v14 = vunpack.c.l.b16 %v6705_v17 }
 0x204   :  { %1917 = vmatmul.bf16.gmra.mxu3 %v7873_v40  ;;  %v930_v40 = vrot.slane %v928_v13, 1  ;;  %v6339_v13 = vld [vmem:[%s12185_s0 + $0x1c] sm:$0xf] }
 0x206   :  { %v1709_v24 = vpop.f32.mrf.mxu2  ;;  %v1213_v7 = vpop.f32.mrf.mxu0 }
 0x207   :  { %v1878_v0 = vpop.f32.mrf.mxu3  ;;  %v1710_v41 = vadd.f32 %v1709_v24, %v1381_v33  ;;  %v1382_v27 = vpop.f32.mrf.mxu1  ;;  %v923_v24 = vsel %vm411_vm0, %v918_v61, %v922_v2  ;;  %v2953_v2 = vshll.u32 %v5908_v42, 16 }
 0x208   :  { %v1383_v22 = vadd.f32 %v1382_v27, %v1213_v7  ;;  %v5915_v7 = vld [vmem:[%s12185_s0 + $0x18] sm:$0xf]  ;;  %v6340_v27 = vld [vmem:[%s12185_s0 + $0x1c] sm:$0xf0] }
 0x209   :  { %v7930_v39 = vadd.f32 %v1878_v0, %v1710_v41  ;;  %v931_v0 = vsel %vm411_vm0, %v926_v51, %v930_v40  ;;  %v5916_v61 = vor.u32 %v6340_v27, %v5915_v7  ;;  %v2965_v40 = vshll.u32 %v5912_v55, 16 }
 0x20b   :  { %12574 = vst [vmem:[#allocation72_spill] sm:$0xff] %v7930_v39 }
 0x20e   :  { %v1711_v54 = vpop.f32.mrf.mxu2  ;;  %v1216_v3 = vpop.f32.mrf.mxu0 }
 0x20f   :  { %v1880_v33 = vpop.f32.mrf.mxu3  ;;  %v1712_v11 = vadd.f32 %v1711_v54, %v1383_v22  ;;  %v1385_v4 = vpop.f32.mrf.mxu1  ;;  %v5917_v22 = vld [vmem:[%s12185_s0 + $0x20] sm:$0xf0] }
 0x210   :  { %v1386_v41 = vadd.f32 %v1385_v4, %v1216_v3  ;;  %v5920_v51 = vor.u32 %v6339_v13, %v5917_v22  ;;  %v2958_v3 = vshll.u32 %v5916_v61, 16 }
 0x211   :  { %v7952_v1 = vadd.f32 %v1880_v33, %v1712_v11  ;;  %1255 = vmatmul.bf16.gmra.mxu0 %v923_v24  ;;  %v2951_v33 = vshrl.u32 %v5908_v42, 16  ;;  %v2955_v11 = vrot.slane %v2953_v2, 1  ;;  %v2967_v24 = vrot.slane %v2965_v40, 1 }
 0x212   :  { %1424 = vmatmul.bf16.gmra.mxu1 %v931_v0  ;;  %v2970_v0 = vshll.u32 %v5920_v51, 16  ;;  %v12579_v42 = vunpack.c.h.b16 %v6705_v17  ;;  %v12580_v2 = vunpack.c.h.b16 %v6710_v18  ;;  %v6342_v17 = vld [vmem:[%s12185_s0 + $0x2c] sm:$0xf0] }
 0x213   :  { %12575 = vst [vmem:[#allocation73_spill] sm:$0xff] %v7952_v1  ;;  %1753 = vmatmul.bf16.gmra.mxu2 %v7903_v15  ;;  %v2963_v1 = vshrl.u32 %v5912_v55, 16  ;;  %v2956_v15 = vor.u32 %v2955_v11, %v2951_v33  ;;  %v5923_v33 = vld [vmem:[%s12185_s0 + $0x28] sm:$0xf] }
 0x214   :  { %1922 = vmatmul.bf16.gmra.mxu3 %v7911_v25  ;;  %v2960_v25 = vrot.slane %v2958_v3, 1  ;;  %v2972_v27 = vrot.slane %v2970_v0, 1  ;;  %v1966_v55 = vpack.c.b16 %v12580_v2, %v12579_v42  ;;  %v5924_v3 = vor.u32 %v6342_v17, %v5923_v33 }
 0x215   :  { %v2968_v7 = vor.u32 %v2967_v24, %v2963_v1  ;;  %v2982_v2 = vshrl.u32 %v5920_v51, 16  ;;  %v12583_v33 = vunpack.c.l.b16 %v6715_v19  ;;  %v12584_v17 = vunpack.c.l.b16 %v6794_v58 }
 0x216   :  { %v1714_v34 = vpop.f32.mrf.mxu2  ;;  %v1218_v5 = vpop.f32.mrf.mxu0  ;;  %v2978_v42 = vshll.u32 %v5924_v3, 16 }
 0x217   :  { %v1883_v29 = vpop.f32.mrf.mxu3  ;;  %v1715_v57 = vadd.f32 %v1714_v34, %v1386_v41  ;;  %v1387_v54 = vpop.f32.mrf.mxu1  ;;  %v12578_v41 = vunpack.c.l.b16 %v6710_v18  ;;  %v2973_v1 = vsel %vm411_vm0, %v2968_v7, %v2972_v27  ;;  %v6341_v18 = vld [vmem:[%s12185_s0 + $0x2c] sm:$0xf] }
 0x218   :  { %v1388_v4 = vadd.f32 %v1387_v54, %v1218_v5  ;;  %v2961_v54 = vsel %vm411_vm0, %v2956_v15, %v2960_v25 }
 0x219   :  { %v7962_v39 = vadd.f32 %v1883_v29, %v1715_v57  ;;  %v1965_v34 = vpack.c.b16 %v12578_v41, %v12577_v14  ;;  %v5925_v14 = vld [vmem:[%s12185_s0 + $0x30] sm:$0xf0] }
 0x21b   :  { %12576 = vst [vmem:[#allocation74_spill] sm:$0xff] %v7962_v39 }
 0x21e   :  { %v1716_v13 = vpop.f32.mrf.mxu2  ;;  %v1221_v5 = vpop.f32.mrf.mxu0 }
 0x21f   :  { %v1885_v22 = vpop.f32.mrf.mxu3  ;;  %v1717_v40 = vadd.f32 %v1716_v13, %v1388_v4  ;;  %v1390_v29 = vpop.f32.mrf.mxu1  ;;  %v5928_v4 = vor.u32 %v6341_v18, %v5925_v14  ;;  %v12585_v18 = vunpack.c.h.b16 %v6715_v19  ;;  %v6344_v19 = vld [vmem:[%s12185_s0 + $0x3c] sm:$0xf0] }
 0x220   :  { %v1391_v57 = vadd.f32 %v1390_v29, %v1221_v5 }
 0x221   :  { %v7977_v11 = vadd.f32 %v1885_v22, %v1717_v40  ;;  %2197 = vmatmul.bf16.vlgmr.msrb.gmra.mxu0 %v1965_v34  ;;  %v2974_v22 = vshrl.u32 %v5916_v61, 16  ;;  %v2986_v40 = vshll.u32 %v5928_v4, 16  ;;  %v2984_v34 = vor.u32 %v2982_v2, %v2972_v27 }
 0x222   :  { %2366 = vmatmul.bf16.vlgmr.msrb.gmra.mxu1 %v1966_v55  ;;  %v12586_v61 = vunpack.c.h.b16 %v6794_v58  ;;  %v6343_v58 = vld [vmem:[%s12185_s0 + $0x3c] sm:$0xf] }
 0x223   :  { %12581 = vst [vmem:[#allocation75_spill] sm:$0xff] %v7977_v11  ;;  %3638 = vmatmul.bf16.vlgmr.msrb.gmra.mxu2 %v2961_v54  ;;  %v2976_v29 = vor.u32 %v2974_v22, %v2960_v25  ;;  %v2980_v11 = vrot.slane %v2978_v42, 1  ;;  %v2988_v55 = vrot.slane %v2986_v40, 1  ;;  %v5933_v22 = vld [vmem:[%s12185_s0 + $0x40] sm:$0xf0] }
 0x224   :  { %3807 = vmatmul.bf16.vlgmr.msrb.gmra.mxu3 %v2973_v1  ;;  %v1968_v14 = vpack.c.b16 %v12586_v61, %v12585_v18  ;;  %v5936_v42 = vor.u32 %v6343_v58, %v5933_v22  ;;  %v2998_v18 = vshrl.u32 %v5928_v4, 16  ;;  %v12591_v58 = vunpack.c.h.b16 %v6799_v59 }
 0x225   :  { %v2981_v25 = vsel %vm411_vm0, %v2976_v29, %v2980_v11  ;;  %v2989_v27 = vsel %vm411_vm0, %v2984_v34, %v2988_v55 }
 0x226   :  { %v1719_v24 = vpop.f32.mrf.mxu2  ;;  %v1223_v7 = vpop.f32.mrf.mxu0  ;;  %v3002_v61 = vshll.u32 %v5936_v42, 16 }
 0x227   :  { %v1888_v0 = vpop.f32.mrf.mxu3  ;;  %v1720_v15 = vadd.f32 %v1719_v24, %v1391_v57  ;;  %v1392_v13 = vpop.f32.mrf.mxu1  ;;  %v1967_v57 = vpack.c.b16 %v12584_v17, %v12583_v33 }
 0x228   :  { %v1393_v41 = vadd.f32 %v1392_v13, %v1223_v7  ;;  %v5931_v7 = vld [vmem:[%s12185_s0 + $0x38] sm:$0xf] }
 0x229   :  { %v7988_v5 = vadd.f32 %v1888_v0, %v1720_v15 }
 0x22b   :  { %12582 = vst [vmem:[#allocation76_spill] sm:$0xff] %v7988_v5 }
 0x22e   :  { %v1721_v54 = vpop.f32.mrf.mxu2  ;;  %v1226_v24 = vpop.f32.mrf.mxu0 }
 0x22f   :  { %v1890_v1 = vpop.f32.mrf.mxu3  ;;  %v1722_v51 = vadd.f32 %v1721_v54, %v1393_v41  ;;  %v1395_v0 = vpop.f32.mrf.mxu1  ;;  %v5932_v41 = vor.u32 %v6344_v19, %v5931_v7  ;;  %v12589_v7 = vunpack.c.l.b16 %v6799_v59  ;;  %v12590_v19 = vunpack.c.l.b16 %v6840_v21  ;;  %v6346_v59 = vld [vmem:[%s12185_s0 + $0x4c] sm:$0xf0] }
 0x230   :  { %v1396_v15 = vadd.f32 %v1395_v0, %v1226_v24 }
 0x231   :  { %v8003_v13 = vadd.f32 %v1890_v1, %v1722_v51  ;;  %2202 = vmatmul.bf16.gmra.mxu0 %v1967_v57  ;;  %v2990_v1 = vshrl.u32 %v5924_v3, 16  ;;  %v2994_v17 = vshll.u32 %v5932_v41, 16  ;;  %v3000_v57 = vor.u32 %v2998_v18, %v2988_v55 }
 0x232   :  { %2371 = vmatmul.bf16.gmra.mxu1 %v1968_v14  ;;  %v3004_v14 = vrot.slane %v3002_v61, 1  ;;  %v12592_v3 = vunpack.c.h.b16 %v6840_v21  ;;  %v6345_v21 = vld [vmem:[%s12185_s0 + $0x4c] sm:$0xf] }
 0x233   :  { %12587 = vst [vmem:[#allocation77_spill] sm:$0xff] %v8003_v13  ;;  %3643 = vmatmul.bf16.gmra.mxu2 %v2981_v25  ;;  %v2992_v24 = vor.u32 %v2990_v1, %v2980_v11  ;;  %v2996_v0 = vrot.slane %v2994_v17, 1  ;;  %v5941_v1 = vld [vmem:[%s12185_s0 + $0x50] sm:$0xf0] }
 0x234   :  { %3812 = vmatmul.bf16.gmra.mxu3 %v2989_v27  ;;  %v1970_v22 = vpack.c.b16 %v12592_v3, %v12591_v58  ;;  %v3005_v55 = vsel %vm411_vm0, %v3000_v57, %v3004_v14  ;;  %v5944_v17 = vor.u32 %v6345_v21, %v5941_v1  ;;  %v3014_v58 = vshrl.u32 %v5936_v42, 16 }
 0x235   :  { %v2997_v11 = vsel %vm411_vm0, %v2992_v24, %v2996_v0  ;;  %v12597_v21 = vunpack.c.h.b16 %v6845_v26 }
 0x236   :  { %v1724_v2 = vpop.f32.mrf.mxu2  ;;  %v1228_v34 = vpop.f32.mrf.mxu0  ;;  %v3018_v3 = vshll.u32 %v5944_v17, 16 }
 0x237   :  { %v1893_v40 = vpop.f32.mrf.mxu3  ;;  %v1725_v29 = vadd.f32 %v1724_v2, %v1396_v15  ;;  %v1397_v54 = vpop.f32.mrf.mxu1  ;;  %v1969_v15 = vpack.c.b16 %v12590_v19, %v12589_v7 }
 0x238   :  { %v1398_v33 = vadd.f32 %v1397_v54, %v1228_v34  ;;  %v5939_v34 = vld [vmem:[%s12185_s0 + $0x48] sm:$0xf] }
 0x239   :  { %v8014_v51 = vadd.f32 %v1893_v40, %v1725_v29 }
 0x23b   :  { %12588 = vst [vmem:[#allocation78_spill] sm:$0xff] %v8014_v51 }
 0x23e   :  { %v1726_v25 = vpop.f32.mrf.mxu2  ;;  %v1231_v2 = vpop.f32.mrf.mxu0 }
 0x23f   :  { %v1895_v27 = vpop.f32.mrf.mxu3  ;;  %v1727_v4 = vadd.f32 %v1726_v25, %v1398_v33  ;;  %v1400_v40 = vpop.f32.mrf.mxu1  ;;  %v5940_v33 = vor.u32 %v6346_v59, %v5939_v34  ;;  %v12595_v34 = vunpack.c.l.b16 %v6845_v26  ;;  %v12596_v59 = vunpack.c.l.b16 %v6866_v38  ;;  %v6348_v26 = vld [vmem:[%s12185_s0 + $0x5c] sm:$0xf0] }
 0x240   :  { %v1401_v29 = vadd.f32 %v1400_v40, %v1231_v2 }
 0x241   :  { %v8029_v54 = vadd.f32 %v1895_v27, %v1727_v4  ;;  %2207 = vmatmul.bf16.gmra.mxu0 %v1969_v15  ;;  %v3006_v27 = vshrl.u32 %v5932_v41, 16  ;;  %v3010_v19 = vshll.u32 %v5940_v33, 16  ;;  %v3016_v15 = vor.u32 %v3014_v58, %v3004_v14 }
 0x242   :  { %2376 = vmatmul.bf16.gmra.mxu1 %v1970_v22  ;;  %v3020_v22 = vrot.slane %v3018_v3, 1  ;;  %v12598_v41 = vunpack.c.h.b16 %v6866_v38  ;;  %v6347_v38 = vld [vmem:[%s12185_s0 + $0x5c] sm:$0xf] }
 0x243   :  { %12593 = vst [vmem:[#allocation79_spill] sm:$0xff] %v8029_v54  ;;  %3648 = vmatmul.bf16.gmra.mxu2 %v2997_v11  ;;  %v3008_v2 = vor.u32 %v3006_v27, %v2996_v0  ;;  %v3012_v40 = vrot.slane %v3010_v19, 1  ;;  %v5949_v27 = vld [vmem:[%s12185_s0 + $0x60] sm:$0xf0] }
 0x244   :  { %3817 = vmatmul.bf16.gmra.mxu3 %v3005_v55  ;;  %v1972_v1 = vpack.c.b16 %v12598_v41, %v12597_v21  ;;  %v3021_v14 = vsel %vm411_vm0, %v3016_v15, %v3020_v22  ;;  %v5952_v19 = vor.u32 %v6347_v38, %v5949_v27  ;;  %v3030_v21 = vshrl.u32 %v5944_v17, 16 }
 0x245   :  { %v3013_v0 = vsel %vm411_vm0, %v3008_v2, %v3012_v40  ;;  %v12603_v38 = vunpack.c.h.b16 %v6871_v46 }
 0x246   :  { %v1729_v18 = vpop.f32.mrf.mxu2  ;;  %v1233_v57 = vpop.f32.mrf.mxu0  ;;  %v3034_v41 = vshll.u32 %v5952_v19, 16 }
 0x247   :  { %v1898_v61 = vpop.f32.mrf.mxu3  ;;  %v1730_v24 = vadd.f32 %v1729_v18, %v1401_v29  ;;  %v1402_v25 = vpop.f32.mrf.mxu1  ;;  %v1971_v29 = vpack.c.b16 %v12596_v59, %v12595_v34 }
 0x248   :  { %v1403_v7 = vadd.f32 %v1402_v25, %v1233_v57  ;;  %v5947_v57 = vld [vmem:[%s12185_s0 + $0x58] sm:$0xf] }
 0x249   :  { %v8040_v4 = vadd.f32 %v1898_v61, %v1730_v24 }
 0x24b   :  { %12594 = vst [vmem:[#allocation80_spill] sm:$0xff] %v8040_v4 }
 0x24e   :  { %v1731_v11 = vpop.f32.mrf.mxu2  ;;  %v1236_v18 = vpop.f32.mrf.mxu0 }
 0x24f   :  { %v1900_v55 = vpop.f32.mrf.mxu3  ;;  %v1732_v42 = vadd.f32 %v1731_v11, %v1403_v7  ;;  %v1405_v61 = vpop.f32.mrf.mxu1  ;;  %v5948_v7 = vor.u32 %v6348_v26, %v5947_v57  ;;  %v12601_v57 = vunpack.c.l.b16 %v6871_v46  ;;  %v12602_v26 = vunpack.c.l.b16 %v6902_v9  ;;  %v6350_v46 = vld [vmem:[%s12185_s0 + $0x6c] sm:$0xf0] }
 0x250   :  { %v1406_v24 = vadd.f32 %v1405_v61, %v1236_v18 }
 0x251   :  { %v8055_v25 = vadd.f32 %v1900_v55, %v1732_v42  ;;  %2212 = vmatmul.bf16.gmra.mxu0 %v1971_v29  ;;  %v3022_v55 = vshrl.u32 %v5940_v33, 16  ;;  %v3026_v59 = vshll.u32 %v5948_v7, 16  ;;  %v3032_v29 = vor.u32 %v3030_v21, %v3020_v22 }
 0x252   :  { %2381 = vmatmul.bf16.gmra.mxu1 %v1972_v1  ;;  %v3036_v1 = vrot.slane %v3034_v41, 1  ;;  %v12604_v33 = vunpack.c.h.b16 %v6902_v9  ;;  %v6349_v9 = vld [vmem:[%s12185_s0 + $0x6c] sm:$0xf] }
 0x253   :  { %12599 = vst [vmem:[#allocation81_spill] sm:$0xff] %v8055_v25  ;;  %3653 = vmatmul.bf16.gmra.mxu2 %v3013_v0  ;;  %v3024_v18 = vor.u32 %v3022_v55, %v3012_v40  ;;  %v3028_v61 = vrot.slane %v3026_v59, 1  ;;  %v5957_v55 = vld [vmem:[%s12185_s0 + $0x70] sm:$0xf0] }
 0x254   :  { %3822 = vmatmul.bf16.gmra.mxu3 %v3021_v14  ;;  %v1974_v27 = vpack.c.b16 %v12604_v33, %v12603_v38  ;;  %v3037_v22 = vsel %vm411_vm0, %v3032_v29, %v3036_v1  ;;  %v5960_v59 = vor.u32 %v6349_v9, %v5957_v55  ;;  %v3046_v38 = vshrl.u32 %v5952_v19, 16 }
 0x255   :  { %v3029_v40 = vsel %vm411_vm0, %v3024_v18, %v3028_v61  ;;  %v12609_v9 = vunpack.c.h.b16 %v6907_v10 }
 0x256   :  { %v1734_v58 = vpop.f32.mrf.mxu2  ;;  %v1238_v15 = vpop.f32.mrf.mxu0  ;;  %v3050_v33 = vshll.u32 %v5960_v59, 16 }
 0x257   :  { %v1903_v3 = vpop.f32.mrf.mxu3  ;;  %v1735_v2 = vadd.f32 %v1734_v58, %v1406_v24  ;;  %v1407_v11 = vpop.f32.mrf.mxu1  ;;  %v1973_v24 = vpack.c.b16 %v12602_v26, %v12601_v57 }
 0x258   :  { %v1408_v34 = vadd.f32 %v1407_v11, %v1238_v15  ;;  %v5955_v15 = vld [vmem:[%s12185_s0 + $0x68] sm:$0xf] }
 0x259   :  { %v8066_v42 = vadd.f32 %v1903_v3, %v1735_v2 }
 0x25b   :  { %12600 = vst [vmem:[#allocation82_spill] sm:$0xff] %v8066_v42 }
 0x25e   :  { %v1736_v0 = vpop.f32.mrf.mxu2  ;;  %v1241_v58 = vpop.f32.mrf.mxu0 }
 0x25f   :  { %v1905_v14 = vpop.f32.mrf.mxu3  ;;  %v1737_v17 = vadd.f32 %v1736_v0, %v1408_v34  ;;  %v1410_v3 = vpop.f32.mrf.mxu1  ;;  %v5956_v34 = vor.u32 %v6350_v46, %v5955_v15  ;;  %v12607_v15 = vunpack.c.l.b16 %v6907_v10  ;;  %v12608_v46 = vunpack.c.l.b16 %v6926_v36  ;;  %v6352_v10 = vld [vmem:[%s12185_s0 + $0x7c] sm:$0xf0] }
 0x260   :  { %v1411_v2 = vadd.f32 %v1410_v3, %v1241_v58 }
 0x261   :  { %v8081_v11 = vadd.f32 %v1905_v14, %v1737_v17  ;;  %2217 = vmatmul.bf16.gmra.mxu0 %v1973_v24  ;;  %v3038_v14 = vshrl.u32 %v5948_v7, 16  ;;  %v3042_v26 = vshll.u32 %v5956_v34, 16  ;;  %v3048_v24 = vor.u32 %v3046_v38, %v3036_v1 }
 0x262   :  { %2386 = vmatmul.bf16.gmra.mxu1 %v1974_v27  ;;  %v3052_v27 = vrot.slane %v3050_v33, 1  ;;  %v12610_v7 = vunpack.c.h.b16 %v6926_v36  ;;  %v6351_v36 = vld [vmem:[%s12185_s0 + $0x7c] sm:$0xf] }
 0x263   :  { %12605 = vst [vmem:[#allocation83_spill] sm:$0xff] %v8081_v11  ;;  %3658 = vmatmul.bf16.gmra.mxu2 %v3029_v40  ;;  %v3040_v58 = vor.u32 %v3038_v14, %v3028_v61  ;;  %v3044_v3 = vrot.slane %v3042_v26, 1  ;;  %v5965_v14 = vld [vmem:[%s12185_s0 + $0x80] sm:$0xf0] }
 0x264   :  { %3827 = vmatmul.bf16.gmra.mxu3 %v3037_v22  ;;  %v1976_v55 = vpack.c.b16 %v12610_v7, %v12609_v9  ;;  %v3053_v1 = vsel %vm411_vm0, %v3048_v24, %v3052_v27  ;;  %v5968_v26 = vor.u32 %v6351_v36, %v5965_v14  ;;  %v3062_v9 = vshrl.u32 %v5960_v59, 16 }
 0x265   :  { %v3045_v61 = vsel %vm411_vm0, %v3040_v58, %v3044_v3  ;;  %v12615_v36 = vunpack.c.h.b16 %v6931_v37 }
 0x266   :  { %v1739_v21 = vpop.f32.mrf.mxu2  ;;  %v1243_v29 = vpop.f32.mrf.mxu0  ;;  %v3066_v7 = vshll.u32 %v5968_v26, 16 }
 0x267   :  { %v1908_v41 = vpop.f32.mrf.mxu3  ;;  %v1740_v18 = vadd.f32 %v1739_v21, %v1411_v2  ;;  %v1412_v0 = vpop.f32.mrf.mxu1  ;;  %v1975_v2 = vpack.c.b16 %v12608_v46, %v12607_v15 }
 0x268   :  { %v1413_v57 = vadd.f32 %v1412_v0, %v1243_v29  ;;  %v5963_v29 = vld [vmem:[%s12185_s0 + $0x78] sm:$0xf] }
 0x269   :  { %v8092_v17 = vadd.f32 %v1908_v41, %v1740_v18 }
 0x26b   :  { %12606 = vst [vmem:[#allocation84_spill] sm:$0xff] %v8092_v17 }
 0x26e   :  { %v1741_v40 = vpop.f32.mrf.mxu2  ;;  %v1246_v21 = vpop.f32.mrf.mxu0 }
 0x26f   :  { %v1910_v22 = vpop.f32.mrf.mxu3  ;;  %v1742_v19 = vadd.f32 %v1741_v40, %v1413_v57  ;;  %v1415_v41 = vpop.f32.mrf.mxu1  ;;  %v5964_v57 = vor.u32 %v6352_v10, %v5963_v29  ;;  %v12613_v29 = vunpack.c.l.b16 %v6931_v37  ;;  %v12614_v10 = vunpack.c.l.b16 %v6950_v12  ;;  %v6354_v37 = vld [vmem:[%s12185_s0 + $0x8c] sm:$0xf0] }
 0x270   :  { %v1416_v18 = vadd.f32 %v1415_v41, %v1246_v21 }
 0x271   :  { %v8107_v0 = vadd.f32 %v1910_v22, %v1742_v19  ;;  %2222 = vmatmul.bf16.gmra.mxu0 %v1975_v2  ;;  %v3054_v22 = vshrl.u32 %v5956_v34, 16  ;;  %v3058_v46 = vshll.u32 %v5964_v57, 16  ;;  %v3064_v2 = vor.u32 %v3062_v9, %v3052_v27 }
 0x272   :  { %2391 = vmatmul.bf16.gmra.mxu1 %v1976_v55  ;;  %v3068_v55 = vrot.slane %v3066_v7, 1  ;;  %v12616_v34 = vunpack.c.h.b16 %v6950_v12  ;;  %v6353_v12 = vld [vmem:[%s12185_s0 + $0x8c] sm:$0xf] }
 0x273   :  { %12611 = vst [vmem:[#allocation85_spill] sm:$0xff] %v8107_v0  ;;  %3663 = vmatmul.bf16.gmra.mxu2 %v3045_v61  ;;  %v3056_v21 = vor.u32 %v3054_v22, %v3044_v3  ;;  %v3060_v41 = vrot.slane %v3058_v46, 1  ;;  %v5973_v22 = vld [vmem:[%s12185_s0 + $0x90] sm:$0xf0]  ;;  %v12709_v0 = vld [vmem:[#allocation38_spill] sm:$0xff] }
 0x274   :  { %3832 = vmatmul.bf16.gmra.mxu3 %v3053_v1  ;;  %v1978_v14 = vpack.c.b16 %v12616_v34, %v12615_v36  ;;  %v3069_v27 = vsel %vm411_vm0, %v3064_v2, %v3068_v55  ;;  %v5976_v46 = vor.u32 %v6353_v12, %v5973_v22  ;;  %v3078_v36 = vshrl.u32 %v5968_v26, 16 }
 0x275   :  { %v3061_v3 = vsel %vm411_vm0, %v3056_v21, %v3060_v41  ;;  %v12621_v12 = vunpack.c.h.b16 %v6955_v32 }
 0x276   :  { %v1744_v38 = vpop.f32.mrf.mxu2  ;;  %v1248_v24 = vpop.f32.mrf.mxu0  ;;  %v3082_v34 = vshll.u32 %v5976_v46, 16 }
 0x277   :  { %v1913_v33 = vpop.f32.mrf.mxu3  ;;  %v1745_v58 = vadd.f32 %v1744_v38, %v1416_v18  ;;  %v1417_v40 = vpop.f32.mrf.mxu1  ;;  %v1977_v18 = vpack.c.b16 %v12614_v10, %v12613_v29 }
 0x278   :  { %v1418_v15 = vadd.f32 %v1417_v40, %v1248_v24  ;;  %v5971_v24 = vld [vmem:[%s12185_s0 + $0x88] sm:$0xf] }
 0x279   :  { %v8118_v19 = vadd.f32 %v1913_v33, %v1745_v58 }
 0x27b   :  { %12612 = vst [vmem:[#allocation86_spill] sm:$0xff] %v8118_v19 }
 0x27e   :  { %v1746_v61 = vpop.f32.mrf.mxu2  ;;  %v1251_v38 = vpop.f32.mrf.mxu0 }
 0x27f   :  { %v1915_v1 = vpop.f32.mrf.mxu3  ;;  %v1747_v59 = vadd.f32 %v1746_v61, %v1418_v15  ;;  %v1420_v33 = vpop.f32.mrf.mxu1  ;;  %v5972_v15 = vor.u32 %v6354_v37, %v5971_v24  ;;  %v12619_v24 = vunpack.c.l.b16 %v6955_v32  ;;  %v12620_v37 = vunpack.c.l.b16 %v6974_v20  ;;  %v6356_v32 = vld [vmem:[%s12185_s0 + $0x9c] sm:$0xf0] }
 0x280   :  { %v1421_v58 = vadd.f32 %v1420_v33, %v1251_v38 }
 0x281   :  { %v8133_v40 = vadd.f32 %v1915_v1, %v1747_v59  ;;  %2227 = vmatmul.bf16.gmra.mxu0 %v1977_v18  ;;  %v3070_v1 = vshrl.u32 %v5964_v57, 16  ;;  %v3074_v10 = vshll.u32 %v5972_v15, 16  ;;  %v3080_v18 = vor.u32 %v3078_v36, %v3068_v55 }
 0x282   :  { %2396 = vmatmul.bf16.gmra.mxu1 %v1978_v14  ;;  %v3084_v14 = vrot.slane %v3082_v34, 1  ;;  %v12622_v57 = vunpack.c.h.b16 %v6974_v20  ;;  %v6355_v20 = vld [vmem:[%s12185_s0 + $0x9c] sm:$0xf] }
 0x283   :  { %12617 = vst [vmem:[#allocation87_spill] sm:$0xff] %v8133_v40  ;;  %3668 = vmatmul.bf16.gmra.mxu2 %v3061_v3  ;;  %v3072_v38 = vor.u32 %v3070_v1, %v3060_v41  ;;  %v3076_v33 = vrot.slane %v3074_v10, 1  ;;  %v5981_v1 = vld [vmem:[%s12185_s0 + $0xa0] sm:$0xf0] }
 0x284   :  { %3837 = vmatmul.bf16.gmra.mxu3 %v3069_v27  ;;  %v1980_v22 = vpack.c.b16 %v12622_v57, %v12621_v12  ;;  %v3085_v55 = vsel %vm411_vm0, %v3080_v18, %v3084_v14  ;;  %v5984_v10 = vor.u32 %v6355_v20, %v5981_v1  ;;  %v3094_v12 = vshrl.u32 %v5976_v46, 16  ;;  %v12701_v40 = vld [vmem:[#allocation34_spill] sm:$0xff] }
 0x285   :  { %v3077_v41 = vsel %vm411_vm0, %v3072_v38, %v3076_v33  ;;  %v12627_v20 = vunpack.c.h.b16 %v6979_v31 }
 0x286   :  { %v1749_v9 = vpop.f32.mrf.mxu2  ;;  %v1253_v2 = vpop.f32.mrf.mxu0  ;;  %v3098_v57 = vshll.u32 %v5984_v10, 16 }
 0x287   :  { %v1918_v7 = vpop.f32.mrf.mxu3  ;;  %v1750_v21 = vadd.f32 %v1749_v9, %v1421_v58  ;;  %v1422_v61 = vpop.f32.mrf.mxu1  ;;  %v1979_v58 = vpack.c.b16 %v12620_v37, %v12619_v24 }
 0x288   :  { %v1423_v29 = vadd.f32 %v1422_v61, %v1253_v2  ;;  %v5979_v2 = vld [vmem:[%s12185_s0 + $0x98] sm:$0xf] }
 0x289   :  { %v8144_v59 = vadd.f32 %v1918_v7, %v1750_v21 }
 0x28b   :  { %12618 = vst [vmem:[#allocation88_spill] sm:$0xff] %v8144_v59 }
 0x28e   :  { %v1751_v3 = vpop.f32.mrf.mxu2  ;;  %v1256_v9 = vpop.f32.mrf.mxu0 }
 0x28f   :  { %v1920_v27 = vpop.f32.mrf.mxu3  ;;  %v1752_v26 = vadd.f32 %v1751_v3, %v1423_v29  ;;  %v1425_v7 = vpop.f32.mrf.mxu1  ;;  %v5980_v29 = vor.u32 %v6356_v32, %v5979_v2  ;;  %v12625_v2 = vunpack.c.l.b16 %v6979_v31  ;;  %v12626_v32 = vunpack.c.l.b16 %v7010_v62  ;;  %v6358_v31 = vld [vmem:[%s12185_s0 + $0xac] sm:$0xf0] }
 0x290   :  { %v1426_v21 = vadd.f32 %v1425_v7, %v1256_v9 }
 0x291   :  { %v8159_v61 = vadd.f32 %v1920_v27, %v1752_v26  ;;  %2232 = vmatmul.bf16.gmra.mxu0 %v1979_v58  ;;  %v3086_v27 = vshrl.u32 %v5972_v15, 16  ;;  %v3090_v37 = vshll.u32 %v5980_v29, 16  ;;  %v3096_v58 = vor.u32 %v3094_v12, %v3084_v14 }
 0x292   :  { %2401 = vmatmul.bf16.gmra.mxu1 %v1980_v22  ;;  %v3100_v22 = vrot.slane %v3098_v57, 1  ;;  %v12628_v15 = vunpack.c.h.b16 %v7010_v62  ;;  %v6357_v62 = vld [vmem:[%s12185_s0 + $0xac] sm:$0xf] }
 0x293   :  { %12623 = vst [vmem:[#allocation89_spill] sm:$0xff] %v8159_v61  ;;  %3673 = vmatmul.bf16.gmra.mxu2 %v3077_v41  ;;  %v3088_v9 = vor.u32 %v3086_v27, %v3076_v33  ;;  %v3092_v7 = vrot.slane %v3090_v37, 1  ;;  %v5989_v27 = vld [vmem:[%s12185_s0 + $0xb0] sm:$0xf0]  ;;  %v12693_v61 = vld [vmem:[#allocation30_spill] sm:$0xff] }
 0x294   :  { %3842 = vmatmul.bf16.gmra.mxu3 %v3085_v55  ;;  %v1982_v1 = vpack.c.b16 %v12628_v15, %v12627_v20  ;;  %v3101_v14 = vsel %vm411_vm0, %v3096_v58, %v3100_v22  ;;  %v5992_v12 = vor.u32 %v6357_v62, %v5989_v27  ;;  %v3110_v15 = vshrl.u32 %v5984_v10, 16 }
 0x295   :  { %v3093_v33 = vsel %vm411_vm0, %v3088_v9, %v3092_v7  ;;  %v12633_v10 = vunpack.c.h.b16 %v7034_v43 }
 0x296   :  { %v1754_v36 = vpop.f32.mrf.mxu2  ;;  %v1258_v18 = vpop.f32.mrf.mxu0 }
 0x297   :  { %v1923_v34 = vpop.f32.mrf.mxu3  ;;  %v1755_v38 = vadd.f32 %v1754_v36, %v1426_v21  ;;  %v1427_v3 = vpop.f32.mrf.mxu1  ;;  %v1981_v21 = vpack.c.b16 %v12626_v32, %v12625_v2  ;;  %v3102_v2 = vshrl.u32 %v5980_v29, 16  ;;  %v12632_v29 = vunpack.c.h.b16 %v7015_v63 }
 0x298   :  { %v1428_v24 = vadd.f32 %v1427_v3, %v1258_v18  ;;  %v5987_v18 = vld [vmem:[%s12185_s0 + $0xa8] sm:$0xf] }
 0x299   :  { %v8170_v26 = vadd.f32 %v1923_v34, %v1755_v38  ;;  %v5988_v37 = vor.u32 %v6358_v31, %v5987_v18  ;;  %v12630_v18 = vunpack.c.l.b16 %v7015_v63  ;;  %v12631_v31 = vunpack.c.l.b16 %v7034_v43  ;;  %v6360_v63 = vld [vmem:[%s12185_s0 + $0xbc] sm:$0xf0]  ;;  %v6359_v43 = vld [vmem:[%s12185_s0 + $0xbc] sm:$0xf] }
 0x29a   :  { %v1984_v27 = vpack.c.b16 %v12633_v10, %v12632_v29 }
 0x29b   :  { %12624 = vst [vmem:[#allocation90_spill] sm:$0xff] %v8170_v26  ;;  %v3106_v20 = vshll.u32 %v5988_v37, 16  ;;  %v1983_v62 = vpack.c.b16 %v12631_v31, %v12630_v18  ;;  %v3126_v31 = vshrl.u32 %v5992_v12, 16 }
 0x29e   :  { %v1756_v41 = vpop.f32.mrf.mxu2  ;;  %v2198_v36 = vpop.f32.mrf.mxu0 }
 0x29f   :  { %v1925_v55 = vpop.f32.mrf.mxu3  ;;  %v1757_v46 = vadd.f32 %v1756_v41, %v1428_v24  ;;  %v2367_v34 = vpop.f32.mrf.mxu1 }
 0x2a0   :  { %v2368_v38 = vadd.f32 %v2367_v34, %v2198_v36  ;;  %v3112_v34 = vor.u32 %v3110_v15, %v3100_v22 }
 0x2a1   :  { %v8185_v3 = vadd.f32 %v1925_v55, %v1757_v46  ;;  %2237 = vmatmul.bf16.gmra.mxu0 %v1981_v21  ;;  %v3114_v46 = vshll.u32 %v5992_v12, 16  ;;  %v3104_v21 = vor.u32 %v3102_v2, %v3092_v7  ;;  %v12637_v12 = vunpack.c.h.b16 %v7066_v45 }
 0x2a2   :  { %v2527_v24 = vadd.f32 %v2368_v38, %v7061_v56  ;;  %2406 = vmatmul.bf16.gmra.mxu1 %v1982_v1  ;;  %v3108_v1 = vrot.slane %v3106_v20, 1 }
 0x2a3   :  { %12629 = vst [vmem:[#allocation91_spill] sm:$0xff] %v8185_v3  ;;  %3678 = vmatmul.bf16.gmra.mxu2 %v3093_v33  ;;  %v3116_v38 = vrot.slane %v3114_v46, 1  ;;  %v12685_v3 = vld [vmem:[#allocation26_spill] sm:$0xff] }
 0x2a4   :  { %3847 = vmatmul.bf16.gmra.mxu3 %v3101_v14  ;;  %v3109_v7 = vsel %vm411_vm0, %v3104_v21, %v3108_v1 }
 0x2a5   :  { %v3117_v22 = vsel %vm411_vm0, %v3112_v34, %v3116_v38 }
 0x2a6   :  { %v3639_v57 = vpop.f32.mrf.mxu2  ;;  %v2200_v41 = vpop.f32.mrf.mxu0 }
 0x2a7   :  { %v3808_v9 = vpop.f32.mrf.mxu3  ;;  %v2369_v55 = vpop.f32.mrf.mxu1 }
 0x2a8   :  { %v3809_v58 = vadd.f32 %v3808_v9, %v3639_v57  ;;  %v2370_v32 = vadd.f32 %v2369_v55, %v2200_v41  ;;  %v5997_v55 = vld [vmem:[%s12185_s0 + $0xc0] sm:$0xf0] }
 0x2a9   :  { %v6000_v20 = vor.u32 %v6359_v43, %v5997_v55 }
 0x2aa   :  { %v8197_v36 = vadd.f32 %v3809_v58, %v2527_v24  ;;  %v2528_v56 = vadd.f32 %v2370_v32, %v7079_v50  ;;  %v5995_v58 = vld [vmem:[%s12185_s0 + $0xb8] sm:$0xf] }
 0x2ab   :  { %v5996_v32 = vor.u32 %v6360_v63, %v5995_v58  ;;  %v3130_v29 = vshll.u32 %v6000_v20, 16 }
 0x2ad   :  { %v3122_v18 = vshll.u32 %v5996_v32, 16 }
 0x2ae   :  { %v3641_v33 = vpop.f32.mrf.mxu2  ;;  %v2203_v57 = vpop.f32.mrf.mxu0 }
 0x2af   :  { %v3810_v14 = vpop.f32.mrf.mxu3  ;;  %v2372_v9 = vpop.f32.mrf.mxu1 }
 0x2b0   :  { %v3811_v24 = vadd.f32 %v3810_v14, %v3641_v33  ;;  %v2373_v50 = vadd.f32 %v2372_v9, %v2203_v57  ;;  %v3118_v33 = vshrl.u32 %v5988_v37, 16  ;;  %v3132_v57 = vrot.slane %v3130_v29, 1 }
 0x2b1   :  { %2242 = vmatmul.bf16.gmra.mxu0 %v1983_v62  ;;  %v12636_v37 = vunpack.c.h.b16 %v7039_v44 }
 0x2b2   :  { %v8213_v41 = vadd.f32 %v3811_v24, %v2528_v56  ;;  %v2529_v2 = vadd.f32 %v2373_v50, %v7097_v52  ;;  %2411 = vmatmul.bf16.gmra.mxu1 %v1984_v27  ;;  %v3120_v62 = vor.u32 %v3118_v33, %v3108_v1  ;;  %v3124_v27 = vrot.slane %v3122_v18, 1 }
 0x2b3   :  { %3683 = vmatmul.bf16.gmra.mxu2 %v3109_v7  ;;  %v3128_v24 = vor.u32 %v3126_v31, %v3116_v38  ;;  %v12634_v7 = vunpack.c.l.b16 %v7039_v44  ;;  %v1986_v63 = vpack.c.b16 %v12637_v12, %v12636_v37  ;;  %v6362_v44 = vld [vmem:[%s12185_s0 + $0xcc] sm:$0xf0] }
 0x2b4   :  { %3852 = vmatmul.bf16.gmra.mxu3 %v3117_v22  ;;  %v12635_v22 = vunpack.c.l.b16 %v7066_v45  ;;  %v3125_v1 = vsel %vm411_vm0, %v3120_v62, %v3124_v27  ;;  %v6361_v45 = vld [vmem:[%s12185_s0 + $0xcc] sm:$0xf]  ;;  %v3134_v62 = vshrl.u32 %v5996_v32, 16  ;;  %v12640_v32 = vunpack.c.h.b16 %v7071_v60 }
 0x2b5   :  { %v3133_v38 = vsel %vm411_vm0, %v3128_v24, %v3132_v57 }
 0x2b6   :  { %v3644_v15 = vpop.f32.mrf.mxu2  ;;  %v2205_v21 = vpop.f32.mrf.mxu0  ;;  %v1985_v58 = vpack.c.b16 %v12635_v22, %v12634_v7 }
 0x2b7   :  { %v3813_v46 = vpop.f32.mrf.mxu3  ;;  %v2374_v34 = vpop.f32.mrf.mxu1 }
 0x2b8   :  { %v3814_v56 = vadd.f32 %v3813_v46, %v3644_v15  ;;  %v2375_v14 = vadd.f32 %v2374_v34, %v2205_v21  ;;  %v6003_v15 = vld [vmem:[%s12185_s0 + $0xc8] sm:$0xf] }
 0x2b9   :  { %v6004_v34 = vor.u32 %v6362_v44, %v6003_v15 }
 0x2ba   :  { %v8225_v10 = vadd.f32 %v3814_v56, %v2529_v2  ;;  %v2530_v52 = vadd.f32 %v2375_v14, %v7115_v35  ;;  %v6005_v56 = vld [vmem:[%s12185_s0 + $0xd0] sm:$0xf0] }
 0x2bb   :  { %v6008_v33 = vor.u32 %v6361_v45, %v6005_v56  ;;  %v6011_v56 = vld [vmem:[%s12185_s0 + $0xd8] sm:$0xf] }
 0x2bd   :  { %v3146_v7 = vshll.u32 %v6008_v33, 16 }
 0x2be   :  { %v3646_v9 = vpop.f32.mrf.mxu2  ;;  %v2208_v55 = vpop.f32.mrf.mxu0 }
 0x2bf   :  { %v3815_v50 = vpop.f32.mrf.mxu3  ;;  %v2377_v2 = vpop.f32.mrf.mxu1 }
 0x2c0   :  { %v3816_v43 = vadd.f32 %v3815_v50, %v3646_v9  ;;  %v2378_v35 = vadd.f32 %v2377_v2, %v2208_v55  ;;  %v3138_v9 = vshll.u32 %v6004_v34, 16  ;;  %v3142_v50 = vshrl.u32 %v6000_v20, 16 }
 0x2c1   :  { %2247 = vmatmul.bf16.gmra.mxu0 %v1985_v58  ;;  %v3136_v58 = vor.u32 %v3134_v62, %v3124_v27  ;;  %v12638_v2 = vunpack.c.l.b16 %v7071_v60  ;;  %v12641_v20 = vunpack.c.h.b16 %v7102_v48  ;;  %v6364_v60 = vld [vmem:[%s12185_s0 + $0xdc] sm:$0xf0] }
 0x2c2   :  { %v8241_v46 = vadd.f32 %v3816_v43, %v2530_v52  ;;  %v2531_v21 = vadd.f32 %v2378_v35, %v7141_v6  ;;  %2416 = vmatmul.bf16.gmra.mxu1 %v1986_v63  ;;  %v3140_v37 = vrot.slane %v3138_v9, 1  ;;  %v3144_v12 = vor.u32 %v3142_v50, %v3132_v57 }
 0x2c3   :  { %3688 = vmatmul.bf16.gmra.mxu2 %v3125_v1  ;;  %v3148_v63 = vrot.slane %v3146_v7, 1  ;;  %v12639_v35 = vunpack.c.l.b16 %v7102_v48  ;;  %v6363_v48 = vld [vmem:[%s12185_s0 + $0xdc] sm:$0xf]  ;;  %v3150_v7 = vshrl.u32 %v6004_v34, 16  ;;  %v12644_v34 = vunpack.c.h.b16 %v7107_v8 }
 0x2c4   :  { %3857 = vmatmul.bf16.gmra.mxu3 %v3133_v38  ;;  %v1988_v38 = vpack.c.b16 %v12641_v20, %v12640_v32  ;;  %v3141_v27 = vsel %vm411_vm0, %v3136_v58, %v3140_v37 }
 0x2c5   :  { %v1987_v1 = vpack.c.b16 %v12639_v35, %v12638_v2  ;;  %v3149_v57 = vsel %vm411_vm0, %v3144_v12, %v3148_v63  ;;  %v3158_v12 = vshrl.u32 %v6008_v33, 16  ;;  %v3152_v2 = vor.u32 %v3150_v7, %v3140_v37 }
 0x2c6   :  { %v3649_v14 = vpop.f32.mrf.mxu2  ;;  %v2210_v29 = vpop.f32.mrf.mxu0  ;;  %v12645_v33 = vunpack.c.h.b16 %v7152_v28 }
 0x2c7   :  { %v3818_v18 = vpop.f32.mrf.mxu3  ;;  %v2379_v52 = vpop.f32.mrf.mxu1 }
 0x2c8   :  { %v3819_v31 = vadd.f32 %v3818_v18, %v3649_v14  ;;  %v2380_v24 = vadd.f32 %v2379_v52, %v2210_v29  ;;  %v6013_v14 = vld [vmem:[%s12185_s0 + $0xe0] sm:$0xf0] }
 0x2c9   :  { %v6016_v29 = vor.u32 %v6363_v48, %v6013_v14  ;;  %v6021_v14 = vld [vmem:[%s12185_s0 + $0xf0] sm:$0xf0] }
 0x2ca   :  { %v8253_v22 = vadd.f32 %v3819_v31, %v2531_v21  ;;  %v2532_v6 = vadd.f32 %v2380_v24, %v7165_v49  ;;  %v6012_v31 = vor.u32 %v6364_v60, %v6011_v56  ;;  %v6019_v60 = vld [vmem:[%s12185_s0 + $0xe8] sm:$0xf] }
 0x2cc   :  { %v3154_v58 = vshll.u32 %v6012_v31, 16 }
 0x2ce   :  { %v3651_v43 = vpop.f32.mrf.mxu2  ;;  %v2213_v44 = vpop.f32.mrf.mxu0  ;;  %v3156_v35 = vrot.slane %v3154_v58, 1  ;;  %v3166_v58 = vshrl.u32 %v6012_v31, 16 }
 0x2cf   :  { %v3820_v55 = vpop.f32.mrf.mxu3  ;;  %v2382_v45 = vpop.f32.mrf.mxu1 }
 0x2d0   :  { %v3821_v15 = vadd.f32 %v3820_v55, %v3651_v43  ;;  %v2383_v49 = vadd.f32 %v2382_v45, %v2213_v44  ;;  %v3162_v43 = vshll.u32 %v6016_v29, 16  ;;  %v12643_v44 = vunpack.c.l.b16 %v7152_v28  ;;  %v6365_v28 = vld [vmem:[%s12185_s0 + $0xec] sm:$0xf] }
 0x2d1   :  { %2252 = vmatmul.bf16.gmra.mxu0 %v1987_v1  ;;  %v3160_v1 = vor.u32 %v3158_v12, %v3148_v63  ;;  %v3157_v37 = vsel %vm411_vm0, %v3152_v2, %v3156_v35 }
 0x2d2   :  { %v8269_v21 = vadd.f32 %v3821_v15, %v2532_v6  ;;  %v2533_v18 = vadd.f32 %v2383_v49, %v7185_v16  ;;  %2421 = vmatmul.bf16.gmra.mxu1 %v1988_v38  ;;  %v3164_v32 = vrot.slane %v3162_v43, 1  ;;  %v12642_v15 = vunpack.c.l.b16 %v7107_v8  ;;  %v6366_v8 = vld [vmem:[%s12185_s0 + $0xec] sm:$0xf0] }
 0x2d3   :  { %3693 = vmatmul.bf16.gmra.mxu2 %v3141_v27  ;;  %v1990_v49 = vpack.c.b16 %v12645_v33, %v12644_v34  ;;  %v12646_v33 = vld [vmem:[#allocation2_spill] sm:$0xff] }
 0x2d4   :  { %3862 = vmatmul.bf16.gmra.mxu3 %v3149_v57  ;;  %v1989_v45 = vpack.c.b16 %v12643_v44, %v12642_v15  ;;  %v3165_v63 = vsel %vm411_vm0, %v3160_v1, %v3164_v32  ;;  %v12650_v31 = vunpack.c.h.b16 %v12646_v33 }
 0x2d6   :  { %v3654_v52 = vpop.f32.mrf.mxu2  ;;  %v2215_v9 = vpop.f32.mrf.mxu0 }
 0x2d7   :  { %v3823_v62 = vpop.f32.mrf.mxu3  ;;  %v2384_v50 = vpop.f32.mrf.mxu1 }
 0x2d8   :  { %v3824_v24 = vadd.f32 %v3823_v62, %v3654_v52  ;;  %v2385_v6 = vadd.f32 %v2384_v50, %v2215_v9  ;;  %v6020_v52 = vor.u32 %v6366_v8, %v6019_v60  ;;  %v6024_v62 = vor.u32 %v6365_v28, %v6021_v14  ;;  %v6027_v8 = vld [vmem:[%s12185_s0 + $0xf8] sm:$0xf]  ;;  %v6368_v14 = vld [vmem:[%s12185_s0 + $0xfc] sm:$0xf0] }
 0x2da   :  { %v8281_v55 = vadd.f32 %v3824_v24, %v2533_v18  ;;  %v2534_v16 = vadd.f32 %v2385_v6, %v7203_v30  ;;  %v3170_v43 = vshll.u32 %v6020_v52, 16  ;;  %v3178_v2 = vshll.u32 %v6024_v62, 16 }
 0x2dc   :  { %v3180_v44 = vrot.slane %v3178_v2, 1 }
 0x2de   :  { %v3656_v20 = vpop.f32.mrf.mxu2  ;;  %v2218_v57 = vpop.f32.mrf.mxu0 }
 0x2df   :  { %v3825_v38 = vpop.f32.mrf.mxu3  ;;  %v2387_v56 = vpop.f32.mrf.mxu1 }
 0x2e0   :  { %v3826_v27 = vadd.f32 %v3825_v38, %v3656_v20  ;;  %v2388_v30 = vadd.f32 %v2387_v56, %v2218_v57  ;;  %v3168_v20 = vor.u32 %v3166_v58, %v3156_v35  ;;  %v3172_v38 = vrot.slane %v3170_v43, 1 }
 0x2e1   :  { %2257 = vmatmul.bf16.gmra.mxu0 %v1989_v45 }
 0x2e2   :  { %v8297_v48 = vadd.f32 %v3826_v27, %v2534_v16  ;;  %v2535_v18 = vadd.f32 %v2388_v30, %v7223_v47  ;;  %2426 = vmatmul.bf16.gmra.mxu1 %v1990_v49  ;;  %v3174_v16 = vshrl.u32 %v6016_v29, 16  ;;  %v12647_v49 = vunpack.c.l.b16 %v12646_v33  ;;  %v12648_v27 = vld [vmem:[#allocation3_spill] sm:$0xff] }
 0x2e3   :  { %3698 = vmatmul.bf16.gmra.mxu2 %v3157_v37  ;;  %v12649_v57 = vunpack.c.l.b16 %v12648_v27  ;;  %v12651_v29 = vunpack.c.h.b16 %v12648_v27  ;;  %v3173_v35 = vsel %vm411_vm0, %v3168_v20, %v3172_v38 }
 0x2e4   :  { %3867 = vmatmul.bf16.gmra.mxu3 %v3165_v63  ;;  %v3176_v15 = vor.u32 %v3174_v16, %v3164_v32 }
 0x2e5   :  { %v1991_v56 = vpack.c.b16 %v12649_v57, %v12647_v49  ;;  %v1992_v30 = vpack.c.b16 %v12651_v29, %v12650_v31  ;;  %v12653_v49 = vld [vmem:[#allocation10_spill] sm:$0xff] }
 0x2e6   :  { %v3659_v24 = vpop.f32.mrf.mxu2  ;;  %v2220_v7 = vpop.f32.mrf.mxu0  ;;  %v3181_v32 = vsel %vm411_vm0, %v3176_v15, %v3180_v44 }
 0x2e7   :  { %v3828_v9 = vpop.f32.mrf.mxu3  ;;  %v2389_v6 = vpop.f32.mrf.mxu1 }
 0x2e8   :  { %v3829_v50 = vadd.f32 %v3828_v9, %v3659_v24  ;;  %v2390_v12 = vadd.f32 %v2389_v6, %v2220_v7  ;;  %v6029_v24 = vld [vmem:[%s12185_s0 + $0x100] sm:$0xf0]  ;;  %v12652_v9 = vld [vmem:[#allocation7_spill] sm:$0xff]  ;;  %v6028_v7 = vor.u32 %v6368_v14, %v6027_v8 }
 0x2ea   :  { %v8309_v1 = vadd.f32 %v3829_v50, %v2535_v18  ;;  %v2536_v47 = vadd.f32 %v2390_v12, %v7241_v23  ;;  %v6367_v18 = vld [vmem:[%s12185_s0 + $0xfc] sm:$0xf]  ;;  %v3186_v15 = vshll.u32 %v6028_v7, 16 }
 0x2eb   :  { %v6032_v6 = vor.u32 %v6367_v18, %v6029_v24 }
 0x2ee   :  { %v3661_v45 = vpop.f32.mrf.mxu2  ;;  %v2223_v63 = vpop.f32.mrf.mxu0 }
 0x2ef   :  { %v3830_v34 = vpop.f32.mrf.mxu3  ;;  %v2392_v60 = vpop.f32.mrf.mxu1 }
 0x2f0   :  { %v3831_v37 = vadd.f32 %v3830_v34, %v3661_v45  ;;  %v2393_v23 = vadd.f32 %v2392_v60, %v2223_v63  ;;  %v3190_v45 = vshrl.u32 %v6024_v62, 16  ;;  %v3194_v34 = vshll.u32 %v6032_v6, 16  ;;  %v12654_v63 = vld [vmem:[#allocation4_spill] sm:$0xff] }
 0x2f1   :  { %2262 = vmatmul.bf16.gmra.mxu0 %v1991_v56  ;;  %v3188_v56 = vrot.slane %v3186_v15, 1  ;;  %v12655_v60 = vunpack.c.l.b16 %v12654_v63 }
 0x2f2   :  { %v8325_v28 = vadd.f32 %v3831_v37, %v2536_v47  ;;  %v2537_v50 = vadd.f32 %v2393_v23, %v12652_v9  ;;  %2431 = vmatmul.bf16.gmra.mxu1 %v1992_v30  ;;  %v3182_v47 = vshrl.u32 %v6020_v52, 16  ;;  %v3192_v31 = vor.u32 %v3190_v45, %v3180_v44  ;;  %v12656_v23 = vld [vmem:[#allocation5_spill] sm:$0xff] }
 0x2f3   :  { %3703 = vmatmul.bf16.gmra.mxu2 %v3173_v35  ;;  %v3196_v29 = vrot.slane %v3194_v34, 1  ;;  %v12657_v35 = vunpack.c.l.b16 %v12656_v23  ;;  %v12658_v52 = vunpack.c.h.b16 %v12654_v63  ;;  %v12659_v62 = vunpack.c.h.b16 %v12656_v23 }
 0x2f4   :  { %3872 = vmatmul.bf16.gmra.mxu3 %v3181_v32  ;;  %v3184_v57 = vor.u32 %v3182_v47, %v3172_v38  ;;  %v3206_v63 = vshrl.u32 %v6032_v6, 16 }
 0x2f5   :  { %v1993_v32 = vpack.c.b16 %v12657_v35, %v12655_v60  ;;  %v1994_v8 = vpack.c.b16 %v12659_v62, %v12658_v52  ;;  %v3197_v44 = vsel %vm411_vm0, %v3192_v31, %v3196_v29  ;;  %v3198_v31 = vshrl.u32 %v6028_v7, 16  ;;  %v12661_v35 = vld [vmem:[#allocation14_spill] sm:$0xff] }
 0x2f6   :  { %v3664_v58 = vpop.f32.mrf.mxu2  ;;  %v2225_v16 = vpop.f32.mrf.mxu0  ;;  %v3189_v38 = vsel %vm411_vm0, %v3184_v57, %v3188_v56 }
 0x2f7   :  { %v3833_v12 = vpop.f32.mrf.mxu3  ;;  %v2394_v2 = vpop.f32.mrf.mxu1 }
 0x2f8   :  { %v3834_v43 = vadd.f32 %v3833_v12, %v3664_v58  ;;  %v2395_v20 = vadd.f32 %v2394_v2, %v2225_v16  ;;  %v6370_v12 = vld [vmem:[%s12185_s0 + $0x10c] sm:$0xf0]  ;;  %v6037_v16 = vld [vmem:[%s12185_s0 + $0x110] sm:$0xf0]  ;;  %v12660_v2 = vld [vmem:[#allocation11_spill] sm:$0xff] }
 0x2fa   :  { %v8337_v33 = vadd.f32 %v3834_v43, %v2537_v50  ;;  %v2538_v27 = vadd.f32 %v2395_v20, %v12653_v49  ;;  %v6035_v50 = vld [vmem:[%s12185_s0 + $0x108] sm:$0xf]  ;;  %v6369_v43 = vld [vmem:[%s12185_s0 + $0x10c] sm:$0xf] }
 0x2fb   :  { %v6036_v20 = vor.u32 %v6370_v12, %v6035_v50  ;;  %v6040_v15 = vor.u32 %v6369_v43, %v6037_v16 }
 0x2fd   :  { %v3210_v60 = vshll.u32 %v6040_v15, 16 }
 0x2fe   :  { %v3666_v30 = vpop.f32.mrf.mxu2  ;;  %v2228_v18 = vpop.f32.mrf.mxu0 }
 0x2ff   :  { %v3835_v37 = vpop.f32.mrf.mxu3  ;;  %v2397_v24 = vpop.f32.mrf.mxu1 }
 0x300   :  { %v3836_v14 = vadd.f32 %v3835_v37, %v3666_v30  ;;  %v2398_v9 = vadd.f32 %v2397_v24, %v2228_v18  ;;  %v3202_v37 = vshll.u32 %v6036_v20, 16 }
 0x301   :  { %2267 = vmatmul.bf16.gmra.mxu0 %v1993_v32  ;;  %v3200_v32 = vor.u32 %v3198_v31, %v3188_v56  ;;  %v6045_v31 = vld [vmem:[%s12185_s0 + $0x120] sm:$0xf0] }
 0x302   :  { %v8353_v58 = vadd.f32 %v3836_v14, %v2538_v27  ;;  %v2539_v47 = vadd.f32 %v2398_v9, %v12660_v2  ;;  %2436 = vmatmul.bf16.gmra.mxu1 %v1994_v8  ;;  %v3204_v62 = vrot.slane %v3202_v37, 1  ;;  %v3208_v8 = vor.u32 %v3206_v63, %v3196_v29  ;;  %v12662_v9 = vld [vmem:[#allocation6_spill] sm:$0xff] }
 0x303   :  { %3708 = vmatmul.bf16.gmra.mxu2 %v3189_v38  ;;  %v3212_v14 = vrot.slane %v3210_v60, 1  ;;  %v12663_v38 = vunpack.c.l.b16 %v12662_v9  ;;  %v12666_v7 = vunpack.c.h.b16 %v12662_v9 }
 0x304   :  { %3877 = vmatmul.bf16.gmra.mxu3 %v3197_v44  ;;  %v12664_v44 = vld [vmem:[#allocation8_spill] sm:$0xff]  ;;  %v3205_v56 = vsel %vm411_vm0, %v3200_v32, %v3204_v62 }
 0x305   :  { %v12665_v50 = vunpack.c.l.b16 %v12664_v44  ;;  %v12667_v6 = vunpack.c.h.b16 %v12664_v44  ;;  %v3213_v29 = vsel %vm411_vm0, %v3208_v8, %v3212_v14  ;;  %v3222_v44 = vshrl.u32 %v6040_v15, 16 }
 0x306   :  { %v3669_v45 = vpop.f32.mrf.mxu2  ;;  %v2230_v27 = vpop.f32.mrf.mxu0 }
 0x307   :  { %v3838_v34 = vpop.f32.mrf.mxu3  ;;  %v2399_v57 = vpop.f32.mrf.mxu1  ;;  %v1995_v12 = vpack.c.b16 %v12665_v50, %v12663_v38  ;;  %v1996_v43 = vpack.c.b16 %v12667_v6, %v12666_v7  ;;  %v12669_v6 = vld [vmem:[#allocation18_spill] sm:$0xff] }
 0x308   :  { %v3839_v49 = vadd.f32 %v3838_v34, %v3669_v45  ;;  %v2400_v30 = vadd.f32 %v2399_v57, %v2230_v27  ;;  %v6043_v34 = vld [vmem:[%s12185_s0 + $0x118] sm:$0xf]  ;;  %v6372_v27 = vld [vmem:[%s12185_s0 + $0x11c] sm:$0xf0]  ;;  %v6371_v57 = vld [vmem:[%s12185_s0 + $0x11c] sm:$0xf] }
 0x309   :  { %v6044_v63 = vor.u32 %v6372_v27, %v6043_v34  ;;  %v6048_v60 = vor.u32 %v6371_v57, %v6045_v31  ;;  %v12672_v27 = vld [vmem:[#allocation12_spill] sm:$0xff] }
 0x30a   :  { %v8365_v23 = vadd.f32 %v3839_v49, %v2539_v47  ;;  %v2540_v52 = vadd.f32 %v2400_v30, %v12661_v35  ;;  %v12668_v30 = vld [vmem:[#allocation15_spill] sm:$0xff]  ;;  %v12673_v57 = vunpack.c.l.b16 %v12672_v27  ;;  %v12675_v15 = vunpack.c.h.b16 %v12672_v27 }
 0x30b   :  { %v3218_v38 = vshll.u32 %v6044_v63, 16  ;;  %v3226_v50 = vshll.u32 %v6048_v60, 16 }
 0x30e   :  { %v3671_v18 = vpop.f32.mrf.mxu2  ;;  %v2233_v2 = vpop.f32.mrf.mxu0 }
 0x30f   :  { %v3840_v24 = vpop.f32.mrf.mxu3  ;;  %v2402_v47 = vpop.f32.mrf.mxu1 }
 0x310   :  { %v3841_v16 = vadd.f32 %v3840_v24, %v3671_v18  ;;  %v2403_v45 = vadd.f32 %v2402_v47, %v2233_v2  ;;  %v3214_v24 = vshrl.u32 %v6036_v20, 16  ;;  %v3224_v2 = vor.u32 %v3222_v44, %v3212_v14  ;;  %v12676_v44 = vld [vmem:[#allocation19_spill] sm:$0xff] }
 0x311   :  { %2272 = vmatmul.bf16.gmra.mxu0 %v1995_v12  ;;  %v3228_v47 = vrot.slane %v3226_v50, 1 }
 0x312   :  { %v8381_v49 = vadd.f32 %v3841_v16, %v2540_v52  ;;  %v2541_v37 = vadd.f32 %v2403_v45, %v12668_v30  ;;  %2441 = vmatmul.bf16.gmra.mxu1 %v1996_v43  ;;  %v3216_v12 = vor.u32 %v3214_v24, %v3204_v62  ;;  %v3220_v43 = vrot.slane %v3218_v38, 1  ;;  %v6374_v24 = vld [vmem:[%s12185_s0 + $0x12c] sm:$0xf0]  ;;  %v6053_v38 = vld [vmem:[%s12185_s0 + $0x130] sm:$0xf0] }
 0x313   :  { %3713 = vmatmul.bf16.gmra.mxu2 %v3205_v56  ;;  %v3229_v14 = vsel %vm411_vm0, %v3224_v2, %v3228_v47 }
 0x314   :  { %3882 = vmatmul.bf16.gmra.mxu3 %v3213_v29  ;;  %v12670_v29 = vld [vmem:[#allocation9_spill] sm:$0xff]  ;;  %v3221_v62 = vsel %vm411_vm0, %v3216_v12, %v3220_v43 }
 0x315   :  { %v12671_v34 = vunpack.c.l.b16 %v12670_v29  ;;  %v12674_v20 = vunpack.c.h.b16 %v12670_v29 }
 0x316   :  { %v3674_v35 = vpop.f32.mrf.mxu2  ;;  %v2235_v8 = vpop.f32.mrf.mxu0 }
 0x317   :  { %v3843_v52 = vpop.f32.mrf.mxu3  ;;  %v2404_v18 = vpop.f32.mrf.mxu1  ;;  %v1997_v31 = vpack.c.b16 %v12673_v57, %v12671_v34  ;;  %v1998_v30 = vpack.c.b16 %v12675_v15, %v12674_v20  ;;  %v3230_v34 = vshrl.u32 %v6044_v63, 16  ;;  %v3238_v20 = vshrl.u32 %v6048_v60, 16 }
 0x318   :  { %v3844_v32 = vadd.f32 %v3843_v52, %v3674_v35  ;;  %v2405_v9 = vadd.f32 %v2404_v18, %v2235_v8  ;;  %v6051_v8 = vld [vmem:[%s12185_s0 + $0x128] sm:$0xf] }
 0x31a   :  { %v8393_v7 = vadd.f32 %v3844_v32, %v2541_v37  ;;  %v2542_v16 = vadd.f32 %v2405_v9, %v12669_v6  ;;  %v6373_v9 = vld [vmem:[%s12185_s0 + $0x12c] sm:$0xf]  ;;  %v6052_v6 = vor.u32 %v6374_v24, %v6051_v8  ;;  %v12678_v24 = vld [vmem:[#allocation13_spill] sm:$0xff] }
 0x31b   :  { %v12682_v63 = vunpack.c.h.b16 %v12678_v24 }
 0x31c   :  { %v3234_v57 = vshll.u32 %v6052_v6, 16 }
 0x31e   :  { %v3676_v45 = vpop.f32.mrf.mxu2  ;;  %v2238_v35 = vpop.f32.mrf.mxu0 }
 0x31f   :  { %v3845_v56 = vpop.f32.mrf.mxu3  ;;  %v2407_v52 = vpop.f32.mrf.mxu1 }
 0x320   :  { %v3846_v37 = vadd.f32 %v3845_v56, %v3676_v45  ;;  %v2408_v32 = vadd.f32 %v2407_v52, %v2238_v35  ;;  %v12677_v35 = vld [vmem:[#allocation22_spill] sm:$0xff] }
 0x321   :  { %2277 = vmatmul.bf16.gmra.mxu0 %v1997_v31  ;;  %v3232_v31 = vor.u32 %v3230_v34, %v3220_v43  ;;  %v6059_v34 = vld [vmem:[%s12185_s0 + $0x138] sm:$0xf] }
 0x322   :  { %v8409_v18 = vadd.f32 %v3846_v37, %v2542_v16  ;;  %v2543_v50 = vadd.f32 %v2408_v32, %v12676_v44  ;;  %2446 = vmatmul.bf16.gmra.mxu1 %v1998_v30  ;;  %v6056_v16 = vor.u32 %v6373_v9, %v6053_v38  ;;  %v3236_v30 = vrot.slane %v3234_v57, 1  ;;  %v12680_v38 = vld [vmem:[#allocation16_spill] sm:$0xff]  ;;  %v6376_v57 = vld [vmem:[%s12185_s0 + $0x13c] sm:$0xf0] }
 0x323   :  { %3718 = vmatmul.bf16.gmra.mxu2 %v3221_v62  ;;  %v3240_v32 = vor.u32 %v3238_v20, %v3228_v47  ;;  %v12679_v9 = vunpack.c.l.b16 %v12678_v24  ;;  %v12681_v44 = vunpack.c.l.b16 %v12680_v38  ;;  %v12683_v60 = vunpack.c.h.b16 %v12680_v38  ;;  %v6375_v20 = vld [vmem:[%s12185_s0 + $0x13c] sm:$0xf] }
 0x324   :  { %3887 = vmatmul.bf16.gmra.mxu3 %v3229_v14  ;;  %v3242_v15 = vshll.u32 %v6056_v16, 16  ;;  %v3237_v43 = vsel %vm411_vm0, %v3232_v31, %v3236_v30 }
 0x326   :  { %v3679_v12 = vpop.f32.mrf.mxu2  ;;  %v2240_v56 = vpop.f32.mrf.mxu0  ;;  %v3244_v62 = vrot.slane %v3242_v15, 1  ;;  %v6061_v15 = vld [vmem:[%s12185_s0 + $0x140] sm:$0xf0] }
 0x327   :  { %v3848_v2 = vpop.f32.mrf.mxu3  ;;  %v2409_v29 = vpop.f32.mrf.mxu1 }
 0x328   :  { %v3849_v45 = vadd.f32 %v3848_v2, %v3679_v12  ;;  %v2410_v27 = vadd.f32 %v2409_v29, %v2240_v56  ;;  %v1999_v12 = vpack.c.b16 %v12681_v44, %v12679_v9  ;;  %v2000_v2 = vpack.c.b16 %v12683_v60, %v12682_v63 }
 0x329   :  { %v3245_v47 = vsel %vm411_vm0, %v3240_v32, %v3244_v62  ;;  %v6064_v32 = vor.u32 %v6375_v20, %v6061_v15  ;;  %v3246_v44 = vshrl.u32 %v6052_v6, 16  ;;  %v12686_v20 = vld [vmem:[#allocation17_spill] sm:$0xff] }
 0x32a   :  { %v8421_v37 = vadd.f32 %v3849_v45, %v2543_v50  ;;  %v2544_v52 = vadd.f32 %v2410_v27, %v12677_v35  ;;  %v12684_v35 = vld [vmem:[#allocation23_spill] sm:$0xff]  ;;  %v12687_v15 = vunpack.c.l.b16 %v12686_v20  ;;  %v12690_v6 = vunpack.c.h.b16 %v12686_v20 }
 0x32e   :  { %v3681_v14 = vpop.f32.mrf.mxu2  ;;  %v2243_v45 = vpop.f32.mrf.mxu0 }
 0x32f   :  { %v3850_v8 = vpop.f32.mrf.mxu3  ;;  %v2412_v56 = vpop.f32.mrf.mxu1 }
 0x330   :  { %v3851_v50 = vadd.f32 %v3850_v8, %v3681_v14  ;;  %v2413_v29 = vadd.f32 %v2412_v56, %v2243_v45  ;;  %v3258_v45 = vshll.u32 %v6064_v32, 16 }
 0x331   :  { %2282 = vmatmul.bf16.gmra.mxu0 %v1999_v12  ;;  %v3248_v12 = vor.u32 %v3246_v44, %v3236_v30  ;;  %v6067_v44 = vld [vmem:[%s12185_s0 + $0x148] sm:$0xf] }
 0x332   :  { %v8437_v27 = vadd.f32 %v3851_v50, %v2544_v52  ;;  %v2545_v31 = vadd.f32 %v2413_v29, %v12684_v35  ;;  %2451 = vmatmul.bf16.gmra.mxu1 %v2000_v2  ;;  %v6060_v52 = vor.u32 %v6376_v57, %v6059_v34  ;;  %v3254_v50 = vshrl.u32 %v6056_v16, 16  ;;  %v12688_v35 = vld [vmem:[#allocation20_spill] sm:$0xff] }
 0x333   :  { %3723 = vmatmul.bf16.gmra.mxu2 %v3237_v43  ;;  %v12691_v16 = vunpack.c.h.b16 %v12688_v35 }
 0x334   :  { %3892 = vmatmul.bf16.gmra.mxu3 %v3245_v47  ;;  %v3250_v60 = vshll.u32 %v6060_v52, 16  ;;  %v3256_v43 = vor.u32 %v3254_v50, %v3244_v62  ;;  %v3260_v47 = vrot.slane %v3258_v45, 1  ;;  %v6377_v50 = vld [vmem:[%s12185_s0 + $0x14c] sm:$0xf]  ;;  %v6069_v45 = vld [vmem:[%s12185_s0 + $0x150] sm:$0xf0] }
 0x336   :  { %v3684_v14 = vpop.f32.mrf.mxu2  ;;  %v2245_v9 = vpop.f32.mrf.mxu0  ;;  %v3252_v2 = vrot.slane %v3250_v60, 1  ;;  %v3261_v62 = vsel %vm411_vm0, %v3256_v43, %v3260_v47  ;;  %v6378_v60 = vld [vmem:[%s12185_s0 + $0x14c] sm:$0xf0] }
 0x337   :  { %v3853_v8 = vpop.f32.mrf.mxu3  ;;  %v2414_v38 = vpop.f32.mrf.mxu1 }
 0x338   :  { %v3854_v24 = vadd.f32 %v3853_v8, %v3684_v14  ;;  %v2415_v63 = vadd.f32 %v2414_v38, %v2245_v9  ;;  %v12689_v14 = vunpack.c.l.b16 %v12688_v35  ;;  %v2002_v9 = vpack.c.b16 %v12691_v16, %v12690_v6 }
 0x339   :  { %v3253_v30 = vsel %vm411_vm0, %v3248_v12, %v3252_v2  ;;  %v12692_v12 = vld [vmem:[#allocation27_spill] sm:$0xff]  ;;  %v3262_v6 = vshrl.u32 %v6060_v52, 16 }
 0x33a   :  { %v8449_v56 = vadd.f32 %v3854_v24, %v2545_v31  ;;  %v2546_v29 = vadd.f32 %v2415_v63, %v12685_v3  ;;  %v2001_v8 = vpack.c.b16 %v12689_v14, %v12687_v15 }
 0x33e   :  { %v3686_v34 = vpop.f32.mrf.mxu2  ;;  %v2248_v24 = vpop.f32.mrf.mxu0 }
 0x33f   :  { %v3855_v57 = vpop.f32.mrf.mxu3  ;;  %v2417_v38 = vpop.f32.mrf.mxu1 }
 0x340   :  { %v3856_v31 = vadd.f32 %v3855_v57, %v3686_v34  ;;  %v2418_v3 = vadd.f32 %v2417_v38, %v2248_v24  ;;  %v6072_v34 = vor.u32 %v6377_v50, %v6069_v45  ;;  %v3270_v24 = vshrl.u32 %v6064_v32, 16  ;;  %v12694_v50 = vld [vmem:[#allocation21_spill] sm:$0xff] }
 0x341   :  { %2287 = vmatmul.bf16.gmra.mxu0 %v2001_v8  ;;  %v3264_v8 = vor.u32 %v3262_v6, %v3252_v2  ;;  %v12695_v45 = vunpack.c.l.b16 %v12694_v50  ;;  %v12698_v52 = vunpack.c.h.b16 %v12694_v50  ;;  %v6075_v6 = vld [vmem:[%s12185_s0 + $0x158] sm:$0xf] }
 0x342   :  { %v8465_v63 = vadd.f32 %v3856_v31, %v2546_v29  ;;  %v2547_v43 = vadd.f32 %v2418_v3, %v12692_v12  ;;  %2456 = vmatmul.bf16.gmra.mxu1 %v2002_v9  ;;  %v6068_v29 = vor.u32 %v6378_v60, %v6067_v44  ;;  %v3274_v38 = vshll.u32 %v6072_v34, 16  ;;  %v12696_v12 = vld [vmem:[#allocation24_spill] sm:$0xff] }
 0x343   :  { %3728 = vmatmul.bf16.gmra.mxu2 %v3253_v30  ;;  %v3272_v30 = vor.u32 %v3270_v24, %v3260_v47  ;;  %v12699_v32 = vunpack.c.h.b16 %v12696_v12  ;;  %v6379_v24 = vld [vmem:[%s12185_s0 + $0x15c] sm:$0xf] }
 0x344   :  { %3897 = vmatmul.bf16.gmra.mxu3 %v3261_v62  ;;  %v3266_v31 = vshll.u32 %v6068_v29, 16  ;;  %v3276_v62 = vrot.slane %v3274_v38, 1  ;;  %v6077_v38 = vld [vmem:[%s12185_s0 + $0x160] sm:$0xf0] }
 0x346   :  { %v3689_v57 = vpop.f32.mrf.mxu2  ;;  %v2250_v35 = vpop.f32.mrf.mxu0  ;;  %v3268_v9 = vrot.slane %v3266_v31, 1  ;;  %v3277_v47 = vsel %vm411_vm0, %v3272_v30, %v3276_v62  ;;  %v6380_v31 = vld [vmem:[%s12185_s0 + $0x15c] sm:$0xf0] }
 0x347   :  { %v3858_v20 = vpop.f32.mrf.mxu3  ;;  %v2419_v14 = vpop.f32.mrf.mxu1 }
 0x348   :  { %v3859_v15 = vadd.f32 %v3858_v20, %v3689_v57  ;;  %v2420_v16 = vadd.f32 %v2419_v14, %v2250_v35  ;;  %v12697_v57 = vunpack.c.l.b16 %v12696_v12  ;;  %v2004_v35 = vpack.c.b16 %v12699_v32, %v12698_v52 }
 0x349   :  { %v3269_v2 = vsel %vm411_vm0, %v3264_v8, %v3268_v9  ;;  %v12700_v8 = vld [vmem:[#allocation31_spill] sm:$0xff]  ;;  %v3278_v52 = vshrl.u32 %v6068_v29, 16 }
 0x34a   :  { %v8477_v26 = vadd.f32 %v3859_v15, %v2547_v43  ;;  %v2548_v3 = vadd.f32 %v2420_v16, %v12693_v61  ;;  %v2003_v20 = vpack.c.b16 %v12697_v57, %v12695_v45 }
 0x34e   :  { %v3691_v44 = vpop.f32.mrf.mxu2  ;;  %v2253_v15 = vpop.f32.mrf.mxu0 }
 0x34f   :  { %v3860_v60 = vpop.f32.mrf.mxu3  ;;  %v2422_v14 = vpop.f32.mrf.mxu1 }
 0x350   :  { %v3861_v43 = vadd.f32 %v3860_v60, %v3691_v44  ;;  %v2423_v61 = vadd.f32 %v2422_v14, %v2253_v15  ;;  %v6080_v44 = vor.u32 %v6379_v24, %v6077_v38  ;;  %v3286_v15 = vshrl.u32 %v6072_v34, 16  ;;  %v12702_v24 = vld [vmem:[#allocation25_spill] sm:$0xff] }
 0x351   :  { %2292 = vmatmul.bf16.gmra.mxu0 %v2003_v20  ;;  %v3280_v20 = vor.u32 %v3278_v52, %v3268_v9  ;;  %v12703_v38 = vunpack.c.l.b16 %v12702_v24  ;;  %v12706_v29 = vunpack.c.h.b16 %v12702_v24  ;;  %v6083_v52 = vld [vmem:[%s12185_s0 + $0x168] sm:$0xf] }
 0x352   :  { %v8493_v16 = vadd.f32 %v3861_v43, %v2548_v3  ;;  %v2549_v30 = vadd.f32 %v2423_v61, %v12700_v8  ;;  %2461 = vmatmul.bf16.gmra.mxu1 %v2004_v35  ;;  %v6076_v3 = vor.u32 %v6380_v31, %v6075_v6  ;;  %v3290_v14 = vshll.u32 %v6080_v44, 16  ;;  %v12704_v8 = vld [vmem:[#allocation28_spill] sm:$0xff] }
 0x353   :  { %3733 = vmatmul.bf16.gmra.mxu2 %v3269_v2  ;;  %v3288_v2 = vor.u32 %v3286_v15, %v3276_v62  ;;  %v12707_v34 = vunpack.c.h.b16 %v12704_v8  ;;  %v6381_v15 = vld [vmem:[%s12185_s0 + $0x16c] sm:$0xf] }
 0x354   :  { %3902 = vmatmul.bf16.gmra.mxu3 %v3277_v47  ;;  %v3282_v43 = vshll.u32 %v6076_v3, 16  ;;  %v3292_v47 = vrot.slane %v3290_v14, 1  ;;  %v6085_v14 = vld [vmem:[%s12185_s0 + $0x170] sm:$0xf0] }
 0x356   :  { %v3694_v60 = vpop.f32.mrf.mxu2  ;;  %v2255_v12 = vpop.f32.mrf.mxu0  ;;  %v3284_v35 = vrot.slane %v3282_v43, 1  ;;  %v3293_v62 = vsel %vm411_vm0, %v3288_v2, %v3292_v47  ;;  %v6382_v43 = vld [vmem:[%s12185_s0 + $0x16c] sm:$0xf0] }
 0x357   :  { %v3863_v50 = vpop.f32.mrf.mxu3  ;;  %v2424_v57 = vpop.f32.mrf.mxu1 }
 0x358   :  { %v3864_v45 = vadd.f32 %v3863_v50, %v3694_v60  ;;  %v2425_v32 = vadd.f32 %v2424_v57, %v2255_v12  ;;  %v12705_v60 = vunpack.c.l.b16 %v12704_v8  ;;  %v2006_v12 = vpack.c.b16 %v12707_v34, %v12706_v29 }
 0x359   :  { %v3285_v9 = vsel %vm411_vm0, %v3280_v20, %v3284_v35  ;;  %v12708_v20 = vld [vmem:[#allocation35_spill] sm:$0xff]  ;;  %v3294_v29 = vshrl.u32 %v6076_v3, 16 }
 0x35a   :  { %v8505_v59 = vadd.f32 %v3864_v45, %v2549_v30  ;;  %v2550_v61 = vadd.f32 %v2425_v32, %v12701_v40  ;;  %v2005_v50 = vpack.c.b16 %v12705_v60, %v12703_v38 }
 0x35e   :  { %v3696_v6 = vpop.f32.mrf.mxu2  ;;  %v2258_v45 = vpop.f32.mrf.mxu0 }
 0x35f   :  { %v3865_v31 = vpop.f32.mrf.mxu3  ;;  %v2427_v57 = vpop.f32.mrf.mxu1 }
 0x360   :  { %v3866_v30 = vadd.f32 %v3865_v31, %v3696_v6  ;;  %v2428_v40 = vadd.f32 %v2427_v57, %v2258_v45  ;;  %v6088_v6 = vor.u32 %v6381_v15, %v6085_v14  ;;  %v3302_v45 = vshrl.u32 %v6080_v44, 16  ;;  %v12710_v15 = vld [vmem:[#allocation29_spill] sm:$0xff] }
 0x361   :  { %2297 = vmatmul.bf16.gmra.mxu0 %v2005_v50  ;;  %v3296_v50 = vor.u32 %v3294_v29, %v3284_v35  ;;  %v12711_v14 = vunpack.c.l.b16 %v12710_v15  ;;  %v12714_v3 = vunpack.c.h.b16 %v12710_v15  ;;  %v6091_v29 = vld [vmem:[%s12185_s0 + $0x178] sm:$0xf] }
 0x362   :  { %v8521_v32 = vadd.f32 %v3866_v30, %v2550_v61  ;;  %v2551_v2 = vadd.f32 %v2428_v40, %v12708_v20  ;;  %2466 = vmatmul.bf16.gmra.mxu1 %v2006_v12  ;;  %v6084_v61 = vor.u32 %v6382_v43, %v6083_v52  ;;  %v3306_v57 = vshll.u32 %v6088_v6, 16  ;;  %v12712_v20 = vld [vmem:[#allocation32_spill] sm:$0xff] }
 0x363   :  { %3738 = vmatmul.bf16.gmra.mxu2 %v3285_v9  ;;  %v3304_v9 = vor.u32 %v3302_v45, %v3292_v47  ;;  %v12715_v44 = vunpack.c.h.b16 %v12712_v20  ;;  %v6383_v45 = vld [vmem:[%s12185_s0 + $0x17c] sm:$0xf] }
 0x364   :  { %3907 = vmatmul.bf16.gmra.mxu3 %v3293_v62  ;;  %v3298_v30 = vshll.u32 %v6084_v61, 16  ;;  %v3308_v62 = vrot.slane %v3306_v57, 1  ;;  %v6093_v57 = vld [vmem:[%s12185_s0 + $0x180] sm:$0xf0] }
 0x366   :  { %v3699_v31 = vpop.f32.mrf.mxu2  ;;  %v2260_v8 = vpop.f32.mrf.mxu0  ;;  %v3300_v12 = vrot.slane %v3298_v30, 1  ;;  %v3309_v47 = vsel %vm411_vm0, %v3304_v9, %v3308_v62  ;;  %v6384_v30 = vld [vmem:[%s12185_s0 + $0x17c] sm:$0xf0] }
 0x367   :  { %v3868_v24 = vpop.f32.mrf.mxu3  ;;  %v2429_v60 = vpop.f32.mrf.mxu1 }
 0x368   :  { %v3869_v38 = vadd.f32 %v3868_v24, %v3699_v31  ;;  %v2430_v34 = vadd.f32 %v2429_v60, %v2260_v8  ;;  %v12713_v31 = vunpack.c.l.b16 %v12712_v20  ;;  %v2008_v8 = vpack.c.b16 %v12715_v44, %v12714_v3 }
 0x369   :  { %v3301_v35 = vsel %vm411_vm0, %v3296_v50, %v3300_v12  ;;  %v12717_v50 = vld [vmem:[#allocation39_spill] sm:$0xff]  ;;  %v3310_v3 = vshrl.u32 %v6084_v61, 16  ;;  %v12720_v61 = vld [vmem:[#allocation33_spill] sm:$0xff] }
 0x36a   :  { %v8533_v19 = vadd.f32 %v3869_v38, %v2551_v2  ;;  %v2552_v40 = vadd.f32 %v2430_v34, %v12709_v0  ;;  %v2007_v24 = vpack.c.b16 %v12713_v31, %v12711_v14  ;;  %v12724_v17 = vunpack.c.h.b16 %v12720_v61 }
 0x36e   :  { %v3701_v52 = vpop.f32.mrf.mxu2  ;;  %v2263_v38 = vpop.f32.mrf.mxu0 }
 0x36f   :  { %v3870_v43 = vpop.f32.mrf.mxu3  ;;  %v2432_v60 = vpop.f32.mrf.mxu1 }
 0x370   :  { %v3871_v2 = vadd.f32 %v3870_v43, %v3701_v52  ;;  %v2433_v0 = vadd.f32 %v2432_v60, %v2263_v38  ;;  %v8563_v52 = vor.u32 %v6383_v45, %v6093_v57  ;;  %v3318_v38 = vshrl.u32 %v6088_v6, 16 }
 0x371   :  { %2302 = vmatmul.bf16.gmra.mxu0 %v2007_v24  ;;  %v4100_v24 = vlaneseq }
 0x372   :  { %v8549_v34 = vadd.f32 %v3871_v2, %v2552_v40  ;;  %v2553_v9 = vadd.f32 %v2433_v0, %v12717_v50  ;;  %2471 = vmatmul.bf16.gmra.mxu1 %v2008_v8  ;;  %v8561_v40 = vor.u32 %v6384_v30, %v6091_v29  ;;  %v3322_v60 = vshll.u32 %v8563_v52, 16  ;;  %v12719_v0 = vld [vmem:[#allocation42_spill] sm:$0xff] }
 0x373   :  { %3743 = vmatmul.bf16.gmra.mxu2 %v3301_v35  ;;  %v3320_v30 = vor.u32 %v3318_v38, %v3308_v62  ;;  %v8570_v57 = vshrl.u32 %v4100_v24, 7 }
 0x374   :  { %12716 = vst [vmem:[#allocation2_spill] sm:$0xff] %v8549_v34  ;;  %3912 = vmatmul.bf16.gmra.mxu3 %v3309_v47  ;;  %v3314_v2 = vshll.u32 %v8561_v40, 16  ;;  %v3312_v47 = vor.u32 %v3310_v3, %v3300_v12  ;;  %v3324_v45 = vrot.slane %v3322_v60, 1  ;;  %v3326_v54 = vshrl.u32 %v8561_v40, 16 }
 0x375   :  { %v8801_v39 = vadd.s32 72, %v8570_v57 }
 0x376   :  { %v3704_v43 = vpop.f32.mrf.mxu2  ;;  %v2265_v20 = vpop.f32.mrf.mxu0  ;;  %v3316_v29 = vrot.slane %v3314_v2, 1  ;;  %v4103_v2 = vadd.s32 16, %v8570_v57  ;;  %v3325_v24 = vsel %vm411_vm0, %v3320_v30, %v3324_v45  ;;  %v4293_v30 = vshra.s32 %v8570_v57, 3 }
 0x377   :  { %v3873_v15 = vpop.f32.mrf.mxu3  ;;  %v2434_v31 = vpop.f32.mrf.mxu1 }
 0x378   :  { %v3874_v14 = vadd.f32 %v3873_v15, %v3704_v43  ;;  %v2435_v44 = vadd.f32 %v2434_v31, %v2265_v20  ;;  %v12721_v15 = vunpack.c.l.b16 %v12720_v61  ;;  %v12722_v20 = vld [vmem:[#allocation36_spill] sm:$0xff]  ;;  %v3317_v60 = vsel %vm411_vm0, %v3312_v47, %v3316_v29 }
 0x379   :  { %v12723_v31 = vunpack.c.l.b16 %v12722_v20  ;;  %v6101_v47 = vld [vmem:[%s12185_s0 + $0x190] sm:$0xf0] }
 0x37a   :  { %v8567_v8 = vadd.f32 %v3874_v14, %v2553_v9  ;;  %v2554_v35 = vadd.f32 %v2435_v44, %v12719_v0  ;;  %v12725_v9 = vunpack.c.h.b16 %v12722_v20  ;;  %v4102_v44 = vadd.s32 8, %v8570_v57  ;;  %v6099_v0 = vld [vmem:[%s12185_s0 + $0x188] sm:$0xf] }
 0x37b   :  { %v2009_v6 = vpack.c.b16 %v12723_v31, %v12721_v15  ;;  %v4104_v20 = vadd.s32 24, %v8570_v57 }
 0x37c   :  { %12718 = vst [vmem:[#allocation3_spill] sm:$0xff] %v8567_v8  ;;  %v2010_v14 = vpack.c.b16 %v12725_v9, %v12724_v17  ;;  %v6386_v17 = vld [vmem:[%s12185_s0 + $0x18c] sm:$0xf0]  ;;  %v4166_v11 = vand.u32 7, %v4102_v44 }
 0x37d   :  { %v8601_v31 = vor.u32 %v6386_v17, %v6099_v0  ;;  %v3334_v0 = vshrl.u32 %v8563_v52, 16  ;;  %v4168_v52 = vand.u32 7, %v4104_v20 }
 0x37e   :  { %v3706_v50 = vpop.f32.mrf.mxu2  ;;  %v2268_v3 = vpop.f32.mrf.mxu0  ;;  %vm8618_vm3 = vcmp.lt.s32.totalorder %v4166_v11, 7  ;;  %v8633_v11 = vld [vmem:[%s12186_s2] ss:$0 sm:$0xff] }
 0x37f   :  { %v3875_v43 = vpop.f32.mrf.mxu3  ;;  %v2437_v62 = vpop.f32.mrf.mxu1  ;;  %vm8659_vm9 = vcmp.lt.s32.totalorder %v4168_v52, 7 }
 0x380   :  { %v3876_v12 = vadd.f32 %v3875_v43, %v3706_v50  ;;  %v2438_v38 = vadd.f32 %v2437_v62, %v2268_v3  ;;  %v6385_v50 = vld [vmem:[%s12185_s0 + $0x18c] sm:$0xf]  ;;  %v4165_v3 = vand.u32 7, %v8570_v57  ;;  %v4357_v62 = vand.u32 7, %v4293_v30 }
 0x381   :  { %v12727_v43 = vld [vmem:[#allocation43_spill] sm:$0xff]  ;;  %2307 = vmatmul.bf16.gmra.mxu0 %v2009_v6  ;;  %v8603_v9 = vor.u32 %v6385_v50, %v6101_v47  ;;  %v4167_v50 = vand.u32 7, %v4103_v2 }
 0x382   :  { %v8587_v61 = vadd.f32 %v3876_v12, %v2554_v35  ;;  %v2555_v15 = vadd.f32 %v2438_v38, %v12727_v43  ;;  %2476 = vmatmul.bf16.gmra.mxu1 %v2010_v14  ;;  %v4294_v35 = vshra.s32 %v4102_v44, 3  ;;  %v4295_v12 = vshra.s32 %v4103_v2, 3 }
 0x383   :  { %3748 = vmatmul.bf16.gmra.mxu2 %v3317_v60  ;;  %v4296_v38 = vshra.s32 %v4104_v20, 3  ;;  %v3338_v17 = vshll.u32 %v8603_v9, 16  ;;  %vm8612_vm1 = vcmp.lt.s32.totalorder %v4165_v3, 7  ;;  %vm4421_vm2 = vcmp.lt.s32.totalorder %v4357_v62, 7 }
 0x384   :  { %12726 = vst [vmem:[#allocation7_spill] sm:$0xff] %v8587_v61  ;;  %3917 = vmatmul.bf16.gmra.mxu3 %v3325_v24  ;;  %v4358_v4 = vand.u32 7, %v4294_v35  ;;  %v3330_v24 = vshll.u32 %v8601_v31, 16  ;;  %v4359_v47 = vand.u32 7, %v4295_v12  ;;  %v3328_v2 = vor.u32 %v3326_v54, %v3316_v29  ;;  %vm8637_vm7 = vmand %vm8612_vm1, %vm4421_vm2 }
 0x385   :  { %v8624_v3 = vrot.slane %v3338_v17, 1  ;;  %vm8626_vm5 = vcmp.lt.s32.totalorder %v4167_v50, 7  ;;  %v8642_v29 = vadd.s32 40, %v8570_v57  ;;  %v4107_v35 = vadd.s32 48, %v8570_v57 }
 0x386   :  { %v3709_v42 = vpop.f32.mrf.mxu2  ;;  %v2270_v14 = vpop.f32.mrf.mxu0  ;;  %vm4422_vm4 = vcmp.lt.s32.totalorder %v4358_v4, 7  ;;  %v8622_v12 = vrot.slane %v3330_v24, 1  ;;  %vm4423_vm6 = vcmp.lt.s32.totalorder %v4359_v47, 7 }
 0x387   :  { %v3878_v25 = vpop.f32.mrf.mxu3  ;;  %v2439_v43 = vpop.f32.mrf.mxu1  ;;  %vm8655_vm8 = vmand %vm8618_vm3, %vm4422_vm4  ;;  %v4170_v4 = vand.u32 7, %v8642_v29 }
 0x388   :  { %v3879_v6 = vadd.f32 %v3878_v25, %v3709_v42  ;;  %v2440_v60 = vadd.f32 %v2439_v43, %v2270_v14  ;;  %v4105_v25 = vadd.s32 32, %v8570_v57  ;;  %v12731_v42 = vld [vmem:[#allocation46_spill] sm:$0xff]  ;;  %v4360_v14 = vand.u32 7, %v4296_v38  ;;  %v12738_v38 = vld [vmem:[#allocation37_spill] sm:$0xff]  ;;  %vm8666_vm11 = vmand %vm8626_vm5, %vm4423_vm6 }
 0x389   :  { %v12739_v43 = vunpack.c.l.b16 %v12738_v38  ;;  %v12742_v17 = vunpack.c.h.b16 %v12738_v38  ;;  %v3333_v52 = vsel %vm411_vm0, %v3328_v2, %v8622_v12  ;;  %v6109_v2 = vld [vmem:[%s12185_s0 + $0x1a0] sm:$0xf0]  ;;  %vm8741_vm15 = vcmp.lt.s32.totalorder %v4170_v4, 7 }
 0x38a   :  { %v8610_v30 = vadd.f32 %v3879_v6, %v2555_v15  ;;  %v2556_v40 = vadd.f32 %v2440_v60, %v12731_v42  ;;  %v3336_v15 = vor.u32 %v3334_v0, %v3324_v45  ;;  %v4297_v54 = vshra.s32 %v4105_v25, 3  ;;  %v12740_v60 = vld [vmem:[#allocation40_spill] sm:$0xff]  ;;  %v6388_v6 = vld [vmem:[%s12185_s0 + $0x19c] sm:$0xf0] }
 0x38b   :  { %v12741_v24 = vunpack.c.l.b16 %v12740_v60  ;;  %v12743_v50 = vunpack.c.h.b16 %v12740_v60  ;;  %vm4424_vm10 = vcmp.lt.s32.totalorder %v4360_v14, 7  ;;  %v4169_v13 = vand.u32 7, %v4105_v25  ;;  %v6107_v25 = vld [vmem:[%s12185_s0 + $0x198] sm:$0xf] }
 0x38c   :  { %12728 = vst [vmem:[#allocation10_spill] sm:$0xff] %v8610_v30  ;;  %v3341_v60 = vsel %vm411_vm0, %v3336_v15, %v8624_v3  ;;  %v8691_v15 = vadd.f32 %v8633_v11, %v8197_v36  ;;  %vm4488_vm12 = vmand %vm8659_vm9, %vm4424_vm10  ;;  %v8707_v14 = vor.u32 %v6388_v6, %v6107_v25  ;;  %v4299_v42 = vshra.s32 %v4107_v35, 3 }
 0x38d   :  { %v2011_v0 = vpack.c.b16 %v12741_v24, %v12739_v43  ;;  %v2012_v44 = vpack.c.b16 %v12743_v50, %v12742_v17  ;;  %v12390_v50 = vmov 0.0   ;;  %vm8718_vm13 = vcmp.lt.s32.totalorder %v4169_v13, 7 }
 0x38e   :  { %v3711_v45 = vpop.f32.mrf.mxu2  ;;  %v2273_v43 = vpop.f32.mrf.mxu0  ;;  %12751 = vst [vmem:[#allocation5_spill] sm:$0xff] %v8691_v15  ;;  %v6226_v36 = vsel %vm8655_vm8, 1.0, %v12390_v50  ;;  %v6227_v51 = vsel %vm8666_vm11, 1.0, %v12390_v50  ;;  %v8716_v20 = vsel %vm4488_vm12, 1.0, %v12390_v50  ;;  %v8730_v25 = vadd.s32 56, %v8570_v57 }
 0x38f   :  { %v3880_v62 = vpop.f32.mrf.mxu3  ;;  %v2442_v24 = vpop.f32.mrf.mxu1  ;;  %v4363_v30 = vand.u32 7, %v4299_v42 }
 0x390   :  { %v3881_v5 = vadd.f32 %v3880_v62, %v3711_v45  ;;  %v2443_v38 = vadd.f32 %v2442_v24, %v2273_v43  ;;  %v6387_v45 = vld [vmem:[%s12185_s0 + $0x19c] sm:$0xf]  ;;  %v12752_v62 = vld [vmem:[#allocation47_spill] sm:$0xff]  ;;  %v6225_v43 = vsel %vm8637_vm7, 1.0, %v12390_v50  ;;  %v4810_v24 = vmul.f32 %v8691_v15, %v8691_v15 }
 0x391   :  { %2312 = vmatmul.bf16.gmra.mxu0 %v2011_v0  ;;  %v8713_v0 = vadd.f32 %v8633_v11, %v8213_v41  ;;  %v8727_v41 = vadd.f32 %v8633_v11, %v8225_v10  ;;  %v3346_v50 = vshll.u32 %v8707_v14, 16  ;;  %v4171_v10 = vand.u32 7, %v4107_v35 }
 0x392   :  { %v8678_v47 = vadd.f32 %v3881_v5, %v2556_v40  ;;  %v4361_v5 = vand.u32 7, %v4297_v54  ;;  %v4298_v40 = vshra.s32 %v8642_v29, 3  ;;  %v2557_v17 = vadd.f32 %v2443_v38, %v12752_v62  ;;  %2481 = vmatmul.bf16.gmra.mxu1 %v2012_v44 }
 0x393   :  { %3753 = vmatmul.bf16.gmra.mxu2 %v3333_v52  ;;  %v8709_v54 = vor.u32 %v6387_v45, %v6109_v2  ;;  %12753 = vst [vmem:[#allocation11_spill] sm:$0xff] %v8713_v0  ;;  %v3342_v2 = vshrl.u32 %v8601_v31, 16  ;;  %v3350_v29 = vshrl.u32 %v8603_v9, 16  ;;  %v12760_v31 = vld [vmem:[#allocation50_spill] sm:$0xff]  ;;  %v4678_v9 = vmul.f32 %v6226_v36, %v8713_v0 }
 0x394   :  { %12750 = vst [vmem:[#allocation4_spill] sm:$0xff] %v8678_v47  ;;  %3922 = vmatmul.bf16.gmra.mxu3 %v3341_v60  ;;  %vm4425_vm14 = vcmp.lt.s32.totalorder %v4361_v5, 7  ;;  %v4362_v38 = vand.u32 7, %v4298_v40  ;;  %v4811_v47 = vmul.f32 %v8713_v0, %v8713_v0  ;;  %v4300_v35 = vshra.s32 %v8730_v25, 3 }
 0x395   :  { %12756 = vst [vmem:[#allocation14_spill] sm:$0xff] %v8727_v41  ;;  %v3354_v40 = vshll.u32 %v8709_v54, 16  ;;  %v8751_v42 = vrot.slane %v3346_v50, 1  ;;  %vm8757_vm2 = vcmp.lt.s32.totalorder %v4171_v10, 7  ;;  %vm4427_vm3 = vcmp.lt.s32.totalorder %v4363_v30, 7  ;;  %vm8768_vm4 = vmand %vm8718_vm13, %vm4425_vm14 }
 0x396   :  { %v3714_v52 = vpop.f32.mrf.mxu2  ;;  %v2275_v6 = vpop.f32.mrf.mxu0  ;;  %vm4426_vm1 = vcmp.lt.s32.totalorder %v4362_v38, 7  ;;  %v4875_v4 = vmul.f32 %v6226_v36, %v4811_v47  ;;  %v12766_v36 = vld [vmem:[#allocation41_spill] sm:$0xff]  ;;  %vm8796_vm6 = vmand %vm8757_vm2, %vm4427_vm3  ;;  %v6115_v30 = vld [vmem:[%s12185_s0 + $0x1a8] sm:$0xf] }
 0x397   :  { %v3883_v60 = vpop.f32.mrf.mxu3  ;;  %v2444_v45 = vpop.f32.mrf.mxu1  ;;  %vm8786_vm5 = vmand %vm8741_vm15, %vm4426_vm1 }
 0x398   :  { %v3884_v13 = vadd.f32 %v3883_v60, %v3714_v52  ;;  %v2445_v62 = vadd.f32 %v2444_v45, %v2275_v6  ;;  %v4677_v52 = vmul.f32 %v6225_v43, %v8691_v15  ;;  %v4874_v60 = vmul.f32 %v6225_v43, %v4810_v24 }
 0x399   :  { %v4812_v45 = vmul.f32 %v8727_v41, %v8727_v41  ;;  %v3352_v43 = vor.u32 %v3350_v29, %v8624_v3  ;;  %v8754_v24 = vrot.slane %v3354_v40, 1  ;;  %v8773_v3 = vadd.s32 64, %v8570_v57  ;;  %v12768_v29 = vld [vmem:[#allocation44_spill] sm:$0xff] }
 0x39a   :  { %v8738_v61 = vadd.f32 %v3884_v13, %v2557_v17  ;;  %v2558_v6 = vadd.f32 %v2445_v62, %v12760_v31  ;;  %v3344_v17 = vor.u32 %v3342_v2, %v8622_v12  ;;  %v4679_v13 = vmul.f32 %v6227_v51, %v8727_v41 }
 0x39b   :  { %v8763_v31 = vadd.f32 %v8633_v11, %v8241_v46  ;;  %v12767_v2 = vunpack.c.l.b16 %v12766_v36  ;;  %v12769_v40 = vunpack.c.l.b16 %v12768_v29  ;;  %v12770_v46 = vunpack.c.h.b16 %v12766_v36 }
 0x39c   :  { %12757 = vst [vmem:[#allocation6_spill] sm:$0xff] %v8738_v61  ;;  %v12771_v5 = vunpack.c.h.b16 %v12768_v29  ;;  %v4876_v44 = vmul.f32 %v6227_v51, %v4812_v45  ;;  %v4172_v15 = vand.u32 7, %v8730_v25  ;;  %v8791_v61 = vand.u32 7, %v4300_v35 }
 0x39d   :  { %12763 = vst [vmem:[#allocation8_spill] sm:$0xff] %v8763_v31  ;;  %v2013_v10 = vpack.c.b16 %v12769_v40, %v12767_v2  ;;  %v3349_v38 = vsel %vm411_vm0, %v3344_v17, %v8751_v42  ;;  %v3357_v25 = vsel %vm411_vm0, %v3352_v43, %v8754_v24  ;;  %v4741_v45 = vadd.f32 %v4678_v9, %v4677_v52  ;;  %v6117_v17 = vld [vmem:[%s12185_s0 + $0x1b0] sm:$0xf0] }
 0x39e   :  { %v3716_v47 = vpop.f32.mrf.mxu2  ;;  %v2014_v41 = vpack.c.b16 %v12771_v5, %v12770_v46  ;;  %v2278_v34 = vpop.f32.mrf.mxu0  ;;  %v4938_v35 = vadd.f32 %v4875_v4, %v4874_v60  ;;  %v4680_v43 = vmul.f32 %v8716_v20, %v8763_v31  ;;  %v4813_v52 = vmul.f32 %v8763_v31, %v8763_v31  ;;  %v12776_v60 = vld [vmem:[#allocation51_spill] sm:$0xff] }
 0x39f   :  { %v3885_v50 = vpop.f32.mrf.mxu3  ;;  %v2447_v2 = vpop.f32.mrf.mxu1  ;;  %v12777_v9 = vmov 0.0   ;;  %v4742_v40 = vadd.f32 %v4741_v45, %v4679_v13  ;;  %v8844_v12 = vadd.f32 %v8633_v11, %v8253_v22  ;;  %vm8846_vm7 = vcmp.lt.s32.totalorder %v4172_v15, 7 }
 0x3a0   :  { %v3886_v8 = vadd.f32 %v3885_v50, %v3716_v47  ;;  %v2448_v51 = vadd.f32 %v2447_v2, %v2278_v34  ;;  %v6390_v47 = vld [vmem:[%s12185_s0 + $0x1ac] sm:$0xf0]  ;;  %v6389_v34 = vld [vmem:[%s12185_s0 + $0x1ac] sm:$0xf]  ;;  %v6229_v4 = vsel %vm8768_vm4, 1.0, %v12777_v9  ;;  %v6230_v50 = vsel %vm8786_vm5, 1.0, %v12777_v9 }
 0x3a1   :  { %2317 = vmatmul.bf16.gmra.mxu0 %v2013_v10  ;;  %v8836_v29 = vsel %vm8796_vm6, 1.0, %v12777_v9  ;;  %v4939_v46 = vadd.f32 %v4938_v35, %v4876_v44  ;;  %v8838_v5 = vor.u32 %v6390_v47, %v6115_v30  ;;  %12778 = vst [vmem:[#allocation15_spill] sm:$0xff] %v8844_v12  ;;  %vm4428_vm8 = vcmp.lt.s32.totalorder %v8791_v61, 7 }
 0x3a2   :  { %v8810_v62 = vadd.f32 %v3886_v8, %v2558_v6  ;;  %v4301_v8 = vshra.s32 %v8773_v3, 3  ;;  %v2559_v6 = vadd.f32 %v2448_v51, %v12776_v60  ;;  %2486 = vmatmul.bf16.gmra.mxu1 %v2014_v41  ;;  %v8840_v41 = vor.u32 %v6389_v34, %v6117_v17  ;;  %vm8900_vm13 = vmand %vm8846_vm7, %vm4428_vm8 }
 0x3a3   :  { %3758 = vmatmul.bf16.gmra.mxu2 %v3349_v38  ;;  %v4302_v10 = vshra.s32 %v8801_v39, 3  ;;  %v4743_v2 = vadd.f32 %v4742_v40, %v4680_v43  ;;  %v4877_v13 = vmul.f32 %v8716_v20, %v4813_v52  ;;  %v4173_v44 = vand.u32 7, %v8773_v3 }
 0x3a4   :  { %3927 = vmatmul.bf16.gmra.mxu3 %v3357_v25  ;;  %v4365_v36 = vand.u32 7, %v4301_v8  ;;  %v8856_v22 = vadd.f32 %v8633_v11, %v8269_v21  ;;  %v8859_v15 = vadd.s32 80, %v8570_v57  ;;  %v3358_v35 = vshrl.u32 %v8707_v14, 16 }
 0x3a5   :  { %v3362_v20 = vshll.u32 %v8838_v5, 16  ;;  %v3366_v3 = vshrl.u32 %v8709_v54, 16  ;;  %v3370_v34 = vshll.u32 %v8840_v41, 16  ;;  %v4814_v17 = vmul.f32 %v8844_v12, %v8844_v12  ;;  %v12785_v54 = vld [vmem:[#allocation54_spill] sm:$0xff] }
 0x3a6   :  { %v3719_v51 = vpop.f32.mrf.mxu2  ;;  %12781 = vst [vmem:[#allocation18_spill] sm:$0xff] %v8856_v22  ;;  %v2280_v30 = vpop.f32.mrf.mxu0  ;;  %v4174_v21 = vand.u32 7, %v8801_v39  ;;  %v4366_v43 = vand.u32 7, %v4302_v10  ;;  %v4940_v8 = vadd.f32 %v4939_v46, %v4877_v13  ;;  %v8872_v60 = vadd.f32 %v8633_v11, %v8281_v55 }
 0x3a7   :  { %v3888_v38 = vpop.f32.mrf.mxu3  ;;  %v2449_v45 = vpop.f32.mrf.mxu1  ;;  %vm8874_vm9 = vcmp.lt.s32.totalorder %v4173_v44, 7  ;;  %vm4429_vm10 = vcmp.lt.s32.totalorder %v4365_v36, 7  ;;  %v4303_v39 = vshra.s32 %v8859_v15, 3  ;;  %v8884_v46 = vrot.slane %v3362_v20, 1  ;;  %v12792_v20 = vld [vmem:[#allocation48_spill] sm:$0xff] }
 0x3a8   :  { %v3889_v25 = vadd.f32 %v3888_v38, %v3719_v51  ;;  %v2450_v47 = vadd.f32 %v2449_v45, %v2280_v30  ;;  %v4681_v51 = vmul.f32 %v6229_v4, %v8844_v12  ;;  %v4815_v38 = vmul.f32 %v8856_v22, %v8856_v22  ;;  %vm8918_vm14 = vmand %vm8874_vm9, %vm4429_vm10 }
 0x3a9   :  { %v3368_v55 = vor.u32 %v3366_v3, %v8754_v24  ;;  %v8887_v10 = vrot.slane %v3370_v34, 1  ;;  %v4878_v13 = vmul.f32 %v6229_v4, %v4814_v17  ;;  %v4682_v44 = vmul.f32 %v6230_v50, %v8856_v22 }
 0x3aa   :  { %v8868_v52 = vadd.f32 %v3889_v25, %v2559_v6  ;;  %v2560_v40 = vadd.f32 %v2450_v47, %v12785_v54  ;;  %v3360_v6 = vor.u32 %v3358_v35, %v8751_v42  ;;  %vm8890_vm11 = vcmp.lt.s32.totalorder %v4174_v21, 7  ;;  %v12790_v35 = vld [vmem:[#allocation45_spill] sm:$0xff] }
 0x3ab   :  { %vm4430_vm12 = vcmp.lt.s32.totalorder %v4366_v43, 7  ;;  %v4816_v30 = vmul.f32 %v8872_v60, %v8872_v60  ;;  %v8905_v24 = vadd.s32 88, %v8570_v57  ;;  %v12791_v47 = vunpack.c.l.b16 %v12790_v35  ;;  %v6123_v43 = vld [vmem:[%s12185_s0 + $0x1b8] sm:$0xf] }
 0x3ac   :  { %12782 = vst [vmem:[#allocation9_spill] sm:$0xff] %v8868_v52  ;;  %v12793_v3 = vunpack.c.l.b16 %v12792_v20  ;;  %v12794_v17 = vunpack.c.h.b16 %v12790_v35  ;;  %v12795_v61 = vunpack.c.h.b16 %v12792_v20  ;;  %v4879_v0 = vmul.f32 %v6230_v50, %v4815_v38  ;;  %vm8928_vm15 = vmand %vm8890_vm11, %vm4430_vm12 }
 0x3ad   :  { %v4175_v22 = vand.u32 7, %v8859_v15  ;;  %v8923_v12 = vand.u32 7, %v4303_v39  ;;  %v8933_v50 = vadd.s32 96, %v8570_v57  ;;  %v3365_v14 = vsel %vm411_vm0, %v3360_v6, %v8884_v46  ;;  %v6391_v6 = vld [vmem:[%s12185_s0 + $0x1bc] sm:$0xf] }
 0x3ae   :  { %v3721_v4 = vpop.f32.mrf.mxu2  ;;  %v2015_v34 = vpack.c.b16 %v12793_v3, %v12791_v47  ;;  %v2016_v21 = vpack.c.b16 %v12795_v61, %v12794_v17  ;;  %v2283_v52 = vpop.f32.mrf.mxu0  ;;  %v3373_v15 = vsel %vm411_vm0, %v3368_v55, %v8887_v10  ;;  %v4744_v38 = vadd.f32 %v4743_v2, %v4681_v51  ;;  %v6125_v55 = vld [vmem:[%s12185_s0 + $0x1c0] sm:$0xf0] }
 0x3af   :  { %v3890_v45 = vpop.f32.mrf.mxu3  ;;  %v2452_v47 = vpop.f32.mrf.mxu1  ;;  %v4941_v39 = vadd.f32 %v4940_v8, %v4878_v13  ;;  %v4683_v25 = vmul.f32 %v8836_v29, %v8872_v60  ;;  %v4880_v2 = vmul.f32 %v8836_v29, %v4816_v30  ;;  %v8958_v8 = vadd.f32 %v8633_v11, %v8297_v48 }
 0x3b0   :  { %v3891_v31 = vadd.f32 %v3890_v45, %v3721_v4  ;;  %v2453_v36 = vadd.f32 %v2452_v47, %v2283_v52  ;;  %v6392_v52 = vld [vmem:[%s12185_s0 + $0x1bc] sm:$0xf0]  ;;  %v4745_v13 = vadd.f32 %v4744_v38, %v4682_v44  ;;  %v6232_v45 = vsel %vm8900_vm13, 1.0, %v12777_v9 }
 0x3b1   :  { %12800 = vst [vmem:[#allocation12_spill] sm:$0xff] %v8958_v8  ;;  %2322 = vmatmul.bf16.gmra.mxu0 %v2015_v34  ;;  %v8968_v20 = vsel %vm8918_vm14, 1.0, %v12777_v9  ;;  %v4114_v29 = vadd.s32 104, %v8570_v57  ;;  %v4942_v48 = vadd.f32 %v4941_v39, %v4879_v0  ;;  %v8974_v30 = vsel %vm8928_vm15, 1.0, %v12777_v9 }
 0x3b2   :  { %v8944_v4 = vadd.f32 %v3891_v31, %v2560_v40  ;;  %v4304_v31 = vshra.s32 %v8905_v24, 3  ;;  %v12801_v40 = vld [vmem:[#allocation55_spill] sm:$0xff]  ;;  %2491 = vmatmul.bf16.gmra.mxu1 %v2016_v21  ;;  %v8976_v44 = vor.u32 %v6392_v52, %v6123_v43  ;;  %v8978_v3 = vor.u32 %v6391_v6, %v6125_v55 }
 0x3b3   :  { %v2561_v51 = vadd.f32 %v2453_v36, %v12801_v40  ;;  %3763 = vmatmul.bf16.gmra.mxu2 %v3365_v14  ;;  %v4746_v42 = vadd.f32 %v4745_v13, %v4683_v25  ;;  %vm8980_vm1 = vcmp.lt.s32.totalorder %v4175_v22, 7  ;;  %vm4431_vm2 = vcmp.lt.s32.totalorder %v8923_v12, 7  ;;  %v12807_v13 = vld [vmem:[#allocation58_spill] sm:$0xff] }
 0x3b4   :  { %3932 = vmatmul.bf16.gmra.mxu3 %v3373_v15  ;;  %v4305_v17 = vshra.s32 %v8933_v50, 3  ;;  %v8986_v61 = vadd.f32 %v4942_v48, %v4880_v2  ;;  %v4817_v21 = vmul.f32 %v8958_v8, %v8958_v8  ;;  %v4176_v0 = vand.u32 7, %v8905_v24  ;;  %vm9034_vm7 = vmand %vm8980_vm1, %vm4431_vm2 }
 0x3b5   :  { %v4368_v54 = vand.u32 7, %v4304_v31  ;;  %v4306_v36 = vshra.s32 %v4114_v29, 3  ;;  %v8992_v22 = vadd.s32 112, %v8570_v57  ;;  %v3374_v38 = vshrl.u32 %v8838_v5, 16 }
 0x3b6   :  { %v3724_v47 = vpop.f32.mrf.mxu2  ;;  %v2285_v15 = vpop.f32.mrf.mxu0  ;;  %v3378_v25 = vshll.u32 %v8976_v44, 16  ;;  %v3382_v52 = vshrl.u32 %v8840_v41, 16  ;;  %v3386_v6 = vshll.u32 %v8978_v3, 16  ;;  %v9000_v24 = vadd.f32 %v8633_v11, %v8309_v1 }
 0x3b7   :  { %v3893_v35 = vpop.f32.mrf.mxu3  ;;  %v2454_v43 = vpop.f32.mrf.mxu1  ;;  %v4177_v55 = vand.u32 7, %v8933_v50  ;;  %v4369_v2 = vand.u32 7, %v4305_v17  ;;  %vm9005_vm3 = vcmp.lt.s32.totalorder %v4176_v0, 7  ;;  %vm4432_vm4 = vcmp.lt.s32.totalorder %v4368_v54, 7 }
 0x3b8   :  { %v3894_v14 = vadd.f32 %v3893_v35, %v3724_v47  ;;  %v2455_v39 = vadd.f32 %v2454_v43, %v2285_v15  ;;  %12804 = vst [vmem:[#allocation19_spill] sm:$0xff] %v9000_v24  ;;  %v4178_v5 = vand.u32 7, %v4114_v29  ;;  %v4684_v41 = vmul.f32 %v6232_v45, %v8958_v8  ;;  %vm9053_vm9 = vmand %vm9005_vm3, %vm4432_vm4 }
 0x3b9   :  { %v4881_v47 = vmul.f32 %v6232_v45, %v4817_v21  ;;  %v4370_v35 = vand.u32 7, %v4306_v36  ;;  %v4307_v1 = vshra.s32 %v8992_v22, 3  ;;  %v3376_v15 = vor.u32 %v3374_v38, %v8884_v46  ;;  %v12816_v38 = vld [vmem:[#allocation52_spill] sm:$0xff] }
 0x3ba   :  { %v9003_v31 = vadd.f32 %v3894_v14, %v2561_v51  ;;  %v2562_v48 = vadd.f32 %v2455_v39, %v12807_v13  ;;  %v9013_v50 = vrot.slane %v3378_v25, 1  ;;  %v3384_v51 = vor.u32 %v3382_v52, %v8887_v10  ;;  %v12814_v14 = vld [vmem:[#allocation49_spill] sm:$0xff] }
 0x3bb   :  { %v9016_v17 = vrot.slane %v3386_v6, 1  ;;  %v4818_v0 = vmul.f32 %v9000_v24, %v9000_v24  ;;  %v9022_v29 = vadd.f32 %v8633_v11, %v8325_v28  ;;  %vm9024_vm5 = vcmp.lt.s32.totalorder %v4177_v55, 7 }
 0x3bc   :  { %vm4433_vm6 = vcmp.lt.s32.totalorder %v4369_v2, 7  ;;  %v4685_v46 = vmul.f32 %v8968_v20, %v9000_v24  ;;  %vm9038_vm8 = vcmp.lt.s32.totalorder %v4178_v5, 7  ;;  %v12815_v43 = vunpack.c.l.b16 %v12814_v14  ;;  %v6131_v2 = vld [vmem:[%s12185_s0 + $0x1c8] sm:$0xf] }
 0x3bd   :  { %v12817_v39 = vunpack.c.l.b16 %v12816_v38  ;;  %v12818_v52 = vunpack.c.h.b16 %v12814_v14  ;;  %v12819_v12 = vunpack.c.h.b16 %v12816_v38  ;;  %vm4434_vm10 = vcmp.lt.s32.totalorder %v4370_v35, 7  ;;  %vm9061_vm11 = vmand %vm9024_vm5, %vm4433_vm6  ;;  %v12834_v14 = vld [vmem:[#allocation53_spill] sm:$0xff] }
 0x3be   :  { %v3726_v28 = vpop.f32.mrf.mxu2  ;;  %v4179_v55 = vand.u32 7, %v8992_v22  ;;  %v4371_v5 = vand.u32 7, %v4307_v1  ;;  %v2288_v24 = vpop.f32.mrf.mxu0  ;;  %v9066_v54 = vadd.s32 120, %v8570_v57  ;;  %v3389_v22 = vsel %vm411_vm0, %v3384_v51, %v9016_v17  ;;  %vm9098_vm12 = vmand %vm9038_vm8, %vm4434_vm10 }
 0x3bf   :  { %v3895_v36 = vpop.f32.mrf.mxu3  ;;  %v2017_v25 = vpack.c.b16 %v12817_v39, %v12815_v43  ;;  %v2018_v34 = vpack.c.b16 %v12819_v12, %v12818_v52  ;;  %v2457_v8 = vpop.f32.mrf.mxu1  ;;  %v3381_v43 = vsel %vm411_vm0, %v3376_v15, %v9013_v50  ;;  %v4747_v1 = vadd.f32 %v4746_v42, %v4684_v41  ;;  %v6133_v15 = vld [vmem:[%s12185_s0 + $0x1d0] sm:$0xf0]  ;;  %v12826_v41 = vld [vmem:[#allocation59_spill] sm:$0xff] }
 0x3c0   :  { %v3896_v13 = vadd.f32 %v3895_v36, %v3726_v28  ;;  %v2458_v40 = vadd.f32 %v2457_v8, %v2288_v24  ;;  %v4882_v45 = vmul.f32 %v8968_v20, %v4818_v0  ;;  %v4686_v28 = vmul.f32 %v8974_v30, %v9022_v29  ;;  %v6394_v8 = vld [vmem:[%s12185_s0 + $0x1cc] sm:$0xf0]  ;;  %v6393_v24 = vld [vmem:[%s12185_s0 + $0x1cc] sm:$0xf] }
 0x3c1   :  { %v4819_v20 = vmul.f32 %v9022_v29, %v9022_v29  ;;  %v9093_v42 = vadd.f32 %v8633_v11, %v8337_v33  ;;  %2327 = vmatmul.bf16.gmra.mxu0 %v2017_v25  ;;  %v4944_v0 = vadd.f32 %v8986_v61, %v4881_v47  ;;  %v4748_v38 = vadd.f32 %v4747_v1, %v4685_v46 }
 0x3c2   :  { %v9078_v36 = vadd.f32 %v3896_v13, %v2562_v48  ;;  %v2563_v51 = vadd.f32 %v2458_v40, %v12826_v41  ;;  %2496 = vmatmul.bf16.gmra.mxu1 %v2018_v34  ;;  %v6235_v39 = vsel %vm9034_vm7, 1.0, %v12777_v9  ;;  %v6236_v33 = vsel %vm9053_vm9, 1.0, %v12777_v9 }
 0x3c3   :  { %3768 = vmatmul.bf16.gmra.mxu2 %v3381_v43  ;;  %vm9110_vm13 = vcmp.lt.s32.totalorder %v4179_v55, 7  ;;  %vm4435_vm14 = vcmp.lt.s32.totalorder %v4371_v5, 7  ;;  %v9114_v21 = vor.u32 %v6394_v8, %v6131_v2  ;;  %v9116_v25 = vor.u32 %v6393_v24, %v6133_v15 }
 0x3c4   :  { %3937 = vmatmul.bf16.gmra.mxu3 %v3389_v22  ;;  %v4945_v61 = vadd.f32 %v4944_v0, %v4882_v45  ;;  %v6237_v47 = vsel %vm9061_vm11, 1.0, %v12777_v9  ;;  %v9124_v46 = vsel %vm9098_vm12, 1.0, %v12777_v9  ;;  %v4308_v10 = vshra.s32 %v9066_v54, 3  ;;  %vm9137_vm15 = vmand %vm9110_vm13, %vm4435_vm14 }
 0x3c5   :  { %v4749_v52 = vadd.f32 %v4748_v38, %v4686_v28  ;;  %v4883_v12 = vmul.f32 %v8974_v30, %v4819_v20  ;;  %v4687_v34 = vmul.f32 %v6235_v39, %v9093_v42  ;;  %v9131_v6 = vadd.f32 %v8633_v11, %v8353_v58 }
 0x3c6   :  { %v3729_v55 = vpop.f32.mrf.mxu2  ;;  %v4820_v13 = vmul.f32 %v9093_v42, %v9093_v42  ;;  %v4117_v40 = vadd.s32 128, %v8570_v57  ;;  %v2290_v43 = vpop.f32.mrf.mxu0  ;;  %v3390_v2 = vshrl.u32 %v8976_v44, 16  ;;  %v3394_v1 = vshll.u32 %v9114_v21, 16 }
 0x3c7   :  { %12829 = vst [vmem:[#allocation22_spill] sm:$0xff] %v9131_v6  ;;  %v3898_v5 = vpop.f32.mrf.mxu3  ;;  %v2459_v22 = vpop.f32.mrf.mxu1  ;;  %v3398_v45 = vshrl.u32 %v8978_v3, 16  ;;  %v3402_v28 = vshll.u32 %v9116_v25, 16  ;;  %v9148_v8 = vadd.f32 %v8633_v11, %v8365_v23  ;;  %v4180_v24 = vand.u32 7, %v9066_v54  ;;  %v12833_v3 = vld [vmem:[#allocation62_spill] sm:$0xff] }
 0x3c8   :  { %v3899_v30 = vadd.f32 %v3898_v5, %v3729_v55  ;;  %v2460_v58 = vadd.f32 %v2459_v22, %v2290_v43  ;;  %v4372_v15 = vand.u32 7, %v4308_v10  ;;  %v4946_v48 = vadd.f32 %v4945_v61, %v4883_v12 }
 0x3c9   :  { %12832 = vst [vmem:[#allocation13_spill] sm:$0xff] %v9148_v8  ;;  %v4821_v44 = vmul.f32 %v9131_v6, %v9131_v6  ;;  %v9158_v41 = vsel %vm9137_vm15, 1.0, %v12777_v9  ;;  %v4750_v38 = vadd.f32 %v4749_v52, %v4687_v34  ;;  %v4884_v35 = vmul.f32 %v6235_v39, %v4820_v13 }
 0x3ca   :  { %v9151_v20 = vadd.f32 %v3899_v30, %v2563_v51  ;;  %v2564_v0 = vadd.f32 %v2460_v58, %v12833_v3  ;;  %v4309_v23 = vshra.s32 %v4117_v40, 3  ;;  %v4118_v55 = vadd.s32 136, %v8570_v57 }
 0x3cb   :  { %v3392_v54 = vor.u32 %v3390_v2, %v9013_v50  ;;  %v9163_v51 = vrot.slane %v3394_v1, 1  ;;  %v3400_v61 = vor.u32 %v3398_v45, %v9016_v17  ;;  %v9166_v10 = vrot.slane %v3402_v28, 1  ;;  %v12836_v50 = vld [vmem:[#allocation56_spill] sm:$0xff] }
 0x3cc   :  { %v4688_v12 = vmul.f32 %v6236_v33, %v9131_v6  ;;  %v4822_v5 = vmul.f32 %v9148_v8, %v9148_v8  ;;  %vm4244_vm1 = vcmp.lt.s32.totalorder %v4180_v24, 7  ;;  %vm4436_vm2 = vcmp.lt.s32.totalorder %v4372_v15, 7 }
 0x3cd   :  { %v4885_v52 = vmul.f32 %v6236_v33, %v4821_v44  ;;  %v4181_v39 = vand.u32 7, %v4117_v40  ;;  %v12835_v30 = vunpack.c.l.b16 %v12834_v14  ;;  %v12837_v43 = vunpack.c.l.b16 %v12836_v50  ;;  %vm9182_vm3 = vmand %vm4244_vm1, %vm4436_vm2 }
 0x3ce   :  { %v3731_v34 = vpop.f32.mrf.mxu2  ;;  %v12838_v17 = vunpack.c.h.b16 %v12834_v14  ;;  %v12839_v2 = vunpack.c.h.b16 %v12836_v50  ;;  %v4689_v1 = vmul.f32 %v6237_v47, %v9148_v8  ;;  %v9180_v45 = vand.u32 7, %v4309_v23  ;;  %v2293_v33 = vpop.f32.mrf.mxu0  ;;  %v6139_v23 = vld [vmem:[%s12185_s0 + $0x1d8] sm:$0xf] }
 0x3cf   :  { %v3900_v13 = vpop.f32.mrf.mxu3  ;;  %v2019_v22 = vpack.c.b16 %v12837_v43, %v12835_v30  ;;  %v4310_v28 = vshra.s32 %v4118_v55, 3  ;;  %v2462_v40 = vpop.f32.mrf.mxu1  ;;  %v4119_v44 = vadd.s32 144, %v8570_v57  ;;  %v3397_v14 = vsel %vm411_vm0, %v3392_v54, %v9163_v51  ;;  %v6396_v43 = vld [vmem:[%s12185_s0 + $0x1dc] sm:$0xf0]  ;;  %v6141_v54 = vld [vmem:[%s12185_s0 + $0x1e0] sm:$0xf0] }
 0x3d0   :  { %v2020_v58 = vpack.c.b16 %v12839_v2, %v12838_v17  ;;  %v3901_v24 = vadd.f32 %v3900_v13, %v3731_v34  ;;  %v2463_v3 = vadd.f32 %v2462_v40, %v2293_v33  ;;  %v3405_v30 = vsel %vm411_vm0, %v3400_v61, %v9166_v10  ;;  %v6395_v17 = vld [vmem:[%s12185_s0 + $0x1dc] sm:$0xf] }
 0x3d1   :  { %v4947_v34 = vadd.f32 %v4946_v48, %v4884_v35  ;;  %v4886_v13 = vmul.f32 %v6237_v47, %v4822_v5  ;;  %v4751_v61 = vadd.f32 %v4750_v38, %v4688_v12  ;;  %v9207_v2 = vadd.f32 %v8633_v11, %v8381_v49  ;;  %v12843_v48 = vld [vmem:[#allocation63_spill] sm:$0xff]  ;;  %2332 = vmatmul.bf16.gmra.mxu0 %v2019_v22 }
 0x3d2   :  { %v9194_v50 = vadd.f32 %v3901_v24, %v2564_v0  ;;  %v4182_v47 = vand.u32 7, %v4118_v55  ;;  %v2565_v0 = vadd.f32 %v2463_v3, %v12843_v48  ;;  %2501 = vmatmul.bf16.gmra.mxu1 %v2020_v58  ;;  %v9213_v5 = vsel %vm9182_vm3, 1.0, %v12777_v9 }
 0x3d3   :  { %12842 = vst [vmem:[#allocation16_spill] sm:$0xff] %v9207_v2  ;;  %v4948_v35 = vadd.f32 %v4947_v34, %v4885_v52  ;;  %vm9215_vm4 = vcmp.lt.s32.totalorder %v4181_v39, 7  ;;  %v4120_v38 = vadd.s32 152, %v8570_v57  ;;  %3773 = vmatmul.bf16.gmra.mxu2 %v3397_v14  ;;  %v4752_v49 = vadd.f32 %v4751_v61, %v4689_v1 }
 0x3d4   :  { %3942 = vmatmul.bf16.gmra.mxu3 %v3405_v30  ;;  %vm4437_vm5 = vcmp.lt.s32.totalorder %v9180_v45, 7  ;;  %v9221_v55 = vor.u32 %v6396_v43, %v6139_v23  ;;  %v9223_v12 = vor.u32 %v6395_v17, %v6141_v54  ;;  %v9227_v22 = vadd.f32 %v8633_v11, %v8393_v7 }
 0x3d5   :  { %v4949_v52 = vadd.f32 %v4948_v35, %v4886_v13  ;;  %v4374_v39 = vand.u32 7, %v4310_v28  ;;  %v4311_v58 = vshra.s32 %v4119_v44, 3  ;;  %v4690_v33 = vmul.f32 %v9124_v46, %v9207_v2  ;;  %vm9274_vm10 = vmand %vm9215_vm4, %vm4437_vm5 }
 0x3d6   :  { %12846 = vst [vmem:[#allocation23_spill] sm:$0xff] %v9227_v22  ;;  %v4823_v40 = vmul.f32 %v9207_v2, %v9207_v2  ;;  %vm9233_vm6 = vcmp.lt.s32.totalorder %v4182_v47, 7  ;;  %v4183_v15 = vand.u32 7, %v4119_v44  ;;  %v3734_v3 = vpop.f32.mrf.mxu2  ;;  %v4312_v30 = vshra.s32 %v4120_v38, 3  ;;  %v2295_v28 = vpop.f32.mrf.mxu0 }
 0x3d7   :  { %v3903_v14 = vpop.f32.mrf.mxu3  ;;  %v9238_v23 = vadd.s32 160, %v8570_v57  ;;  %v2464_v34 = vpop.f32.mrf.mxu1  ;;  %v3406_v13 = vshrl.u32 %v9114_v21, 16  ;;  %v3410_v17 = vshll.u32 %v9221_v55, 16  ;;  %v3414_v54 = vshrl.u32 %v9116_v25, 16 }
 0x3d8   :  { %v3904_v7 = vadd.f32 %v3903_v14, %v3734_v3  ;;  %v2465_v43 = vadd.f32 %v2464_v34, %v2295_v28  ;;  %v3418_v61 = vshll.u32 %v9223_v12, 16  ;;  %v4824_v44 = vmul.f32 %v9227_v22, %v9227_v22  ;;  %v12849_v14 = vld [vmem:[#allocation66_spill] sm:$0xff] }
 0x3d9   :  { %v9248_v47 = vadd.f32 %v8633_v11, %v8409_v18  ;;  %v4375_v48 = vand.u32 7, %v4311_v58  ;;  %v4753_v3 = vadd.f32 %v4752_v49, %v4690_v33  ;;  %vm4438_vm7 = vcmp.lt.s32.totalorder %v4374_v39, 7 }
 0x3da   :  { %v9250_v35 = vadd.f32 %v3904_v7, %v2565_v0  ;;  %v4184_v21 = vand.u32 7, %v4120_v38  ;;  %v2566_v28 = vadd.f32 %v2465_v43, %v12849_v14  ;;  %v4887_v34 = vmul.f32 %v9124_v46, %v4823_v40  ;;  %v12858_v7 = vld [vmem:[#allocation60_spill] sm:$0xff]  ;;  %vm9296_vm12 = vmand %vm9233_vm6, %vm4438_vm7 }
 0x3db   :  { %vm9254_vm8 = vcmp.lt.s32.totalorder %v4183_v15, 7  ;;  %v4376_v2 = vand.u32 7, %v4312_v30  ;;  %v4313_v8 = vshra.s32 %v9238_v23, 3  ;;  %v3408_v18 = vor.u32 %v3406_v13, %v9163_v51  ;;  %v12856_v15 = vld [vmem:[#allocation57_spill] sm:$0xff] }
 0x3dc   :  { %v9260_v6 = vrot.slane %v3410_v17, 1  ;;  %v3416_v0 = vor.u32 %v3414_v54, %v9166_v10  ;;  %v9263_v49 = vrot.slane %v3418_v61, 1  ;;  %v4691_v38 = vmul.f32 %v9158_v41, %v9227_v22 }
 0x3dd   :  { %v4888_v46 = vmul.f32 %v9158_v41, %v4824_v44  ;;  %v4825_v58 = vmul.f32 %v9248_v47, %v9248_v47  ;;  %vm4439_vm9 = vcmp.lt.s32.totalorder %v4375_v48, 7  ;;  %vm9278_vm11 = vcmp.lt.s32.totalorder %v4184_v21, 7 }
 0x3de   :  { %v9283_v33 = vadd.s32 168, %v8570_v57  ;;  %v3736_v41 = vpop.f32.mrf.mxu2  ;;  %v12857_v30 = vunpack.c.l.b16 %v12856_v15  ;;  %v12859_v13 = vunpack.c.l.b16 %v12858_v7  ;;  %v12860_v24 = vunpack.c.h.b16 %v12856_v15  ;;  %v2298_v14 = vpop.f32.mrf.mxu0  ;;  %vm9304_vm14 = vmand %vm9254_vm8, %vm4439_vm9 }
 0x3df   :  { %v3905_v40 = vpop.f32.mrf.mxu3  ;;  %v12861_v43 = vunpack.c.h.b16 %v12858_v7  ;;  %vm4440_vm13 = vcmp.lt.s32.totalorder %v4376_v2, 7  ;;  %v4185_v61 = vand.u32 7, %v9238_v23  ;;  %v4377_v44 = vand.u32 7, %v4313_v8  ;;  %v2467_v22 = vpop.f32.mrf.mxu1  ;;  %v6147_v23 = vld [vmem:[%s12185_s0 + $0x1e8] sm:$0xf] }
 0x3e0   :  { %v2021_v45 = vpack.c.b16 %v12859_v13, %v12857_v30  ;;  %v3906_v21 = vadd.f32 %v3905_v40, %v3736_v41  ;;  %v9309_v39 = vadd.s32 176, %v8570_v57  ;;  %v2468_v1 = vadd.f32 %v2467_v22, %v2298_v14  ;;  %v6398_v22 = vld [vmem:[%s12185_s0 + $0x1ec] sm:$0xf0]  ;;  %vm9342_vm15 = vmand %vm9278_vm11, %vm4440_vm13 }
 0x3e1   :  { %v2022_v17 = vpack.c.b16 %v12861_v43, %v12860_v24  ;;  %v3413_v30 = vsel %vm411_vm0, %v3408_v18, %v9260_v6  ;;  %v3421_v8 = vsel %vm411_vm0, %v3416_v0, %v9263_v49  ;;  %v4950_v48 = vadd.f32 %v4949_v52, %v4887_v34  ;;  %v6397_v18 = vld [vmem:[%s12185_s0 + $0x1ec] sm:$0xf]  ;;  %v6149_v0 = vld [vmem:[%s12185_s0 + $0x1f0] sm:$0xf0] }
 0x3e2   :  { %v4692_v25 = vmul.f32 %v9213_v5, %v9248_v47  ;;  %v4889_v41 = vmul.f32 %v9213_v5, %v4825_v58  ;;  %v9321_v40 = vadd.f32 %v3906_v21, %v2566_v28  ;;  %v9334_v52 = vadd.f32 %v8633_v11, %v8421_v37  ;;  %v12869_v58 = vld [vmem:[#allocation67_spill] sm:$0xff]  ;;  %2337 = vmatmul.bf16.gmra.mxu0 %v2021_v45 }
 0x3e3   :  { %v6241_v5 = vsel %vm9274_vm10, 1.0, %v12777_v9  ;;  %v4314_v34 = vshra.s32 %v9283_v33, 3  ;;  %v2567_v7 = vadd.f32 %v2468_v1, %v12869_v58  ;;  %2506 = vmatmul.bf16.gmra.mxu1 %v2022_v17  ;;  %v4754_v13 = vadd.f32 %v4753_v3, %v4691_v38  ;;  %3778 = vmatmul.bf16.gmra.mxu2 %v3413_v30  ;;  %v12880_v1 = vld [vmem:[#allocation61_spill] sm:$0xff] }
 0x3e4   :  { %12866 = vst [vmem:[#allocation26_spill] sm:$0xff] %v9334_v52  ;;  %v4951_v37 = vadd.f32 %v4950_v48, %v4888_v46  ;;  %v6242_v51 = vsel %vm9296_vm12, 1.0, %v12777_v9  ;;  %v9354_v2 = vsel %vm9304_vm14, 1.0, %v12777_v9  ;;  %3947 = vmatmul.bf16.gmra.mxu3 %v3421_v8  ;;  %vm9356_vm1 = vcmp.lt.s32.totalorder %v4185_v61, 7 }
 0x3e5   :  { %vm4441_vm2 = vcmp.lt.s32.totalorder %v4377_v44, 7  ;;  %v9360_v45 = vor.u32 %v6398_v22, %v6147_v23  ;;  %v9362_v3 = vor.u32 %v6397_v18, %v6149_v0  ;;  %v4755_v38 = vadd.f32 %v4754_v13, %v4692_v25  ;;  %v12875_v13 = vld [vmem:[#allocation70_spill] sm:$0xff] }
 0x3e6   :  { %v4952_v46 = vadd.f32 %v4951_v37, %v4889_v41  ;;  %v9367_v24 = vsel %vm9342_vm15, 1.0, %v12777_v9  ;;  %v4315_v43 = vshra.s32 %v9309_v39, 3  ;;  %v4693_v17 = vmul.f32 %v6241_v5, %v9334_v52  ;;  %v3739_v21 = vpop.f32.mrf.mxu2  ;;  %vm9380_vm3 = vmand %vm9356_vm1, %vm4441_vm2  ;;  %v2300_v23 = vpop.f32.mrf.mxu0 }
 0x3e7   :  { %v4826_v54 = vmul.f32 %v9334_v52, %v9334_v52  ;;  %v4186_v61 = vand.u32 7, %v9283_v33  ;;  %v4378_v44 = vand.u32 7, %v4314_v34  ;;  %v3908_v14 = vpop.f32.mrf.mxu3  ;;  %v9376_v15 = vadd.f32 %v8633_v11, %v8437_v27  ;;  %v2469_v48 = vpop.f32.mrf.mxu1 }
 0x3e8   :  { %v4187_v30 = vand.u32 7, %v9309_v39  ;;  %v3909_v8 = vadd.f32 %v3908_v14, %v3739_v21  ;;  %v3422_v33 = vshrl.u32 %v9221_v55, 16  ;;  %v2470_v25 = vadd.f32 %v2469_v48, %v2300_v23  ;;  %v12882_v23 = vld [vmem:[#allocation64_spill] sm:$0xff] }
 0x3e9   :  { %12872 = vst [vmem:[#allocation17_spill] sm:$0xff] %v9376_v15  ;;  %v3426_v41 = vshll.u32 %v9360_v45, 16  ;;  %v3430_v22 = vshrl.u32 %v9223_v12, 16  ;;  %v3434_v27 = vshll.u32 %v9362_v3, 16  ;;  %v9391_v18 = vadd.f32 %v8633_v11, %v8449_v56 }
 0x3ea   :  { %v4379_v0 = vand.u32 7, %v4315_v43  ;;  %v4124_v28 = vadd.s32 184, %v8570_v57  ;;  %v9394_v39 = vadd.f32 %v3909_v8, %v2567_v7  ;;  %v4756_v34 = vadd.f32 %v4755_v38, %v4693_v17 }
 0x3eb   :  { %v4890_v58 = vmul.f32 %v6241_v5, %v4826_v54  ;;  %v9399_v55 = vsel %vm9380_vm3, 1.0, %v12777_v9  ;;  %v2568_v12 = vadd.f32 %v2470_v25, %v12875_v13  ;;  %v4694_v37 = vmul.f32 %v6242_v51, %v9376_v15 }
 0x3ec   :  { %v4827_v56 = vmul.f32 %v9376_v15, %v9376_v15  ;;  %vm9405_vm4 = vcmp.lt.s32.totalorder %v4186_v61, 7  ;;  %vm4442_vm5 = vcmp.lt.s32.totalorder %v4378_v44, 7  ;;  %v3424_v7 = vor.u32 %v3422_v33, %v9260_v6  ;;  %v6400_v44 = vld [vmem:[%s12185_s0 + $0x1fc] sm:$0xf0] }
 0x3ed   :  { %v9410_v5 = vrot.slane %v3426_v41, 1  ;;  %v3432_v38 = vor.u32 %v3430_v22, %v9263_v49  ;;  %v9413_v43 = vrot.slane %v3434_v27, 1  ;;  %v4828_v17 = vmul.f32 %v9391_v18, %v9391_v18  ;;  %vm9441_vm8 = vmand %vm9405_vm4, %vm4442_vm5 }
 0x3ee   :  { %vm9417_vm6 = vcmp.lt.s32.totalorder %v4187_v30, 7  ;;  %vm4443_vm7 = vcmp.lt.s32.totalorder %v4379_v0, 7  ;;  %v4316_v61 = vshra.s32 %v4124_v28, 3  ;;  %v9423_v21 = vadd.f32 %v8633_v11, %v8465_v63  ;;  %v3741_v14 = vpop.f32.mrf.mxu2  ;;  %v2303_v13 = vpop.f32.mrf.mxu0 }
 0x3ef   :  { %v9426_v6 = vadd.s32 192, %v8570_v57  ;;  %v3910_v49 = vpop.f32.mrf.mxu3  ;;  %v12881_v8 = vunpack.c.l.b16 %v12880_v1  ;;  %v12883_v48 = vunpack.c.l.b16 %v12882_v23  ;;  %v12884_v30 = vunpack.c.h.b16 %v12880_v1  ;;  %v2472_v15 = vpop.f32.mrf.mxu1  ;;  %vm9459_vm9 = vmand %vm9417_vm6, %vm4443_vm7 }
 0x3f0   :  { %v12885_v25 = vunpack.c.h.b16 %v12882_v23  ;;  %v4953_v22 = vadd.f32 %v4952_v46, %v4890_v58  ;;  %v4891_v27 = vmul.f32 %v6242_v51, %v4827_v56  ;;  %v4695_v63 = vmul.f32 %v9354_v2, %v9391_v18  ;;  %v6155_v46 = vld [vmem:[%s12185_s0 + $0x1f8] sm:$0xf] }
 0x3f1   :  { %v2023_v33 = vpack.c.b16 %v12883_v48, %v12881_v8  ;;  %v3911_v11 = vadd.f32 %v3910_v49, %v3741_v14  ;;  %v4188_v8 = vand.u32 7, %v4124_v28  ;;  %v2473_v1 = vadd.f32 %v2472_v15, %v2303_v13  ;;  %v9489_v49 = vld [vmem:[%s12186_s2] ss:$0 sm:$0xff] }
 0x3f2   :  { %v2024_v41 = vpack.c.b16 %v12885_v25, %v12884_v30  ;;  %v3429_v23 = vsel %vm411_vm0, %v3424_v7, %v9410_v5  ;;  %v3437_v51 = vsel %vm411_vm0, %v3432_v38, %v9413_v43  ;;  %v4892_v58 = vmul.f32 %v9354_v2, %v4828_v17  ;;  %v6399_v7 = vld [vmem:[%s12185_s0 + $0x1fc] sm:$0xf]  ;;  %v6157_v2 = vld [vmem:[%s12185_s0 + $0x200] sm:$0xf0] }
 0x3f3   :  { %v9463_v28 = vand.u32 7, %v4316_v61  ;;  %v4126_v56 = vadd.s32 200, %v8570_v57  ;;  %v9466_v10 = vadd.f32 %v3911_v11, %v2568_v12  ;;  %v4757_v0 = vadd.f32 %v4756_v34, %v4694_v37  ;;  %2342 = vmatmul.bf16.gmra.mxu0 %v2023_v33  ;;  %3783 = vmatmul.bf16.gmra.mxu2 %v3429_v23 }
 0x3f4   :  { %v4696_v38 = vmul.f32 %v9367_v24, %v9423_v21  ;;  %v4317_v17 = vshra.s32 %v9426_v6, 3  ;;  %v2569_v54 = vadd.f32 %v2473_v1, %v7917_v53  ;;  %2511 = vmatmul.bf16.gmra.mxu1 %v2024_v41  ;;  %v4954_v12 = vadd.f32 %v4953_v22, %v4891_v27  ;;  %3952 = vmatmul.bf16.gmra.mxu3 %v3437_v51 }
 0x3f5   :  { %v9481_v61 = vsel %vm9441_vm8, 1.0, %v12777_v9  ;;  %v4127_v14 = vadd.s32 208, %v8570_v57  ;;  %v9484_v34 = vor.u32 %v6400_v44, %v6155_v46  ;;  %v4758_v37 = vadd.f32 %v4757_v0, %v4695_v63 }
 0x3f6   :  { %v9493_v53 = vadd.f32 %v9489_v49, %v8477_v26  ;;  %v9498_v52 = vsel %vm9459_vm9, 1.0, %v12777_v9  ;;  %v9500_v48 = vor.u32 %v6399_v7, %v6157_v2  ;;  %v4955_v33 = vadd.f32 %v4954_v12, %v4892_v58  ;;  %v3744_v63 = vpop.f32.mrf.mxu2  ;;  %v2305_v23 = vpop.f32.mrf.mxu0 }
 0x3f7   :  { %vm9502_vm10 = vcmp.lt.s32.totalorder %v4188_v8, 7  ;;  %vm4444_vm11 = vcmp.lt.s32.totalorder %v9463_v28, 7  ;;  %v4318_v25 = vshra.s32 %v4126_v56, 3  ;;  %v4759_v41 = vadd.f32 %v4758_v37, %v4696_v38  ;;  %v3913_v11 = vpop.f32.mrf.mxu3  ;;  %v2474_v51 = vpop.f32.mrf.mxu1  ;;  %v12895_v37 = vld [vmem:[#allocation71_spill] sm:$0xff] }
 0x3f8   :  { %v4829_v26 = vmul.f32 %v9423_v21, %v9423_v21  ;;  %v4189_v22 = vand.u32 7, %v9426_v6  ;;  %v4381_v27 = vand.u32 7, %v4317_v17  ;;  %v4319_v13 = vshra.s32 %v4127_v14, 3  ;;  %vm9571_vm3 = vmand %vm9502_vm10, %vm4444_vm11 }
 0x3f9   :  { %v3914_v1 = vadd.f32 %v3913_v11, %v3744_v63  ;;  %v3438_v8 = vshrl.u32 %v9360_v45, 16  ;;  %v3442_v46 = vshll.u32 %v9484_v34, 16  ;;  %v4830_v44 = vmul.f32 %v9493_v53, %v9493_v53 }
 0x3fa   :  { %v2475_v58 = vadd.f32 %v2474_v51, %v2305_v23  ;;  %v3446_v15 = vshrl.u32 %v9362_v3, 16  ;;  %v3450_v7 = vshll.u32 %v9500_v48, 16  ;;  %v9518_v6 = vadd.f32 %v9489_v49, %v8493_v16  ;;  %v12902_v51 = vld [vmem:[#allocation68_spill] sm:$0xff] }
 0x3fb   :  { %v4190_v2 = vand.u32 7, %v4126_v56  ;;  %v4382_v0 = vand.u32 7, %v4318_v25  ;;  %v9520_v38 = vadd.f32 %v3914_v1, %v2569_v54  ;;  %v4893_v45 = vmul.f32 %v9367_v24, %v4829_v26 }
 0x3fc   :  { %12892 = vst [vmem:[#allocation20_spill] sm:$0xff] %v9518_v6  ;;  %vm9523_vm12 = vcmp.lt.s32.totalorder %v4189_v22, 7  ;;  %v4191_v12 = vand.u32 7, %v4127_v14  ;;  %v2570_v63 = vadd.f32 %v2475_v58, %v12895_v37  ;;  %vm4445_vm13 = vcmp.lt.s32.totalorder %v4381_v27, 7 }
 0x3fd   :  { %v4383_v3 = vand.u32 7, %v4319_v13  ;;  %v3440_v11 = vor.u32 %v3438_v8, %v9410_v5  ;;  %v9529_v23 = vrot.slane %v3442_v46, 1  ;;  %v4697_v16 = vmul.f32 %v9399_v55, %v9493_v53  ;;  %vm4509_vm4 = vmand %vm9523_vm12, %vm4445_vm13 }
 0x3fe   :  { %v4894_v56 = vmul.f32 %v9399_v55, %v4830_v44  ;;  %v3448_v24 = vor.u32 %v3446_v15, %v9413_v43  ;;  %v9535_v54 = vrot.slane %v3450_v7, 1  ;;  %v4831_v14 = vmul.f32 %v9518_v6, %v9518_v6  ;;  %v2655_v55 = vld [vmem:[%s12185_s0 + $0x208] sm:$0x11]  ;;  %v3746_v22 = vpop.f32.mrf.mxu2 }
 0x3ff   :  { %v9541_v25 = vadd.f32 %v9489_v49, %v8505_v59  ;;  %vm9543_vm14 = vcmp.lt.s32.totalorder %v4190_v2, 7  ;;  %vm4446_vm15 = vcmp.lt.s32.totalorder %v4382_v0, 7  ;;  %v4698_v43 = vmul.f32 %v9481_v61, %v9518_v6  ;;  %v3915_v13 = vpop.f32.mrf.mxu3  ;;  %v12900_v59 = vld [vmem:[#allocation65_spill] sm:$0xff]  ;;  %v2477_v37 = vpop.f32.mrf.mxu1 }
 0x400   :  { %vm9552_vm1 = vcmp.lt.s32.totalorder %v4191_v12, 7  ;;  %v12901_v1 = vunpack.c.l.b16 %v12900_v59  ;;  %v12903_v8 = vunpack.c.l.b16 %v12902_v51  ;;  %v12904_v44 = vunpack.c.h.b16 %v12900_v59  ;;  %v2308_v12 = vpop.f32.mrf.mxu0  ;;  %vm9590_vm5 = vmand %vm9543_vm14, %vm4446_vm15 }
 0x401   :  { %v12905_v58 = vunpack.c.h.b16 %v12902_v51  ;;  %vm4447_vm2 = vcmp.lt.s32.totalorder %v4383_v3, 7  ;;  %v4128_v7 = vadd.s32 216, %v8570_v57  ;;  %v3916_v2 = vadd.f32 %v3915_v13, %v3746_v22 }
 0x402   :  { %v2025_v46 = vpack.c.b16 %v12903_v8, %v12901_v1  ;;  %v3445_v6 = vsel %vm411_vm0, %v3440_v11, %v9529_v23  ;;  %v2478_v59 = vadd.f32 %v2477_v37, %v2308_v12  ;;  %v3453_v51 = vsel %vm411_vm0, %v3448_v24, %v9535_v54  ;;  %vm4511_vm6 = vmand %vm9552_vm1, %vm4447_vm2  ;;  %v1928_v1 = vld [vmem:[%s12185_s0 + $0x200] sm:$0xff] }
 0x403   :  { %v2026_v15 = vpack.c.b16 %v12905_v58, %v12904_v44  ;;  %v2882_v8 = vunpack.c.l.b16 %v2655_v55  ;;  %v2883_v44 = vunpack.c.h.b16 %v2655_v55  ;;  %v4956_v22 = vadd.f32 %v4955_v33, %v4893_v45  ;;  %3788 = vmatmul.bf16.gmra.mxu2 %v3445_v6 }
 0x404   :  { %v4895_v13 = vmul.f32 %v9481_v61, %v4831_v14  ;;  %v4832_v11 = vmul.f32 %v9541_v25, %v9541_v25  ;;  %v9583_v28 = vadd.f32 %v3916_v2, %v2570_v63  ;;  %v4760_v30 = vadd.f32 %v4759_v41, %v4697_v16  ;;  %v12910_v61 = vld [vmem:[#allocation72_spill] sm:$0xff]  ;;  %2347 = vmatmul.bf16.gmra.mxu0 %v2025_v46 }
 0x405   :  { %v4699_v58 = vmul.f32 %v9498_v52, %v9541_v25  ;;  %v2571_v45 = vadd.f32 %v2478_v59, %v12910_v61  ;;  %2516 = vmatmul.bf16.gmra.mxu1 %v2026_v15  ;;  %v4957_v27 = vadd.f32 %v4956_v22, %v4894_v56  ;;  %v6248_v17 = vsel %vm9571_vm3, 1.0, %v12777_v9  ;;  %3957 = vmatmul.bf16.gmra.mxu3 %v3453_v51 }
 0x406   :  { %v4320_v41 = vshra.s32 %v4128_v7, 3  ;;  %v4761_v0 = vadd.f32 %v4760_v30, %v4698_v43  ;;  %v6249_v63 = vsel %vm4509_vm4, 1.0, %v12777_v9  ;;  %v2948_v16 = vpack.c.b16 %v2882_v8, %v2882_v8  ;;  %v3749_v46 = vpop.f32.mrf.mxu2 }
 0x407   :  { %v2949_v24 = vpack.c.b16 %v2883_v44, %v2883_v44  ;;  %v4958_v14 = vadd.f32 %v4957_v27, %v4895_v13  ;;  %v4896_v5 = vmul.f32 %v9498_v52, %v4832_v11  ;;  %v9605_v56 = vadd.f32 %v9489_v49, %v8521_v32  ;;  %v3918_v15 = vpop.f32.mrf.mxu3  ;;  %v2479_v37 = vpop.f32.mrf.mxu1 }
 0x408   :  { %v9610_v3 = vsel %vm9590_vm5, 1.0, %v12777_v9  ;;  %v4762_v55 = vadd.f32 %v4761_v0, %v4699_v58  ;;  %v9613_v6 = vsel %vm4511_vm6, 1.0, %v12777_v9  ;;  %v4192_v43 = vand.u32 7, %v4128_v7  ;;  %v2310_v12 = vpop.f32.mrf.mxu0  ;;  %v12912_v58 = vld [vmem:[#allocation73_spill] sm:$0xff] }
 0x409   :  { %v9616_v26 = vadd.s32 224, %v8570_v57  ;;  %v9620_v52 = vadd.f32 %v9489_v49, %v8533_v19  ;;  %v4384_v32 = vand.u32 7, %v4320_v41  ;;  %v3919_v2 = vadd.f32 %v3918_v15, %v3749_v46  ;;  %v12913_v41 = vld [vmem:[#allocation2_spill] sm:$0xff] }
 0x40a   :  { %v3454_v59 = vshrl.u32 %v9484_v34, 16  ;;  %v2480_v7 = vadd.f32 %v2479_v37, %v2310_v12  ;;  %v3458_v51 = vshll.u32 %v2948_v16, 16  ;;  %v3462_v8 = vshrl.u32 %v9500_v48, 16 }
 0x40b   :  { %12911 = vst [vmem:[#allocation27_spill] sm:$0xff] %v9620_v52  ;;  %v3466_v44 = vshll.u32 %v2949_v24, 16  ;;  %v4959_v22 = vadd.f32 %v4958_v14, %v4896_v5  ;;  %v4833_v19 = vmul.f32 %v9605_v56, %v9605_v56  ;;  %v4130_v13 = vadd.s32 232, %v8570_v57 }
 0x40c   :  { %v9630_v11 = vadd.f32 %v3919_v2, %v2571_v45  ;;  %v4321_v30 = vshra.s32 %v9616_v26, 3  ;;  %v2572_v33 = vadd.f32 %v2480_v7, %v12912_v58  ;;  %v1963_v61 = vunpack.c.l.b16 %v1928_v1  ;;  %v12916_v7 = vld [vmem:[#allocation69_spill] sm:$0xff] }
 0x40d   :  { %v1964_v27 = vunpack.c.h.b16 %v1928_v1  ;;  %v4834_v34 = vmul.f32 %v9620_v52, %v9620_v52  ;;  %v9638_v48 = vadd.f32 %v9489_v49, %v12913_v41  ;;  %vm9640_vm7 = vcmp.lt.s32.totalorder %v4192_v43, 7 }
 0x40e   :  { %vm4448_vm8 = vcmp.lt.s32.totalorder %v4384_v32, 7  ;;  %v3456_v45 = vor.u32 %v3454_v59, %v9529_v23  ;;  %v3460_v16 = vrot.slane %v3458_v51, 1  ;;  %v3464_v24 = vor.u32 %v3462_v8, %v9535_v54  ;;  %v3751_v43 = vpop.f32.mrf.mxu2 }
 0x40f   :  { %v3468_v14 = vrot.slane %v3466_v44, 1  ;;  %v4700_v5 = vmul.f32 %v6248_v17, %v9605_v56  ;;  %v4897_v46 = vmul.f32 %v6248_v17, %v4833_v19  ;;  %v4193_v15 = vand.u32 7, %v9616_v26  ;;  %v3920_v1 = vpop.f32.mrf.mxu3  ;;  %v2482_v44 = vpop.f32.mrf.mxu1  ;;  %v12919_v19 = vld [vmem:[#allocation3_spill] sm:$0xff]  ;;  %vm9665_vm9 = vmand %vm9640_vm7, %vm4448_vm8 }
 0x410   :  { %v4322_v2 = vshra.s32 %v4130_v13, 3  ;;  %v4385_v12 = vand.u32 7, %v4321_v30  ;;  %v9649_v37 = vadd.s32 240, %v8570_v57  ;;  %v12917_v58 = vunpack.c.l.b16 %v12916_v7  ;;  %v2313_v8 = vpop.f32.mrf.mxu0 }
 0x411   :  { %v12918_v23 = vunpack.c.h.b16 %v12916_v7  ;;  %v4701_v54 = vmul.f32 %v6249_v63, %v9620_v52  ;;  %v4898_v51 = vmul.f32 %v6249_v63, %v4834_v34  ;;  %v4835_v17 = vmul.f32 %v9638_v48, %v9638_v48 }
 0x412   :  { %v2027_v41 = vpack.c.b16 %v1963_v61, %v12917_v58  ;;  %v3921_v26 = vadd.f32 %v3920_v1, %v3751_v43  ;;  %v9660_v30 = vadd.f32 %v9489_v49, %v12919_v19  ;;  %v3461_v63 = vsel %vm411_vm0, %v3456_v45, %v3460_v16  ;;  %v12923_v19 = vld [vmem:[#allocation74_spill] sm:$0xff]  ;;  %v12924_v16 = vld [vmem:[#allocation7_spill] sm:$0xff] }
 0x413   :  { %v2028_v59 = vpack.c.b16 %v1964_v27, %v12918_v23  ;;  %v2483_v27 = vadd.f32 %v2482_v44, %v2313_v8  ;;  %v3469_v34 = vsel %vm411_vm0, %v3464_v24, %v3468_v14  ;;  %v4194_v7 = vand.u32 7, %v4130_v13  ;;  %3793 = vmatmul.bf16.gmra.mxu2 %v3461_v63  ;;  %v12932_v63 = vld [vmem:[#allocation10_spill] sm:$0xff] }
 0x414   :  { %12920 = vst [vmem:[#allocation30_spill] sm:$0xff] %v9660_v30  ;;  %v4386_v43 = vand.u32 7, %v4322_v2  ;;  %v4132_v1 = vadd.s32 248, %v8570_v57  ;;  %v9672_v58 = vadd.f32 %v3921_v26, %v2572_v33  ;;  %v4763_v23 = vadd.f32 %v4762_v55, %v4700_v5  ;;  %2352 = vmatmul.bf16.gmra.mxu0 %v2027_v41 }
 0x415   :  { %v4702_v32 = vmul.f32 %v9610_v3, %v9638_v48  ;;  %v4323_v0 = vshra.s32 %v9649_v37, 3  ;;  %v2573_v52 = vadd.f32 %v2483_v27, %v12923_v19  ;;  %2521 = vmatmul.bf16.gmra.mxu1 %v2028_v59  ;;  %v4960_v8 = vadd.f32 %v4959_v22, %v4897_v46  ;;  %3962 = vmatmul.bf16.gmra.mxu3 %v3469_v34 }
 0x416   :  { %v4899_v45 = vmul.f32 %v9610_v3, %v4835_v17  ;;  %v9681_v13 = vadd.f32 %v9489_v49, %v12924_v16  ;;  %v6252_v55 = vsel %vm9665_vm9, 1.0, %v12777_v9  ;;  %v4764_v33 = vadd.f32 %v4763_v23, %v4701_v54  ;;  %v3754_v54 = vpop.f32.mrf.mxu2 }
 0x417   :  { %v4836_v24 = vmul.f32 %v9660_v30, %v9660_v30  ;;  %vm9688_vm0 = vcmp.lt.s32.totalorder %v4193_v15, 7  ;;  %vm4449_vm10 = vcmp.lt.s32.totalorder %v4385_v12, 7  ;;  %v4961_v3 = vadd.f32 %v4960_v8, %v4898_v51  ;;  %v3923_v15 = vpop.f32.mrf.mxu3  ;;  %v2484_v61 = vpop.f32.mrf.mxu1 }
 0x418   :  { %12925 = vst [vmem:[#allocation21_spill] sm:$0xff] %v9681_v13  ;;  %vm9692_vm11 = vcmp.lt.s32.totalorder %v4194_v7, 7  ;;  %vm4450_vm12 = vcmp.lt.s32.totalorder %v4386_v43, 7  ;;  %v4324_v5 = vshra.s32 %v4132_v1, 3  ;;  %v4765_v46 = vadd.f32 %v4764_v33, %v4702_v32  ;;  %vm9706_vm13 = vmand %vm9688_vm0, %vm4449_vm10  ;;  %v2315_v44 = vpop.f32.mrf.mxu0  ;;  %v12934_v32 = vld [vmem:[#allocation4_spill] sm:$0xff]  ;;  %v12936_v33 = vld [vmem:[#allocation75_spill] sm:$0xff] }
 0x419   :  { %v4195_v2 = vand.u32 7, %v9649_v37  ;;  %v4387_v41 = vand.u32 7, %v4323_v0  ;;  %v9698_v59 = vadd.s32 256, %v8570_v57  ;;  %v4962_v17 = vadd.f32 %v4961_v3, %v4899_v45  ;;  %vm4514_vm14 = vmand %vm9692_vm11, %vm4450_vm12 }
 0x41a   :  { %v4703_v12 = vmul.f32 %v9613_v6, %v9660_v30  ;;  %v4837_v51 = vmul.f32 %v9681_v13, %v9681_v13  ;;  %v3924_v37 = vadd.f32 %v3923_v15, %v3754_v54  ;;  %v4900_v27 = vmul.f32 %v9613_v6, %v4836_v24 }
 0x41b   :  { %v9713_v34 = vadd.f32 %v9489_v49, %v12932_v63  ;;  %v4196_v7 = vand.u32 7, %v4132_v1  ;;  %v2485_v23 = vadd.f32 %v2484_v61, %v2315_v44  ;;  %v9720_v0 = vadd.f32 %v9489_v49, %v12934_v32 }
 0x41c   :  { %v4388_v19 = vand.u32 7, %v4324_v5  ;;  %v4134_v8 = vadd.s32 264, %v8570_v57  ;;  %v9723_v45 = vadd.f32 %v3924_v37, %v2573_v52  ;;  %v4704_v6 = vmul.f32 %v6252_v55, %v9681_v13 }
 0x41d   :  { %12933 = vst [vmem:[#allocation24_spill] sm:$0xff] %v9713_v34  ;;  %v4325_v16 = vshra.s32 %v9698_v59, 3  ;;  %v4135_v43 = vadd.s32 272, %v8570_v57  ;;  %v2574_v24 = vadd.f32 %v2485_v23, %v12936_v33  ;;  %v4901_v14 = vmul.f32 %v6252_v55, %v4837_v51  ;;  %v12948_v55 = vld [vmem:[#allocation76_spill] sm:$0xff] }
 0x41e   :  { %12935 = vst [vmem:[#allocation31_spill] sm:$0xff] %v9720_v0  ;;  %v6253_v1 = vsel %vm9706_vm13, 1.0, %v12777_v9  ;;  %v6254_v3 = vsel %vm4514_vm14, 1.0, %v12777_v9  ;;  %vm9733_vm15 = vcmp.lt.s32.totalorder %v4195_v2, 7  ;;  %v4766_v52 = vadd.f32 %v4765_v46, %v4703_v12  ;;  %v3756_v46 = vpop.f32.mrf.mxu2 }
 0x41f   :  { %v4963_v5 = vadd.f32 %v4962_v17, %v4900_v27  ;;  %v4838_v54 = vmul.f32 %v9713_v34, %v9713_v34  ;;  %vm4451_vm1 = vcmp.lt.s32.totalorder %v4387_v41, 7  ;;  %v4839_v15 = vmul.f32 %v9720_v0, %v9720_v0  ;;  %v3925_v17 = vpop.f32.mrf.mxu3  ;;  %v12941_v41 = vld [vmem:[#allocation6_spill] sm:$0xff] }
 0x420   :  { %vm9741_vm2 = vcmp.lt.s32.totalorder %v4196_v7, 7  ;;  %vm4452_vm3 = vcmp.lt.s32.totalorder %v4388_v19, 7  ;;  %v4326_v51 = vshra.s32 %v4134_v8, 3  ;;  %v4767_v26 = vadd.f32 %v4766_v52, %v4704_v6  ;;  %vm9753_vm4 = vmand %vm9733_vm15, %vm4451_vm1  ;;  %v2318_v23 = vpop.f32.mrf.mxu0 }
 0x421   :  { %v4197_v2 = vand.u32 7, %v9698_v59  ;;  %v4389_v37 = vand.u32 7, %v4325_v16  ;;  %v4327_v44 = vshra.s32 %v4135_v43, 3  ;;  %v4964_v12 = vadd.f32 %v4963_v5, %v4901_v14  ;;  %v2487_v59 = vpop.f32.mrf.mxu1  ;;  %vm9760_vm5 = vmand %vm9741_vm2, %vm4452_vm3 }
 0x422   :  { %v4705_v61 = vmul.f32 %v6253_v1, %v9713_v34  ;;  %v9749_v27 = vadd.f32 %v9489_v49, %v12941_v41  ;;  %v3926_v7 = vadd.f32 %v3925_v17, %v3756_v46  ;;  %v4902_v32 = vmul.f32 %v6253_v1, %v4838_v54 }
 0x423   :  { %v4198_v16 = vand.u32 7, %v4134_v8  ;;  %v4136_v33 = vadd.s32 280, %v8570_v57  ;;  %v2488_v14 = vadd.f32 %v2487_v59, %v2318_v23  ;;  %v4706_v22 = vmul.f32 %v6254_v3, %v9720_v0 }
 0x424   :  { %12942 = vst [vmem:[#allocation34_spill] sm:$0xff] %v9749_v27  ;;  %v4903_v52 = vmul.f32 %v6254_v3, %v4839_v15  ;;  %v4390_v5 = vand.u32 7, %v4326_v51  ;;  %v9766_v41 = vadd.f32 %v3926_v7, %v2574_v24  ;;  %v9770_v1 = vadd.f32 %v9489_v49, %v8810_v62 }
 0x425   :  { %v4199_v19 = vand.u32 7, %v4135_v43  ;;  %v4391_v54 = vand.u32 7, %v4327_v44  ;;  %v2575_v46 = vadd.f32 %v2488_v14, %v12948_v55  ;;  %v4768_v17 = vadd.f32 %v4767_v26, %v4705_v61 }
 0x426   :  { %12947 = vst [vmem:[#allocation25_spill] sm:$0xff] %v9770_v1  ;;  %v6255_v8 = vsel %vm9753_vm4, 1.0, %v12777_v9  ;;  %v4840_v23 = vmul.f32 %v9749_v27, %v9749_v27  ;;  %v6256_v24 = vsel %vm9760_vm5, 1.0, %v12777_v9  ;;  %v4965_v3 = vadd.f32 %v4964_v12, %v4902_v32  ;;  %v12955_v32 = vld [vmem:[#allocation9_spill] sm:$0xff] }
 0x427   :  { %vm9781_vm6 = vcmp.lt.s32.totalorder %v4197_v2, 7  ;;  %vm4453_vm7 = vcmp.lt.s32.totalorder %v4389_v37, 7  ;;  %v4328_v43 = vshra.s32 %v4136_v33, 3  ;;  %v4769_v15 = vadd.f32 %v4768_v17, %v4706_v22  ;;  %v3759_v2 = vpop.f32.mrf.mxu2  ;;  %v3928_v63 = vpop.f32.mrf.mxu3 }
 0x428   :  { %vm9785_vm8 = vcmp.lt.s32.totalorder %v4198_v16, 7  ;;  %vm4454_vm9 = vcmp.lt.s32.totalorder %v4390_v5, 7  ;;  %v4137_v26 = vadd.s32 288, %v8570_v57  ;;  %v4966_v44 = vadd.f32 %v4965_v3, %v4903_v52  ;;  %vm9804_vm11 = vmand %vm9781_vm6, %vm4453_vm7  ;;  %v2320_v22 = vpop.f32.mrf.mxu0 }
 0x429   :  { %v4841_v61 = vmul.f32 %v9770_v1, %v9770_v1  ;;  %vm9792_vm0 = vcmp.lt.s32.totalorder %v4199_v19, 7  ;;  %vm4455_vm10 = vcmp.lt.s32.totalorder %v4391_v54, 7  ;;  %v4707_v7 = vmul.f32 %v6255_v8, %v9749_v27  ;;  %v2489_v52 = vpop.f32.mrf.mxu1  ;;  %vm9811_vm12 = vmand %vm9785_vm8, %vm4454_vm9 }
 0x42a   :  { %v4904_v59 = vmul.f32 %v6255_v8, %v4840_v23  ;;  %v9799_v6 = vadd.f32 %v9489_v49, %v12955_v32  ;;  %v3929_v14 = vadd.f32 %v3928_v63, %v3759_v2  ;;  %v4200_v55 = vand.u32 7, %v4136_v33  ;;  %vm4519_vm13 = vmand %vm9792_vm0, %vm4455_vm10 }
 0x42b   :  { %v4392_v17 = vand.u32 7, %v4328_v43  ;;  %v4138_v37 = vadd.s32 296, %v8570_v57  ;;  %v2490_v8 = vadd.f32 %v2489_v52, %v2320_v22  ;;  %v4708_v23 = vmul.f32 %v6256_v24, %v9770_v1  ;;  %v12961_v43 = vld [vmem:[#allocation77_spill] sm:$0xff] }
 0x42c   :  { %12956 = vst [vmem:[#allocation28_spill] sm:$0xff] %v9799_v6  ;;  %v4329_v3 = vshra.s32 %v4137_v26, 3  ;;  %v4139_v5 = vadd.s32 304, %v8570_v57  ;;  %v9821_v62 = vadd.f32 %v3929_v14, %v2575_v46  ;;  %v4905_v51 = vmul.f32 %v6256_v24, %v4841_v61 }
 0x42d   :  { %v9825_v2 = vadd.f32 %v9489_v49, %v8944_v4  ;;  %v4201_v33 = vand.u32 7, %v4137_v26  ;;  %v2576_v63 = vadd.f32 %v2490_v8, %v12961_v43  ;;  %v4770_v32 = vadd.f32 %v4769_v15, %v4707_v7 }
 0x42e   :  { %v6257_v54 = vsel %vm9804_vm11, 1.0, %v12777_v9  ;;  %v4842_v12 = vmul.f32 %v9799_v6, %v9799_v6  ;;  %v6258_v46 = vsel %vm9811_vm12, 1.0, %v12777_v9  ;;  %v4967_v24 = vadd.f32 %v4966_v44, %v4904_v59 }
 0x42f   :  { %v6259_v61 = vsel %vm4519_vm13, 1.0, %v12777_v9  ;;  %v4330_v4 = vshra.s32 %v4138_v37, 3  ;;  %v4140_v26 = vadd.s32 312, %v8570_v57  ;;  %v4771_v14 = vadd.f32 %v4770_v32, %v4708_v23  ;;  %v3761_v59 = vpop.f32.mrf.mxu2  ;;  %v3930_v19 = vpop.f32.mrf.mxu3 }
 0x430   :  { %vm9838_vm14 = vcmp.lt.s32.totalorder %v4200_v55, 7  ;;  %vm4456_vm15 = vcmp.lt.s32.totalorder %v4392_v17, 7  ;;  %v4331_v7 = vshra.s32 %v4139_v5, 3  ;;  %v4968_v16 = vadd.f32 %v4967_v24, %v4905_v51  ;;  %v2323_v32 = vpop.f32.mrf.mxu0 }
 0x431   :  { %v4843_v22 = vmul.f32 %v9825_v2, %v9825_v2  ;;  %vm9844_vm1 = vcmp.lt.s32.totalorder %v4201_v33, 7  ;;  %v4393_v44 = vand.u32 7, %v4329_v3  ;;  %v4709_v8 = vmul.f32 %v6257_v54, %v9799_v6  ;;  %v2492_v51 = vpop.f32.mrf.mxu1  ;;  %vm4520_vm3 = vmand %vm9838_vm14, %vm4456_vm15 }
 0x432   :  { %v4906_v23 = vmul.f32 %v6257_v54, %v4842_v12  ;;  %v9851_v55 = vadd.f32 %v9489_v49, %v9003_v31  ;;  %v3931_v43 = vadd.f32 %v3930_v19, %v3761_v59  ;;  %v4202_v24 = vand.u32 7, %v4138_v37  ;;  %v12967_v12 = vld [vmem:[#allocation78_spill] sm:$0xff] }
 0x433   :  { %v4394_v1 = vand.u32 7, %v4330_v4  ;;  %v4332_v27 = vshra.s32 %v4140_v26, 3  ;;  %v2493_v33 = vadd.f32 %v2492_v51, %v2323_v32  ;;  %v4203_v0 = vand.u32 7, %v4139_v5 }
 0x434   :  { %12966 = vst [vmem:[#allocation35_spill] sm:$0xff] %v9851_v55  ;;  %v4395_v34 = vand.u32 7, %v4331_v7  ;;  %v4141_v3 = vadd.s32 320, %v8570_v57  ;;  %v9854_v13 = vadd.f32 %v3931_v43, %v2576_v63  ;;  %v4710_v6 = vmul.f32 %v6258_v46, %v9825_v2 }
 0x435   :  { %v4907_v54 = vmul.f32 %v6258_v46, %v4843_v22  ;;  %vm4457_vm2 = vcmp.lt.s32.totalorder %v4393_v44, 7  ;;  %v2577_v31 = vadd.f32 %v2493_v33, %v12967_v12  ;;  %v4772_v30 = vadd.f32 %v4771_v14, %v4709_v8 }
 0x436   :  { %v4969_v59 = vadd.f32 %v4968_v16, %v4906_v23  ;;  %v4844_v37 = vmul.f32 %v9851_v55, %v9851_v55  ;;  %v9862_v4 = vadd.f32 %v9489_v49, %v9078_v36  ;;  %vm9867_vm4 = vcmp.lt.s32.totalorder %v4202_v24, 7  ;;  %vm9879_vm8 = vmand %vm9844_vm1, %vm4457_vm2 }
 0x437   :  { %vm4458_vm5 = vcmp.lt.s32.totalorder %v4394_v1, 7  ;;  %v4204_v63 = vand.u32 7, %v4140_v26  ;;  %v4396_v46 = vand.u32 7, %v4332_v27  ;;  %vm9871_vm6 = vcmp.lt.s32.totalorder %v4203_v0, 7  ;;  %v3764_v27 = vpop.f32.mrf.mxu2  ;;  %v3933_v0 = vpop.f32.mrf.mxu3 }
 0x438   :  { %12968 = vst [vmem:[#allocation38_spill] sm:$0xff] %v9862_v4  ;;  %vm4459_vm7 = vcmp.lt.s32.totalorder %v4395_v34, 7  ;;  %v4333_v7 = vshra.s32 %v4141_v3, 3  ;;  %v4773_v16 = vadd.f32 %v4772_v30, %v4710_v6  ;;  %v4970_v36 = vadd.f32 %v4969_v59, %v4907_v54  ;;  %vm9890_vm9 = vmand %vm9867_vm4, %vm4458_vm5  ;;  %v2325_v44 = vpop.f32.mrf.mxu0  ;;  %v12982_v59 = vld [vmem:[#allocation79_spill] sm:$0xff] }
 0x439   :  { %v6260_v17 = vsel %vm4520_vm3, 1.0, %v12777_v9  ;;  %v4142_v26 = vadd.s32 328, %v8570_v57  ;;  %v4711_v22 = vmul.f32 %v6259_v61, %v9851_v55  ;;  %v4908_v19 = vmul.f32 %v6259_v61, %v4844_v37  ;;  %v2494_v8 = vpop.f32.mrf.mxu1  ;;  %vm9897_vm0 = vmand %vm9871_vm6, %vm4459_vm7 }
 0x43a   :  { %v4845_v30 = vmul.f32 %v9862_v4, %v9862_v4  ;;  %v3934_v52 = vadd.f32 %v3933_v0, %v3764_v27  ;;  %vm9901_vm10 = vcmp.lt.s32.totalorder %v4204_v63, 7  ;;  %vm4460_vm11 = vcmp.lt.s32.totalorder %v4396_v46, 7 }
 0x43b   :  { %v4143_v1 = vadd.s32 336, %v8570_v57  ;;  %v2495_v43 = vadd.f32 %v2494_v8, %v2325_v44  ;;  %v9908_v32 = vadd.f32 %v9489_v49, %v9151_v20  ;;  %v4205_v51 = vand.u32 7, %v4141_v3  ;;  %vm4524_vm12 = vmand %vm9901_vm10, %vm4460_vm11 }
 0x43c   :  { %v4397_v34 = vand.u32 7, %v4333_v7  ;;  %v9910_v24 = vadd.f32 %v3934_v52, %v2577_v31  ;;  %v4712_v33 = vmul.f32 %v6260_v17, %v9862_v4  ;;  %v4334_v54 = vshra.s32 %v4142_v26, 3 }
 0x43d   :  { %12981 = vst [vmem:[#allocation29_spill] sm:$0xff] %v9908_v32  ;;  %v4144_v12 = vadd.s32 344, %v8570_v57  ;;  %v2578_v37 = vadd.f32 %v2495_v43, %v12982_v59  ;;  %v4909_v5 = vmul.f32 %v6260_v17, %v4845_v30  ;;  %v6261_v63 = vsel %vm9879_vm8, 1.0, %v12777_v9 }
 0x43e   :  { %v6262_v20 = vsel %vm9890_vm9, 1.0, %v12777_v9  ;;  %v6263_v3 = vsel %vm9897_vm0, 1.0, %v12777_v9  ;;  %v4774_v31 = vadd.f32 %v4773_v16, %v4711_v22  ;;  %v4971_v14 = vadd.f32 %v4970_v36, %v4908_v19 }
 0x43f   :  { %v9929_v7 = vadd.f32 %v9489_v49, %v9194_v50  ;;  %v4335_v17 = vshra.s32 %v4143_v1, 3  ;;  %v4846_v15 = vmul.f32 %v9908_v32, %v9908_v32  ;;  %vm9933_vm13 = vcmp.lt.s32.totalorder %v4205_v51, 7  ;;  %v3766_v22 = vpop.f32.mrf.mxu2  ;;  %v3935_v19 = vpop.f32.mrf.mxu3 }
 0x440   :  { %vm4461_vm14 = vcmp.lt.s32.totalorder %v4397_v34, 7  ;;  %v4206_v0 = vand.u32 7, %v4142_v26  ;;  %v4775_v46 = vadd.f32 %v4774_v31, %v4712_v33  ;;  %v9938_v30 = vsel %vm4524_vm12, 1.0, %v12777_v9  ;;  %v2328_v8 = vpop.f32.mrf.mxu0 }
 0x441   :  { %12983 = vst [vmem:[#allocation32_spill] sm:$0xff] %v9929_v7  ;;  %v4398_v16 = vand.u32 7, %v4334_v54  ;;  %v4336_v36 = vshra.s32 %v4144_v12, 3  ;;  %v4972_v50 = vadd.f32 %v4971_v14, %v4909_v5  ;;  %v4713_v6 = vmul.f32 %v6261_v63, %v9908_v32  ;;  %v2497_v23 = vpop.f32.mrf.mxu1  ;;  %vm4525_vm15 = vmand %vm9933_vm13, %vm4461_vm14  ;;  %v12989_v14 = vld [vmem:[#allocation80_spill] sm:$0xff] }
 0x442   :  { %v9943_v52 = vadd.f32 %v9489_v49, %v9250_v35  ;;  %v3936_v44 = vadd.f32 %v3935_v19, %v3766_v22  ;;  %v4847_v26 = vmul.f32 %v9929_v7, %v9929_v7  ;;  %v4207_v61 = vand.u32 7, %v4143_v1 }
 0x443   :  { %v4399_v43 = vand.u32 7, %v4335_v17  ;;  %v2498_v51 = vadd.f32 %v2497_v23, %v2328_v8  ;;  %v4910_v33 = vmul.f32 %v6261_v63, %v4846_v15  ;;  %vm9950_vm1 = vcmp.lt.s32.totalorder %v4206_v0, 7 }
 0x444   :  { %12986 = vst [vmem:[#allocation39_spill] sm:$0xff] %v9943_v52  ;;  %v4145_v35 = vadd.s32 352, %v8570_v57  ;;  %v9955_v59 = vadd.f32 %v3936_v44, %v2578_v37  ;;  %vm4462_vm2 = vcmp.lt.s32.totalorder %v4398_v16, 7  ;;  %v4208_v5 = vand.u32 7, %v4144_v12 }
 0x445   :  { %v4400_v31 = vand.u32 7, %v4336_v36  ;;  %v2579_v34 = vadd.f32 %v2498_v51, %v12989_v14  ;;  %v4714_v27 = vmul.f32 %v6262_v20, %v9929_v7  ;;  %v4848_v1 = vmul.f32 %v9943_v52, %v9943_v52  ;;  %vm9975_vm5 = vmand %vm9950_vm1, %vm4462_vm2 }
 0x446   :  { %v6265_v63 = vsel %vm4525_vm15, 1.0, %v12777_v9  ;;  %v4146_v17 = vadd.s32 360, %v8570_v57  ;;  %v4911_v15 = vmul.f32 %v6262_v20, %v4847_v26  ;;  %vm9963_vm3 = vcmp.lt.s32.totalorder %v4207_v61, 7 }
 0x447   :  { %vm4463_vm4 = vcmp.lt.s32.totalorder %v4399_v43, 7  ;;  %v4147_v12 = vadd.s32 368, %v8570_v57  ;;  %v4776_v37 = vadd.f32 %v4775_v46, %v4713_v6  ;;  %v4973_v36 = vadd.f32 %v4972_v50, %v4910_v33  ;;  %v3769_v50 = vpop.f32.mrf.mxu2 }
 0x448   :  { %v9970_v22 = vadd.f32 %v9489_v49, %v9321_v40  ;;  %v4337_v20 = vshra.s32 %v4145_v35, 3  ;;  %v4715_v44 = vmul.f32 %v6263_v3, %v9943_v52  ;;  %vm9980_vm6 = vcmp.lt.s32.totalorder %v4208_v5, 7  ;;  %v3938_v40 = vpop.f32.mrf.mxu3  ;;  %vm9992_vm8 = vmand %vm9963_vm3, %vm4463_vm4  ;;  %v9996_v51 = vpop.f32.mrf.mxu0 }
 0x449   :  { %vm4464_vm7 = vcmp.lt.s32.totalorder %v4400_v31, 7  ;;  %v4148_v46 = vadd.s32 376, %v8570_v57  ;;  %v4912_v6 = vmul.f32 %v6263_v3, %v4848_v1  ;;  %v9987_v16 = vadd.f32 %v9489_v49, %v9394_v39  ;;  %v9998_v33 = vpop.f32.mrf.mxu1 }
 0x44a   :  { %12992 = vst [vmem:[#allocation42_spill] sm:$0xff] %v9970_v22  ;;  %v4338_v26 = vshra.s32 %v4146_v17, 3  ;;  %v3939_v61 = vadd.f32 %v3938_v40, %v3769_v50  ;;  %v4777_v54 = vadd.f32 %v4776_v37, %v4714_v27  ;;  %v4974_v5 = vadd.f32 %v4973_v36, %v4911_v15  ;;  %vm4528_vm9 = vmand %vm9980_vm6, %vm4464_vm7 }
 0x44b   :  { %12997 = vst [vmem:[#allocation33_spill] sm:$0xff] %v9987_v16  ;;  %v6266_v39 = vsel %vm9975_vm5, 1.0, %v12777_v9  ;;  %v4339_v3 = vshra.s32 %v4147_v12, 3  ;;  %v4849_v43 = vmul.f32 %v9970_v22, %v9970_v22  ;;  %v4209_v14 = vand.u32 7, %v4145_v35 }
 0x44c   :  { %v4401_v1 = vand.u32 7, %v4337_v20  ;;  %v10008_v0 = vadd.f32 %v3939_v61, %v2579_v34  ;;  %v4778_v50 = vadd.f32 %v4777_v54, %v4715_v44  ;;  %v10012_v27 = vadd.f32 %v9489_v49, %v9466_v10 }
 0x44d   :  { %v6267_v15 = vsel %vm9992_vm8, 1.0, %v12777_v9  ;;  %v4340_v37 = vshra.s32 %v4148_v46, 3  ;;  %v4975_v36 = vadd.f32 %v4974_v5, %v4912_v6  ;;  %v4850_v31 = vmul.f32 %v9987_v16, %v9987_v16 }
 0x44e   :  { %13000 = vst [vmem:[#allocation36_spill] sm:$0xff] %v10012_v27  ;;  %v4210_v19 = vand.u32 7, %v4146_v17  ;;  %v4402_v8 = vand.u32 7, %v4338_v26  ;;  %v10021_v35 = vadd.f32 %v9489_v49, %v9520_v38  ;;  %v6268_v34 = vsel %vm4528_vm9, 1.0, %v12777_v9 }
 0x44f   :  { %v4211_v20 = vand.u32 7, %v4147_v12  ;;  %v4403_v10 = vand.u32 7, %v4339_v3  ;;  %v4716_v44 = vmul.f32 %v9938_v30, %v9970_v22  ;;  %v4913_v40 = vmul.f32 %v9938_v30, %v4849_v43  ;;  %v10037_v26 = vpop.f32.mrf.mxu2 }
 0x450   :  { %13001 = vst [vmem:[#allocation43_spill] sm:$0xff] %v10021_v35  ;;  %vm10027_vm0 = vcmp.lt.s32.totalorder %v4209_v14, 7  ;;  %vm4465_vm10 = vcmp.lt.s32.totalorder %v4401_v1, 7  ;;  %v4851_v17 = vmul.f32 %v10012_v27, %v10012_v27  ;;  %v10035_v38 = vadd.f32 %v9489_v49, %v9583_v28  ;;  %v10039_v61 = vpop.f32.mrf.mxu3  ;;  %v10046_v3 = vpop.f32.mrf.mxu0 }
 0x451   :  { %v4212_v23 = vand.u32 7, %v4148_v46  ;;  %v4404_v12 = vand.u32 7, %v4340_v37  ;;  %v4717_v30 = vmul.f32 %v6265_v63, %v9987_v16  ;;  %v4914_v54 = vmul.f32 %v6265_v63, %v4850_v31  ;;  %v10048_v43 = vpop.f32.mrf.mxu1  ;;  %vm4529_vm15 = vmand %vm10027_vm0, %vm4465_vm10 }
 0x452   :  { %13004 = vst [vmem:[#allocation46_spill] sm:$0xff] %v10035_v38  ;;  %vm10042_vm11 = vcmp.lt.s32.totalorder %v4210_v19, 7  ;;  %vm4466_vm12 = vcmp.lt.s32.totalorder %v4402_v8, 7  ;;  %v4852_v28 = vmul.f32 %v10021_v35, %v10021_v35  ;;  %vm10052_vm13 = vcmp.lt.s32.totalorder %v4211_v20, 7 }
 0x453   :  { %vm4467_vm14 = vcmp.lt.s32.totalorder %v4403_v10, 7  ;;  %v4149_v14 = vadd.s32 384, %v8570_v57  ;;  %v4779_v63 = vadd.f32 %v4778_v50, %v4716_v44  ;;  %v4976_v37 = vadd.f32 %v4975_v36, %v4913_v40  ;;  %vm4530_vm1 = vmand %vm10042_vm11, %vm4466_vm12 }
 0x454   :  { %v4718_v31 = vmul.f32 %v6266_v39, %v10012_v27  ;;  %v4150_v19 = vadd.s32 392, %v8570_v57  ;;  %v4915_v8 = vmul.f32 %v6266_v39, %v4851_v17  ;;  %v4853_v20 = vmul.f32 %v10035_v38, %v10035_v38  ;;  %vm4531_vm4 = vmand %vm10052_vm13, %vm4467_vm14 }
 0x455   :  { %vm4276_vm2 = vcmp.lt.s32.totalorder %v4212_v23, 7  ;;  %vm4468_vm3 = vcmp.lt.s32.totalorder %v4404_v12, 7  ;;  %v4780_v16 = vadd.f32 %v4779_v63, %v4717_v30  ;;  %v4719_v50 = vmul.f32 %v6267_v15, %v10021_v35 }
 0x456   :  { %v10069_v1 = vadd.f32 %v9489_v49, %v9630_v11  ;;  %v4151_v39 = vadd.s32 400, %v8570_v57  ;;  %v4977_v36 = vadd.f32 %v4976_v37, %v4914_v54  ;;  %v4916_v44 = vmul.f32 %v6267_v15, %v4852_v28  ;;  %vm10077_vm5 = vmand %vm4276_vm2, %vm4468_vm3 }
 0x457   :  { %v6269_v40 = vsel %vm4529_vm15, 1.0, %v12777_v9  ;;  %v4341_v6 = vshra.s32 %v4149_v14, 3  ;;  %v4781_v17 = vadd.f32 %v4780_v16, %v4718_v31  ;;  %v6270_v23 = vsel %vm4530_vm1, 1.0, %v12777_v9  ;;  %v10084_v15 = vpop.f32.mrf.mxu2 }
 0x458   :  { %13009 = vst [vmem:[#allocation37_spill] sm:$0xff] %v10069_v1  ;;  %v4342_v11 = vshra.s32 %v4150_v19, 3  ;;  %v4152_v10 = vadd.s32 408, %v8570_v57  ;;  %v4978_v30 = vadd.f32 %v4977_v36, %v4915_v8  ;;  %v4720_v5 = vmul.f32 %v6268_v34, %v10035_v38  ;;  %v10086_v28 = vpop.f32.mrf.mxu3  ;;  %v10094_v35 = vpop.f32.mrf.mxu0 }
 0x459   :  { %v4917_v46 = vmul.f32 %v6268_v34, %v4853_v20  ;;  %v6271_v54 = vsel %vm4531_vm4, 1.0, %v12777_v9  ;;  %v4782_v16 = vadd.f32 %v4781_v17, %v4719_v50  ;;  %v4854_v63 = vmul.f32 %v10069_v1, %v10069_v1  ;;  %v10096_v8 = vpop.f32.mrf.mxu1 }
 0x45a   :  { %v10092_v37 = vadd.f32 %v9489_v49, %v9672_v58  ;;  %v4343_v31 = vshra.s32 %v4151_v39, 3  ;;  %v4979_v34 = vadd.f32 %v4978_v30, %v4916_v44  ;;  %v6272_v20 = vsel %vm10077_vm5, 1.0, %v12777_v9 }
 0x45b   :  { %v4213_v36 = vand.u32 7, %v4149_v14  ;;  %v4405_v38 = vand.u32 7, %v4341_v6  ;;  %v4214_v50 = vand.u32 7, %v4150_v19  ;;  %v4406_v17 = vand.u32 7, %v4342_v11 }
 0x45c   :  { %13012 = vst [vmem:[#allocation40_spill] sm:$0xff] %v10092_v37  ;;  %v4344_v27 = vshra.s32 %v4152_v10, 3  ;;  %v4153_v22 = vadd.s32 416, %v8570_v57  ;;  %v4783_v52 = vadd.f32 %v4782_v16, %v4720_v5  ;;  %v4980_v58 = vadd.f32 %v4979_v34, %v4917_v46 }
 0x45d   :  { %v4721_v7 = vmul.f32 %v6269_v40, %v10069_v1  ;;  %v10105_v32 = vadd.f32 %v9489_v49, %v9723_v45  ;;  %v4918_v44 = vmul.f32 %v6269_v40, %v4854_v63  ;;  %v4855_v12 = vmul.f32 %v10092_v37, %v10092_v37 }
 0x45e   :  { %v4215_v30 = vand.u32 7, %v4151_v39  ;;  %v4407_v14 = vand.u32 7, %v4343_v31  ;;  %v10111_v19 = vadd.f32 %v9489_v49, %v9766_v41  ;;  %vm10113_vm6 = vcmp.lt.s32.totalorder %v4213_v36, 7  ;;  %v10149_v36 = vld [vmem:[%s12186_s2] ss:$0 sm:$0xff] }
 0x45f   :  { %13013 = vst [vmem:[#allocation47_spill] sm:$0xff] %v10105_v32  ;;  %vm4469_vm7 = vcmp.lt.s32.totalorder %v4405_v38, 7  ;;  %v4216_v11 = vand.u32 7, %v4152_v10  ;;  %vm10117_vm8 = vcmp.lt.s32.totalorder %v4214_v50, 7  ;;  %vm4470_vm9 = vcmp.lt.s32.totalorder %v4406_v17, 7  ;;  %v10125_v16 = vpop.f32.mrf.mxu2 }
 0x460   :  { %13014 = vst [vmem:[#allocation50_spill] sm:$0xff] %v10111_v19  ;;  %v4408_v45 = vand.u32 7, %v4344_v27  ;;  %v4345_v40 = vshra.s32 %v4153_v22, 3  ;;  %v4784_v46 = vadd.f32 %v4783_v52, %v4721_v7  ;;  %v4722_v39 = vmul.f32 %v6270_v23, %v10092_v37  ;;  %v10127_v63 = vpop.f32.mrf.mxu3  ;;  %vm10131_vm0 = vmand %vm10113_vm6, %vm4469_vm7  ;;  %v10139_v52 = vpop.f32.mrf.mxu0 }
 0x461   :  { %v4856_v49 = vmul.f32 %v10105_v32, %v10105_v32  ;;  %v4154_v41 = vadd.s32 424, %v8570_v57  ;;  %v4981_v38 = vadd.f32 %v4980_v58, %v4918_v44  ;;  %v4919_v10 = vmul.f32 %v6270_v23, %v4855_v12  ;;  %v10141_v27 = vpop.f32.mrf.mxu1  ;;  %vm4534_vm12 = vmand %vm10117_vm8, %vm4470_vm9 }
 0x462   :  { %vm10135_vm10 = vcmp.lt.s32.totalorder %v4215_v30, 7  ;;  %vm4471_vm11 = vcmp.lt.s32.totalorder %v4407_v14, 7  ;;  %v4723_v34 = vmul.f32 %v6271_v54, %v10105_v32  ;;  %v4857_v23 = vmul.f32 %v10111_v19, %v10111_v19 }
 0x463   :  { %v10153_v50 = vadd.f32 %v10149_v36, %v9821_v62  ;;  %vm10158_vm13 = vcmp.lt.s32.totalorder %v4216_v11, 7  ;;  %vm4472_vm14 = vcmp.lt.s32.totalorder %v4408_v45, 7  ;;  %v4217_v44 = vand.u32 7, %v4153_v22  ;;  %vm10170_vm15 = vmand %vm10135_vm10, %vm4471_vm11 }
 0x464   :  { %v4409_v12 = vand.u32 7, %v4345_v40  ;;  %v4155_v30 = vadd.s32 432, %v8570_v57  ;;  %v4785_v6 = vadd.f32 %v4784_v46, %v4722_v39  ;;  %v4920_v32 = vmul.f32 %v6271_v54, %v4856_v49  ;;  %vm4536_vm1 = vmand %vm10158_vm13, %vm4472_vm14 }
 0x465   :  { %13023 = vst [vmem:[#allocation41_spill] sm:$0xff] %v10153_v50  ;;  %v4346_v37 = vshra.s32 %v4154_v41, 3  ;;  %v4982_v1 = vadd.f32 %v4981_v38, %v4919_v10  ;;  %v6273_v62 = vsel %vm10131_vm0, 1.0, %v12777_v9  ;;  %v6274_v17 = vsel %vm4534_vm12, 1.0, %v12777_v9 }
 0x466   :  { %v4156_v22 = vadd.s32 440, %v8570_v57  ;;  %v4786_v5 = vadd.f32 %v4785_v6, %v4723_v34  ;;  %v4724_v54 = vmul.f32 %v6272_v20, %v10111_v19  ;;  %v4921_v40 = vmul.f32 %v6272_v20, %v4857_v23 }
 0x467   :  { %v4858_v46 = vmul.f32 %v10153_v50, %v10153_v50  ;;  %v10183_v14 = vadd.f32 %v10149_v36, %v9854_v13  ;;  %vm10185_vm2 = vcmp.lt.s32.totalorder %v4217_v44, 7  ;;  %vm4473_vm3 = vcmp.lt.s32.totalorder %v4409_v12, 7  ;;  %v10189_v31 = vpop.f32.mrf.mxu2 }
 0x468   :  { %v4347_v49 = vshra.s32 %v4155_v30, 3  ;;  %v4983_v38 = vadd.f32 %v4982_v1, %v4920_v32  ;;  %v4218_v10 = vand.u32 7, %v4154_v41  ;;  %v4410_v20 = vand.u32 7, %v4346_v37  ;;  %v10191_v7 = vpop.f32.mrf.mxu3  ;;  %v10199_v44 = vpop.f32.mrf.mxu0  ;;  %vm4537_vm4 = vmand %vm10185_vm2, %vm4473_vm3 }
 0x469   :  { %v4157_v45 = vadd.s32 448, %v8570_v57  ;;  %v4725_v34 = vmul.f32 %v6273_v62, %v10153_v50  ;;  %v6275_v13 = vsel %vm10170_vm15, 1.0, %v12777_v9  ;;  %v6276_v23 = vsel %vm4536_vm1, 1.0, %v12777_v9  ;;  %v10201_v32 = vpop.f32.mrf.mxu1 }
 0x46a   :  { %v4348_v58 = vshra.s32 %v4156_v22, 3  ;;  %v4787_v1 = vadd.f32 %v4786_v5, %v4724_v54  ;;  %v4984_v37 = vadd.f32 %v4983_v38, %v4921_v40  ;;  %v4922_v41 = vmul.f32 %v6273_v62, %v4858_v46 }
 0x46b   :  { %v10205_v6 = vadd.f32 %v10149_v36, %v9910_v24  ;;  %v4859_v11 = vmul.f32 %v10183_v14, %v10183_v14  ;;  %v10214_v50 = vadd.f32 %v10149_v36, %v9955_v59  ;;  %v4219_v19 = vand.u32 7, %v4155_v30 }
 0x46c   :  { %v4411_v4 = vand.u32 7, %v4347_v49  ;;  %v2500_v62 = vadd.f32 %v9998_v33, %v9996_v51  ;;  %vm4282_vm5 = vcmp.lt.s32.totalorder %v4218_v10, 7  ;;  %vm4474_vm6 = vcmp.lt.s32.totalorder %v4410_v20, 7  ;;  %v13034_v10 = vld [vmem:[#allocation81_spill] sm:$0xff] }
 0x46d   :  { %v4349_v24 = vshra.s32 %v4157_v45, 3  ;;  %v4788_v5 = vadd.f32 %v4787_v1, %v4725_v34  ;;  %v6277_v12 = vsel %vm4537_vm4, 1.0, %v12777_v9  ;;  %v4220_v54 = vand.u32 7, %v4156_v22  ;;  %vm10226_vm7 = vmand %vm4282_vm5, %vm4474_vm6 }
 0x46e   :  { %v4412_v40 = vand.u32 7, %v4348_v58  ;;  %v4985_v46 = vadd.f32 %v4984_v37, %v4922_v41  ;;  %v4726_v39 = vmul.f32 %v6274_v17, %v10183_v14  ;;  %v4860_v59 = vmul.f32 %v10205_v6, %v10205_v6 }
 0x46f   :  { %v3941_v30 = vadd.f32 %v10039_v61, %v10037_v26  ;;  %v4923_v49 = vmul.f32 %v6274_v17, %v4859_v11  ;;  %v4861_v51 = vmul.f32 %v10214_v50, %v10214_v50  ;;  %vm10230_vm8 = vcmp.lt.s32.totalorder %v4219_v19, 7  ;;  %v10239_v17 = vpop.f32.mrf.mxu2  ;;  %v13040_v19 = vld [vmem:[#allocation83_spill] sm:$0xff] }
 0x470   :  { %vm4475_vm9 = vcmp.lt.s32.totalorder %v4411_v4, 7  ;;  %v10236_v38 = vadd.f32 %v10149_v36, %v10008_v0  ;;  %v2580_v20 = vadd.f32 %v2500_v62, %v13034_v10  ;;  %v4221_v26 = vand.u32 7, %v4157_v45  ;;  %v10241_v34 = vpop.f32.mrf.mxu3  ;;  %v2343_v0 = vpop.f32.mrf.mxu0 }
 0x471   :  { %v4413_v61 = vand.u32 7, %v4349_v24  ;;  %v2503_v58 = vadd.f32 %v10048_v43, %v10046_v3  ;;  %vm10245_vm0 = vcmp.lt.s32.totalorder %v4220_v54, 7  ;;  %vm4476_vm10 = vcmp.lt.s32.totalorder %v4412_v40, 7  ;;  %v2512_v37 = vpop.f32.mrf.mxu1  ;;  %vm4539_vm11 = vmand %vm10230_vm8, %vm4475_vm9 }
 0x472   :  { %v4158_v1 = vadd.s32 456, %v8570_v57  ;;  %v4727_v41 = vmul.f32 %v6275_v13, %v10205_v6  ;;  %v4924_v45 = vmul.f32 %v6275_v13, %v4860_v59  ;;  %v4021_v11 = vadd.f32 %v3941_v30, %v2580_v20  ;;  %vm4540_vm12 = vmand %vm10245_vm0, %vm4476_vm10 }
 0x473   :  { %v6278_v62 = vsel %vm10226_vm7, 1.0, %v12777_v9  ;;  %v4789_v24 = vadd.f32 %v4788_v5, %v4726_v39  ;;  %v4986_v10 = vadd.f32 %v4985_v46, %v4923_v49  ;;  %v4728_v3 = vmul.f32 %v6276_v23, %v10214_v50  ;;  %v13037_v5 = vld [vmem:[#allocation82_spill] sm:$0xff] }
 0x474   :  { %v3944_v43 = vadd.f32 %v10086_v28, %v10084_v15  ;;  %v4925_v54 = vmul.f32 %v6276_v23, %v4861_v51  ;;  %v4862_v13 = vmul.f32 %v10236_v38, %v10236_v38  ;;  %vm4285_vm13 = vcmp.lt.s32.totalorder %v4221_v26, 7 }
 0x475   :  { %vm4477_vm14 = vcmp.lt.s32.totalorder %v4413_v61, 7  ;;  %v2581_v46 = vadd.f32 %v2503_v58, %v13037_v5  ;;  %v2505_v39 = vadd.f32 %v10096_v8, %v10094_v35  ;;  %v4350_v15 = vshra.s32 %v4158_v1, 3 }
 0x476   :  { %v4159_v4 = vadd.s32 464, %v8570_v57  ;;  %v4790_v28 = vadd.f32 %v4789_v24, %v4727_v41  ;;  %v4987_v59 = vadd.f32 %v4986_v10, %v4924_v45  ;;  %v4729_v23 = vmul.f32 %v6277_v12, %v10236_v38  ;;  %vm10279_vm15 = vmand %vm4285_vm13, %vm4477_vm14 }
 0x477   :  { %v10271_v30 = vadd.f32 %v10149_v36, %v4021_v11  ;;  %v4022_v40 = vadd.f32 %v3944_v43, %v2581_v46  ;;  %v6279_v49 = vsel %vm4539_vm11, 1.0, %v12777_v9  ;;  %v3946_v51 = vadd.f32 %v10127_v63, %v10125_v16  ;;  %v3784_v61 = vpop.f32.mrf.mxu2 }
 0x478   :  { %v10277_v33 = vsel %vm4540_vm12, 1.0, %v12777_v9  ;;  %v4791_v8 = vadd.f32 %v4790_v28, %v4728_v3  ;;  %v4988_v22 = vadd.f32 %v4987_v59, %v4925_v54  ;;  %v4926_v20 = vmul.f32 %v6277_v12, %v4862_v13  ;;  %v3953_v58 = vpop.f32.mrf.mxu3  ;;  %v2345_v24 = vpop.f32.mrf.mxu0 }
 0x479   :  { %v4222_v26 = vand.u32 7, %v4158_v1  ;;  %v2582_v41 = vadd.f32 %v2505_v39, %v13040_v19  ;;  %v4414_v45 = vand.u32 7, %v4350_v15  ;;  %v4351_v11 = vshra.s32 %v4159_v4, 3  ;;  %v2514_v10 = vpop.f32.mrf.mxu1 }
 0x47a   :  { %v4160_v16 = vadd.s32 472, %v8570_v57  ;;  %v4792_v63 = vadd.f32 %v4791_v8, %v4729_v23  ;;  %v4730_v43 = vmul.f32 %v6278_v62, %v10271_v30  ;;  %v2508_v5 = vadd.f32 %v10141_v27, %v10139_v52 }
 0x47b   :  { %v10291_v12 = vsel %vm10279_vm15, 1.0, %v12777_v9  ;;  %v4863_v1 = vmul.f32 %v10271_v30, %v10271_v30  ;;  %v10296_v3 = vadd.f32 %v10149_v36, %v4022_v40  ;;  %v4023_v54 = vadd.f32 %v3946_v51, %v2582_v41  ;;  %v13043_v40 = vld [vmem:[#allocation84_spill] sm:$0xff] }
 0x47c   :  { %v4161_v13 = vadd.s32 480, %v8570_v57  ;;  %v4989_v46 = vadd.f32 %v4988_v22, %v4926_v20  ;;  %v3949_v39 = vadd.f32 %v10191_v7, %v10189_v31  ;;  %v2510_v52 = vadd.f32 %v10201_v32, %v10199_v44  ;;  %v13044_v20 = vld [vmem:[#allocation85_spill] sm:$0xff] }
 0x47d   :  { %vm10303_vm1 = vcmp.lt.s32.totalorder %v4222_v26, 7  ;;  %vm4478_vm2 = vcmp.lt.s32.totalorder %v4414_v45, 7  ;;  %v4223_v15 = vand.u32 7, %v4159_v4  ;;  %v4415_v28 = vand.u32 7, %v4351_v11 }
 0x47e   :  { %v4352_v59 = vshra.s32 %v4160_v16, 3  ;;  %v4793_v23 = vadd.f32 %v4792_v63, %v4730_v43  ;;  %v2583_v51 = vadd.f32 %v2508_v5, %v13043_v40  ;;  %v3951_v35 = vadd.f32 %v10241_v34, %v10239_v17  ;;  %v13047_v43 = vld [vmem:[#allocation86_spill] sm:$0xff]  ;;  %vm4542_vm5 = vmand %vm10303_vm1, %vm4478_vm2 }
 0x47f   :  { %v2513_v8 = vadd.f32 %v2512_v37, %v2343_v0  ;;  %v4927_v22 = vmul.f32 %v6278_v62, %v4863_v1  ;;  %v4864_v31 = vmul.f32 %v10296_v3, %v10296_v3  ;;  %v10313_v7 = vadd.f32 %v10149_v36, %v4023_v54  ;;  %v3786_v41 = vpop.f32.mrf.mxu2 }
 0x480   :  { %v4353_v44 = vshra.s32 %v4161_v13, 3  ;;  %v4024_v32 = vadd.f32 %v3949_v39, %v2583_v51  ;;  %v2584_v4 = vadd.f32 %v2510_v52, %v13044_v20  ;;  %v3954_v26 = vadd.f32 %v3953_v58, %v3784_v61  ;;  %v3955_v11 = vpop.f32.mrf.mxu3  ;;  %v13048_v52 = vld [vmem:[#allocation87_spill] sm:$0xff] }
 0x481   :  { %v2515_v19 = vadd.f32 %v2514_v10, %v2345_v24  ;;  %vm10316_vm3 = vcmp.lt.s32.totalorder %v4223_v15, 7  ;;  %vm4479_vm4 = vcmp.lt.s32.totalorder %v4415_v28, 7  ;;  %v4224_v17 = vand.u32 7, %v4160_v16  ;;  %v2348_v0 = vpop.f32.mrf.mxu0 }
 0x482   :  { %v4416_v34 = vand.u32 7, %v4352_v59  ;;  %v2517_v37 = vpop.f32.mrf.mxu1  ;;  %v4025_v62 = vadd.f32 %v3951_v35, %v2584_v4  ;;  %v2585_v5 = vadd.f32 %v2513_v8, %v13047_v43  ;;  %v3956_v1 = vadd.f32 %v3955_v11, %v3786_v41  ;;  %vm10342_vm8 = vmand %vm10316_vm3, %vm4479_vm4 }
 0x483   :  { %v4162_v54 = vadd.s32 488, %v8570_v57  ;;  %v4731_v61 = vmul.f32 %v6279_v49, %v10296_v3  ;;  %v4928_v58 = vmul.f32 %v6279_v49, %v4864_v31  ;;  %v4865_v24 = vmul.f32 %v10313_v7, %v10313_v7 }
 0x484   :  { %v4225_v10 = vand.u32 7, %v4161_v13  ;;  %v10329_v16 = vadd.f32 %v10149_v36, %v4024_v32  ;;  %v4026_v39 = vadd.f32 %v3954_v26, %v2585_v5  ;;  %v2586_v15 = vadd.f32 %v2515_v19, %v13048_v52  ;;  %v13055_v26 = vld [vmem:[#allocation88_spill] sm:$0xff] }
 0x485   :  { %v4417_v59 = vand.u32 7, %v4353_v44  ;;  %v4990_v40 = vadd.f32 %v4989_v46, %v4927_v22  ;;  %vm4288_vm6 = vcmp.lt.s32.totalorder %v4224_v17, 7  ;;  %vm4480_vm7 = vcmp.lt.s32.totalorder %v4416_v34, 7 }
 0x486   :  { %v2518_v51 = vadd.f32 %v2517_v37, %v2348_v0  ;;  %v10333_v49 = vadd.f32 %v10149_v36, %v4025_v62  ;;  %v6282_v45 = vsel %vm4542_vm5, 1.0, %v12777_v9  ;;  %v4027_v35 = vadd.f32 %v3956_v1, %v2586_v15  ;;  %vm10351_vm9 = vmand %vm4288_vm6, %vm4480_vm7 }
 0x487   :  { %v4354_v27 = vshra.s32 %v4162_v54, 3  ;;  %v4794_v8 = vadd.f32 %v4793_v23, %v4731_v61  ;;  %v4991_v13 = vadd.f32 %v4990_v40, %v4928_v58  ;;  %v4732_v31 = vmul.f32 %v10277_v33, %v10313_v7  ;;  %v3789_v20 = vpop.f32.mrf.mxu2 }
 0x488   :  { %v4929_v32 = vmul.f32 %v10277_v33, %v4865_v24  ;;  %v4866_v22 = vmul.f32 %v10329_v16, %v10329_v16  ;;  %v10349_v44 = vadd.f32 %v10149_v36, %v4026_v39  ;;  %v3958_v4 = vpop.f32.mrf.mxu3  ;;  %vm10355_vm0 = vcmp.lt.s32.totalorder %v4225_v10, 7 }
 0x489   :  { %vm4481_vm10 = vcmp.lt.s32.totalorder %v4417_v59, 7  ;;  %v4733_v28 = vmul.f32 %v10291_v12, %v10329_v16  ;;  %v2587_v19 = vadd.f32 %v2518_v51, %v13055_v26  ;;  %v3959_v41 = vadd.f32 %v3958_v4, %v3789_v20  ;;  %v2350_v11 = vpop.f32.mrf.mxu0 }
 0x48a   :  { %v2519_v63 = vpop.f32.mrf.mxu1  ;;  %v4226_v17 = vand.u32 7, %v4162_v54  ;;  %v4867_v34 = vmul.f32 %v10333_v49, %v10333_v49  ;;  %v10365_v0 = vadd.f32 %v10149_v36, %v4027_v35  ;;  %v4418_v37 = vand.u32 7, %v4354_v27  ;;  %vm4545_vm11 = vmand %vm10355_vm0, %vm4481_vm10 }
 0x48b   :  { %v4163_v62 = vadd.s32 496, %v8570_v57  ;;  %v4795_v43 = vadd.f32 %v4794_v8, %v4732_v31  ;;  %v6283_v5 = vsel %vm10342_vm8, 1.0, %v12777_v9  ;;  %v6284_v1 = vsel %vm10351_vm9, 1.0, %v12777_v9 }
 0x48c   :  { %v4028_v61 = vadd.f32 %v3959_v41, %v2587_v19  ;;  %v4992_v54 = vadd.f32 %v4991_v13, %v4929_v32  ;;  %v4930_v58 = vmul.f32 %v10291_v12, %v4866_v22  ;;  %v4734_v24 = vmul.f32 %v6282_v45, %v10333_v49 }
 0x48d   :  { %v4868_v10 = vmul.f32 %v10349_v44, %v10349_v44  ;;  %v4796_v39 = vadd.f32 %v4795_v43, %v4733_v28  ;;  %v2520_v15 = vadd.f32 %v2519_v63, %v2350_v11  ;;  %vm10384_vm12 = vcmp.lt.s32.totalorder %v4226_v17, 7 }
 0x48e   :  { %v10382_v52 = vadd.f32 %v10149_v36, %v4028_v61  ;;  %v4931_v51 = vmul.f32 %v6282_v45, %v4867_v34  ;;  %v4869_v12 = vmul.f32 %v10365_v0, %v10365_v0  ;;  %vm4482_vm13 = vcmp.lt.s32.totalorder %v4418_v37, 7  ;;  %v13059_v45 = vld [vmem:[#allocation89_spill] sm:$0xff] }
 0x48f   :  { %v4355_v35 = vshra.s32 %v4163_v62, 3  ;;  %v4735_v59 = vmul.f32 %v6283_v5, %v10349_v44  ;;  %v6285_v27 = vsel %vm4545_vm11, 1.0, %v12777_v9  ;;  %v4993_v8 = vadd.f32 %v4992_v54, %v4930_v58  ;;  %v3791_v46 = vpop.f32.mrf.mxu2  ;;  %vm4546_vm14 = vmand %vm10384_vm12, %vm4482_vm13 }
 0x490   :  { %13056 = vst [vmem:[#allocation44_spill] sm:$0xff] %v10382_v52  ;;  %v4797_v13 = vadd.f32 %v4796_v39, %v4734_v24  ;;  %v4932_v31 = vmul.f32 %v6283_v5, %v4868_v10  ;;  %v4870_v32 = vmul.f32 %v10382_v52, %v10382_v52  ;;  %v3960_v22 = vpop.f32.mrf.mxu3  ;;  %v4736_v23 = vmul.f32 %v6284_v1, %v10365_v0 }
 0x491   :  { %v2588_v20 = vadd.f32 %v2520_v15, %v13059_v45  ;;  %v3961_v4 = vadd.f32 %v3960_v22, %v3791_v46  ;;  %v2353_v33 = vpop.f32.mrf.mxu0  ;;  %v4227_v26 = vand.u32 7, %v4163_v62  ;;  %v4994_v19 = vadd.f32 %v4993_v8, %v4931_v51 }
 0x492   :  { %v2522_v28 = vpop.f32.mrf.mxu1  ;;  %v4933_v41 = vmul.f32 %v6284_v1, %v4869_v12  ;;  %v4419_v11 = vand.u32 7, %v4355_v35  ;;  %v4164_v63 = vadd.s32 504, %v8570_v57  ;;  %v4798_v17 = vadd.f32 %v4797_v13, %v4735_v59  ;;  %v13061_v59 = vld [vmem:[#allocation90_spill] sm:$0xff] }
 0x493   :  { %v4737_v34 = vmul.f32 %v6285_v27, %v10382_v52  ;;  %v4029_v37 = vadd.f32 %v3961_v4, %v2588_v20  ;;  %v4995_v43 = vadd.f32 %v4994_v19, %v4932_v31  ;;  %v4934_v5 = vmul.f32 %v6285_v27, %v4870_v32 }
 0x494   :  { %v6286_v61 = vsel %vm4546_vm14, 1.0, %v12777_v9  ;;  %v4799_v54 = vadd.f32 %v4798_v17, %v4736_v23  ;;  %v2523_v24 = vadd.f32 %v2522_v28, %v2353_v33  ;;  %vm4291_vm15 = vcmp.lt.s32.totalorder %v4227_v26, 7 }
 0x495   :  { %v10402_v58 = vadd.f32 %v10149_v36, %v4029_v37  ;;  %v4996_v10 = vadd.f32 %v4995_v43, %v4933_v41  ;;  %vm4483_vm1 = vcmp.lt.s32.totalorder %v4419_v11, 7  ;;  %v4356_v62 = vshra.s32 %v4164_v63, 3 }
 0x496   :  { %v4800_v1 = vadd.f32 %v4799_v54, %v4737_v34  ;;  %v2589_v27 = vadd.f32 %v2523_v24, %v13061_v59  ;;  %vm4547_vm2 = vmand %vm4291_vm15, %vm4483_vm1  ;;  %v4228_v32 = vand.u32 7, %v4164_v63  ;;  %v6620_v45 = vmov 392.0   ;;  %v13063_v34 = vld [vmem:[#allocation91_spill] sm:$0xff] }
 0x497   :  { %13060 = vst [vmem:[#allocation51_spill] sm:$0xff] %v10402_v58  ;;  %v4738_v57 = vmul.f32 %v6286_v61, %v10402_v58  ;;  %v4871_v39 = vmul.f32 %v10402_v58, %v10402_v58  ;;  %v4997_v15 = vadd.f32 %v4996_v10, %v4934_v5  ;;  %v3794_v40 = vpop.f32.mrf.mxu2  ;;  %v4420_v46 = vand.u32 7, %v4356_v62  ;;  %v13099_v58 = vld [vmem:[#allocation47_spill] sm:$0xff] }
 0x498   :  { %v3963_v51 = vpop.f32.mrf.mxu3  ;;  %6613 = vrcp.f32 %v6620_v45  ;;  %v6287_v20 = vsel %vm4547_vm2, 1.0, %v12777_v9  ;;  %vm4292_vm3 = vcmp.lt.s32.totalorder %v4228_v32, 7 }
 0x499   :  { %v4801_v12 = vadd.f32 %v4800_v1, %v4738_v57  ;;  %v4935_v35 = vmul.f32 %v6286_v61, %v4871_v39  ;;  %v3964_v8 = vadd.f32 %v3963_v51, %v3794_v40  ;;  %v2355_v13 = vpop.f32.mrf.mxu0  ;;  %vm4484_vm4 = vcmp.lt.s32.totalorder %v4420_v46, 7 }
 0x49a   :  { %v2524_v31 = vpop.f32.mrf.mxu1  ;;  %vm4548_vm5 = vmand %vm4292_vm3, %vm4484_vm4 }
 0x49b   :  { %v4998_v22 = vadd.f32 %v4997_v15, %v4935_v35  ;;  %v4030_v23 = vadd.f32 %v3964_v8, %v2589_v27  ;;  %v2525_v33 = vadd.f32 %v2524_v31, %v2355_v13  ;;  %v6288_v54 = vsel %vm4548_vm5, 1.0, %v12777_v9 }
 0x49d   :  { %v10410_v4 = vadd.f32 %v10149_v36, %v4030_v23  ;;  %v2590_v37 = vadd.f32 %v2525_v33, %v13063_v34  ;;  %v13065_v34 = vld [vmem:[#allocation5_spill] sm:$0xff] }
 0x49e   :  { %v6614_v11 = vpop.eup %6613 }
 0x49f   :  { %13062 = vst [vmem:[#allocation54_spill] sm:$0xff] %v10410_v4  ;;  %v4739_v28 = vmul.f32 %v6287_v20, %v10410_v4  ;;  %v4872_v26 = vmul.f32 %v10410_v4, %v10410_v4  ;;  %v3796_v19 = vpop.f32.mrf.mxu2  ;;  %v5008_v24 = vmul.f32 392.0, %v6614_v11  ;;  %vm5012_vm6 = vweird.f32 %v6614_v11  ;;  %v13098_v4 = vld [vmem:[#allocation40_spill] sm:$0xff] }
 0x4a0   :  { %v3965_v41 = vpop.f32.mrf.mxu3 }
 0x4a1   :  { %v4802_v63 = vadd.f32 %v4801_v12, %v4739_v28  ;;  %v4936_v17 = vmul.f32 %v6287_v20, %v4872_v26  ;;  %v3966_v43 = vadd.f32 %v3965_v41, %v3796_v19  ;;  %v5009_v57 = vsub.f32 1.0, %v5008_v24  ;;  %v13068_v24 = vld [vmem:[#allocation8_spill] sm:$0xff]  ;;  %v13081_v41 = vld [vmem:[#allocation30_spill] sm:$0xff] }
 0x4a3   :  { %v4999_v5 = vadd.f32 %v4998_v22, %v4936_v17  ;;  %v4031_v61 = vadd.f32 %v3966_v43, %v2590_v37  ;;  %v5010_v12 = vmul.f32 %v6614_v11, %v5009_v57  ;;  %v13066_v43 = vld [vmem:[#allocation11_spill] sm:$0xff]  ;;  %v13087_v57 = vld [vmem:[#allocation28_spill] sm:$0xff]  ;;  %v13096_v37 = vld [vmem:[#allocation46_spill] sm:$0xff] }
 0x4a5   :  { %v10418_v10 = vadd.f32 %v10149_v36, %v4031_v61  ;;  %v5011_v9 = vadd.f32 %v6614_v11, %v5010_v12  ;;  %v13067_v61 = vld [vmem:[#allocation14_spill] sm:$0xff]  ;;  %v13084_v12 = vld [vmem:[#allocation31_spill] sm:$0xff] }
 0x4a7   :  { %13064 = vst [vmem:[#allocation45_spill] sm:$0xff] %v10418_v10  ;;  %v4740_v62 = vmul.f32 %v6288_v54, %v10418_v10  ;;  %v4873_v1 = vmul.f32 %v10418_v10, %v10418_v10  ;;  %v5013_v46 = vsel %vm5012_vm6, %v6614_v11, %v5011_v9  ;;  %v13073_v9 = vld [vmem:[#allocation22_spill] sm:$0xff]  ;;  %v13080_v11 = vld [vmem:[#allocation27_spill] sm:$0xff]  ;;  %v13097_v10 = vld [vmem:[#allocation37_spill] sm:$0xff] }
 0x4a9   :  { %v4803_v39 = vadd.f32 %v4802_v63, %v4740_v62  ;;  %v4937_v15 = vmul.f32 %v6288_v54, %v4873_v1  ;;  %v13069_v1 = vld [vmem:[#allocation15_spill] sm:$0xff] }
 0x4ab   :  { %v4804_v40 = vrot.slane %v4803_v39, 4  ;;  %v5000_v51 = vadd.f32 %v4999_v5, %v4937_v15  ;;  %v13086_v15 = vld [vmem:[#allocation25_spill] sm:$0xff]  ;;  %v13095_v5 = vld [vmem:[#allocation43_spill] sm:$0xff] }
 0x4ad   :  { %v4805_v35 = vadd.f32 %v4804_v40, %v4803_v39  ;;  %v5001_v59 = vrot.slane %v5000_v51, 4  ;;  %v13070_v39 = vld [vmem:[#allocation18_spill] sm:$0xff] }
 0x4ae   :  { %v13085_v40 = vld [vmem:[#allocation34_spill] sm:$0xff] }
 0x4af   :  { %v4806_v27 = vrot.slane %v4805_v35, 2  ;;  %v5002_v8 = vadd.f32 %v5001_v59, %v5000_v51  ;;  %v13071_v51 = vld [vmem:[#allocation12_spill] sm:$0xff] }
 0x4b0   :  { %v13083_v59 = vld [vmem:[#allocation24_spill] sm:$0xff] }
 0x4b1   :  { %v4807_v13 = vadd.f32 %v4806_v27, %v4805_v35  ;;  %v5003_v31 = vrot.slane %v5002_v8, 2  ;;  %v13072_v35 = vld [vmem:[#allocation19_spill] sm:$0xff]  ;;  %v13082_v27 = vld [vmem:[#allocation21_spill] sm:$0xff] }
 0x4b3   :  { %v4808_v36 = vrot.slane %v4807_v13, 1  ;;  %v5004_v32 = vadd.f32 %v5003_v31, %v5002_v8  ;;  %v13074_v31 = vld [vmem:[#allocation13_spill] sm:$0xff] }
 0x4b5   :  { %v4809_v22 = vadd.f32 %v4808_v36, %v4807_v13  ;;  %v5005_v23 = vrot.slane %v5004_v32, 1  ;;  %v13101_v36 = vld [vmem:[#allocation41_spill] sm:$0xff] }
 0x4b7   :  { %v5006_v45 = vadd.f32 %v5005_v23, %v5004_v32  ;;  %v10423_v20 = vmul.f32 %v5013_v46, %v4809_v22  ;;  %v13075_v32 = vld [vmem:[#allocation16_spill] sm:$0xff]  ;;  %v13076_v22 = vld [vmem:[#allocation23_spill] sm:$0xff] }
 0x4b8   :  { %v13079_v23 = vld [vmem:[#allocation20_spill] sm:$0xff] }
 0x4b9   :  { %v5015_v33 = vmul.f32 %v5013_v46, %v5006_v45  ;;  %v5016_v28 = vmul.f32 %v10423_v20, %v10423_v20  ;;  %v5071_v55 = vsub.f32 %v10271_v30, %v10423_v20  ;;  %v5072_v45 = vsub.f32 %v10296_v3, %v10423_v20 }
 0x4ba   :  { %v5074_v13 = vsub.f32 %v10329_v16, %v10423_v20  ;;  %v5075_v63 = vsub.f32 %v10333_v49, %v10423_v20  ;;  %v13102_v3 = vsub.f32 %v13065_v34, %v10423_v20  ;;  %v13103_v16 = vsub.f32 %v13066_v43, %v10423_v20 }
 0x4bb   :  { %v5017_v26 = vsub.f32 %v5015_v33, %v5016_v28  ;;  %v13077_v33 = vld [vmem:[#allocation26_spill] sm:$0xff]  ;;  %v5073_v28 = vsub.f32 %v10313_v7, %v10423_v20  ;;  %v13104_v49 = vsub.f32 %v13067_v61, %v10423_v20  ;;  %v13106_v34 = vsub.f32 %v13069_v1, %v10423_v20 }
 0x4bd   :  { %v10435_v17 = vadd.f32 1e-05, %v5017_v26  ;;  %v13078_v26 = vld [vmem:[#allocation17_spill] sm:$0xff] }
 0x4bf   :  { %6615 = vrsqrt.f32 %v10435_v17  ;;  %vm5089_vm8 = vweird.f32 %v10435_v17 }
 0x4c5   :  { %v6616_v19 = vpop.eup %6615 }
 0x4c6   :  { %v5084_v46 = vmul.f32 %v6616_v19, %v10435_v17  ;;  %vm5090_vm7 = vweird.f32 %v6616_v19  ;;  %v5077_v17 = vsub.f32 %v10365_v0, %v10423_v20  ;;  %v13105_v0 = vsub.f32 %v13068_v24, %v10423_v20 }
 0x4c7   :  { %vm5091_vm9 = vmor %vm5089_vm8, %vm5090_vm7 }
 0x4c8   :  { %v5085_v54 = vmul.f32 %v6616_v19, %v5084_v46  ;;  %v13093_v46 = vld [vmem:[#allocation33_spill] sm:$0xff] }
 0x4ca   :  { %v5086_v52 = vmul.f32 0.5, %v5085_v54  ;;  %v13100_v54 = vld [vmem:[#allocation50_spill] sm:$0xff] }
 0x4cc   :  { %v5087_v62 = vsub.f32 1.5, %v5086_v52 }
 0x4ce   :  { %v5088_v52 = vmul.f32 %v6616_v19, %v5087_v62  ;;  %v5076_v62 = vsub.f32 %v10349_v44, %v10423_v20 }
 0x4d0   :  { %v10560_v30 = vsel %vm5091_vm9, %v6616_v19, %v5088_v52  ;;  %v13107_v52 = vsub.f32 %v13070_v39, %v10423_v20 }
 0x4d1   :  { %v10566_v7 = vmul.f32 %v10560_v30, %v13102_v3  ;;  %v10572_v8 = vmul.f32 %v10560_v30, %v13103_v16  ;;  %v10578_v44 = vmul.f32 %v10560_v30, %v13104_v49  ;;  %v10584_v19 = vmul.f32 %v10560_v30, %v13105_v0 }
 0x4d2   :  { %v10590_v43 = vmul.f32 %v10560_v30, %v13106_v34  ;;  %v10596_v61 = vmul.f32 %v10560_v30, %v13107_v52  ;;  %v13108_v3 = vsub.f32 %v8872_v60, %v10423_v20  ;;  %v13109_v16 = vsub.f32 %v13071_v51, %v10423_v20 }
 0x4d3   :  { %v13110_v49 = vsub.f32 %v13072_v35, %v10423_v20  ;;  %v13111_v0 = vsub.f32 %v9022_v29, %v10423_v20  ;;  %v13112_v34 = vsub.f32 %v9093_v42, %v10423_v20  ;;  %v13113_v52 = vsub.f32 %v13073_v9, %v10423_v20 }
 0x4d4   :  { %v10602_v24 = vmul.f32 %v10560_v30, %v13108_v3  ;;  %v10608_v1 = vmul.f32 %v10560_v30, %v13109_v16  ;;  %v13114_v3 = vsub.f32 %v13074_v31, %v10423_v20  ;;  %v13115_v16 = vsub.f32 %v13075_v32, %v10423_v20 }
 0x4d5   :  { %v10614_v39 = vmul.f32 %v10560_v30, %v13110_v49  ;;  %v10620_v60 = vmul.f32 %v10560_v30, %v13111_v0  ;;  %v10626_v51 = vmul.f32 %v10560_v30, %v13112_v34  ;;  %v10632_v35 = vmul.f32 %v10560_v30, %v13113_v52 }
 0x4d6   :  { %v10638_v29 = vmul.f32 %v10560_v30, %v13114_v3  ;;  %v10644_v42 = vmul.f32 %v10560_v30, %v13115_v16  ;;  %v13116_v49 = vsub.f32 %v13076_v22, %v10423_v20  ;;  %v13117_v0 = vsub.f32 %v9248_v47, %v10423_v20 }
 0x4d7   :  { %v13118_v34 = vsub.f32 %v13077_v33, %v10423_v20  ;;  %v13119_v52 = vsub.f32 %v13078_v26, %v10423_v20  ;;  %v13120_v3 = vsub.f32 %v9391_v18, %v10423_v20  ;;  %v13121_v16 = vsub.f32 %v9423_v21, %v10423_v20 }
 0x4d8   :  { %v10650_v9 = vmul.f32 %v10560_v30, %v13116_v49  ;;  %v10656_v31 = vmul.f32 %v10560_v30, %v13117_v0  ;;  %v13122_v49 = vsub.f32 %v9493_v53, %v10423_v20  ;;  %v13123_v0 = vsub.f32 %v13079_v23, %v10423_v20 }
 0x4d9   :  { %v10662_v32 = vmul.f32 %v10560_v30, %v13118_v34  ;;  %v10668_v22 = vmul.f32 %v10560_v30, %v13119_v52  ;;  %v10674_v47 = vmul.f32 %v10560_v30, %v13120_v3  ;;  %v10680_v33 = vmul.f32 %v10560_v30, %v13121_v16 }
 0x4da   :  { %v10686_v26 = vmul.f32 %v10560_v30, %v13122_v49  ;;  %v10692_v18 = vmul.f32 %v10560_v30, %v13123_v0  ;;  %v13124_v34 = vsub.f32 %v9541_v25, %v10423_v20  ;;  %v13125_v52 = vsub.f32 %v9605_v56, %v10423_v20 }
 0x4db   :  { %v13126_v3 = vsub.f32 %v13080_v11, %v10423_v20  ;;  %v13127_v16 = vsub.f32 %v9638_v48, %v10423_v20  ;;  %v13128_v49 = vsub.f32 %v13081_v41, %v10423_v20  ;;  %v13129_v0 = vsub.f32 %v13082_v27, %v10423_v20 }
 0x4dc   :  { %v10698_v21 = vmul.f32 %v10560_v30, %v13124_v34  ;;  %v10704_v53 = vmul.f32 %v10560_v30, %v13125_v52  ;;  %v13130_v34 = vsub.f32 %v13083_v59, %v10423_v20  ;;  %v13131_v52 = vsub.f32 %v13084_v12, %v10423_v20 }
 0x4dd   :  { %v10710_v23 = vmul.f32 %v10560_v30, %v13126_v3  ;;  %v10716_v25 = vmul.f32 %v10560_v30, %v13127_v16  ;;  %v10722_v56 = vmul.f32 %v10560_v30, %v13128_v49  ;;  %v10728_v11 = vmul.f32 %v10560_v30, %v13129_v0 }
 0x4de   :  { %v10734_v48 = vmul.f32 %v10560_v30, %v13130_v34  ;;  %v10740_v41 = vmul.f32 %v10560_v30, %v13131_v52  ;;  %v13132_v3 = vsub.f32 %v13085_v40, %v10423_v20  ;;  %v13133_v16 = vsub.f32 %v13086_v15, %v10423_v20  ;;  %v13138_v34 = vld [vmem:[#allocation35_spill] sm:$0xff] }
 0x4df   :  { %v13134_v49 = vsub.f32 %v13087_v57, %v10423_v20  ;;  %v13136_v0 = vsub.f32 %v9825_v2, %v10423_v20  ;;  %v13139_v52 = vsub.f32 %v13138_v34, %v10423_v20 }
 0x4e0   :  { %v10746_v27 = vmul.f32 %v10560_v30, %v13132_v3  ;;  %v10752_v59 = vmul.f32 %v10560_v30, %v13133_v16  ;;  %v13141_v3 = vld [vmem:[#allocation38_spill] sm:$0xff] }
 0x4e1   :  { %v10758_v12 = vmul.f32 %v10560_v30, %v13134_v49  ;;  %v10764_v40 = vmul.f32 %v10560_v30, %v13136_v0  ;;  %v10770_v15 = vmul.f32 %v10560_v30, %v13139_v52  ;;  %v13142_v16 = vsub.f32 %v13141_v3, %v10423_v20  ;;  %v13144_v49 = vld [vmem:[#allocation29_spill] sm:$0xff]  ;;  %v13146_v0 = vld [vmem:[#allocation32_spill] sm:$0xff]  ;;  %v13149_v52 = vld [vmem:[#allocation39_spill] sm:$0xff] }
 0x4e3   :  { %13135 = vst [vmem:[#allocation48_spill] sm:$0xff] %v10758_v12  ;;  %v10776_v57 = vmul.f32 %v10560_v30, %v13142_v16  ;;  %v13145_v12 = vsub.f32 %v13144_v49, %v10423_v20  ;;  %v13151_v16 = vld [vmem:[#allocation42_spill] sm:$0xff] }
 0x4e4   :  { %13137 = vst [vmem:[#allocation55_spill] sm:$0xff] %v10764_v40  ;;  %v13147_v40 = vsub.f32 %v13146_v0, %v10423_v20 }
 0x4e5   :  { %13140 = vst [vmem:[#allocation58_spill] sm:$0xff] %v10770_v15  ;;  %v10782_v2 = vmul.f32 %v10560_v30, %v13145_v12  ;;  %v13150_v15 = vsub.f32 %v13149_v52, %v10423_v20  ;;  %v13153_v12 = vsub.f32 %v13093_v46, %v10423_v20 }
 0x4e6   :  { %13143 = vst [vmem:[#allocation49_spill] sm:$0xff] %v10776_v57  ;;  %v10788_v34 = vmul.f32 %v10560_v30, %v13147_v40  ;;  %v13152_v57 = vsub.f32 %v13151_v16, %v10423_v20  ;;  %v13154_v40 = vld [vmem:[#allocation36_spill] sm:$0xff] }
 0x4e7   :  { %v10794_v3 = vmul.f32 %v10560_v30, %v13150_v15  ;;  %v10806_v0 = vmul.f32 %v10560_v30, %v13153_v12  ;;  %v13156_v15 = vsub.f32 %v13095_v5, %v10423_v20  ;;  %v13158_v12 = vsub.f32 %v13097_v10, %v10423_v20 }
 0x4e8   :  { %13148 = vst [vmem:[#allocation52_spill] sm:$0xff] %v10788_v34  ;;  %v10800_v49 = vmul.f32 %v10560_v30, %v13152_v57  ;;  %v13155_v34 = vsub.f32 %v13154_v40, %v10423_v20  ;;  %v13157_v57 = vsub.f32 %v13096_v37, %v10423_v20 }
 0x4e9   :  { %v10818_v16 = vmul.f32 %v10560_v30, %v13156_v15  ;;  %v10830_v40 = vmul.f32 %v10560_v30, %v13158_v12  ;;  %v13160_v15 = vsub.f32 %v13099_v58, %v10423_v20  ;;  %v13162_v12 = vsub.f32 %v13101_v36, %v10423_v20 }
 0x4ea   :  { %v10812_v52 = vmul.f32 %v10560_v30, %v13155_v34  ;;  %v10824_v46 = vmul.f32 %v10560_v30, %v13157_v57  ;;  %v13159_v34 = vsub.f32 %v13098_v4, %v10423_v20  ;;  %v13161_v57 = vsub.f32 %v13100_v54, %v10423_v20 }
 0x4eb   :  { %v10842_v37 = vmul.f32 %v10560_v30, %v13160_v15  ;;  %v10854_v4 = vmul.f32 %v10560_v30, %v13162_v12  ;;  %v13164_v15 = vsub.f32 %v10205_v6, %v10423_v20  ;;  %v13166_v12 = vsub.f32 %v10236_v38, %v10423_v20 }
 0x4ec   :  { %v10836_v5 = vmul.f32 %v10560_v30, %v13159_v34  ;;  %v10848_v10 = vmul.f32 %v10560_v30, %v13161_v57  ;;  %v13163_v34 = vsub.f32 %v10183_v14, %v10423_v20  ;;  %v13165_v57 = vsub.f32 %v10214_v50, %v10423_v20 }
 0x4ed   :  { %v10866_v54 = vmul.f32 %v10560_v30, %v13164_v15  ;;  %v10878_v14 = vmul.f32 %v10560_v30, %v13166_v12  ;;  %v10884_v6 = vmul.f32 %v10560_v30, %v5072_v45  ;;  %v10887_v15 = vmul.f32 %v10560_v30, %v5073_v28  ;;  %v13173_v28 = vld [vmem:[#allocation51_spill] sm:$0xff] }
 0x4ee   :  { %v10860_v58 = vmul.f32 %v10560_v30, %v13163_v34  ;;  %v10872_v36 = vmul.f32 %v10560_v30, %v13165_v57  ;;  %v10881_v34 = vmul.f32 %v10560_v30, %v5071_v55  ;;  %v10890_v50 = vmul.f32 %v10560_v30, %v5074_v13  ;;  %v13171_v55 = vld [vmem:[#allocation44_spill] sm:$0xff] }
 0x4ef   :  { %13168 = vst [vmem:[#allocation62_spill] sm:$0xff] %v10887_v15  ;;  %v10893_v57 = vmul.f32 %v10560_v30, %v5075_v63  ;;  %v10896_v38 = vmul.f32 %v10560_v30, %v5076_v62  ;;  %v10899_v12 = vmul.f32 %v10560_v30, %v5077_v17  ;;  %v13174_v15 = vsub.f32 %v13173_v28, %v10423_v20  ;;  %v13175_v63 = vld [vmem:[#allocation54_spill] sm:$0xff]  ;;  %v13177_v17 = vld [vmem:[#allocation45_spill] sm:$0xff] }
 0x4f0   :  { %13167 = vst [vmem:[#allocation59_spill] sm:$0xff] %v10881_v34  ;;  %v13172_v34 = vsub.f32 %v13171_v55, %v10423_v20 }
 0x4f1   :  { %13169 = vst [vmem:[#allocation53_spill] sm:$0xff] %v10893_v57  ;;  %v10911_v13 = vmul.f32 %v10560_v30, %v13174_v15  ;;  %v13176_v57 = vsub.f32 %v13175_v63, %v10423_v20  ;;  %v13182_v63 = vld [vmem:[#allocation55_spill] sm:$0xff] }
 0x4f2   :  { %13170 = vst [vmem:[#allocation56_spill] sm:$0xff] %v10899_v12  ;;  %v10905_v45 = vmul.f32 %v10560_v30, %v13172_v34  ;;  %v13178_v12 = vsub.f32 %v13177_v17, %v10423_v20  ;;  %v10928_v34 = vld [vmem:[%s12187_s3] ss:$0 sm:$0xff] }
 0x4f3   :  { %v10917_v62 = vmul.f32 %v10560_v30, %v13176_v57  ;;  %v10932_v15 = vmul.f32 %v10928_v34, %v10566_v7  ;;  %v10936_v28 = vmul.f32 %v10928_v34, %v10572_v8  ;;  %v10940_v57 = vmul.f32 %v10928_v34, %v10578_v44  ;;  %v13183_v17 = vld [vmem:[#allocation58_spill] sm:$0xff] }
 0x4f4   :  { %v10923_v55 = vmul.f32 %v10560_v30, %v13178_v12  ;;  %v10944_v20 = vmul.f32 %v10928_v34, %v10584_v19  ;;  %v10948_v30 = vmul.f32 %v10928_v34, %v10590_v43  ;;  %v10952_v7 = vmul.f32 %v10928_v34, %v10596_v61  ;;  %v13181_v12 = vld [vmem:[#allocation48_spill] sm:$0xff] }
 0x4f5   :  { %v10956_v8 = vmul.f32 %v10928_v34, %v10602_v24  ;;  %v10960_v44 = vmul.f32 %v10928_v34, %v10608_v1  ;;  %v10964_v19 = vmul.f32 %v10928_v34, %v10614_v39  ;;  %v10968_v43 = vmul.f32 %v10928_v34, %v10620_v60 }
 0x4f6   :  { %v10972_v61 = vmul.f32 %v10928_v34, %v10626_v51  ;;  %v10976_v24 = vmul.f32 %v10928_v34, %v10632_v35  ;;  %v10980_v1 = vmul.f32 %v10928_v34, %v10638_v29  ;;  %v10984_v39 = vmul.f32 %v10928_v34, %v10644_v42 }
 0x4f7   :  { %v10988_v60 = vmul.f32 %v10928_v34, %v10650_v9  ;;  %v10992_v51 = vmul.f32 %v10928_v34, %v10656_v31  ;;  %v10996_v35 = vmul.f32 %v10928_v34, %v10662_v32  ;;  %v11000_v29 = vmul.f32 %v10928_v34, %v10668_v22 }
 0x4f8   :  { %v11004_v42 = vmul.f32 %v10928_v34, %v10674_v47  ;;  %v11008_v9 = vmul.f32 %v10928_v34, %v10680_v33  ;;  %v11012_v31 = vmul.f32 %v10928_v34, %v10686_v26  ;;  %v11016_v32 = vmul.f32 %v10928_v34, %v10692_v18 }
 0x4f9   :  { %v11020_v22 = vmul.f32 %v10928_v34, %v10698_v21  ;;  %v11024_v47 = vmul.f32 %v10928_v34, %v10704_v53  ;;  %v11028_v33 = vmul.f32 %v10928_v34, %v10710_v23  ;;  %v11032_v26 = vmul.f32 %v10928_v34, %v10716_v25 }
 0x4fa   :  { %v11036_v18 = vmul.f32 %v10928_v34, %v10722_v56  ;;  %v11040_v21 = vmul.f32 %v10928_v34, %v10728_v11  ;;  %v11044_v53 = vmul.f32 %v10928_v34, %v10734_v48  ;;  %v11048_v23 = vmul.f32 %v10928_v34, %v10740_v41 }
 0x4fb   :  { %v11052_v25 = vmul.f32 %v10928_v34, %v10746_v27  ;;  %v11056_v56 = vmul.f32 %v10928_v34, %v10752_v59  ;;  %v11060_v11 = vmul.f32 %v10928_v34, %v13181_v12  ;;  %v11064_v48 = vmul.f32 %v10928_v34, %v13182_v63 }
 0x4fc   :  { %13179 = vst [vmem:[#allocation63_spill] sm:$0xff] %v11048_v23  ;;  %v11068_v41 = vmul.f32 %v10928_v34, %v13183_v17  ;;  %v13184_v23 = vld [vmem:[#allocation49_spill] sm:$0xff]  ;;  %v11076_v59 = vmul.f32 %v10928_v34, %v10782_v2  ;;  %v11084_v63 = vmul.f32 %v10928_v34, %v10794_v3  ;;  %v11088_v17 = vmul.f32 %v10928_v34, %v10800_v49 }
 0x4fd   :  { %13180 = vst [vmem:[#allocation66_spill] sm:$0xff] %v11056_v56  ;;  %v11072_v27 = vmul.f32 %v10928_v34, %v13184_v23  ;;  %v13185_v56 = vld [vmem:[#allocation52_spill] sm:$0xff]  ;;  %v11092_v23 = vmul.f32 %v10928_v34, %v10806_v0  ;;  %v11096_v2 = vmul.f32 %v10928_v34, %v10812_v52  ;;  %v11104_v3 = vmul.f32 %v10928_v34, %v10824_v46 }
 0x4fe   :  { %v11080_v12 = vmul.f32 %v10928_v34, %v13185_v56  ;;  %v11100_v56 = vmul.f32 %v10928_v34, %v10818_v16  ;;  %v11108_v49 = vmul.f32 %v10928_v34, %v10830_v40  ;;  %v11112_v0 = vmul.f32 %v10928_v34, %v10836_v5 }
 0x4ff   :  { %v11116_v52 = vmul.f32 %v10928_v34, %v10842_v37  ;;  %v11120_v16 = vmul.f32 %v10928_v34, %v10848_v10  ;;  %v11124_v46 = vmul.f32 %v10928_v34, %v10854_v4  ;;  %v11128_v40 = vmul.f32 %v10928_v34, %v10860_v58  ;;  %v11137_v37 = vld [vmem:[%s12188_s4] ss:$0 sm:$0xff] }
 0x500   :  { %v11132_v5 = vmul.f32 %v10928_v34, %v10866_v54  ;;  %v11141_v10 = vmul.f32 %v10928_v34, %v10872_v36  ;;  %v11145_v4 = vmul.f32 %v10928_v34, %v10878_v14  ;;  %v11153_v54 = vmul.f32 %v10928_v34, %v10884_v6 }
 0x501   :  { %13186 = vst [vmem:[#allocation57_spill] sm:$0xff] %v11124_v46  ;;  %v13190_v46 = vld [vmem:[#allocation59_spill] sm:$0xff]  ;;  %v11161_v36 = vmul.f32 %v10928_v34, %v10890_v50  ;;  %v11181_v50 = vmul.f32 %v10928_v34, %v10911_v13  ;;  %v11201_v13 = vadd.f32 %v11137_v37, %v10940_v57  ;;  %v11225_v57 = vadd.f32 %v11137_v37, %v10964_v19 }
 0x502   :  { %13187 = vst [vmem:[#allocation60_spill] sm:$0xff] %v11128_v40  ;;  %v11149_v58 = vmul.f32 %v10928_v34, %v13190_v46  ;;  %v11169_v46 = vmul.f32 %v10928_v34, %v10896_v38  ;;  %v11189_v38 = vmul.f32 %v10928_v34, %v10923_v55  ;;  %v11209_v55 = vadd.f32 %v11137_v37, %v10948_v30 }
 0x503   :  { %13188 = vst [vmem:[#allocation67_spill] sm:$0xff] %v11132_v5  ;;  %v13192_v5 = vld [vmem:[#allocation62_spill] sm:$0xff]  ;;  %v11233_v30 = vadd.f32 %v11137_v37, %v10972_v61  ;;  %v11249_v19 = vadd.f32 %v11137_v37, %v10988_v60  ;;  %v11257_v61 = vadd.f32 %v11137_v37, %v10996_v35  ;;  %v11273_v60 = vadd.f32 %v11137_v37, %v11012_v31 }
 0x504   :  { %13189 = vst [vmem:[#allocation70_spill] sm:$0xff] %v11141_v10  ;;  %v11157_v40 = vmul.f32 %v10928_v34, %v13192_v5  ;;  %v13193_v10 = vld [vmem:[#allocation53_spill] sm:$0xff]  ;;  %v11177_v5 = vmul.f32 %v10928_v34, %v10905_v45  ;;  %v11197_v45 = vadd.f32 %v11137_v37, %v10936_v28  ;;  %v11221_v28 = vadd.f32 %v11137_v37, %v10960_v44 }
 0x505   :  { %13191 = vst [vmem:[#allocation61_spill] sm:$0xff] %v11149_v58  ;;  %v11165_v14 = vmul.f32 %v10928_v34, %v13193_v10  ;;  %v13194_v58 = vld [vmem:[#allocation56_spill] sm:$0xff]  ;;  %v11185_v10 = vmul.f32 %v10928_v34, %v10917_v62  ;;  %v11205_v62 = vadd.f32 %v11137_v37, %v10944_v20  ;;  %v11229_v20 = vadd.f32 %v11137_v37, %v10968_v43 }
 0x506   :  { %v11173_v6 = vmul.f32 %v10928_v34, %v13194_v58  ;;  %v11193_v58 = vadd.f32 %v11137_v37, %v10932_v15  ;;  %v11213_v34 = vadd.f32 %v11137_v37, %v10952_v7  ;;  %v11217_v15 = vadd.f32 %v11137_v37, %v10956_v8 }
 0x507   :  { %v11237_v7 = vadd.f32 %v11137_v37, %v10976_v24  ;;  %v11241_v8 = vadd.f32 %v11137_v37, %v10980_v1  ;;  %v11245_v44 = vadd.f32 %v11137_v37, %v10984_v39  ;;  %v11253_v43 = vadd.f32 %v11137_v37, %v10992_v51 }
 0x508   :  { %v11261_v24 = vadd.f32 %v11137_v37, %v11000_v29  ;;  %v11265_v1 = vadd.f32 %v11137_v37, %v11004_v42  ;;  %v11269_v39 = vadd.f32 %v11137_v37, %v11008_v9  ;;  %v11277_v51 = vadd.f32 %v11137_v37, %v11016_v32 }
 0x509   :  { %v11281_v35 = vadd.f32 %v11137_v37, %v11020_v22  ;;  %v11285_v29 = vadd.f32 %v11137_v37, %v11024_v47  ;;  %v11289_v42 = vadd.f32 %v11137_v37, %v11028_v33  ;;  %v11293_v9 = vadd.f32 %v11137_v37, %v11032_v26  ;;  %v13196_v47 = vld [vmem:[#allocation63_spill] sm:$0xff] }
 0x50a   :  { %v11297_v31 = vadd.f32 %v11137_v37, %v11036_v18  ;;  %v11301_v32 = vadd.f32 %v11137_v37, %v11040_v21  ;;  %v11305_v22 = vadd.f32 %v11137_v37, %v11044_v53  ;;  %v11309_v33 = vadd.f32 %v11137_v37, %v13196_v47 }
 0x50b   :  { %13195 = vst [vmem:[#allocation64_spill] sm:$0xff] %v11293_v9  ;;  %v11313_v26 = vadd.f32 %v11137_v37, %v11052_v25  ;;  %v13197_v9 = vld [vmem:[#allocation66_spill] sm:$0xff]  ;;  %v11321_v21 = vadd.f32 %v11137_v37, %v11060_v11  ;;  %v11325_v53 = vadd.f32 %v11137_v37, %v11064_v48  ;;  %v11329_v47 = vadd.f32 %v11137_v37, %v11068_v41 }
 0x50c   :  { %v11317_v18 = vadd.f32 %v11137_v37, %v13197_v9  ;;  %v11333_v25 = vadd.f32 %v11137_v37, %v11072_v27  ;;  %v11337_v9 = vadd.f32 %v11137_v37, %v11076_v59  ;;  %v11341_v11 = vadd.f32 %v11137_v37, %v11080_v12 }
 0x50d   :  { %v11345_v48 = vadd.f32 %v11137_v37, %v11084_v63  ;;  %v11349_v41 = vadd.f32 %v11137_v37, %v11088_v17  ;;  %v11353_v27 = vadd.f32 %v11137_v37, %v11092_v23  ;;  %v11357_v59 = vadd.f32 %v11137_v37, %v11096_v2 }
 0x50e   :  { %v11361_v12 = vadd.f32 %v11137_v37, %v11100_v56  ;;  %v11365_v63 = vadd.f32 %v11137_v37, %v11104_v3  ;;  %v11369_v17 = vadd.f32 %v11137_v37, %v11108_v49  ;;  %v11373_v23 = vadd.f32 %v11137_v37, %v11112_v0 }
 0x50f   :  { %v11377_v2 = vadd.f32 %v11137_v37, %v11116_v52  ;;  %v11381_v56 = vadd.f32 %v11137_v37, %v11120_v16  ;;  %v11401_v16 = vadd.f32 %v11137_v37, %v11145_v4  ;;  %v11421_v4 = vadd.f32 %v11137_v37, %v11165_v14 }
 0x510   :  { %13198 = vst [vmem:[#allocation71_spill] sm:$0xff] %v11361_v12  ;;  %v13203_v12 = vld [vmem:[#allocation57_spill] sm:$0xff]  ;;  %vm5293_vm0 = vcmp.ge.f32.partialorder %v11193_v58, 0.0  ;;  %vm5294_vm10 = vcmp.ge.f32.partialorder %v11197_v45, 0.0  ;;  %vm5295_vm11 = vcmp.ge.f32.partialorder %v11201_v13, 0.0  ;;  %vm5296_vm12 = vcmp.ge.f32.partialorder %v11205_v62, 0.0 }
 0x511   :  { %13199 = vst [vmem:[#allocation65_spill] sm:$0xff] %v11365_v63  ;;  %v11385_v3 = vadd.f32 %v11137_v37, %v13203_v12  ;;  %v13204_v63 = vld [vmem:[#allocation60_spill] sm:$0xff]  ;;  %vm5297_vm13 = vcmp.ge.f32.partialorder %v11209_v55, 0.0  ;;  %vm5298_vm14 = vcmp.ge.f32.partialorder %v11213_v34, 0.0  ;;  %vm5299_vm15 = vcmp.ge.f32.partialorder %v11217_v15, 0.0 }
 0x512   :  { %13200 = vst [vmem:[#allocation68_spill] sm:$0xff] %v11369_v17  ;;  %v11389_v49 = vadd.f32 %v11137_v37, %v13204_v63  ;;  %v13206_v17 = vld [vmem:[#allocation67_spill] sm:$0xff]  ;;  %v11409_v63 = vadd.f32 %v11137_v37, %v11153_v54  ;;  %v11429_v54 = vadd.f32 %v11137_v37, %v11173_v6  ;;  %vm5300_vm1 = vcmp.ge.f32.partialorder %v11221_v28, 0.0 }
 0x513   :  { %13201 = vst [vmem:[#allocation72_spill] sm:$0xff] %v11373_v23  ;;  %v11393_v0 = vadd.f32 %v11137_v37, %v13206_v17  ;;  %v13208_v23 = vld [vmem:[#allocation70_spill] sm:$0xff]  ;;  %v11413_v17 = vadd.f32 %v11137_v37, %v11157_v40  ;;  %v11433_v40 = vadd.f32 %v11137_v37, %v11177_v5  ;;  %vm5301_vm2 = vcmp.ge.f32.partialorder %v11225_v57, 0.0 }
 0x514   :  { %13202 = vst [vmem:[#allocation73_spill] sm:$0xff] %v11381_v56  ;;  %v11397_v52 = vadd.f32 %v11137_v37, %v13208_v23  ;;  %v13211_v56 = vld [vmem:[#allocation61_spill] sm:$0xff]  ;;  %v11417_v23 = vadd.f32 %v11137_v37, %v11161_v36  ;;  %v11437_v36 = vadd.f32 %v11137_v37, %v11181_v50  ;;  %v11450_v14 = vadd.f32 %v11137_v37, %v11185_v10 }
 0x515   :  { %13205 = vst [vmem:[#allocation2_spill] sm:$0xff] %v11389_v49  ;;  %v11405_v12 = vadd.f32 %v11137_v37, %v13211_v56  ;;  %v11425_v56 = vadd.f32 %v11137_v37, %v11169_v46  ;;  %vm5302_vm3 = vcmp.ge.f32.partialorder %v11229_v20, 0.0  ;;  %v5357_v46 = vmul.f32 0.1, %v11193_v58 }
 0x516   :  { %13207 = vst [vmem:[#allocation69_spill] sm:$0xff] %v11393_v0  ;;  %v5358_v6 = vmul.f32 0.1, %v11197_v45  ;;  %v5359_v5 = vmul.f32 0.1, %v11201_v13  ;;  %v11458_v50 = vadd.f32 %v11137_v37, %v11189_v38  ;;  %vm5303_vm4 = vcmp.ge.f32.partialorder %v11233_v30, 0.0 }
 0x517   :  { %13209 = vst [vmem:[#allocation3_spill] sm:$0xff] %v11397_v52  ;;  %v5362_v10 = vmul.f32 0.1, %v11213_v34  ;;  %vm5304_vm5 = vcmp.ge.f32.partialorder %v11237_v7, 0.0  ;;  %v11471_v37 = vsel %vm5293_vm0, %v11193_v58, %v5357_v46  ;;  %vm5305_vm6 = vcmp.ge.f32.partialorder %v11241_v8, 0.0 }
 0x518   :  { %13210 = vst [vmem:[#allocation74_spill] sm:$0xff] %v11401_v16  ;;  %v5366_v38 = vmul.f32 0.1, %v11229_v20  ;;  %vm5306_vm7 = vcmp.ge.f32.partialorder %v11245_v44, 0.0  ;;  %v11489_v58 = vmul.f32 0.1, %v11245_v44 }
 0x519   :  { %13212 = vst [vmem:[#allocation7_spill] sm:$0xff] %v11405_v12  ;;  %v11492_v46 = vmul.f32 0.1, %v11249_v19  ;;  %vm5307_vm8 = vcmp.ge.f32.partialorder %v11249_v19, 0.0  ;;  %vm5308_vm9 = vcmp.ge.f32.partialorder %v11253_v43, 0.0  ;;  %vm5309_vm0 = vcmp.ge.f32.partialorder %v11257_v61, 0.0 }
 0x51a   :  { %13213 = vst [vmem:[#allocation10_spill] sm:$0xff] %v11409_v63 }
 0x51b   :  { %13214 = vst [vmem:[#allocation4_spill] sm:$0xff] %v11413_v17  ;;  %v11486_v17 = vmul.f32 0.1, %v11241_v8 }
 0x51c   :  { %13215 = vst [vmem:[#allocation75_spill] sm:$0xff] %v11417_v23  ;;  %v11482_v23 = vsel %vm5294_vm10, %v11197_v45, %v5358_v6  ;;  %v11501_v45 = vmul.f32 0.1, %v11253_v43  ;;  %v11504_v6 = vmul.f32 0.1, %v11257_v61  ;;  %vm5310_vm10 = vcmp.ge.f32.partialorder %v11261_v24, 0.0 }
 0x51d   :  { %13216 = vst [vmem:[#allocation6_spill] sm:$0xff] %v11421_v4  ;;  %v11477_v4 = vmul.f32 0.1, %v11237_v7 }
 0x51e   :  { %13217 = vst [vmem:[#allocation76_spill] sm:$0xff] %v11425_v56  ;;  %v5365_v56 = vmul.f32 0.1, %v11225_v57 }
 0x51f   :  { %13218 = vst [vmem:[#allocation9_spill] sm:$0xff] %v11429_v54  ;;  %v5364_v54 = vmul.f32 0.1, %v11221_v28 }
 0x520   :  { %13219 = vst [vmem:[#allocation77_spill] sm:$0xff] %v11433_v40  ;;  %v5361_v40 = vmul.f32 0.1, %v11209_v55 }
 0x521   :  { %13220 = vst [vmem:[#allocation78_spill] sm:$0xff] %v11437_v36  ;;  %v5360_v36 = vmul.f32 0.1, %v11205_v62 }
 0x522   :  { %13221 = vst [vmem:[#allocation79_spill] sm:$0xff] %v11450_v14  ;;  %v5363_v14 = vmul.f32 0.1, %v11217_v15 }
 0x523   :  { %13222 = vst [vmem:[#allocation80_spill] sm:$0xff] %v11458_v50  ;;  %v5367_v50 = vmul.f32 0.1, %v11233_v30  ;;  %v11512_v63 = vsel %vm5296_vm12, %v11205_v62, %v5360_v36  ;;  %v11531_v62 = vmul.f32 0.1, %v11277_v51  ;;  %vm5312_vm12 = vcmp.ge.f32.partialorder %v11269_v39, 0.0 }
 0x524   :  { %13223 = vst [vmem:[#allocation81_spill] sm:$0xff] %v11471_v37  ;;  %v11497_v37 = vsel %vm5295_vm11, %v11201_v13, %v5359_v5  ;;  %v11516_v13 = vmul.f32 0.1, %v11265_v1  ;;  %v11519_v5 = vmul.f32 0.1, %v11269_v39  ;;  %vm5311_vm11 = vcmp.ge.f32.partialorder %v11265_v1, 0.0 }
 0x525   :  { %13224 = vst [vmem:[#allocation82_spill] sm:$0xff] %v11482_v23  ;;  %v11507_v23 = vmul.f32 0.1, %v11261_v24  ;;  %v11534_v36 = vmul.f32 0.1, %v11281_v35 }
 0x526   :  { %13225 = vst [vmem:[#allocation83_spill] sm:$0xff] %v11497_v37  ;;  %v11522_v37 = vmul.f32 0.1, %v11273_v60 }
 0x527   :  { %13226 = vst [vmem:[#allocation84_spill] sm:$0xff] %v11507_v23  ;;  %v11527_v23 = vsel %vm5297_vm13, %v11209_v55, %v5361_v40  ;;  %v11546_v55 = vmul.f32 0.1, %v11289_v42  ;;  %v13233_v40 = vld [vmem:[#allocation64_spill] sm:$0xff] }
 0x528   :  { %13227 = vst [vmem:[#allocation85_spill] sm:$0xff] %v11512_v63  ;;  %v11537_v63 = vmul.f32 0.1, %v11285_v29 }
 0x529   :  { %13228 = vst [vmem:[#allocation86_spill] sm:$0xff] %v11522_v37  ;;  %v11542_v37 = vsel %vm5298_vm14, %v11213_v34, %v5362_v10  ;;  %v11561_v34 = vmul.f32 0.1, %v11301_v32  ;;  %v11564_v10 = vmul.f32 0.1, %v11305_v22 }
 0x52a   :  { %13229 = vst [vmem:[#allocation87_spill] sm:$0xff] %v11527_v23  ;;  %v11549_v23 = vmul.f32 0.1, %v13233_v40 }
 0x52b   :  { %13230 = vst [vmem:[#allocation88_spill] sm:$0xff] %v11531_v62  ;;  %v11552_v62 = vmul.f32 0.1, %v11297_v31 }
 0x52c   :  { %13231 = vst [vmem:[#allocation89_spill] sm:$0xff] %v11537_v63  ;;  %v11557_v63 = vsel %vm5299_vm15, %v11217_v15, %v5363_v14  ;;  %v11578_v15 = vmul.f32 0.1, %v11313_v26  ;;  %v11581_v14 = vmul.f32 0.1, %v11317_v18  ;;  %vm5315_vm15 = vcmp.ge.f32.partialorder %v11281_v35, 0.0 }
 0x52d   :  { %13232 = vst [vmem:[#allocation90_spill] sm:$0xff] %v11542_v37  ;;  %v11567_v37 = vmul.f32 0.1, %v11309_v33 }
 0x52e   :  { %13234 = vst [vmem:[#allocation91_spill] sm:$0xff] %v11552_v62  ;;  %v11572_v62 = vsel %vm5300_vm1, %v11221_v28, %v5364_v54  ;;  %v11589_v28 = vsel %vm5301_vm2, %v11225_v57, %v5365_v56  ;;  %v11596_v54 = vmul.f32 0.1, %v11325_v53  ;;  %v11607_v57 = vsel %vm5302_vm3, %v11229_v20, %v5366_v38 }
 0x52f   :  { %13235 = vst [vmem:[#allocation5_spill] sm:$0xff] %v11557_v63  ;;  %v11584_v63 = vmul.f32 0.1, %v11321_v21  ;;  %vm5319_vm2 = vcmp.ge.f32.partialorder %v11297_v31, 0.0  ;;  %v11614_v56 = vmul.f32 0.1, %v11337_v9  ;;  %v11625_v20 = vsel %vm5303_vm4, %v11233_v30, %v5367_v50 }
 0x530   :  { %13236 = vst [vmem:[#allocation11_spill] sm:$0xff] %v11572_v62  ;;  %v11599_v62 = vmul.f32 0.1, %v11329_v47  ;;  %vm5323_vm3 = vcmp.ge.f32.partialorder %v11313_v26, 0.0  ;;  %v11632_v38 = vmul.f32 0.1, %v11349_v41  ;;  %v11644_v30 = vsel %vm5304_vm5, %v11237_v7, %v11477_v4 }
 0x531   :  { %13237 = vst [vmem:[#allocation14_spill] sm:$0xff] %v11584_v63  ;;  %v11602_v63 = vmul.f32 0.1, %v11333_v25  ;;  %vm5327_vm4 = vcmp.ge.f32.partialorder %v11329_v47, 0.0  ;;  %v13248_v50 = vld [vmem:[#allocation71_spill] sm:$0xff]  ;;  %v11663_v7 = vsel %vm5305_vm6, %v11241_v8, %v11486_v17  ;;  %vm5331_vm5 = vcmp.ge.f32.partialorder %v11345_v48, 0.0 }
 0x532   :  { %13238 = vst [vmem:[#allocation8_spill] sm:$0xff] %v11589_v28  ;;  %v11617_v28 = vmul.f32 0.1, %v11341_v11  ;;  %v13255_v4 = vld [vmem:[#allocation72_spill] sm:$0xff]  ;;  %v11682_v8 = vsel %vm5306_vm7, %v11245_v44, %v11489_v58  ;;  %vm5335_vm6 = vcmp.ge.f32.partialorder %v13248_v50, 0.0  ;;  %v11701_v44 = vsel %vm5307_vm8, %v11249_v19, %v11492_v46  ;;  %v13266_v46 = vld [vmem:[#allocation10_spill] sm:$0xff] }
 0x533   :  { %13239 = vst [vmem:[#allocation15_spill] sm:$0xff] %v11602_v63  ;;  %v11620_v63 = vmul.f32 0.1, %v11345_v48  ;;  %v11689_v17 = vmul.f32 0.1, %v11385_v3  ;;  %vm5339_vm7 = vcmp.ge.f32.partialorder %v11377_v2, 0.0  ;;  %v11720_v19 = vsel %vm5308_vm9, %v11253_v43, %v11501_v45 }
 0x534   :  { %13240 = vst [vmem:[#allocation18_spill] sm:$0xff] %v11607_v57  ;;  %v11635_v57 = vmul.f32 0.1, %v11353_v27  ;;  %v11708_v58 = vmul.f32 0.1, %v11397_v52  ;;  %vm5343_vm8 = vcmp.ge.f32.partialorder %v11393_v0, 0.0  ;;  %v11733_v43 = vsel %vm5309_vm0, %v11257_v61, %v11504_v6 }
 0x535   :  { %13241 = vst [vmem:[#allocation12_spill] sm:$0xff] %v11617_v28  ;;  %vm5347_vm9 = vcmp.ge.f32.partialorder %v13266_v46, 0.0  ;;  %v13270_v45 = vld [vmem:[#allocation6_spill] sm:$0xff]  ;;  %v13272_v52 = vld [vmem:[#allocation9_spill] sm:$0xff]  ;;  %vm13281_vm1 = vcmp.ge.f32.partialorder %v11273_v60, 0.0 }
 0x536   :  { %13242 = vst [vmem:[#allocation19_spill] sm:$0xff] %v11620_v63  ;;  %v11638_v63 = vmul.f32 0.1, %v11357_v59  ;;  %v13275_v6 = vld [vmem:[#allocation77_spill] sm:$0xff] }
 0x537   :  { %13243 = vst [vmem:[#allocation22_spill] sm:$0xff] %v11625_v20  ;;  %v11651_v20 = vmul.f32 0.1, %v13248_v50  ;;  %vm5353_vm13 = vcmp.ge.f32.partialorder %v13275_v6, 0.0 }
 0x538   :  { %13244 = vst [vmem:[#allocation13_spill] sm:$0xff] %v11632_v38 }
 0x539   :  { %13245 = vst [vmem:[#allocation16_spill] sm:$0xff] %v11635_v57  ;;  %v13250_v57 = vld [vmem:[#allocation65_spill] sm:$0xff] }
 0x53a   :  { %13246 = vst [vmem:[#allocation23_spill] sm:$0xff] %v11638_v63  ;;  %v11654_v38 = vmul.f32 0.1, %v13250_v57  ;;  %v13252_v63 = vld [vmem:[#allocation68_spill] sm:$0xff] }
 0x53b   :  { %13247 = vst [vmem:[#allocation26_spill] sm:$0xff] %v11644_v30  ;;  %v11657_v28 = vmul.f32 0.1, %v13252_v63  ;;  %v11670_v30 = vmul.f32 0.1, %v13255_v4 }
 0x53c   :  { %13249 = vst [vmem:[#allocation17_spill] sm:$0xff] %v11651_v20 }
 0x53d   :  { %13251 = vst [vmem:[#allocation20_spill] sm:$0xff] %v11654_v38  ;;  %v11673_v38 = vmul.f32 0.1, %v11377_v2 }
 0x53e   :  { %13253 = vst [vmem:[#allocation27_spill] sm:$0xff] %v11657_v28  ;;  %v13256_v28 = vld [vmem:[#allocation73_spill] sm:$0xff] }
 0x53f   :  { %13254 = vst [vmem:[#allocation30_spill] sm:$0xff] %v11663_v7  ;;  %v11676_v20 = vmul.f32 0.1, %v13256_v28  ;;  %v11692_v7 = vmul.f32 0.1, %v11389_v49  ;;  %v13268_v49 = vld [vmem:[#allocation75_spill] sm:$0xff] }
 0x540   :  { %13258 = vst [vmem:[#allocation24_spill] sm:$0xff] %v11682_v8  ;;  %v11711_v8 = vmul.f32 0.1, %v11401_v16 }
 0x541   :  { %13257 = vst [vmem:[#allocation21_spill] sm:$0xff] %v11676_v20  ;;  %v11695_v20 = vmul.f32 0.1, %v11393_v0  ;;  %v5416_v0 = vmul.f32 0.1, %v13272_v52 }
 0x542   :  { %13259 = vst [vmem:[#allocation31_spill] sm:$0xff] %v11692_v7  ;;  %v13273_v7 = vld [vmem:[#allocation84_spill] sm:$0xff] }
 0x543   :  { %13260 = vst [vmem:[#allocation34_spill] sm:$0xff] %v11695_v20  ;;  %v11714_v20 = vmul.f32 0.1, %v11405_v12  ;;  %v13271_v12 = vld [vmem:[#allocation76_spill] sm:$0xff]  ;;  %v11746_v61 = vsel %vm5310_vm10, %v11261_v24, %v13273_v7  ;;  %v11759_v24 = vsel %vm5311_vm11, %v11265_v1, %v11516_v13  ;;  %vm13283_vm11 = vcmp.ge.f32.partialorder %v11277_v51, 0.0 }
 0x544   :  { %13261 = vst [vmem:[#allocation25_spill] sm:$0xff] %v11701_v44  ;;  %v5411_v44 = vmul.f32 0.1, %v13266_v46  ;;  %v5415_v16 = vmul.f32 0.1, %v13271_v12  ;;  %vm5351_vm0 = vcmp.ge.f32.partialorder %v13271_v12, 0.0 }
 0x545   :  { %13262 = vst [vmem:[#allocation28_spill] sm:$0xff] %v11708_v58  ;;  %v13279_v7 = vld [vmem:[#allocation80_spill] sm:$0xff] }
 0x546   :  { %13263 = vst [vmem:[#allocation33_spill] sm:$0xff] %v11711_v8  ;;  %v13267_v8 = vld [vmem:[#allocation4_spill] sm:$0xff]  ;;  %vm5356_vm14 = vcmp.ge.f32.partialorder %v13279_v7, 0.0 }
 0x547   :  { %13264 = vst [vmem:[#allocation43_spill] sm:$0xff] %v11714_v20  ;;  %v5412_v58 = vmul.f32 0.1, %v13267_v8  ;;  %v5413_v20 = vmul.f32 0.1, %v13268_v49  ;;  %v13277_v8 = vld [vmem:[#allocation79_spill] sm:$0xff] }
 0x548   :  { %13265 = vst [vmem:[#allocation46_spill] sm:$0xff] %v11720_v19  ;;  %v5414_v19 = vmul.f32 0.1, %v13270_v45  ;;  %v5417_v45 = vmul.f32 0.1, %v13275_v6  ;;  %vm5355_vm10 = vcmp.ge.f32.partialorder %v13277_v8, 0.0  ;;  %v11768_v6 = vsel %vm5312_vm12, %v11269_v39, %v11519_v5 }
 0x549   :  { %13269 = vst [vmem:[#allocation37_spill] sm:$0xff] %v11733_v43  ;;  %v13276_v43 = vld [vmem:[#allocation78_spill] sm:$0xff]  ;;  %v5419_v46 = vmul.f32 0.1, %v13277_v8  ;;  %v13282_v1 = vld [vmem:[#allocation88_spill] sm:$0xff]  ;;  %v13284_v39 = vld [vmem:[#allocation89_spill] sm:$0xff] }
 0x54a   :  { %13274 = vst [vmem:[#allocation40_spill] sm:$0xff] %v11746_v61  ;;  %v5418_v49 = vmul.f32 0.1, %v13276_v43  ;;  %v5420_v61 = vmul.f32 0.1, %v13279_v7  ;;  %v13280_v43 = vld [vmem:[#allocation86_spill] sm:$0xff]  ;;  %v11780_v13 = vsel %vm13283_vm11, %v11277_v51, %v13282_v1 }
 0x54b   :  { %13278 = vst [vmem:[#allocation47_spill] sm:$0xff] %v11759_v24  ;;  %v11774_v52 = vsel %vm13281_vm1, %v11273_v60, %v13280_v43  ;;  %v11786_v24 = vsel %vm5315_vm15, %v11281_v35, %v11534_v36  ;;  %vm13285_vm12 = vcmp.ge.f32.partialorder %v11285_v29, 0.0  ;;  %vm13286_vm1 = vcmp.ge.f32.partialorder %v11289_v42, 0.0  ;;  %v13288_v35 = vld [vmem:[#allocation91_spill] sm:$0xff] }
 0x54c   :  { %v11792_v5 = vsel %vm13285_vm12, %v11285_v29, %v13284_v39  ;;  %v11798_v60 = vsel %vm13286_vm1, %v11289_v42, %v11546_v55  ;;  %vm13287_vm11 = vcmp.ge.f32.partialorder %v13233_v40, 0.0  ;;  %v11810_v36 = vsel %vm5319_vm2, %v11297_v31, %v13288_v35  ;;  %v13323_v35 = vld [vmem:[#allocation3_spill] sm:$0xff] }
 0x54d   :  { %v11804_v51 = vsel %vm13287_vm11, %v13233_v40, %v11549_v23  ;;  %vm13289_vm15 = vcmp.ge.f32.partialorder %v11301_v32, 0.0  ;;  %vm13290_vm12 = vcmp.ge.f32.partialorder %v11305_v22, 0.0  ;;  %vm13291_vm1 = vcmp.ge.f32.partialorder %v11309_v33, 0.0 }
 0x54e   :  { %v11816_v29 = vsel %vm13289_vm15, %v11301_v32, %v11561_v34  ;;  %v11822_v42 = vsel %vm13290_vm12, %v11305_v22, %v11564_v10  ;;  %v11828_v23 = vsel %vm13291_vm1, %v11309_v33, %v11567_v37  ;;  %v11834_v31 = vsel %vm5323_vm3, %v11313_v26, %v11578_v15  ;;  %v13293_v22 = vld [vmem:[#allocation14_spill] sm:$0xff] }
 0x54f   :  { %vm13292_vm2 = vcmp.ge.f32.partialorder %v11317_v18, 0.0  ;;  %vm13294_vm11 = vcmp.ge.f32.partialorder %v11321_v21, 0.0  ;;  %vm13295_vm15 = vcmp.ge.f32.partialorder %v11325_v53, 0.0  ;;  %v11858_v26 = vsel %vm5327_vm4, %v11329_v47, %v11599_v62  ;;  %v13301_v47 = vld [vmem:[#allocation19_spill] sm:$0xff] }
 0x550   :  { %v11840_v32 = vsel %vm13292_vm2, %v11317_v18, %v11581_v14  ;;  %v11846_v55 = vsel %vm13294_vm11, %v11321_v21, %v13293_v22  ;;  %v11852_v33 = vsel %vm13295_vm15, %v11325_v53, %v11596_v54  ;;  %v13296_v18 = vld [vmem:[#allocation15_spill] sm:$0xff]  ;;  %vm13297_vm3 = vcmp.ge.f32.partialorder %v11333_v25, 0.0  ;;  %v13299_v53 = vld [vmem:[#allocation12_spill] sm:$0xff] }
 0x551   :  { %v11864_v37 = vsel %vm13297_vm3, %v11333_v25, %v13296_v18  ;;  %vm13298_vm12 = vcmp.ge.f32.partialorder %v11337_v9, 0.0  ;;  %vm13300_vm1 = vcmp.ge.f32.partialorder %v11341_v11, 0.0  ;;  %v11882_v62 = vsel %vm5331_vm5, %v11345_v48, %v13301_v47  ;;  %v13302_v25 = vld [vmem:[#allocation13_spill] sm:$0xff]  ;;  %v13329_v47 = vld [vmem:[#allocation7_spill] sm:$0xff] }
 0x552   :  { %v11870_v21 = vsel %vm13298_vm12, %v11337_v9, %v11614_v56  ;;  %v11876_v40 = vsel %vm13300_vm1, %v11341_v11, %v13299_v53  ;;  %vm13303_vm4 = vcmp.ge.f32.partialorder %v11349_v41, 0.0  ;;  %v13304_v9 = vld [vmem:[#allocation16_spill] sm:$0xff]  ;;  %vm13305_vm2 = vcmp.ge.f32.partialorder %v11353_v27, 0.0  ;;  %v13306_v11 = vld [vmem:[#allocation23_spill] sm:$0xff]  ;;  %v13308_v48 = vld [vmem:[#allocation17_spill] sm:$0xff] }
 0x553   :  { %v11888_v34 = vsel %vm13303_vm4, %v11349_v41, %v13302_v25  ;;  %v11894_v10 = vsel %vm13305_vm2, %v11353_v27, %v13304_v9  ;;  %vm13307_vm11 = vcmp.ge.f32.partialorder %v11357_v59, 0.0  ;;  %v11906_v14 = vsel %vm5335_vm6, %v13248_v50, %v13308_v48  ;;  %v13309_v41 = vld [vmem:[#allocation20_spill] sm:$0xff]  ;;  %v13311_v27 = vld [vmem:[#allocation27_spill] sm:$0xff]  ;;  %v13331_v9 = vld [vmem:[#allocation10_spill] sm:$0xff] }
 0x554   :  { %v11900_v15 = vsel %vm13307_vm11, %v11357_v59, %v13306_v11  ;;  %vm13310_vm5 = vcmp.ge.f32.partialorder %v13250_v57, 0.0  ;;  %vm13312_vm15 = vcmp.ge.f32.partialorder %v13252_v63, 0.0  ;;  %vm13313_vm3 = vcmp.ge.f32.partialorder %v13255_v4, 0.0  ;;  %v13328_v53 = vld [vmem:[#allocation43_spill] sm:$0xff]  ;;  %v13332_v48 = vld [vmem:[#allocation4_spill] sm:$0xff] }
 0x555   :  { %v11912_v54 = vsel %vm13310_vm5, %v13250_v57, %v13309_v41  ;;  %v11918_v56 = vsel %vm13312_vm15, %v13252_v63, %v13311_v27  ;;  %v11924_v59 = vsel %vm13313_vm3, %v13255_v4, %v11670_v30  ;;  %v11930_v50 = vsel %vm5339_vm7, %v11377_v2, %v11673_v38  ;;  %v13314_v57 = vld [vmem:[#allocation21_spill] sm:$0xff]  ;;  %v13317_v30 = vld [vmem:[#allocation31_spill] sm:$0xff]  ;;  %v13318_v4 = vld [vmem:[#allocation2_spill] sm:$0xff] }
 0x556   :  { %vm13315_vm6 = vcmp.ge.f32.partialorder %v13256_v28, 0.0  ;;  %vm13316_vm12 = vcmp.ge.f32.partialorder %v11385_v3, 0.0  ;;  %vm13319_vm1 = vcmp.ge.f32.partialorder %v13318_v4, 0.0  ;;  %v13320_v2 = vld [vmem:[#allocation34_spill] sm:$0xff]  ;;  %v13321_v38 = vld [vmem:[#allocation69_spill] sm:$0xff]  ;;  %vm13324_vm7 = vcmp.ge.f32.partialorder %v13323_v35, 0.0 }
 0x557   :  { %v11936_v43 = vsel %vm13315_vm6, %v13256_v28, %v13314_v57  ;;  %v11942_v63 = vsel %vm13316_vm12, %v11385_v3, %v11689_v17  ;;  %v11948_v1 = vsel %vm13319_vm1, %v13318_v4, %v13317_v30  ;;  %v11954_v39 = vsel %vm5343_vm8, %v13321_v38, %v13320_v2  ;;  %v13322_v28 = vld [vmem:[#allocation28_spill] sm:$0xff]  ;;  %v13325_v3 = vld [vmem:[#allocation33_spill] sm:$0xff]  ;;  %v13326_v17 = vld [vmem:[#allocation74_spill] sm:$0xff] }
 0x558   :  { %v11960_v22 = vsel %vm13324_vm7, %v13323_v35, %v13322_v28  ;;  %vm13327_vm4 = vcmp.ge.f32.partialorder %v13326_v17, 0.0  ;;  %vm13330_vm2 = vcmp.ge.f32.partialorder %v13329_v47, 0.0  ;;  %v11977_v11 = vsel %vm5347_vm9, %v13331_v9, %v5411_v44  ;;  %v13334_v27 = vld [vmem:[#allocation75_spill] sm:$0xff]  ;;  %v13336_v30 = vld [vmem:[#allocation6_spill] sm:$0xff]  ;;  %v13338_v2 = vld [vmem:[#allocation9_spill] sm:$0xff] }
 0x559   :  { %v11966_v18 = vsel %vm13327_vm4, %v13326_v17, %v13325_v3  ;;  %v11972_v25 = vsel %vm13330_vm2, %v13329_v47, %v13328_v53  ;;  %vm13333_vm8 = vcmp.ge.f32.partialorder %v13332_v48, 0.0  ;;  %vm13335_vm11 = vcmp.ge.f32.partialorder %v13334_v27, 0.0  ;;  %v13340_v38 = vld [vmem:[#allocation77_spill] sm:$0xff]  ;;  %v13341_v28 = vld [vmem:[#allocation78_spill] sm:$0xff]  ;;  %v13349_v47 = vld [vmem:[#allocation87_spill] sm:$0xff] }
 0x55a   :  { %v11982_v41 = vsel %vm13333_vm8, %v13332_v48, %v5412_v58  ;;  %v11987_v57 = vsel %vm13335_vm11, %v13334_v27, %v5413_v20  ;;  %vm13337_vm5 = vcmp.ge.f32.partialorder %v13336_v30, 0.0  ;;  %v11997_v44 = vsel %vm5351_vm0, %v13271_v12, %v5415_v16  ;;  %v13345_v12 = vld [vmem:[#allocation81_spill] sm:$0xff]  ;;  %v13346_v35 = vld [vmem:[#allocation82_spill] sm:$0xff]  ;;  %v13352_v27 = vld [vmem:[#allocation11_spill] sm:$0xff] }
 0x55b   :  { %v11992_v4 = vsel %vm13337_vm5, %v13336_v30, %v5414_v19  ;;  %vm13339_vm9 = vcmp.ge.f32.partialorder %v13338_v2, 0.0  ;;  %v12007_v20 = vsel %vm5353_vm13, %v13340_v38, %v5417_v45  ;;  %vm13342_vm15 = vcmp.ge.f32.partialorder %v13341_v28, 0.0  ;;  %v13347_v45 = vld [vmem:[#allocation83_spill] sm:$0xff]  ;;  %v13348_v17 = vld [vmem:[#allocation85_spill] sm:$0xff]  ;;  %v13350_v9 = vld [vmem:[#allocation90_spill] sm:$0xff] }
 0x55c   :  { %v12002_v58 = vsel %vm13339_vm9, %v13338_v2, %v5416_v0  ;;  %v12012_v19 = vsel %vm13342_vm15, %v13341_v28, %v5418_v49  ;;  %v12017_v16 = vsel %vm5355_vm10, %v13277_v8, %v5419_v46  ;;  %v12022_v0 = vsel %vm5356_vm14, %v13279_v7, %v5420_v61  ;;  %v13351_v48 = vld [vmem:[#allocation5_spill] sm:$0xff]  ;;  %v13353_v2 = vld [vmem:[#allocation8_spill] sm:$0xff]  ;;  %v13354_v8 = vld [vmem:[#allocation18_spill] sm:$0xff] }
 0x55d   :  { %13343 = vst [vmem:[#allocation50_spill] sm:$0xff] %v12017_v16  ;;  %v6420_v3 = vpack.c.bf16 %v13346_v35, %v13345_v12  ;;  %v6425_v53 = vpack.c.bf16 %v13348_v17, %v13347_v45  ;;  %v6430_v49 = vpack.c.bf16 %v13350_v9, %v13349_v47  ;;  %v6435_v30 = vpack.c.bf16 %v13352_v27, %v13351_v48  ;;  %v13355_v38 = vld [vmem:[#allocation22_spill] sm:$0xff]  ;;  %v13358_v7 = vld [vmem:[#allocation24_spill] sm:$0xff]  ;;  %v13359_v35 = vld [vmem:[#allocation25_spill] sm:$0xff] }
 0x55e   :  { %13344 = vst [vmem:[#allocation41_spill] sm:$0xff] %v12022_v0  ;;  %v6440_v46 = vpack.c.bf16 %v13354_v8, %v13353_v2  ;;  %v13356_v28 = vld [vmem:[#allocation26_spill] sm:$0xff]  ;;  %v13361_v47 = vld [vmem:[#allocation37_spill] sm:$0xff]  ;;  %v13362_v9 = vld [vmem:[#allocation40_spill] sm:$0xff]  ;;  %v6470_v2 = vpack.c.bf16 %v11780_v13, %v11774_v52  ;;  %v6480_v8 = vpack.c.bf16 %v11804_v51, %v11798_v60  ;;  %v6500_v52 = vpack.c.bf16 %v11852_v33, %v11846_v55 }
 0x55f   :  { %v6445_v16 = vpack.c.bf16 %v13356_v28, %v13355_v38  ;;  %6421 = vst [vmem:[%s12189_s5] sm:$0xff] %v6420_v3   ;;  %v13357_v61 = vld [vmem:[#allocation30_spill] sm:$0xff]  ;;  %v6460_v0 = vpack.c.bf16 %v13362_v9, %v13361_v47  ;;  %v13363_v48 = vld [vmem:[#allocation47_spill] sm:$0xff]  ;;  %v6475_v3 = vpack.c.bf16 %v11792_v5, %v11786_v24  ;;  %v6485_v38 = vpack.c.bf16 %v11816_v29, %v11810_v36 }
 0x560   :  { %v6450_v12 = vpack.c.bf16 %v13358_v7, %v13357_v61  ;;  %v13360_v45 = vld [vmem:[#allocation46_spill] sm:$0xff]  ;;  %v6465_v27 = vpack.c.bf16 %v11768_v6, %v13363_v48  ;;  %6577 = vst [vmem:[%s12189_s5 + $0x8] sm:$0xff] %v6425_v53   ;;  %v6490_v6 = vpack.c.bf16 %v11828_v23, %v11822_v42  ;;  %v6495_v53 = vpack.c.bf16 %v11840_v32, %v11834_v31 }
 0x561   :  { %v6455_v17 = vpack.c.bf16 %v13360_v45, %v13359_v35  ;;  %6578 = vst [vmem:[%s12189_s5 + $0x10] sm:$0xff] %v6430_v49   ;;  %v6505_v24 = vpack.c.bf16 %v11864_v37, %v11858_v26  ;;  %v6510_v13 = vpack.c.bf16 %v11876_v40, %v11870_v21  ;;  %v6515_v5 = vpack.c.bf16 %v11888_v34, %v11882_v62 }
 0x562   :  { %6579 = vst [vmem:[%s12189_s5 + $0x18] sm:$0xff] %v6435_v30   ;;  %v6520_v60 = vpack.c.bf16 %v11900_v15, %v11894_v10  ;;  %v6525_v51 = vpack.c.bf16 %v11912_v54, %v11906_v14  ;;  %v6530_v36 = vpack.c.bf16 %v11924_v59, %v11918_v56  ;;  %v6535_v29 = vpack.c.bf16 %v11936_v43, %v11930_v50 }
 0x563   :  { %6580 = vst [vmem:[%s12189_s5 + $0x20] sm:$0xff] %v6440_v46   ;;  %v6540_v42 = vpack.c.bf16 %v11948_v1, %v11942_v63  ;;  %v6545_v23 = vpack.c.bf16 %v11960_v22, %v11954_v39  ;;  %v6550_v31 = vpack.c.bf16 %v11972_v25, %v11966_v18  ;;  %v6555_v32 = vpack.c.bf16 %v11982_v41, %v11977_v11 }
 0x564   :  { %6581 = vst [vmem:[%s12189_s5 + $0x28] sm:$0xff] %v6445_v16   ;;  %v6560_v55 = vpack.c.bf16 %v11992_v4, %v11987_v57  ;;  %v6565_v33 = vpack.c.bf16 %v12002_v58, %v11997_v44  ;;  %v6570_v26 = vpack.c.bf16 %v12012_v19, %v12007_v20  ;;  %v13364_v37 = vld [vmem:[#allocation50_spill] sm:$0xff] }
 0x565   :  { %6582 = vst [vmem:[%s12189_s5 + $0x30] sm:$0xff] %v6450_v12   ;;  %v13365_v21 = vld [vmem:[#allocation41_spill] sm:$0xff] }
 0x566   :  { %v6575_v40 = vpack.c.bf16 %v13365_v21, %v13364_v37  ;;  %6583 = vst [vmem:[%s12189_s5 + $0x38] sm:$0xff] %v6455_v17  }
 0x567   :  { %6584 = vst [vmem:[%s12189_s5 + $0x40] sm:$0xff] %v6460_v0  }
 0x568   :  { %6585 = vst [vmem:[%s12189_s5 + $0x48] sm:$0xff] %v6465_v27  }
 0x569   :  { %6586 = vst [vmem:[%s12189_s5 + $0x50] sm:$0xff] %v6470_v2  }
 0x56a   :  { %6587 = vst [vmem:[%s12189_s5 + $0x58] sm:$0xff] %v6475_v3  }
 0x56b   :  { %6588 = vst [vmem:[%s12189_s5 + $0x60] sm:$0xff] %v6480_v8  }
 0x56c   :  { %6589 = vst [vmem:[%s12189_s5 + $0x68] sm:$0xff] %v6485_v38  }
 0x56d   :  { %6590 = vst [vmem:[%s12189_s5 + $0x70] sm:$0xff] %v6490_v6  }
 0x56e   :  { %6591 = vst [vmem:[%s12189_s5 + $0x78] sm:$0xff] %v6495_v53  }
 0x56f   :  { %6592 = vst [vmem:[%s12189_s5 + $0x80] sm:$0xff] %v6500_v52  }
 0x570   :  { %6593 = vst [vmem:[%s12189_s5 + $0x88] sm:$0xff] %v6505_v24  }
 0x571   :  { %6594 = vst [vmem:[%s12189_s5 + $0x90] sm:$0xff] %v6510_v13  }
 0x572   :  { %6595 = vst [vmem:[%s12189_s5 + $0x98] sm:$0xff] %v6515_v5  }
 0x573   :  { %6596 = vst [vmem:[%s12189_s5 + $0xa0] sm:$0xff] %v6520_v60  }
 0x574   :  { %6597 = vst [vmem:[%s12189_s5 + $0xa8] sm:$0xff] %v6525_v51  }
 0x575   :  { %6598 = vst [vmem:[%s12189_s5 + $0xb0] sm:$0xff] %v6530_v36  }
 0x576   :  { %6599 = vst [vmem:[%s12189_s5 + $0xb8] sm:$0xff] %v6535_v29  }
 0x577   :  { %6600 = vst [vmem:[%s12189_s5 + $0xc0] sm:$0xff] %v6540_v42  }
 0x578   :  { %6601 = vst [vmem:[%s12189_s5 + $0xc8] sm:$0xff] %v6545_v23  }
 0x579   :  { %6602 = vst [vmem:[%s12189_s5 + $0xd0] sm:$0xff] %v6550_v31  }
 0x57a   :  { %6603 = vst [vmem:[%s12189_s5 + $0xd8] sm:$0xff] %v6555_v32  }
 0x57b   :  { %6604 = vst [vmem:[%s12189_s5 + $0xe0] sm:$0xff] %v6560_v55  }
 0x57c   :  { %6605 = vst [vmem:[%s12189_s5 + $0xe8] sm:$0xff] %v6565_v33  }
 0x57d   :  { %6606 = vst [vmem:[%s12189_s5 + $0xf0] sm:$0xff] %v6570_v26  }
 0x57e   :  { %6607 = vst [vmem:[%s12189_s5 + $0xf8] sm:$0xff] %v6575_v40  }

// kernel: discriminator_forward.5
= control target key start
LH: loop header
LB: loop body
LE: loop exit
PB: predicated region body
PF: predicated region fallthrough
CT: control target
= control target key end

     0   :  { %vm5355_vm6 = vcmask 23552   ;;  %s9716_s1 = inlined_call_operand.vmem [shape: bf16[8192,128], index: 1, kind: input, shape index: {}]   ;;  %s9717_s0 = inlined_call_operand.vmem [shape: bf16[8,8192], index: 0, kind: input, shape index: {}]   ;;  %s9718_s2 = inlined_call_operand.vmem [shape: f32[1,128], index: 2, kind: input, shape index: {}]   ;;  %s9719_s3 = inlined_call_operand.vmem [shape: f32[1,128], index: 3, kind: input, shape index: {}]   ;;  %s9720_s4 = inlined_call_operand.vmem [shape: f32[1,128], index: 4, kind: input, shape index: {}]   ;;  %s9721_s6 = inlined_call_operand.vmem [shape: f32[1,3], index: 6, kind: input, shape index: {}]   ;;  %s9722_s5 = inlined_call_operand.vmem [shape: bf16[128,3], index: 5, kind: input, shape index: {}]   ;;  %s9723_s7 = inlined_call_operand.vmem [shape: f32[8,3], index: 7, kind: output, shape index: {}]  }
   0x1   :  { %v7448_v0 = vld [vmem:[%s9716_s1 + $0x38] sm:$0xff]  ;;  %v7447_v4 = vld [vmem:[%s9716_s1 + $0x30] sm:$0xff]  ;;  %v7446_v8 = vld [vmem:[%s9716_s1 + $0x28] sm:$0xff] }
   0x2   :  { %v7456_v1 = vld [vmem:[%s9716_s1 + $0x78] sm:$0xff]  ;;  %4382 = vmatpush.bf16.msra.mxu0 %v7448_v0  ;;  %v7455_v5 = vld [vmem:[%s9716_s1 + $0x70] sm:$0xff]  ;;  %v7454_v9 = vld [vmem:[%s9716_s1 + $0x68] sm:$0xff] }
   0x3   :  { %v7464_v2 = vld [vmem:[%s9716_s1 + $0xb8] sm:$0xff]  ;;  %4395 = vmatpush.bf16.msra.mxu1 %v7456_v1  ;;  %v7463_v6 = vld [vmem:[%s9716_s1 + $0xb0] sm:$0xff]  ;;  %v7462_v10 = vld [vmem:[%s9716_s1 + $0xa8] sm:$0xff] }
   0x4   :  { %v7472_v3 = vld [vmem:[%s9716_s1 + $0xf8] sm:$0xff]  ;;  %4408 = vmatpush.bf16.msra.mxu2 %v7464_v2  ;;  %v7471_v7 = vld [vmem:[%s9716_s1 + $0xf0] sm:$0xff]  ;;  %v7470_v11 = vld [vmem:[%s9716_s1 + $0xe8] sm:$0xff] }
   0x5   :  { %4421 = vmatpush.bf16.msra.mxu3 %v7472_v3  ;;  %v7445_v12 = vld [vmem:[%s9716_s1 + $0x20] sm:$0xff]  ;;  %v7444_v16 = vld [vmem:[%s9716_s1 + $0x18] sm:$0xff]  ;;  %v7443_v20 = vld [vmem:[%s9716_s1 + $0x10] sm:$0xff] }
   0x6   :  { %4383 = vmatpush.bf16.msra.mxu0 %v7447_v4  ;;  %v7453_v13 = vld [vmem:[%s9716_s1 + $0x60] sm:$0xff]  ;;  %v7452_v17 = vld [vmem:[%s9716_s1 + $0x58] sm:$0xff]  ;;  %v7451_v21 = vld [vmem:[%s9716_s1 + $0x50] sm:$0xff] }
   0x7   :  { %4396 = vmatpush.bf16.msra.mxu1 %v7455_v5  ;;  %v7461_v14 = vld [vmem:[%s9716_s1 + $0xa0] sm:$0xff]  ;;  %v7460_v18 = vld [vmem:[%s9716_s1 + $0x98] sm:$0xff]  ;;  %v7459_v22 = vld [vmem:[%s9716_s1 + $0x90] sm:$0xff] }
   0x8   :  { %4409 = vmatpush.bf16.msra.mxu2 %v7463_v6  ;;  %v7469_v15 = vld [vmem:[%s9716_s1 + $0xe0] sm:$0xff]  ;;  %v7468_v19 = vld [vmem:[%s9716_s1 + $0xd8] sm:$0xff]  ;;  %v7467_v23 = vld [vmem:[%s9716_s1 + $0xd0] sm:$0xff] }
   0x9   :  { %4422 = vmatpush.bf16.msra.mxu3 %v7471_v7  ;;  %v7442_v24 = vld [vmem:[%s9716_s1 + $0x8] sm:$0xff]  ;;  %v26_v29 = vld [vmem:[%s9717_s0] sm:$0xff]  ;;  %v7480_v38 = vld [vmem:[%s9716_s1 + $0x138] sm:$0xff] }
   0xa   :  { %4384 = vmatpush.bf16.msra.mxu0 %v7446_v8  ;;  %v7450_v25 = vld [vmem:[%s9716_s1 + $0x48] sm:$0xff]  ;;  %v7441_v30 = vld [vmem:[%s9716_s1] sm:$0xff]  ;;  %v1118_v33 = vunpack.c.l.b16 %v26_v29  ;;  %v1119_v37 = vunpack.c.h.b16 %v26_v29  ;;  %v7488_v39 = vld [vmem:[%s9716_s1 + $0x178] sm:$0xff] }
   0xb   :  { %4397 = vmatpush.bf16.msra.mxu1 %v7454_v9  ;;  %v7458_v26 = vld [vmem:[%s9716_s1 + $0x88] sm:$0xff]  ;;  %v7449_v31 = vld [vmem:[%s9716_s1 + $0x40] sm:$0xff]  ;;  %v7496_v40 = vld [vmem:[%s9716_s1 + $0x1b8] sm:$0xff] }
   0xc   :  { %4410 = vmatpush.bf16.msra.mxu2 %v7462_v10  ;;  %v7466_v27 = vld [vmem:[%s9716_s1 + $0xc8] sm:$0xff]  ;;  %v7457_v34 = vld [vmem:[%s9716_s1 + $0x80] sm:$0xff]  ;;  %v7504_v41 = vld [vmem:[%s9716_s1 + $0x1f8] sm:$0xff]  ;;  %v1182_v43 = vpack.c.b16 %v1118_v33, %v1118_v33  ;;  %v1183_v45 = vpack.c.b16 %v1119_v37, %v1119_v37 }
   0xd   :  { %4423 = vmatpush.bf16.msra.mxu3 %v7470_v11  ;;  %v27_v28 = vld [vmem:[%s9717_s0 + $0x8] sm:$0xff]  ;;  %v7465_v35 = vld [vmem:[%s9716_s1 + $0xc0] sm:$0xff]  ;;  %v7479_v46 = vld [vmem:[%s9716_s1 + $0x130] sm:$0xff] }
   0xe   :  { %4385 = vmatpush.bf16.msra.mxu0 %v7445_v12  ;;  %v1120_v32 = vunpack.c.l.b16 %v27_v28  ;;  %v1121_v36 = vunpack.c.h.b16 %v27_v28  ;;  %v7487_v47 = vld [vmem:[%s9716_s1 + $0x170] sm:$0xff]  ;;  %v7478_v50 = vld [vmem:[%s9716_s1 + $0x128] sm:$0xff]  ;;  %v7477_v54 = vld [vmem:[%s9716_s1 + $0x120] sm:$0xff] }
   0xf   :  { %4398 = vmatpush.bf16.msra.mxu1 %v7453_v13  ;;  %v7495_v48 = vld [vmem:[%s9716_s1 + $0x1b0] sm:$0xff]  ;;  %v7486_v51 = vld [vmem:[%s9716_s1 + $0x168] sm:$0xff]  ;;  %v7485_v55 = vld [vmem:[%s9716_s1 + $0x160] sm:$0xff] }
  0x10   :  { %4411 = vmatpush.bf16.msra.mxu2 %v7461_v14  ;;  %v1184_v42 = vpack.c.b16 %v1120_v32, %v1120_v32  ;;  %v1185_v44 = vpack.c.b16 %v1121_v36, %v1121_v36  ;;  %v7503_v49 = vld [vmem:[%s9716_s1 + $0x1f0] sm:$0xff]  ;;  %v7494_v52 = vld [vmem:[%s9716_s1 + $0x1a8] sm:$0xff]  ;;  %v7493_v56 = vld [vmem:[%s9716_s1 + $0x1a0] sm:$0xff] }
  0x11   :  { %4424 = vmatpush.bf16.msra.mxu3 %v7469_v15  ;;  %v7502_v53 = vld [vmem:[%s9716_s1 + $0x1e8] sm:$0xff]  ;;  %v7501_v57 = vld [vmem:[%s9716_s1 + $0x1e0] sm:$0xff]  ;;  %v7476_v58 = vld [vmem:[%s9716_s1 + $0x118] sm:$0xff] }
  0x12   :  { %4386 = vmatpush.bf16.msra.mxu0 %v7444_v16  ;;  %v7484_v59 = vld [vmem:[%s9716_s1 + $0x158] sm:$0xff]  ;;  %v7475_v62 = vld [vmem:[%s9716_s1 + $0x110] sm:$0xff]  ;;  %v7474_v2 = vld [vmem:[%s9716_s1 + $0x108] sm:$0xff] }
  0x13   :  { %4399 = vmatpush.bf16.msra.mxu1 %v7452_v17  ;;  %v7492_v60 = vld [vmem:[%s9716_s1 + $0x198] sm:$0xff]  ;;  %v7483_v63 = vld [vmem:[%s9716_s1 + $0x150] sm:$0xff]  ;;  %v7482_v3 = vld [vmem:[%s9716_s1 + $0x148] sm:$0xff] }
  0x14   :  { %4412 = vmatpush.bf16.msra.mxu2 %v7460_v18  ;;  %v7500_v61 = vld [vmem:[%s9716_s1 + $0x1d8] sm:$0xff]  ;;  %v7491_v0 = vld [vmem:[%s9716_s1 + $0x190] sm:$0xff]  ;;  %v7490_v4 = vld [vmem:[%s9716_s1 + $0x188] sm:$0xff] }
  0x15   :  { %4425 = vmatpush.bf16.msra.mxu3 %v7468_v19  ;;  %v7499_v1 = vld [vmem:[%s9716_s1 + $0x1d0] sm:$0xff]  ;;  %v7498_v5 = vld [vmem:[%s9716_s1 + $0x1c8] sm:$0xff]  ;;  %v29_v6 = vld [vmem:[%s9717_s0 + $0x18] sm:$0xff] }
  0x16   :  { %4387 = vmatpush.bf16.msra.mxu0 %v7443_v20  ;;  %v28_v7 = vld [vmem:[%s9717_s0 + $0x10] sm:$0xff]  ;;  %v7473_v8 = vld [vmem:[%s9716_s1 + $0x100] sm:$0xff]  ;;  %v1124_v10 = vunpack.c.l.b16 %v29_v6  ;;  %v1125_v14 = vunpack.c.h.b16 %v29_v6  ;;  %v7512_v16 = vld [vmem:[%s9716_s1 + $0x238] sm:$0xff] }
  0x17   :  { %4400 = vmatpush.bf16.msra.mxu1 %v7451_v21  ;;  %v7481_v9 = vld [vmem:[%s9716_s1 + $0x140] sm:$0xff]  ;;  %v1122_v11 = vunpack.c.l.b16 %v28_v7  ;;  %v1123_v15 = vunpack.c.h.b16 %v28_v7  ;;  %v7520_v17 = vld [vmem:[%s9716_s1 + $0x278] sm:$0xff]  ;;  %v7510_v28 = vld [vmem:[%s9716_s1 + $0x228] sm:$0xff] }
  0x18   :  { %4413 = vmatpush.bf16.msra.mxu2 %v7459_v22  ;;  %v7489_v12 = vld [vmem:[%s9716_s1 + $0x180] sm:$0xff]  ;;  %v7528_v18 = vld [vmem:[%s9716_s1 + $0x2b8] sm:$0xff]  ;;  %v1188_v20 = vpack.c.b16 %v1124_v10, %v1124_v10  ;;  %v1189_v22 = vpack.c.b16 %v1125_v14, %v1125_v14  ;;  %v7518_v29 = vld [vmem:[%s9716_s1 + $0x268] sm:$0xff] }
  0x19   :  { %4426 = vmatpush.bf16.msra.mxu3 %v7467_v23  ;;  %v7497_v13 = vld [vmem:[%s9716_s1 + $0x1c0] sm:$0xff]  ;;  %v7536_v19 = vld [vmem:[%s9716_s1 + $0x2f8] sm:$0xff]  ;;  %v1186_v21 = vpack.c.b16 %v1122_v11, %v1122_v11  ;;  %v1187_v23 = vpack.c.b16 %v1123_v15, %v1123_v15  ;;  %v7542_v6 = vld [vmem:[%s9716_s1 + $0x328] sm:$0xff] }
  0x1a   :  { %4388 = vmatpush.bf16.msra.mxu0 %v7442_v24  ;;  %v7511_v24 = vld [vmem:[%s9716_s1 + $0x230] sm:$0xff]  ;;  %v7509_v32 = vld [vmem:[%s9716_s1 + $0x220] sm:$0xff]  ;;  %v7508_v36 = vld [vmem:[%s9716_s1 + $0x218] sm:$0xff] }
  0x1b   :  { %4401 = vmatpush.bf16.msra.mxu1 %v7450_v25  ;;  %v7519_v25 = vld [vmem:[%s9716_s1 + $0x270] sm:$0xff]  ;;  %v7517_v33 = vld [vmem:[%s9716_s1 + $0x260] sm:$0xff]  ;;  %v7516_v37 = vld [vmem:[%s9716_s1 + $0x258] sm:$0xff] }
  0x1c   :  { %4414 = vmatpush.bf16.msra.mxu2 %v7458_v26  ;;  %v7527_v26 = vld [vmem:[%s9716_s1 + $0x2b0] sm:$0xff]  ;;  %v7550_v7 = vld [vmem:[%s9716_s1 + $0x368] sm:$0xff]  ;;  %v7541_v10 = vld [vmem:[%s9716_s1 + $0x320] sm:$0xff] }
  0x1d   :  { %4427 = vmatpush.bf16.msra.mxu3 %v7466_v27  ;;  %v7535_v27 = vld [vmem:[%s9716_s1 + $0x2f0] sm:$0xff]  ;;  %v7549_v11 = vld [vmem:[%s9716_s1 + $0x360] sm:$0xff]  ;;  %v7540_v14 = vld [vmem:[%s9716_s1 + $0x318] sm:$0xff] }
  0x1e   :  { %4389 = vmatpush.bf16.msra.mxu0 %v7441_v30  ;;  %v7526_v30 = vld [vmem:[%s9716_s1 + $0x2a8] sm:$0xff]  ;;  %v7548_v15 = vld [vmem:[%s9716_s1 + $0x358] sm:$0xff] }
  0x1f   :  { %4402 = vmatpush.bf16.msra.mxu1 %v7449_v31  ;;  %v7534_v31 = vld [vmem:[%s9716_s1 + $0x2e8] sm:$0xff] }
  0x20   :  { %4415 = vmatpush.bf16.msra.mxu2 %v7457_v34  ;;  %v7525_v34 = vld [vmem:[%s9716_s1 + $0x2a0] sm:$0xff] }
  0x21   :  { %4428 = vmatpush.bf16.msra.mxu3 %v7465_v35  ;;  %4390 = vmatmul.bf16.vlgmr.msra.gmra.mxu0 %v1182_v43  ;;  %v7533_v35 = vld [vmem:[%s9716_s1 + $0x2e0] sm:$0xff]  ;;  %v7531_v43 = vld [vmem:[%s9716_s1 + $0x2d0] sm:$0xff] }
  0x22   :  { %4434 = vmatpush.bf16.msrb.mxu0 %v7480_v38  ;;  %4403 = vmatmul.bf16.vlgmr.msra.gmra.mxu1 %v1183_v45  ;;  %v7524_v38 = vld [vmem:[%s9716_s1 + $0x298] sm:$0xff]  ;;  %v7514_v45 = vld [vmem:[%s9716_s1 + $0x248] sm:$0xff] }
  0x23   :  { %4447 = vmatpush.bf16.msrb.mxu1 %v7488_v39  ;;  %4416 = vmatmul.bf16.vlgmr.msra.gmra.mxu2 %v1184_v42  ;;  %v7532_v39 = vld [vmem:[%s9716_s1 + $0x2d8] sm:$0xff]  ;;  %v7523_v42 = vld [vmem:[%s9716_s1 + $0x290] sm:$0xff] }
  0x24   :  { %4460 = vmatpush.bf16.msrb.mxu2 %v7496_v40  ;;  %4429 = vmatmul.bf16.vlgmr.msra.gmra.mxu3 %v1185_v44  ;;  %v7507_v40 = vld [vmem:[%s9716_s1 + $0x210] sm:$0xff]  ;;  %v7506_v44 = vld [vmem:[%s9716_s1 + $0x208] sm:$0xff] }
  0x25   :  { %4473 = vmatpush.bf16.msrb.mxu3 %v7504_v41  ;;  %v7515_v41 = vld [vmem:[%s9716_s1 + $0x250] sm:$0xff] }
  0x26   :  { %4435 = vmatpush.bf16.msrb.mxu0 %v7479_v46  ;;  %v7522_v46 = vld [vmem:[%s9716_s1 + $0x288] sm:$0xff] }
  0x27   :  { %4448 = vmatpush.bf16.msrb.mxu1 %v7487_v47  ;;  %v7530_v47 = vld [vmem:[%s9716_s1 + $0x2c8] sm:$0xff] }
  0x28   :  { %4461 = vmatpush.bf16.msrb.mxu2 %v7495_v48  ;;  %v30_v48 = vld [vmem:[%s9717_s0 + $0x20] sm:$0xff] }
  0x29   :  { %4474 = vmatpush.bf16.msrb.mxu3 %v7503_v49  ;;  %v31_v49 = vld [vmem:[%s9717_s0 + $0x28] sm:$0xff] }
  0x2a   :  { %4436 = vmatpush.bf16.msrb.mxu0 %v7478_v50  ;;  %v7505_v50 = vld [vmem:[%s9716_s1 + $0x200] sm:$0xff] }
  0x2b   :  { %4449 = vmatpush.bf16.msrb.mxu1 %v7486_v51  ;;  %v7513_v51 = vld [vmem:[%s9716_s1 + $0x240] sm:$0xff] }
  0x2c   :  { %4462 = vmatpush.bf16.msrb.mxu2 %v7494_v52  ;;  %v1126_v52 = vunpack.c.l.b16 %v30_v48 }
  0x2d   :  { %4475 = vmatpush.bf16.msrb.mxu3 %v7502_v53  ;;  %v1128_v53 = vunpack.c.l.b16 %v31_v49 }
  0x2e   :  { %4437 = vmatpush.bf16.msrb.mxu0 %v7477_v54  ;;  %v7521_v54 = vld [vmem:[%s9716_s1 + $0x280] sm:$0xff] }
  0x2f   :  { %4450 = vmatpush.bf16.msrb.mxu1 %v7485_v55  ;;  %v7529_v55 = vld [vmem:[%s9716_s1 + $0x2c0] sm:$0xff] }
  0x30   :  { %4463 = vmatpush.bf16.msrb.mxu2 %v7493_v56  ;;  %v1127_v56 = vunpack.c.h.b16 %v30_v48  ;;  %v7574_v48 = vld [vmem:[%s9716_s1 + $0x428] sm:$0xff] }
  0x31   :  { %4476 = vmatpush.bf16.msrb.mxu3 %v7501_v57  ;;  %v1129_v57 = vunpack.c.h.b16 %v31_v49  ;;  %v7582_v49 = vld [vmem:[%s9716_s1 + $0x468] sm:$0xff] }
  0x32   :  { %4438 = vmatpush.bf16.msrb.mxu0 %v7476_v58  ;;  %v7544_v58 = vld [vmem:[%s9716_s1 + $0x338] sm:$0xff] }
  0x33   :  { %4451 = vmatpush.bf16.msrb.mxu1 %v7484_v59  ;;  %v7552_v59 = vld [vmem:[%s9716_s1 + $0x378] sm:$0xff] }
  0x34   :  { %4464 = vmatpush.bf16.msrb.mxu2 %v7492_v60  ;;  %v7560_v60 = vld [vmem:[%s9716_s1 + $0x3b8] sm:$0xff] }
  0x35   :  { %4477 = vmatpush.bf16.msrb.mxu3 %v7500_v61  ;;  %v7568_v61 = vld [vmem:[%s9716_s1 + $0x3f8] sm:$0xff] }
  0x36   :  { %4439 = vmatpush.bf16.msrb.mxu0 %v7475_v62  ;;  %v1190_v62 = vpack.c.b16 %v1126_v52, %v1126_v52  ;;  %v7573_v52 = vld [vmem:[%s9716_s1 + $0x420] sm:$0xff] }
  0x37   :  { %4452 = vmatpush.bf16.msrb.mxu1 %v7483_v63  ;;  %v1192_v63 = vpack.c.b16 %v1128_v53, %v1128_v53  ;;  %v7581_v53 = vld [vmem:[%s9716_s1 + $0x460] sm:$0xff] }
  0x38   :  { %4465 = vmatpush.bf16.msrb.mxu2 %v7491_v0  ;;  %v1191_v0 = vpack.c.b16 %v1127_v56, %v1127_v56  ;;  %v7572_v56 = vld [vmem:[%s9716_s1 + $0x418] sm:$0xff] }
  0x39   :  { %4478 = vmatpush.bf16.msrb.mxu3 %v7499_v1  ;;  %v1193_v1 = vpack.c.b16 %v1129_v57, %v1129_v57  ;;  %v7580_v57 = vld [vmem:[%s9716_s1 + $0x458] sm:$0xff] }
  0x3a   :  { %4440 = vmatpush.bf16.msrb.mxu0 %v7474_v2  ;;  %v7543_v2 = vld [vmem:[%s9716_s1 + $0x330] sm:$0xff] }
  0x3b   :  { %4453 = vmatpush.bf16.msrb.mxu1 %v7482_v3  ;;  %v7551_v3 = vld [vmem:[%s9716_s1 + $0x370] sm:$0xff] }
  0x3c   :  { %4466 = vmatpush.bf16.msrb.mxu2 %v7490_v4  ;;  %v7559_v4 = vld [vmem:[%s9716_s1 + $0x3b0] sm:$0xff] }
  0x3d   :  { %4479 = vmatpush.bf16.msrb.mxu3 %v7498_v5  ;;  %v7567_v5 = vld [vmem:[%s9716_s1 + $0x3f0] sm:$0xff] }
  0x3e   :  { %4441 = vmatpush.bf16.msrb.mxu0 %v7473_v8  ;;  %v7558_v8 = vld [vmem:[%s9716_s1 + $0x3a8] sm:$0xff] }
  0x3f   :  { %4454 = vmatpush.bf16.msrb.mxu1 %v7481_v9  ;;  %v7566_v9 = vld [vmem:[%s9716_s1 + $0x3e8] sm:$0xff] }
  0x40   :  { %4467 = vmatpush.bf16.msrb.mxu2 %v7489_v12  ;;  %v7557_v12 = vld [vmem:[%s9716_s1 + $0x3a0] sm:$0xff] }
  0x41   :  { %4480 = vmatpush.bf16.msrb.mxu3 %v7497_v13  ;;  %4442 = vmatmul.bf16.vlgmr.msrb.gmra.mxu0 %v1186_v21  ;;  %v7565_v13 = vld [vmem:[%s9716_s1 + $0x3e0] sm:$0xff]  ;;  %v7563_v21 = vld [vmem:[%s9716_s1 + $0x3d0] sm:$0xff] }
  0x42   :  { %4486 = vmatpush.bf16.msra.mxu0 %v7512_v16  ;;  %4455 = vmatmul.bf16.vlgmr.msrb.gmra.mxu1 %v1187_v23  ;;  %v7556_v16 = vld [vmem:[%s9716_s1 + $0x398] sm:$0xff]  ;;  %v7546_v23 = vld [vmem:[%s9716_s1 + $0x348] sm:$0xff] }
  0x43   :  { %4499 = vmatpush.bf16.msra.mxu1 %v7520_v17  ;;  %4468 = vmatmul.bf16.vlgmr.msrb.gmra.mxu2 %v1188_v20  ;;  %v7564_v17 = vld [vmem:[%s9716_s1 + $0x3d8] sm:$0xff]  ;;  %v7555_v20 = vld [vmem:[%s9716_s1 + $0x390] sm:$0xff] }
  0x44   :  { %4512 = vmatpush.bf16.msra.mxu2 %v7528_v18  ;;  %4481 = vmatmul.bf16.vlgmr.msrb.gmra.mxu3 %v1189_v22  ;;  %v7539_v18 = vld [vmem:[%s9716_s1 + $0x310] sm:$0xff]  ;;  %v7538_v22 = vld [vmem:[%s9716_s1 + $0x308] sm:$0xff] }
  0x45   :  { %4525 = vmatpush.bf16.msra.mxu3 %v7536_v19  ;;  %v7547_v19 = vld [vmem:[%s9716_s1 + $0x350] sm:$0xff] }
  0x46   :  { %4487 = vmatpush.bf16.msra.mxu0 %v7511_v24  ;;  %v7554_v24 = vld [vmem:[%s9716_s1 + $0x388] sm:$0xff] }
  0x47   :  { %4500 = vmatpush.bf16.msra.mxu1 %v7519_v25  ;;  %v7562_v25 = vld [vmem:[%s9716_s1 + $0x3c8] sm:$0xff] }
  0x48   :  { %4513 = vmatpush.bf16.msra.mxu2 %v7527_v26  ;;  %v32_v26 = vld [vmem:[%s9717_s0 + $0x30] sm:$0xff] }
  0x49   :  { %4526 = vmatpush.bf16.msra.mxu3 %v7535_v27  ;;  %v33_v27 = vld [vmem:[%s9717_s0 + $0x38] sm:$0xff] }
  0x4a   :  { %4488 = vmatpush.bf16.msra.mxu0 %v7510_v28  ;;  %v7537_v28 = vld [vmem:[%s9716_s1 + $0x300] sm:$0xff] }
  0x4b   :  { %4501 = vmatpush.bf16.msra.mxu1 %v7518_v29  ;;  %v7545_v29 = vld [vmem:[%s9716_s1 + $0x340] sm:$0xff] }
  0x4c   :  { %4514 = vmatpush.bf16.msra.mxu2 %v7526_v30  ;;  %v1130_v30 = vunpack.c.l.b16 %v32_v26 }
  0x4d   :  { %4527 = vmatpush.bf16.msra.mxu3 %v7534_v31  ;;  %v1132_v31 = vunpack.c.l.b16 %v33_v27 }
  0x4e   :  { %4489 = vmatpush.bf16.msra.mxu0 %v7509_v32  ;;  %v7553_v32 = vld [vmem:[%s9716_s1 + $0x380] sm:$0xff] }
  0x4f   :  { %4502 = vmatpush.bf16.msra.mxu1 %v7517_v33  ;;  %v7561_v33 = vld [vmem:[%s9716_s1 + $0x3c0] sm:$0xff] }
  0x50   :  { %4515 = vmatpush.bf16.msra.mxu2 %v7525_v34  ;;  %v1131_v34 = vunpack.c.h.b16 %v32_v26  ;;  %v7606_v26 = vld [vmem:[%s9716_s1 + $0x528] sm:$0xff] }
  0x51   :  { %4528 = vmatpush.bf16.msra.mxu3 %v7533_v35  ;;  %v1133_v35 = vunpack.c.h.b16 %v33_v27  ;;  %v7614_v27 = vld [vmem:[%s9716_s1 + $0x568] sm:$0xff] }
  0x52   :  { %4490 = vmatpush.bf16.msra.mxu0 %v7508_v36  ;;  %v7576_v36 = vld [vmem:[%s9716_s1 + $0x438] sm:$0xff] }
  0x53   :  { %4503 = vmatpush.bf16.msra.mxu1 %v7516_v37  ;;  %v7584_v37 = vld [vmem:[%s9716_s1 + $0x478] sm:$0xff] }
  0x54   :  { %4516 = vmatpush.bf16.msra.mxu2 %v7524_v38  ;;  %v7592_v38 = vld [vmem:[%s9716_s1 + $0x4b8] sm:$0xff] }
  0x55   :  { %4529 = vmatpush.bf16.msra.mxu3 %v7532_v39  ;;  %v7600_v39 = vld [vmem:[%s9716_s1 + $0x4f8] sm:$0xff] }
  0x56   :  { %4491 = vmatpush.bf16.msra.mxu0 %v7507_v40  ;;  %v1194_v40 = vpack.c.b16 %v1130_v30, %v1130_v30  ;;  %v7630_v30 = vld [vmem:[%s9716_s1 + $0x5e8] sm:$0xff] }
  0x57   :  { %4504 = vmatpush.bf16.msra.mxu1 %v7515_v41  ;;  %v1196_v41 = vpack.c.b16 %v1132_v31, %v1132_v31 }
  0x58   :  { %4517 = vmatpush.bf16.msra.mxu2 %v7523_v42  ;;  %v1195_v42 = vpack.c.b16 %v1131_v34, %v1131_v34 }
  0x59   :  { %4530 = vmatpush.bf16.msra.mxu3 %v7531_v43  ;;  %v1197_v43 = vpack.c.b16 %v1133_v35, %v1133_v35 }
  0x5a   :  { %4492 = vmatpush.bf16.msra.mxu0 %v7506_v44  ;;  %v7575_v44 = vld [vmem:[%s9716_s1 + $0x430] sm:$0xff] }
  0x5b   :  { %4505 = vmatpush.bf16.msra.mxu1 %v7514_v45  ;;  %v7583_v45 = vld [vmem:[%s9716_s1 + $0x470] sm:$0xff] }
  0x5c   :  { %4518 = vmatpush.bf16.msra.mxu2 %v7522_v46  ;;  %v7591_v46 = vld [vmem:[%s9716_s1 + $0x4b0] sm:$0xff] }
  0x5d   :  { %4531 = vmatpush.bf16.msra.mxu3 %v7530_v47  ;;  %v7599_v47 = vld [vmem:[%s9716_s1 + $0x4f0] sm:$0xff] }
  0x5e   :  { %4493 = vmatpush.bf16.msra.mxu0 %v7505_v50  ;;  %v7590_v50 = vld [vmem:[%s9716_s1 + $0x4a8] sm:$0xff] }
  0x5f   :  { %4506 = vmatpush.bf16.msra.mxu1 %v7513_v51  ;;  %v7598_v51 = vld [vmem:[%s9716_s1 + $0x4e8] sm:$0xff] }
  0x60   :  { %4519 = vmatpush.bf16.msra.mxu2 %v7521_v54  ;;  %v7589_v54 = vld [vmem:[%s9716_s1 + $0x4a0] sm:$0xff] }
  0x61   :  { %4532 = vmatpush.bf16.msra.mxu3 %v7529_v55  ;;  %4494 = vmatmul.bf16.vlgmr.msra.gmra.mxu0 %v1190_v62  ;;  %v7597_v55 = vld [vmem:[%s9716_s1 + $0x4e0] sm:$0xff]  ;;  %v7587_v62 = vld [vmem:[%s9716_s1 + $0x490] sm:$0xff] }
  0x62   :  { %4538 = vmatpush.bf16.msrb.mxu0 %v7544_v58  ;;  %4507 = vmatmul.bf16.vlgmr.msra.gmra.mxu1 %v1191_v0  ;;  %v7588_v58 = vld [vmem:[%s9716_s1 + $0x498] sm:$0xff]  ;;  %v7570_v0 = vld [vmem:[%s9716_s1 + $0x408] sm:$0xff] }
  0x63   :  { %4551 = vmatpush.bf16.msrb.mxu1 %v7552_v59  ;;  %4520 = vmatmul.bf16.vlgmr.msra.gmra.mxu2 %v1192_v63  ;;  %v7596_v59 = vld [vmem:[%s9716_s1 + $0x4d8] sm:$0xff]  ;;  %v7595_v63 = vld [vmem:[%s9716_s1 + $0x4d0] sm:$0xff] }
  0x64   :  { %4564 = vmatpush.bf16.msrb.mxu2 %v7560_v60  ;;  %4533 = vmatmul.bf16.vlgmr.msra.gmra.mxu3 %v1193_v1  ;;  %v7571_v60 = vld [vmem:[%s9716_s1 + $0x410] sm:$0xff]  ;;  %v7578_v1 = vld [vmem:[%s9716_s1 + $0x448] sm:$0xff] }
  0x65   :  { %4577 = vmatpush.bf16.msrb.mxu3 %v7568_v61  ;;  %v7579_v61 = vld [vmem:[%s9716_s1 + $0x450] sm:$0xff] }
  0x66   :  { %4539 = vmatpush.bf16.msrb.mxu0 %v7543_v2  ;;  %v7586_v2 = vld [vmem:[%s9716_s1 + $0x488] sm:$0xff] }
  0x67   :  { %4552 = vmatpush.bf16.msrb.mxu1 %v7551_v3  ;;  %v7594_v3 = vld [vmem:[%s9716_s1 + $0x4c8] sm:$0xff] }
  0x68   :  { %4565 = vmatpush.bf16.msrb.mxu2 %v7559_v4  ;;  %v34_v4 = vld [vmem:[%s9717_s0 + $0x40] sm:$0xff] }
  0x69   :  { %4578 = vmatpush.bf16.msrb.mxu3 %v7567_v5  ;;  %v35_v5 = vld [vmem:[%s9717_s0 + $0x48] sm:$0xff] }
  0x6a   :  { %4540 = vmatpush.bf16.msrb.mxu0 %v7542_v6  ;;  %v7569_v6 = vld [vmem:[%s9716_s1 + $0x400] sm:$0xff] }
  0x6b   :  { %4553 = vmatpush.bf16.msrb.mxu1 %v7550_v7  ;;  %v7577_v7 = vld [vmem:[%s9716_s1 + $0x440] sm:$0xff] }
  0x6c   :  { %4566 = vmatpush.bf16.msrb.mxu2 %v7558_v8  ;;  %v1134_v8 = vunpack.c.l.b16 %v34_v4 }
  0x6d   :  { %4579 = vmatpush.bf16.msrb.mxu3 %v7566_v9  ;;  %v1136_v9 = vunpack.c.l.b16 %v35_v5 }
  0x6e   :  { %4541 = vmatpush.bf16.msrb.mxu0 %v7541_v10  ;;  %v7585_v10 = vld [vmem:[%s9716_s1 + $0x480] sm:$0xff] }
  0x6f   :  { %4554 = vmatpush.bf16.msrb.mxu1 %v7549_v11  ;;  %v7593_v11 = vld [vmem:[%s9716_s1 + $0x4c0] sm:$0xff] }
  0x70   :  { %4567 = vmatpush.bf16.msrb.mxu2 %v7557_v12  ;;  %v1135_v12 = vunpack.c.h.b16 %v34_v4 }
  0x71   :  { %4580 = vmatpush.bf16.msrb.mxu3 %v7565_v13  ;;  %v1137_v13 = vunpack.c.h.b16 %v35_v5  ;;  %v7640_v5 = vld [vmem:[%s9716_s1 + $0x638] sm:$0xff] }
  0x72   :  { %4542 = vmatpush.bf16.msrb.mxu0 %v7540_v14  ;;  %v7608_v14 = vld [vmem:[%s9716_s1 + $0x538] sm:$0xff] }
  0x73   :  { %4555 = vmatpush.bf16.msrb.mxu1 %v7548_v15  ;;  %v7616_v15 = vld [vmem:[%s9716_s1 + $0x578] sm:$0xff] }
  0x74   :  { %4568 = vmatpush.bf16.msrb.mxu2 %v7556_v16  ;;  %v7624_v16 = vld [vmem:[%s9716_s1 + $0x5b8] sm:$0xff] }
  0x75   :  { %4581 = vmatpush.bf16.msrb.mxu3 %v7564_v17  ;;  %v7632_v17 = vld [vmem:[%s9716_s1 + $0x5f8] sm:$0xff] }
  0x76   :  { %4543 = vmatpush.bf16.msrb.mxu0 %v7539_v18  ;;  %v1198_v18 = vpack.c.b16 %v1134_v8, %v1134_v8  ;;  %v7664_v8 = vld [vmem:[%s9716_s1 + $0x6f8] sm:$0xff] }
  0x77   :  { %4556 = vmatpush.bf16.msrb.mxu1 %v7547_v19  ;;  %v1200_v19 = vpack.c.b16 %v1136_v9, %v1136_v9 }
  0x78   :  { %4569 = vmatpush.bf16.msrb.mxu2 %v7555_v20  ;;  %v1199_v20 = vpack.c.b16 %v1135_v12, %v1135_v12 }
  0x79   :  { %4582 = vmatpush.bf16.msrb.mxu3 %v7563_v21  ;;  %v1201_v21 = vpack.c.b16 %v1137_v13, %v1137_v13  ;;  %v7639_v13 = vld [vmem:[%s9716_s1 + $0x630] sm:$0xff] }
  0x7a   :  { %4544 = vmatpush.bf16.msrb.mxu0 %v7538_v22  ;;  %v7607_v22 = vld [vmem:[%s9716_s1 + $0x530] sm:$0xff] }
  0x7b   :  { %4557 = vmatpush.bf16.msrb.mxu1 %v7546_v23  ;;  %v7615_v23 = vld [vmem:[%s9716_s1 + $0x570] sm:$0xff] }
  0x7c   :  { %4570 = vmatpush.bf16.msrb.mxu2 %v7554_v24  ;;  %v7623_v24 = vld [vmem:[%s9716_s1 + $0x5b0] sm:$0xff] }
  0x7d   :  { %4583 = vmatpush.bf16.msrb.mxu3 %v7562_v25  ;;  %v7631_v25 = vld [vmem:[%s9716_s1 + $0x5f0] sm:$0xff] }
  0x7e   :  { %4545 = vmatpush.bf16.msrb.mxu0 %v7537_v28  ;;  %v7962_v28 = vld [vmem:[%s9718_s2] ss:$0 sm:$0xff] }
  0x7f   :  { %4558 = vmatpush.bf16.msrb.mxu1 %v7545_v29  ;;  %v7622_v29 = vld [vmem:[%s9716_s1 + $0x5a8] sm:$0xff] }
  0x80   :  { %4571 = vmatpush.bf16.msrb.mxu2 %v7553_v32  ;;  %v7605_v32 = vld [vmem:[%s9716_s1 + $0x520] sm:$0xff] }
  0x81   :  { %4584 = vmatpush.bf16.msrb.mxu3 %v7561_v33  ;;  %4546 = vmatmul.bf16.vlgmr.msrb.gmra.mxu0 %v1194_v40  ;;  %v7613_v33 = vld [vmem:[%s9716_s1 + $0x560] sm:$0xff]  ;;  %v7612_v40 = vld [vmem:[%s9716_s1 + $0x558] sm:$0xff] }
  0x82   :  { %4590 = vmatpush.bf16.msra.mxu0 %v7576_v36  ;;  %4559 = vmatmul.bf16.vlgmr.msrb.gmra.mxu1 %v1195_v42  ;;  %v7621_v36 = vld [vmem:[%s9716_s1 + $0x5a0] sm:$0xff]  ;;  %v7628_v42 = vld [vmem:[%s9716_s1 + $0x5d8] sm:$0xff] }
  0x83   :  { %4603 = vmatpush.bf16.msra.mxu1 %v7584_v37  ;;  %4572 = vmatmul.bf16.vlgmr.msrb.gmra.mxu2 %v1196_v41  ;;  %v7629_v37 = vld [vmem:[%s9716_s1 + $0x5e0] sm:$0xff]  ;;  %v7620_v41 = vld [vmem:[%s9716_s1 + $0x598] sm:$0xff] }
  0x84   :  { %4616 = vmatpush.bf16.msra.mxu2 %v7592_v38  ;;  %4585 = vmatmul.bf16.vlgmr.msrb.gmra.mxu3 %v1197_v43 }
  0x85   :  { %4629 = vmatpush.bf16.msra.mxu3 %v7600_v39  ;;  %v7604_v39 = vld [vmem:[%s9716_s1 + $0x518] sm:$0xff] }
  0x86   :  { %4591 = vmatpush.bf16.msra.mxu0 %v7575_v44 }
  0x87   :  { %4604 = vmatpush.bf16.msra.mxu1 %v7583_v45 }
  0x88   :  { %4617 = vmatpush.bf16.msra.mxu2 %v7591_v46 }
  0x89   :  { %4630 = vmatpush.bf16.msra.mxu3 %v7599_v47  ;;  %v7603_v47 = vld [vmem:[%s9716_s1 + $0x510] sm:$0xff] }
  0x8a   :  { %4592 = vmatpush.bf16.msra.mxu0 %v7574_v48  ;;  %v7611_v48 = vld [vmem:[%s9716_s1 + $0x550] sm:$0xff] }
  0x8b   :  { %4605 = vmatpush.bf16.msra.mxu1 %v7582_v49 }
  0x8c   :  { %4618 = vmatpush.bf16.msra.mxu2 %v7590_v50 }
  0x8d   :  { %4631 = vmatpush.bf16.msra.mxu3 %v7598_v51  ;;  %v7619_v51 = vld [vmem:[%s9716_s1 + $0x590] sm:$0xff] }
  0x8e   :  { %4593 = vmatpush.bf16.msra.mxu0 %v7573_v52  ;;  %v7627_v52 = vld [vmem:[%s9716_s1 + $0x5d0] sm:$0xff] }
  0x8f   :  { %4606 = vmatpush.bf16.msra.mxu1 %v7581_v53  ;;  %v7602_v53 = vld [vmem:[%s9716_s1 + $0x508] sm:$0xff] }
  0x90   :  { %4619 = vmatpush.bf16.msra.mxu2 %v7589_v54  ;;  %v7610_v54 = vld [vmem:[%s9716_s1 + $0x548] sm:$0xff] }
  0x91   :  { %4632 = vmatpush.bf16.msra.mxu3 %v7597_v55  ;;  %v7618_v55 = vld [vmem:[%s9716_s1 + $0x588] sm:$0xff] }
  0x92   :  { %4594 = vmatpush.bf16.msra.mxu0 %v7572_v56  ;;  %v7626_v56 = vld [vmem:[%s9716_s1 + $0x5c8] sm:$0xff] }
  0x93   :  { %4607 = vmatpush.bf16.msra.mxu1 %v7580_v57  ;;  %v36_v57 = vld [vmem:[%s9717_s0 + $0x50] sm:$0xff] }
  0x94   :  { %4620 = vmatpush.bf16.msra.mxu2 %v7588_v58  ;;  %v37_v58 = vld [vmem:[%s9717_s0 + $0x58] sm:$0xff] }
  0x95   :  { %4633 = vmatpush.bf16.msra.mxu3 %v7596_v59  ;;  %v1141_v4 = vunpack.c.h.b16 %v37_v58 }
  0x96   :  { %4595 = vmatpush.bf16.msra.mxu0 %v7571_v60 }
  0x97   :  { %4608 = vmatpush.bf16.msra.mxu1 %v7579_v61  ;;  %v7601_v61 = vld [vmem:[%s9716_s1 + $0x500] sm:$0xff]  ;;  %v1205_v12 = vpack.c.b16 %v1141_v4, %v1141_v4  ;;  %v7679_v4 = vld [vmem:[%s9716_s1 + $0x770] sm:$0xff] }
  0x98   :  { %4621 = vmatpush.bf16.msra.mxu2 %v7587_v62  ;;  %v7609_v62 = vld [vmem:[%s9716_s1 + $0x540] sm:$0xff] }
  0x99   :  { %4634 = vmatpush.bf16.msra.mxu3 %v7595_v63  ;;  %v1138_v63 = vunpack.c.l.b16 %v36_v57 }
  0x9a   :  { %4596 = vmatpush.bf16.msra.mxu0 %v7570_v0  ;;  %v1140_v0 = vunpack.c.l.b16 %v37_v58 }
  0x9b   :  { %4609 = vmatpush.bf16.msra.mxu1 %v7578_v1  ;;  %v7617_v1 = vld [vmem:[%s9716_s1 + $0x580] sm:$0xff]  ;;  %v1202_v9 = vpack.c.b16 %v1138_v63, %v1138_v63 }
  0x9c   :  { %4622 = vmatpush.bf16.msra.mxu2 %v7586_v2  ;;  %v7625_v2 = vld [vmem:[%s9716_s1 + $0x5c0] sm:$0xff] }
  0x9d   :  { %4635 = vmatpush.bf16.msra.mxu3 %v7594_v3  ;;  %v1139_v3 = vunpack.c.h.b16 %v36_v57 }
  0x9e   :  { %4597 = vmatpush.bf16.msra.mxu0 %v7569_v6  ;;  %v4391_v31 = vpop.f32.mrf.mxu0  ;;  %v7648_v6 = vld [vmem:[%s9716_s1 + $0x678] sm:$0xff] }
  0x9f   :  { %4610 = vmatpush.bf16.msra.mxu1 %v7577_v7  ;;  %v4392_v34 = vadd.f32 %v7962_v28, %v4391_v31  ;;  %v4404_v35 = vpop.f32.mrf.mxu1  ;;  %v7656_v7 = vld [vmem:[%s9716_s1 + $0x6b8] sm:$0xff] }
  0xa0   :  { %4623 = vmatpush.bf16.msra.mxu2 %v7585_v10  ;;  %v1204_v10 = vpack.c.b16 %v1140_v0, %v1140_v0  ;;  %v7652_v31 = vld [vmem:[%s9716_s1 + $0x698] sm:$0xff] }
  0xa1   :  { %4636 = vmatpush.bf16.msra.mxu3 %v7593_v11  ;;  %4598 = vmatmul.bf16.vlgmr.msra.gmra.mxu0 %v1198_v18  ;;  %v4405_v38 = vadd.f32 %v4404_v35, %v4392_v34  ;;  %v1203_v11 = vpack.c.b16 %v1139_v3, %v1139_v3  ;;  %v7646_v18 = vld [vmem:[%s9716_s1 + $0x668] sm:$0xff]  ;;  %v7671_v3 = vld [vmem:[%s9716_s1 + $0x730] sm:$0xff] }
  0xa2   :  { %4642 = vmatpush.bf16.msrb.mxu0 %v7608_v14  ;;  %4611 = vmatmul.bf16.vlgmr.msra.gmra.mxu1 %v1199_v20  ;;  %v7647_v14 = vld [vmem:[%s9716_s1 + $0x670] sm:$0xff]  ;;  %v7662_v20 = vld [vmem:[%s9716_s1 + $0x6e8] sm:$0xff] }
  0xa3   :  { %4655 = vmatpush.bf16.msrb.mxu1 %v7616_v15  ;;  %4624 = vmatmul.bf16.vlgmr.msra.gmra.mxu2 %v1200_v19  ;;  %v7655_v15 = vld [vmem:[%s9716_s1 + $0x6b0] sm:$0xff]  ;;  %v7654_v19 = vld [vmem:[%s9716_s1 + $0x6a8] sm:$0xff] }
  0xa4   :  { %4668 = vmatpush.bf16.msrb.mxu2 %v7624_v16  ;;  %4637 = vmatmul.bf16.vlgmr.msra.gmra.mxu3 %v1201_v21  ;;  %v7663_v16 = vld [vmem:[%s9716_s1 + $0x6f0] sm:$0xff] }
  0xa5   :  { %4681 = vmatpush.bf16.msrb.mxu3 %v7632_v17  ;;  %v7638_v17 = vld [vmem:[%s9716_s1 + $0x628] sm:$0xff] }
  0xa6   :  { %4643 = vmatpush.bf16.msrb.mxu0 %v7607_v22  ;;  %v4417_v43 = vpop.f32.mrf.mxu2  ;;  %v4393_v46 = vpop.f32.mrf.mxu0  ;;  %v7637_v22 = vld [vmem:[%s9716_s1 + $0x620] sm:$0xff] }
  0xa7   :  { %4656 = vmatpush.bf16.msrb.mxu1 %v7615_v23  ;;  %v4418_v44 = vadd.f32 %v4417_v43, %v4405_v38  ;;  %v4430_v45 = vpop.f32.mrf.mxu3  ;;  %v4406_v50 = vpop.f32.mrf.mxu1  ;;  %v7645_v23 = vld [vmem:[%s9716_s1 + $0x660] sm:$0xff]  ;;  %v7643_v38 = vld [vmem:[%s9716_s1 + $0x650] sm:$0xff]  ;;  %v7634_v43 = vld [vmem:[%s9716_s1 + $0x608] sm:$0xff] }
  0xa8   :  { %4669 = vmatpush.bf16.msrb.mxu2 %v7623_v24  ;;  %v7658_v46 = vld [vmem:[%s9716_s1 + $0x6c8] sm:$0xff] }
  0xa9   :  { %4682 = vmatpush.bf16.msrb.mxu3 %v7631_v25  ;;  %v8594_v49 = vadd.f32 %v4430_v45, %v4418_v44  ;;  %v7642_v44 = vld [vmem:[%s9716_s1 + $0x648] sm:$0xff] }
  0xaa   :  { %4644 = vmatpush.bf16.msrb.mxu0 %v7606_v26  ;;  %v7653_v26 = vld [vmem:[%s9716_s1 + $0x6a0] sm:$0xff]  ;;  %v7650_v45 = vld [vmem:[%s9716_s1 + $0x688] sm:$0xff] }
  0xab   :  { %4657 = vmatpush.bf16.msrb.mxu1 %v7614_v27  ;;  %v7661_v27 = vld [vmem:[%s9716_s1 + $0x6e0] sm:$0xff] }
  0xac   :  { %4670 = vmatpush.bf16.msrb.mxu2 %v7622_v29  ;;  %v7636_v29 = vld [vmem:[%s9716_s1 + $0x618] sm:$0xff] }
  0xad   :  { %4683 = vmatpush.bf16.msrb.mxu3 %v7630_v30  ;;  %v7644_v30 = vld [vmem:[%s9716_s1 + $0x658] sm:$0xff] }
  0xae   :  { %4645 = vmatpush.bf16.msrb.mxu0 %v7605_v32  ;;  %v4419_v59 = vpop.f32.mrf.mxu2  ;;  %v7660_v32 = vld [vmem:[%s9716_s1 + $0x6d8] sm:$0xff] }
  0xaf   :  { %4658 = vmatpush.bf16.msrb.mxu1 %v7613_v33  ;;  %v4432_v60 = vpop.f32.mrf.mxu3  ;;  %v7672_v59 = vld [vmem:[%s9716_s1 + $0x738] sm:$0xff] }
  0xb0   :  { %4671 = vmatpush.bf16.msrb.mxu2 %v7621_v36  ;;  %v7680_v60 = vld [vmem:[%s9716_s1 + $0x778] sm:$0xff] }
  0xb1   :  { %4684 = vmatpush.bf16.msrb.mxu3 %v7629_v37  ;;  %v7635_v37 = vld [vmem:[%s9716_s1 + $0x610] sm:$0xff] }
  0xb2   :  { %4646 = vmatpush.bf16.msrb.mxu0 %v7604_v39 }
  0xb3   :  { %4659 = vmatpush.bf16.msrb.mxu1 %v7612_v40 }
  0xb4   :  { %4672 = vmatpush.bf16.msrb.mxu2 %v7620_v41  ;;  %v7651_v41 = vld [vmem:[%s9716_s1 + $0x690] sm:$0xff] }
  0xb5   :  { %4685 = vmatpush.bf16.msrb.mxu3 %v7628_v42  ;;  %v7659_v42 = vld [vmem:[%s9716_s1 + $0x6d0] sm:$0xff] }
  0xb6   :  { %4647 = vmatpush.bf16.msrb.mxu0 %v7603_v47  ;;  %v38_v47 = vld [vmem:[%s9717_s0 + $0x60] sm:$0xff] }
  0xb7   :  { %4660 = vmatpush.bf16.msrb.mxu1 %v7611_v48  ;;  %v39_v48 = vld [vmem:[%s9717_s0 + $0x68] sm:$0xff]  ;;  %v1143_v57 = vunpack.c.h.b16 %v38_v47 }
  0xb8   :  { %4673 = vmatpush.bf16.msrb.mxu2 %v7619_v51  ;;  %v7633_v51 = vld [vmem:[%s9716_s1 + $0x600] sm:$0xff]  ;;  %v1145_v58 = vunpack.c.h.b16 %v39_v48 }
  0xb9   :  { %4686 = vmatpush.bf16.msrb.mxu3 %v7627_v52  ;;  %v7641_v52 = vld [vmem:[%s9716_s1 + $0x640] sm:$0xff] }
  0xba   :  { %4648 = vmatpush.bf16.msrb.mxu0 %v7602_v53  ;;  %v1142_v53 = vunpack.c.l.b16 %v38_v47 }
  0xbb   :  { %4661 = vmatpush.bf16.msrb.mxu1 %v7610_v54  ;;  %v1144_v54 = vunpack.c.l.b16 %v39_v48 }
  0xbc   :  { %4674 = vmatpush.bf16.msrb.mxu2 %v7618_v55  ;;  %v7649_v55 = vld [vmem:[%s9716_s1 + $0x680] sm:$0xff]  ;;  %v1206_v63 = vpack.c.b16 %v1142_v53, %v1142_v53 }
  0xbd   :  { %4687 = vmatpush.bf16.msrb.mxu3 %v7626_v56  ;;  %v7657_v56 = vld [vmem:[%s9716_s1 + $0x6c0] sm:$0xff]  ;;  %v1208_v0 = vpack.c.b16 %v1144_v54, %v1144_v54 }
  0xbe   :  { %4649 = vmatpush.bf16.msrb.mxu0 %v7601_v61  ;;  %v4443_v21 = vpop.f32.mrf.mxu0  ;;  %v7688_v61 = vld [vmem:[%s9716_s1 + $0x7b8] sm:$0xff] }
  0xbf   :  { %4662 = vmatpush.bf16.msrb.mxu1 %v7609_v62  ;;  %v4444_v24 = vadd.f32 %v4443_v21, %v8594_v49  ;;  %v4456_v25 = vpop.f32.mrf.mxu1  ;;  %v7696_v62 = vld [vmem:[%s9716_s1 + $0x7f8] sm:$0xff] }
  0xc0   :  { %4675 = vmatpush.bf16.msrb.mxu2 %v7617_v1  ;;  %v1207_v1 = vpack.c.b16 %v1143_v57, %v1143_v57  ;;  %v7684_v21 = vld [vmem:[%s9716_s1 + $0x798] sm:$0xff]  ;;  %v7703_v57 = vld [vmem:[%s9716_s1 + $0x830] sm:$0xff] }
  0xc1   :  { %4688 = vmatpush.bf16.msrb.mxu3 %v7625_v2  ;;  %4650 = vmatmul.bf16.vlgmr.msrb.gmra.mxu0 %v1202_v9  ;;  %v4457_v28 = vadd.f32 %v4456_v25, %v4444_v24  ;;  %v1209_v2 = vpack.c.b16 %v1145_v58, %v1145_v58  ;;  %v7686_v9 = vld [vmem:[%s9716_s1 + $0x7a8] sm:$0xff]  ;;  %v7711_v58 = vld [vmem:[%s9716_s1 + $0x870] sm:$0xff] }
  0xc2   :  { %4694 = vmatpush.bf16.msra.mxu0 %v7640_v5  ;;  %4663 = vmatmul.bf16.vlgmr.msrb.gmra.mxu1 %v1203_v11  ;;  %v7687_v5 = vld [vmem:[%s9716_s1 + $0x7b0] sm:$0xff] }
  0xc3   :  { %4707 = vmatpush.bf16.msra.mxu1 %v7648_v6  ;;  %4676 = vmatmul.bf16.vlgmr.msrb.gmra.mxu2 %v1204_v10  ;;  %v7695_v6 = vld [vmem:[%s9716_s1 + $0x7f0] sm:$0xff]  ;;  %v7694_v10 = vld [vmem:[%s9716_s1 + $0x7e8] sm:$0xff] }
  0xc4   :  { %4720 = vmatpush.bf16.msra.mxu2 %v7656_v7  ;;  %4689 = vmatmul.bf16.vlgmr.msrb.gmra.mxu3 %v1205_v12  ;;  %v7670_v7 = vld [vmem:[%s9716_s1 + $0x728] sm:$0xff] }
  0xc5   :  { %4733 = vmatpush.bf16.msra.mxu3 %v7664_v8  ;;  %v7678_v8 = vld [vmem:[%s9716_s1 + $0x768] sm:$0xff] }
  0xc6   :  { %4695 = vmatpush.bf16.msra.mxu0 %v7639_v13  ;;  %v4469_v33 = vpop.f32.mrf.mxu2  ;;  %v4445_v36 = vpop.f32.mrf.mxu0  ;;  %v7669_v13 = vld [vmem:[%s9716_s1 + $0x720] sm:$0xff] }
  0xc7   :  { %4708 = vmatpush.bf16.msra.mxu1 %v7647_v14  ;;  %v4470_v34 = vadd.f32 %v4469_v33, %v4457_v28  ;;  %v4482_v35 = vpop.f32.mrf.mxu3  ;;  %v4458_v40 = vpop.f32.mrf.mxu1  ;;  %v7677_v14 = vld [vmem:[%s9716_s1 + $0x760] sm:$0xff]  ;;  %v7667_v28 = vld [vmem:[%s9716_s1 + $0x710] sm:$0xff]  ;;  %v7666_v33 = vld [vmem:[%s9716_s1 + $0x708] sm:$0xff] }
  0xc8   :  { %4721 = vmatpush.bf16.msra.mxu2 %v7655_v15  ;;  %v7690_v36 = vld [vmem:[%s9716_s1 + $0x7c8] sm:$0xff] }
  0xc9   :  { %4734 = vmatpush.bf16.msra.mxu3 %v7663_v16  ;;  %v8699_v39 = vadd.f32 %v4482_v35, %v4470_v34  ;;  %v7685_v16 = vld [vmem:[%s9716_s1 + $0x7a0] sm:$0xff]  ;;  %v7674_v34 = vld [vmem:[%s9716_s1 + $0x748] sm:$0xff] }
  0xca   :  { %4696 = vmatpush.bf16.msra.mxu0 %v7638_v17  ;;  %v7693_v17 = vld [vmem:[%s9716_s1 + $0x7e0] sm:$0xff]  ;;  %v7682_v35 = vld [vmem:[%s9716_s1 + $0x788] sm:$0xff] }
  0xcb   :  { %4709 = vmatpush.bf16.msra.mxu1 %v7646_v18 }
  0xcc   :  { %4722 = vmatpush.bf16.msra.mxu2 %v7654_v19  ;;  %v7668_v19 = vld [vmem:[%s9716_s1 + $0x718] sm:$0xff] }
  0xcd   :  { %4735 = vmatpush.bf16.msra.mxu3 %v7662_v20  ;;  %v7676_v20 = vld [vmem:[%s9716_s1 + $0x758] sm:$0xff] }
  0xce   :  { %4697 = vmatpush.bf16.msra.mxu0 %v7637_v22  ;;  %v4471_v49 = vpop.f32.mrf.mxu2  ;;  %v7692_v22 = vld [vmem:[%s9716_s1 + $0x7d8] sm:$0xff] }
  0xcf   :  { %4710 = vmatpush.bf16.msra.mxu1 %v7645_v23  ;;  %v4484_v50 = vpop.f32.mrf.mxu3  ;;  %v7704_v49 = vld [vmem:[%s9716_s1 + $0x838] sm:$0xff] }
  0xd0   :  { %4723 = vmatpush.bf16.msra.mxu2 %v7653_v26  ;;  %v7712_v50 = vld [vmem:[%s9716_s1 + $0x878] sm:$0xff] }
  0xd1   :  { %4736 = vmatpush.bf16.msra.mxu3 %v7661_v27 }
  0xd2   :  { %4698 = vmatpush.bf16.msra.mxu0 %v7636_v29  ;;  %v7675_v29 = vld [vmem:[%s9716_s1 + $0x750] sm:$0xff] }
  0xd3   :  { %4711 = vmatpush.bf16.msra.mxu1 %v7644_v30 }
  0xd4   :  { %4724 = vmatpush.bf16.msra.mxu2 %v7652_v31  ;;  %v7683_v31 = vld [vmem:[%s9716_s1 + $0x790] sm:$0xff] }
  0xd5   :  { %4737 = vmatpush.bf16.msra.mxu3 %v7660_v32  ;;  %v7691_v32 = vld [vmem:[%s9716_s1 + $0x7d0] sm:$0xff] }
  0xd6   :  { %4699 = vmatpush.bf16.msra.mxu0 %v7635_v37  ;;  %v40_v37 = vld [vmem:[%s9717_s0 + $0x70] sm:$0xff] }
  0xd7   :  { %4712 = vmatpush.bf16.msra.mxu1 %v7643_v38  ;;  %v41_v38 = vld [vmem:[%s9717_s0 + $0x78] sm:$0xff]  ;;  %v1147_v47 = vunpack.c.h.b16 %v40_v37 }
  0xd8   :  { %4725 = vmatpush.bf16.msra.mxu2 %v7651_v41  ;;  %v7665_v41 = vld [vmem:[%s9716_s1 + $0x700] sm:$0xff]  ;;  %v1149_v48 = vunpack.c.h.b16 %v41_v38 }
  0xd9   :  { %4738 = vmatpush.bf16.msra.mxu3 %v7659_v42  ;;  %v7673_v42 = vld [vmem:[%s9716_s1 + $0x740] sm:$0xff] }
  0xda   :  { %4700 = vmatpush.bf16.msra.mxu0 %v7634_v43  ;;  %v1146_v43 = vunpack.c.l.b16 %v40_v37 }
  0xdb   :  { %4713 = vmatpush.bf16.msra.mxu1 %v7642_v44  ;;  %v1148_v44 = vunpack.c.l.b16 %v41_v38 }
  0xdc   :  { %4726 = vmatpush.bf16.msra.mxu2 %v7650_v45  ;;  %v7681_v45 = vld [vmem:[%s9716_s1 + $0x780] sm:$0xff]  ;;  %v1210_v53 = vpack.c.b16 %v1146_v43, %v1146_v43 }
  0xdd   :  { %4739 = vmatpush.bf16.msra.mxu3 %v7658_v46  ;;  %v7689_v46 = vld [vmem:[%s9716_s1 + $0x7c0] sm:$0xff]  ;;  %v1212_v54 = vpack.c.b16 %v1148_v44, %v1148_v44 }
  0xde   :  { %4701 = vmatpush.bf16.msra.mxu0 %v7633_v51  ;;  %v4495_v11 = vpop.f32.mrf.mxu0  ;;  %v7720_v51 = vld [vmem:[%s9716_s1 + $0x8b8] sm:$0xff] }
  0xdf   :  { %4714 = vmatpush.bf16.msra.mxu1 %v7641_v52  ;;  %v4496_v12 = vadd.f32 %v4495_v11, %v8699_v39  ;;  %v4508_v15 = vpop.f32.mrf.mxu1  ;;  %v7728_v52 = vld [vmem:[%s9716_s1 + $0x8f8] sm:$0xff] }
  0xe0   :  { %4727 = vmatpush.bf16.msra.mxu2 %v7649_v55  ;;  %v1211_v55 = vpack.c.b16 %v1147_v47, %v1147_v47  ;;  %v7716_v11 = vld [vmem:[%s9716_s1 + $0x898] sm:$0xff]  ;;  %v7735_v47 = vld [vmem:[%s9716_s1 + $0x930] sm:$0xff] }
  0xe1   :  { %4740 = vmatpush.bf16.msra.mxu3 %v7657_v56  ;;  %4702 = vmatmul.bf16.vlgmr.msra.gmra.mxu0 %v1206_v63  ;;  %v4509_v18 = vadd.f32 %v4508_v15, %v4496_v12  ;;  %v1213_v56 = vpack.c.b16 %v1149_v48, %v1149_v48  ;;  %v7718_v63 = vld [vmem:[%s9716_s1 + $0x8a8] sm:$0xff]  ;;  %v7724_v12 = vld [vmem:[%s9716_s1 + $0x8d8] sm:$0xff]  ;;  %v7743_v48 = vld [vmem:[%s9716_s1 + $0x970] sm:$0xff] }
  0xe2   :  { %4746 = vmatpush.bf16.msrb.mxu0 %v7672_v59  ;;  %4715 = vmatmul.bf16.vlgmr.msra.gmra.mxu1 %v1207_v1  ;;  %v7719_v59 = vld [vmem:[%s9716_s1 + $0x8b0] sm:$0xff] }
  0xe3   :  { %4759 = vmatpush.bf16.msrb.mxu1 %v7680_v60  ;;  %4728 = vmatmul.bf16.vlgmr.msra.gmra.mxu2 %v1208_v0  ;;  %v7727_v60 = vld [vmem:[%s9716_s1 + $0x8f0] sm:$0xff]  ;;  %v7726_v0 = vld [vmem:[%s9716_s1 + $0x8e8] sm:$0xff] }
  0xe4   :  { %4772 = vmatpush.bf16.msrb.mxu2 %v7688_v61  ;;  %4741 = vmatmul.bf16.vlgmr.msra.gmra.mxu3 %v1209_v2  ;;  %v7702_v61 = vld [vmem:[%s9716_s1 + $0x828] sm:$0xff] }
  0xe5   :  { %4785 = vmatpush.bf16.msrb.mxu3 %v7696_v62  ;;  %v7710_v62 = vld [vmem:[%s9716_s1 + $0x868] sm:$0xff] }
  0xe6   :  { %4747 = vmatpush.bf16.msrb.mxu0 %v7671_v3  ;;  %v4521_v23 = vpop.f32.mrf.mxu2  ;;  %v4497_v26 = vpop.f32.mrf.mxu0  ;;  %v7701_v3 = vld [vmem:[%s9716_s1 + $0x820] sm:$0xff] }
  0xe7   :  { %4760 = vmatpush.bf16.msrb.mxu1 %v7679_v4  ;;  %v4522_v24 = vadd.f32 %v4521_v23, %v4509_v18  ;;  %v4534_v25 = vpop.f32.mrf.mxu3  ;;  %v4510_v30 = vpop.f32.mrf.mxu1  ;;  %v7709_v4 = vld [vmem:[%s9716_s1 + $0x860] sm:$0xff]  ;;  %v7699_v18 = vld [vmem:[%s9716_s1 + $0x810] sm:$0xff]  ;;  %v7698_v23 = vld [vmem:[%s9716_s1 + $0x808] sm:$0xff] }
  0xe8   :  { %4773 = vmatpush.bf16.msrb.mxu2 %v7687_v5  ;;  %v7722_v26 = vld [vmem:[%s9716_s1 + $0x8c8] sm:$0xff] }
  0xe9   :  { %4786 = vmatpush.bf16.msrb.mxu3 %v7695_v6  ;;  %v8798_v27 = vadd.f32 %v4534_v25, %v4522_v24  ;;  %v7717_v6 = vld [vmem:[%s9716_s1 + $0x8a0] sm:$0xff]  ;;  %v7706_v24 = vld [vmem:[%s9716_s1 + $0x848] sm:$0xff] }
  0xea   :  { %4748 = vmatpush.bf16.msrb.mxu0 %v7670_v7  ;;  %v7725_v7 = vld [vmem:[%s9716_s1 + $0x8e0] sm:$0xff]  ;;  %v7714_v25 = vld [vmem:[%s9716_s1 + $0x888] sm:$0xff] }
  0xeb   :  { %4761 = vmatpush.bf16.msrb.mxu1 %v7678_v8 }
  0xec   :  { %4774 = vmatpush.bf16.msrb.mxu2 %v7686_v9  ;;  %v7700_v9 = vld [vmem:[%s9716_s1 + $0x818] sm:$0xff] }
  0xed   :  { %4787 = vmatpush.bf16.msrb.mxu3 %v7694_v10  ;;  %v7708_v10 = vld [vmem:[%s9716_s1 + $0x858] sm:$0xff] }
  0xee   :  { %4749 = vmatpush.bf16.msrb.mxu0 %v7669_v13  ;;  %v4523_v39 = vpop.f32.mrf.mxu2 }
  0xef   :  { %4762 = vmatpush.bf16.msrb.mxu1 %v7677_v14  ;;  %v4536_v40 = vpop.f32.mrf.mxu3  ;;  %v7736_v39 = vld [vmem:[%s9716_s1 + $0x938] sm:$0xff] }
  0xf0   :  { %4775 = vmatpush.bf16.msrb.mxu2 %v7685_v16  ;;  %v7744_v40 = vld [vmem:[%s9716_s1 + $0x978] sm:$0xff] }
  0xf1   :  { %4788 = vmatpush.bf16.msrb.mxu3 %v7693_v17 }
  0xf2   :  { %4750 = vmatpush.bf16.msrb.mxu0 %v7668_v19  ;;  %v7707_v19 = vld [vmem:[%s9716_s1 + $0x850] sm:$0xff] }
  0xf3   :  { %4763 = vmatpush.bf16.msrb.mxu1 %v7676_v20 }
  0xf4   :  { %4776 = vmatpush.bf16.msrb.mxu2 %v7684_v21  ;;  %v7715_v21 = vld [vmem:[%s9716_s1 + $0x890] sm:$0xff] }
  0xf5   :  { %4789 = vmatpush.bf16.msrb.mxu3 %v7692_v22  ;;  %v7723_v22 = vld [vmem:[%s9716_s1 + $0x8d0] sm:$0xff] }
  0xf6   :  { %4751 = vmatpush.bf16.msrb.mxu0 %v7667_v28  ;;  %v43_v28 = vld [vmem:[%s9717_s0 + $0x88] sm:$0xff] }
  0xf7   :  { %4764 = vmatpush.bf16.msrb.mxu1 %v7675_v29  ;;  %v1153_v38 = vunpack.c.h.b16 %v43_v28 }
  0xf8   :  { %4777 = vmatpush.bf16.msrb.mxu2 %v7683_v31  ;;  %v7697_v31 = vld [vmem:[%s9716_s1 + $0x800] sm:$0xff] }
  0xf9   :  { %4790 = vmatpush.bf16.msrb.mxu3 %v7691_v32  ;;  %v7705_v32 = vld [vmem:[%s9716_s1 + $0x840] sm:$0xff] }
  0xfa   :  { %4752 = vmatpush.bf16.msrb.mxu0 %v7666_v33 }
  0xfb   :  { %4765 = vmatpush.bf16.msrb.mxu1 %v7674_v34  ;;  %v1152_v34 = vunpack.c.l.b16 %v43_v28 }
  0xfc   :  { %4778 = vmatpush.bf16.msrb.mxu2 %v7682_v35  ;;  %v7713_v35 = vld [vmem:[%s9716_s1 + $0x880] sm:$0xff] }
  0xfd   :  { %4791 = vmatpush.bf16.msrb.mxu3 %v7690_v36  ;;  %v7721_v36 = vld [vmem:[%s9716_s1 + $0x8c0] sm:$0xff]  ;;  %v1216_v44 = vpack.c.b16 %v1152_v34, %v1152_v34 }
  0xfe   :  { %4753 = vmatpush.bf16.msrb.mxu0 %v7665_v41  ;;  %v4547_v1 = vpop.f32.mrf.mxu0  ;;  %v7752_v41 = vld [vmem:[%s9716_s1 + $0x9b8] sm:$0xff] }
  0xff   :  { %4766 = vmatpush.bf16.msrb.mxu1 %v7673_v42  ;;  %v4548_v2 = vadd.f32 %v4547_v1, %v8798_v27  ;;  %v4560_v5 = vpop.f32.mrf.mxu1  ;;  %v42_v27 = vld [vmem:[%s9717_s0 + $0x80] sm:$0xff]  ;;  %v7760_v42 = vld [vmem:[%s9716_s1 + $0x9f8] sm:$0xff] }
 0x100   :  { %4779 = vmatpush.bf16.msrb.mxu2 %v7681_v45  ;;  %v1150_v33 = vunpack.c.l.b16 %v42_v27  ;;  %v1151_v37 = vunpack.c.h.b16 %v42_v27  ;;  %v7748_v1 = vld [vmem:[%s9716_s1 + $0x998] sm:$0xff] }
 0x101   :  { %4792 = vmatpush.bf16.msrb.mxu3 %v7689_v46  ;;  %4754 = vmatmul.bf16.vlgmr.msrb.gmra.mxu0 %v1210_v53  ;;  %v4561_v8 = vadd.f32 %v4560_v5, %v4548_v2  ;;  %v1217_v46 = vpack.c.b16 %v1153_v38, %v1153_v38  ;;  %v7750_v53 = vld [vmem:[%s9716_s1 + $0x9a8] sm:$0xff]  ;;  %v7756_v2 = vld [vmem:[%s9716_s1 + $0x9d8] sm:$0xff]  ;;  %v7775_v38 = vld [vmem:[%s9716_s1 + $0xa70] sm:$0xff] }
 0x102   :  { %4798 = vmatpush.bf16.msra.mxu0 %v7704_v49  ;;  %4767 = vmatmul.bf16.vlgmr.msrb.gmra.mxu1 %v1211_v55  ;;  %v1214_v43 = vpack.c.b16 %v1150_v33, %v1150_v33  ;;  %v1215_v45 = vpack.c.b16 %v1151_v37, %v1151_v37  ;;  %v7751_v49 = vld [vmem:[%s9716_s1 + $0x9b0] sm:$0xff] }
 0x103   :  { %4811 = vmatpush.bf16.msra.mxu1 %v7712_v50  ;;  %4780 = vmatmul.bf16.vlgmr.msrb.gmra.mxu2 %v1212_v54  ;;  %v7759_v50 = vld [vmem:[%s9716_s1 + $0x9f0] sm:$0xff]  ;;  %v7758_v54 = vld [vmem:[%s9716_s1 + $0x9e8] sm:$0xff] }
 0x104   :  { %4824 = vmatpush.bf16.msra.mxu2 %v7720_v51  ;;  %4793 = vmatmul.bf16.vlgmr.msrb.gmra.mxu3 %v1213_v56  ;;  %v7734_v51 = vld [vmem:[%s9716_s1 + $0x928] sm:$0xff]  ;;  %v7767_v37 = vld [vmem:[%s9716_s1 + $0xa30] sm:$0xff] }
 0x105   :  { %4837 = vmatpush.bf16.msra.mxu3 %v7728_v52  ;;  %v7742_v52 = vld [vmem:[%s9716_s1 + $0x968] sm:$0xff] }
 0x106   :  { %4799 = vmatpush.bf16.msra.mxu0 %v7703_v57  ;;  %v4573_v13 = vpop.f32.mrf.mxu2  ;;  %v4549_v16 = vpop.f32.mrf.mxu0  ;;  %v7733_v57 = vld [vmem:[%s9716_s1 + $0x920] sm:$0xff] }
 0x107   :  { %4812 = vmatpush.bf16.msra.mxu1 %v7711_v58  ;;  %v4574_v14 = vadd.f32 %v4573_v13, %v4561_v8  ;;  %v4586_v15 = vpop.f32.mrf.mxu3  ;;  %v4562_v20 = vpop.f32.mrf.mxu1  ;;  %v7741_v58 = vld [vmem:[%s9716_s1 + $0x960] sm:$0xff]  ;;  %v7731_v8 = vld [vmem:[%s9716_s1 + $0x910] sm:$0xff]  ;;  %v7730_v13 = vld [vmem:[%s9716_s1 + $0x908] sm:$0xff] }
 0x108   :  { %4825 = vmatpush.bf16.msra.mxu2 %v7719_v59  ;;  %v7754_v16 = vld [vmem:[%s9716_s1 + $0x9c8] sm:$0xff] }
 0x109   :  { %4838 = vmatpush.bf16.msra.mxu3 %v7727_v60  ;;  %v8903_v17 = vadd.f32 %v4586_v15, %v4574_v14  ;;  %v7749_v60 = vld [vmem:[%s9716_s1 + $0x9a0] sm:$0xff]  ;;  %v7738_v14 = vld [vmem:[%s9716_s1 + $0x948] sm:$0xff] }
 0x10a   :  { %4800 = vmatpush.bf16.msra.mxu0 %v7702_v61  ;;  %v7757_v61 = vld [vmem:[%s9716_s1 + $0x9e0] sm:$0xff]  ;;  %v7746_v15 = vld [vmem:[%s9716_s1 + $0x988] sm:$0xff] }
 0x10b   :  { %4813 = vmatpush.bf16.msra.mxu1 %v7710_v62 }
 0x10c   :  { %4826 = vmatpush.bf16.msra.mxu2 %v7718_v63  ;;  %v7732_v63 = vld [vmem:[%s9716_s1 + $0x918] sm:$0xff] }
 0x10d   :  { %4839 = vmatpush.bf16.msra.mxu3 %v7726_v0  ;;  %v7740_v0 = vld [vmem:[%s9716_s1 + $0x958] sm:$0xff] }
 0x10e   :  { %4801 = vmatpush.bf16.msra.mxu0 %v7701_v3  ;;  %v4575_v29 = vpop.f32.mrf.mxu2 }
 0x10f   :  { %4814 = vmatpush.bf16.msra.mxu1 %v7709_v4  ;;  %v4588_v30 = vpop.f32.mrf.mxu3  ;;  %v7768_v29 = vld [vmem:[%s9716_s1 + $0xa38] sm:$0xff] }
 0x110   :  { %4827 = vmatpush.bf16.msra.mxu2 %v7717_v6  ;;  %v7776_v30 = vld [vmem:[%s9716_s1 + $0xa78] sm:$0xff] }
 0x111   :  { %4840 = vmatpush.bf16.msra.mxu3 %v7725_v7 }
 0x112   :  { %4802 = vmatpush.bf16.msra.mxu0 %v7700_v9  ;;  %v7739_v9 = vld [vmem:[%s9716_s1 + $0x950] sm:$0xff] }
 0x113   :  { %4815 = vmatpush.bf16.msra.mxu1 %v7708_v10 }
 0x114   :  { %4828 = vmatpush.bf16.msra.mxu2 %v7716_v11  ;;  %v7747_v11 = vld [vmem:[%s9716_s1 + $0x990] sm:$0xff] }
 0x115   :  { %4841 = vmatpush.bf16.msra.mxu3 %v7724_v12  ;;  %v7755_v12 = vld [vmem:[%s9716_s1 + $0x9d0] sm:$0xff] }
 0x116   :  { %4803 = vmatpush.bf16.msra.mxu0 %v7699_v18  ;;  %v45_v18 = vld [vmem:[%s9717_s0 + $0x98] sm:$0xff] }
 0x117   :  { %4816 = vmatpush.bf16.msra.mxu1 %v7707_v19  ;;  %v1157_v28 = vunpack.c.h.b16 %v45_v18 }
 0x118   :  { %4829 = vmatpush.bf16.msra.mxu2 %v7715_v21  ;;  %v7729_v21 = vld [vmem:[%s9716_s1 + $0x900] sm:$0xff] }
 0x119   :  { %4842 = vmatpush.bf16.msra.mxu3 %v7723_v22  ;;  %v7737_v22 = vld [vmem:[%s9716_s1 + $0x940] sm:$0xff] }
 0x11a   :  { %4804 = vmatpush.bf16.msra.mxu0 %v7698_v23 }
 0x11b   :  { %4817 = vmatpush.bf16.msra.mxu1 %v7706_v24  ;;  %v1156_v24 = vunpack.c.l.b16 %v45_v18 }
 0x11c   :  { %4830 = vmatpush.bf16.msra.mxu2 %v7714_v25  ;;  %v7745_v25 = vld [vmem:[%s9716_s1 + $0x980] sm:$0xff] }
 0x11d   :  { %4843 = vmatpush.bf16.msra.mxu3 %v7722_v26  ;;  %v7753_v26 = vld [vmem:[%s9716_s1 + $0x9c0] sm:$0xff]  ;;  %v1220_v34 = vpack.c.b16 %v1156_v24, %v1156_v24 }
 0x11e   :  { %4805 = vmatpush.bf16.msra.mxu0 %v7697_v31  ;;  %v4599_v55 = vpop.f32.mrf.mxu0  ;;  %v7784_v31 = vld [vmem:[%s9716_s1 + $0xab8] sm:$0xff] }
 0x11f   :  { %4818 = vmatpush.bf16.msra.mxu1 %v7705_v32  ;;  %v4600_v56 = vadd.f32 %v4599_v55, %v8903_v17  ;;  %v4612_v59 = vpop.f32.mrf.mxu1  ;;  %v44_v17 = vld [vmem:[%s9717_s0 + $0x90] sm:$0xff]  ;;  %v7792_v32 = vld [vmem:[%s9716_s1 + $0xaf8] sm:$0xff] }
 0x120   :  { %4831 = vmatpush.bf16.msra.mxu2 %v7713_v35  ;;  %v1154_v23 = vunpack.c.l.b16 %v44_v17  ;;  %v1155_v27 = vunpack.c.h.b16 %v44_v17  ;;  %v7780_v55 = vld [vmem:[%s9716_s1 + $0xa98] sm:$0xff] }
 0x121   :  { %4844 = vmatpush.bf16.msra.mxu3 %v7721_v36  ;;  %4806 = vmatmul.bf16.vlgmr.msra.gmra.mxu0 %v1214_v43  ;;  %v4613_v62 = vadd.f32 %v4612_v59, %v4600_v56  ;;  %v1221_v36 = vpack.c.b16 %v1157_v28, %v1157_v28  ;;  %v7782_v43 = vld [vmem:[%s9716_s1 + $0xaa8] sm:$0xff]  ;;  %v7788_v56 = vld [vmem:[%s9716_s1 + $0xad8] sm:$0xff]  ;;  %v7807_v28 = vld [vmem:[%s9716_s1 + $0xb70] sm:$0xff] }
 0x122   :  { %4850 = vmatpush.bf16.msrb.mxu0 %v7736_v39  ;;  %4819 = vmatmul.bf16.vlgmr.msra.gmra.mxu1 %v1215_v45  ;;  %v1218_v33 = vpack.c.b16 %v1154_v23, %v1154_v23  ;;  %v1219_v35 = vpack.c.b16 %v1155_v27, %v1155_v27  ;;  %v7783_v39 = vld [vmem:[%s9716_s1 + $0xab0] sm:$0xff] }
 0x123   :  { %4863 = vmatpush.bf16.msrb.mxu1 %v7744_v40  ;;  %4832 = vmatmul.bf16.vlgmr.msra.gmra.mxu2 %v1216_v44  ;;  %v7791_v40 = vld [vmem:[%s9716_s1 + $0xaf0] sm:$0xff]  ;;  %v7790_v44 = vld [vmem:[%s9716_s1 + $0xae8] sm:$0xff] }
 0x124   :  { %4876 = vmatpush.bf16.msrb.mxu2 %v7752_v41  ;;  %4845 = vmatmul.bf16.vlgmr.msra.gmra.mxu3 %v1217_v46  ;;  %v7766_v41 = vld [vmem:[%s9716_s1 + $0xa28] sm:$0xff]  ;;  %v7799_v27 = vld [vmem:[%s9716_s1 + $0xb30] sm:$0xff] }
 0x125   :  { %4889 = vmatpush.bf16.msrb.mxu3 %v7760_v42  ;;  %v7774_v42 = vld [vmem:[%s9716_s1 + $0xa68] sm:$0xff] }
 0x126   :  { %4851 = vmatpush.bf16.msrb.mxu0 %v7735_v47  ;;  %v4625_v3 = vpop.f32.mrf.mxu2  ;;  %v4601_v6 = vpop.f32.mrf.mxu0  ;;  %v7765_v47 = vld [vmem:[%s9716_s1 + $0xa20] sm:$0xff] }
 0x127   :  { %4864 = vmatpush.bf16.msrb.mxu1 %v7743_v48  ;;  %v4626_v4 = vadd.f32 %v4625_v3, %v4613_v62  ;;  %v4638_v5 = vpop.f32.mrf.mxu3  ;;  %v4614_v10 = vpop.f32.mrf.mxu1  ;;  %v7773_v48 = vld [vmem:[%s9716_s1 + $0xa60] sm:$0xff]  ;;  %v7763_v62 = vld [vmem:[%s9716_s1 + $0xa10] sm:$0xff]  ;;  %v7762_v3 = vld [vmem:[%s9716_s1 + $0xa08] sm:$0xff] }
 0x128   :  { %4877 = vmatpush.bf16.msrb.mxu2 %v7751_v49  ;;  %v7786_v6 = vld [vmem:[%s9716_s1 + $0xac8] sm:$0xff] }
 0x129   :  { %4890 = vmatpush.bf16.msrb.mxu3 %v7759_v50  ;;  %v9008_v7 = vadd.f32 %v4638_v5, %v4626_v4  ;;  %v7781_v50 = vld [vmem:[%s9716_s1 + $0xaa0] sm:$0xff]  ;;  %v7770_v4 = vld [vmem:[%s9716_s1 + $0xa48] sm:$0xff] }
 0x12a   :  { %4852 = vmatpush.bf16.msrb.mxu0 %v7734_v51  ;;  %v7789_v51 = vld [vmem:[%s9716_s1 + $0xae0] sm:$0xff]  ;;  %v7778_v5 = vld [vmem:[%s9716_s1 + $0xa88] sm:$0xff] }
 0x12b   :  { %4865 = vmatpush.bf16.msrb.mxu1 %v7742_v52 }
 0x12c   :  { %4878 = vmatpush.bf16.msrb.mxu2 %v7750_v53  ;;  %v7764_v53 = vld [vmem:[%s9716_s1 + $0xa18] sm:$0xff] }
 0x12d   :  { %4891 = vmatpush.bf16.msrb.mxu3 %v7758_v54  ;;  %v7772_v54 = vld [vmem:[%s9716_s1 + $0xa58] sm:$0xff] }
 0x12e   :  { %4853 = vmatpush.bf16.msrb.mxu0 %v7733_v57  ;;  %v4627_v19 = vpop.f32.mrf.mxu2 }
 0x12f   :  { %4866 = vmatpush.bf16.msrb.mxu1 %v7741_v58  ;;  %v4640_v20 = vpop.f32.mrf.mxu3  ;;  %v7800_v19 = vld [vmem:[%s9716_s1 + $0xb38] sm:$0xff] }
 0x130   :  { %4879 = vmatpush.bf16.msrb.mxu2 %v7749_v60  ;;  %v7808_v20 = vld [vmem:[%s9716_s1 + $0xb78] sm:$0xff] }
 0x131   :  { %4892 = vmatpush.bf16.msrb.mxu3 %v7757_v61 }
 0x132   :  { %4854 = vmatpush.bf16.msrb.mxu0 %v7732_v63  ;;  %v7771_v63 = vld [vmem:[%s9716_s1 + $0xa50] sm:$0xff] }
 0x133   :  { %4867 = vmatpush.bf16.msrb.mxu1 %v7740_v0 }
 0x134   :  { %4880 = vmatpush.bf16.msrb.mxu2 %v7748_v1  ;;  %v7779_v1 = vld [vmem:[%s9716_s1 + $0xa90] sm:$0xff] }
 0x135   :  { %4893 = vmatpush.bf16.msrb.mxu3 %v7756_v2  ;;  %v7787_v2 = vld [vmem:[%s9716_s1 + $0xad0] sm:$0xff] }
 0x136   :  { %4855 = vmatpush.bf16.msrb.mxu0 %v7731_v8  ;;  %v47_v8 = vld [vmem:[%s9717_s0 + $0xa8] sm:$0xff] }
 0x137   :  { %4868 = vmatpush.bf16.msrb.mxu1 %v7739_v9  ;;  %v1161_v18 = vunpack.c.h.b16 %v47_v8 }
 0x138   :  { %4881 = vmatpush.bf16.msrb.mxu2 %v7747_v11  ;;  %v7761_v11 = vld [vmem:[%s9716_s1 + $0xa00] sm:$0xff] }
 0x139   :  { %4894 = vmatpush.bf16.msrb.mxu3 %v7755_v12  ;;  %v7769_v12 = vld [vmem:[%s9716_s1 + $0xa40] sm:$0xff] }
 0x13a   :  { %4856 = vmatpush.bf16.msrb.mxu0 %v7730_v13 }
 0x13b   :  { %4869 = vmatpush.bf16.msrb.mxu1 %v7738_v14  ;;  %v1160_v14 = vunpack.c.l.b16 %v47_v8 }
 0x13c   :  { %4882 = vmatpush.bf16.msrb.mxu2 %v7746_v15  ;;  %v7777_v15 = vld [vmem:[%s9716_s1 + $0xa80] sm:$0xff] }
 0x13d   :  { %4895 = vmatpush.bf16.msrb.mxu3 %v7754_v16  ;;  %v7785_v16 = vld [vmem:[%s9716_s1 + $0xac0] sm:$0xff]  ;;  %v1224_v24 = vpack.c.b16 %v1160_v14, %v1160_v14 }
 0x13e   :  { %4857 = vmatpush.bf16.msrb.mxu0 %v7729_v21  ;;  %v4651_v45 = vpop.f32.mrf.mxu0  ;;  %v7816_v21 = vld [vmem:[%s9716_s1 + $0xbb8] sm:$0xff] }
 0x13f   :  { %4870 = vmatpush.bf16.msrb.mxu1 %v7737_v22  ;;  %v4652_v46 = vadd.f32 %v4651_v45, %v9008_v7  ;;  %v4664_v49 = vpop.f32.mrf.mxu1  ;;  %v46_v7 = vld [vmem:[%s9717_s0 + $0xa0] sm:$0xff]  ;;  %v7824_v22 = vld [vmem:[%s9716_s1 + $0xbf8] sm:$0xff] }
 0x140   :  { %4883 = vmatpush.bf16.msrb.mxu2 %v7745_v25  ;;  %v1158_v13 = vunpack.c.l.b16 %v46_v7  ;;  %v1159_v17 = vunpack.c.h.b16 %v46_v7  ;;  %v7812_v45 = vld [vmem:[%s9716_s1 + $0xb98] sm:$0xff] }
 0x141   :  { %4896 = vmatpush.bf16.msrb.mxu3 %v7753_v26  ;;  %4858 = vmatmul.bf16.vlgmr.msrb.gmra.mxu0 %v1218_v33  ;;  %v4665_v52 = vadd.f32 %v4664_v49, %v4652_v46  ;;  %v1225_v26 = vpack.c.b16 %v1161_v18, %v1161_v18  ;;  %v7814_v33 = vld [vmem:[%s9716_s1 + $0xba8] sm:$0xff]  ;;  %v7820_v46 = vld [vmem:[%s9716_s1 + $0xbd8] sm:$0xff]  ;;  %v7839_v18 = vld [vmem:[%s9716_s1 + $0xc70] sm:$0xff] }
 0x142   :  { %4902 = vmatpush.bf16.msra.mxu0 %v7768_v29  ;;  %4871 = vmatmul.bf16.vlgmr.msrb.gmra.mxu1 %v1219_v35  ;;  %v1222_v23 = vpack.c.b16 %v1158_v13, %v1158_v13  ;;  %v1223_v25 = vpack.c.b16 %v1159_v17, %v1159_v17  ;;  %v7815_v29 = vld [vmem:[%s9716_s1 + $0xbb0] sm:$0xff] }
 0x143   :  { %4915 = vmatpush.bf16.msra.mxu1 %v7776_v30  ;;  %4884 = vmatmul.bf16.vlgmr.msrb.gmra.mxu2 %v1220_v34  ;;  %v7823_v30 = vld [vmem:[%s9716_s1 + $0xbf0] sm:$0xff]  ;;  %v7822_v34 = vld [vmem:[%s9716_s1 + $0xbe8] sm:$0xff] }
 0x144   :  { %4928 = vmatpush.bf16.msra.mxu2 %v7784_v31  ;;  %4897 = vmatmul.bf16.vlgmr.msrb.gmra.mxu3 %v1221_v36  ;;  %v7798_v31 = vld [vmem:[%s9716_s1 + $0xb28] sm:$0xff]  ;;  %v7831_v17 = vld [vmem:[%s9716_s1 + $0xc30] sm:$0xff] }
 0x145   :  { %4941 = vmatpush.bf16.msra.mxu3 %v7792_v32  ;;  %v7806_v32 = vld [vmem:[%s9716_s1 + $0xb68] sm:$0xff] }
 0x146   :  { %4903 = vmatpush.bf16.msra.mxu0 %v7767_v37  ;;  %v4677_v57 = vpop.f32.mrf.mxu2  ;;  %v4653_v60 = vpop.f32.mrf.mxu0  ;;  %v7797_v37 = vld [vmem:[%s9716_s1 + $0xb20] sm:$0xff] }
 0x147   :  { %4916 = vmatpush.bf16.msra.mxu1 %v7775_v38  ;;  %v4678_v58 = vadd.f32 %v4677_v57, %v4665_v52  ;;  %v4690_v59 = vpop.f32.mrf.mxu3  ;;  %v4666_v0 = vpop.f32.mrf.mxu1  ;;  %v7805_v38 = vld [vmem:[%s9716_s1 + $0xb60] sm:$0xff]  ;;  %v7795_v52 = vld [vmem:[%s9716_s1 + $0xb10] sm:$0xff]  ;;  %v7794_v57 = vld [vmem:[%s9716_s1 + $0xb08] sm:$0xff] }
 0x148   :  { %4929 = vmatpush.bf16.msra.mxu2 %v7783_v39  ;;  %v7818_v60 = vld [vmem:[%s9716_s1 + $0xbc8] sm:$0xff] }
 0x149   :  { %4942 = vmatpush.bf16.msra.mxu3 %v7791_v40  ;;  %v9113_v61 = vadd.f32 %v4690_v59, %v4678_v58  ;;  %v7813_v40 = vld [vmem:[%s9716_s1 + $0xba0] sm:$0xff]  ;;  %v7802_v58 = vld [vmem:[%s9716_s1 + $0xb48] sm:$0xff] }
 0x14a   :  { %4904 = vmatpush.bf16.msra.mxu0 %v7766_v41  ;;  %v7821_v41 = vld [vmem:[%s9716_s1 + $0xbe0] sm:$0xff]  ;;  %v7810_v59 = vld [vmem:[%s9716_s1 + $0xb88] sm:$0xff] }
 0x14b   :  { %4917 = vmatpush.bf16.msra.mxu1 %v7774_v42 }
 0x14c   :  { %4930 = vmatpush.bf16.msra.mxu2 %v7782_v43  ;;  %v7796_v43 = vld [vmem:[%s9716_s1 + $0xb18] sm:$0xff] }
 0x14d   :  { %4943 = vmatpush.bf16.msra.mxu3 %v7790_v44  ;;  %v7804_v44 = vld [vmem:[%s9716_s1 + $0xb58] sm:$0xff] }
 0x14e   :  { %4905 = vmatpush.bf16.msra.mxu0 %v7765_v47  ;;  %v4679_v9 = vpop.f32.mrf.mxu2 }
 0x14f   :  { %4918 = vmatpush.bf16.msra.mxu1 %v7773_v48  ;;  %v4692_v10 = vpop.f32.mrf.mxu3  ;;  %v7832_v9 = vld [vmem:[%s9716_s1 + $0xc38] sm:$0xff] }
 0x150   :  { %4931 = vmatpush.bf16.msra.mxu2 %v7781_v50  ;;  %v7840_v10 = vld [vmem:[%s9716_s1 + $0xc78] sm:$0xff] }
 0x151   :  { %4944 = vmatpush.bf16.msra.mxu3 %v7789_v51 }
 0x152   :  { %4906 = vmatpush.bf16.msra.mxu0 %v7764_v53  ;;  %v7803_v53 = vld [vmem:[%s9716_s1 + $0xb50] sm:$0xff] }
 0x153   :  { %4919 = vmatpush.bf16.msra.mxu1 %v7772_v54 }
 0x154   :  { %4932 = vmatpush.bf16.msra.mxu2 %v7780_v55  ;;  %v7811_v55 = vld [vmem:[%s9716_s1 + $0xb90] sm:$0xff] }
 0x155   :  { %4945 = vmatpush.bf16.msra.mxu3 %v7788_v56  ;;  %v7819_v56 = vld [vmem:[%s9716_s1 + $0xbd0] sm:$0xff] }
 0x156   :  { %4907 = vmatpush.bf16.msra.mxu0 %v7763_v62  ;;  %v49_v62 = vld [vmem:[%s9717_s0 + $0xb8] sm:$0xff] }
 0x157   :  { %4920 = vmatpush.bf16.msra.mxu1 %v7771_v63  ;;  %v1165_v8 = vunpack.c.h.b16 %v49_v62 }
 0x158   :  { %4933 = vmatpush.bf16.msra.mxu2 %v7779_v1  ;;  %v7793_v1 = vld [vmem:[%s9716_s1 + $0xb00] sm:$0xff] }
 0x159   :  { %4946 = vmatpush.bf16.msra.mxu3 %v7787_v2  ;;  %v7801_v2 = vld [vmem:[%s9716_s1 + $0xb40] sm:$0xff] }
 0x15a   :  { %4908 = vmatpush.bf16.msra.mxu0 %v7762_v3 }
 0x15b   :  { %4921 = vmatpush.bf16.msra.mxu1 %v7770_v4  ;;  %v1164_v4 = vunpack.c.l.b16 %v49_v62 }
 0x15c   :  { %4934 = vmatpush.bf16.msra.mxu2 %v7778_v5  ;;  %v7809_v5 = vld [vmem:[%s9716_s1 + $0xb80] sm:$0xff] }
 0x15d   :  { %4947 = vmatpush.bf16.msra.mxu3 %v7786_v6  ;;  %v7817_v6 = vld [vmem:[%s9716_s1 + $0xbc0] sm:$0xff]  ;;  %v1228_v14 = vpack.c.b16 %v1164_v4, %v1164_v4 }
 0x15e   :  { %4909 = vmatpush.bf16.msra.mxu0 %v7761_v11  ;;  %v4703_v35 = vpop.f32.mrf.mxu0  ;;  %v7848_v11 = vld [vmem:[%s9716_s1 + $0xcb8] sm:$0xff] }
 0x15f   :  { %4922 = vmatpush.bf16.msra.mxu1 %v7769_v12  ;;  %v4704_v36 = vadd.f32 %v4703_v35, %v9113_v61  ;;  %v4716_v39 = vpop.f32.mrf.mxu1  ;;  %v48_v61 = vld [vmem:[%s9717_s0 + $0xb0] sm:$0xff]  ;;  %v7856_v12 = vld [vmem:[%s9716_s1 + $0xcf8] sm:$0xff] }
 0x160   :  { %4935 = vmatpush.bf16.msra.mxu2 %v7777_v15  ;;  %v1162_v3 = vunpack.c.l.b16 %v48_v61  ;;  %v1163_v7 = vunpack.c.h.b16 %v48_v61  ;;  %v7844_v35 = vld [vmem:[%s9716_s1 + $0xc98] sm:$0xff] }
 0x161   :  { %4948 = vmatpush.bf16.msra.mxu3 %v7785_v16  ;;  %4910 = vmatmul.bf16.vlgmr.msra.gmra.mxu0 %v1222_v23  ;;  %v4717_v42 = vadd.f32 %v4716_v39, %v4704_v36  ;;  %v1229_v16 = vpack.c.b16 %v1165_v8, %v1165_v8  ;;  %v7846_v23 = vld [vmem:[%s9716_s1 + $0xca8] sm:$0xff]  ;;  %v7852_v36 = vld [vmem:[%s9716_s1 + $0xcd8] sm:$0xff]  ;;  %v7871_v8 = vld [vmem:[%s9716_s1 + $0xd70] sm:$0xff] }
 0x162   :  { %4954 = vmatpush.bf16.msrb.mxu0 %v7800_v19  ;;  %4923 = vmatmul.bf16.vlgmr.msra.gmra.mxu1 %v1223_v25  ;;  %v1226_v13 = vpack.c.b16 %v1162_v3, %v1162_v3  ;;  %v1227_v15 = vpack.c.b16 %v1163_v7, %v1163_v7  ;;  %v7847_v19 = vld [vmem:[%s9716_s1 + $0xcb0] sm:$0xff] }
 0x163   :  { %4967 = vmatpush.bf16.msrb.mxu1 %v7808_v20  ;;  %4936 = vmatmul.bf16.vlgmr.msra.gmra.mxu2 %v1224_v24  ;;  %v7855_v20 = vld [vmem:[%s9716_s1 + $0xcf0] sm:$0xff]  ;;  %v7854_v24 = vld [vmem:[%s9716_s1 + $0xce8] sm:$0xff] }
 0x164   :  { %4980 = vmatpush.bf16.msrb.mxu2 %v7816_v21  ;;  %4949 = vmatmul.bf16.vlgmr.msra.gmra.mxu3 %v1225_v26  ;;  %v7830_v21 = vld [vmem:[%s9716_s1 + $0xc28] sm:$0xff]  ;;  %v7863_v7 = vld [vmem:[%s9716_s1 + $0xd30] sm:$0xff] }
 0x165   :  { %4993 = vmatpush.bf16.msrb.mxu3 %v7824_v22  ;;  %v7838_v22 = vld [vmem:[%s9716_s1 + $0xc68] sm:$0xff] }
 0x166   :  { %4955 = vmatpush.bf16.msrb.mxu0 %v7799_v27  ;;  %v4729_v47 = vpop.f32.mrf.mxu2  ;;  %v4705_v50 = vpop.f32.mrf.mxu0  ;;  %v7829_v27 = vld [vmem:[%s9716_s1 + $0xc20] sm:$0xff] }
 0x167   :  { %4968 = vmatpush.bf16.msrb.mxu1 %v7807_v28  ;;  %v4730_v48 = vadd.f32 %v4729_v47, %v4717_v42  ;;  %v4742_v49 = vpop.f32.mrf.mxu3  ;;  %v4718_v54 = vpop.f32.mrf.mxu1  ;;  %v7837_v28 = vld [vmem:[%s9716_s1 + $0xc60] sm:$0xff]  ;;  %v7827_v42 = vld [vmem:[%s9716_s1 + $0xc10] sm:$0xff]  ;;  %v7826_v47 = vld [vmem:[%s9716_s1 + $0xc08] sm:$0xff] }
 0x168   :  { %4981 = vmatpush.bf16.msrb.mxu2 %v7815_v29  ;;  %v7850_v50 = vld [vmem:[%s9716_s1 + $0xcc8] sm:$0xff] }
 0x169   :  { %4994 = vmatpush.bf16.msrb.mxu3 %v7823_v30  ;;  %v9218_v51 = vadd.f32 %v4742_v49, %v4730_v48  ;;  %v7845_v30 = vld [vmem:[%s9716_s1 + $0xca0] sm:$0xff]  ;;  %v7834_v48 = vld [vmem:[%s9716_s1 + $0xc48] sm:$0xff] }
 0x16a   :  { %4956 = vmatpush.bf16.msrb.mxu0 %v7798_v31  ;;  %v7853_v31 = vld [vmem:[%s9716_s1 + $0xce0] sm:$0xff]  ;;  %v7842_v49 = vld [vmem:[%s9716_s1 + $0xc88] sm:$0xff] }
 0x16b   :  { %4969 = vmatpush.bf16.msrb.mxu1 %v7806_v32 }
 0x16c   :  { %4982 = vmatpush.bf16.msrb.mxu2 %v7814_v33  ;;  %v7828_v33 = vld [vmem:[%s9716_s1 + $0xc18] sm:$0xff] }
 0x16d   :  { %4995 = vmatpush.bf16.msrb.mxu3 %v7822_v34  ;;  %v7836_v34 = vld [vmem:[%s9716_s1 + $0xc58] sm:$0xff] }
 0x16e   :  { %4957 = vmatpush.bf16.msrb.mxu0 %v7797_v37  ;;  %v4731_v63 = vpop.f32.mrf.mxu2 }
 0x16f   :  { %4970 = vmatpush.bf16.msrb.mxu1 %v7805_v38  ;;  %v4744_v0 = vpop.f32.mrf.mxu3  ;;  %v7864_v63 = vld [vmem:[%s9716_s1 + $0xd38] sm:$0xff] }
 0x170   :  { %4983 = vmatpush.bf16.msrb.mxu2 %v7813_v40  ;;  %v7872_v0 = vld [vmem:[%s9716_s1 + $0xd78] sm:$0xff] }
 0x171   :  { %4996 = vmatpush.bf16.msrb.mxu3 %v7821_v41 }
 0x172   :  { %4958 = vmatpush.bf16.msrb.mxu0 %v7796_v43  ;;  %v7835_v43 = vld [vmem:[%s9716_s1 + $0xc50] sm:$0xff] }
 0x173   :  { %4971 = vmatpush.bf16.msrb.mxu1 %v7804_v44 }
 0x174   :  { %4984 = vmatpush.bf16.msrb.mxu2 %v7812_v45  ;;  %v7843_v45 = vld [vmem:[%s9716_s1 + $0xc90] sm:$0xff] }
 0x175   :  { %4997 = vmatpush.bf16.msrb.mxu3 %v7820_v46  ;;  %v7851_v46 = vld [vmem:[%s9716_s1 + $0xcd0] sm:$0xff] }
 0x176   :  { %4959 = vmatpush.bf16.msrb.mxu0 %v7795_v52  ;;  %v51_v52 = vld [vmem:[%s9717_s0 + $0xc8] sm:$0xff] }
 0x177   :  { %4972 = vmatpush.bf16.msrb.mxu1 %v7803_v53  ;;  %v1169_v62 = vunpack.c.h.b16 %v51_v52 }
 0x178   :  { %4985 = vmatpush.bf16.msrb.mxu2 %v7811_v55  ;;  %v7825_v55 = vld [vmem:[%s9716_s1 + $0xc00] sm:$0xff] }
 0x179   :  { %4998 = vmatpush.bf16.msrb.mxu3 %v7819_v56  ;;  %v7833_v56 = vld [vmem:[%s9716_s1 + $0xc40] sm:$0xff] }
 0x17a   :  { %4960 = vmatpush.bf16.msrb.mxu0 %v7794_v57 }
 0x17b   :  { %4973 = vmatpush.bf16.msrb.mxu1 %v7802_v58  ;;  %v1168_v58 = vunpack.c.l.b16 %v51_v52 }
 0x17c   :  { %4986 = vmatpush.bf16.msrb.mxu2 %v7810_v59  ;;  %v7841_v59 = vld [vmem:[%s9716_s1 + $0xc80] sm:$0xff] }
 0x17d   :  { %4999 = vmatpush.bf16.msrb.mxu3 %v7818_v60  ;;  %v7849_v60 = vld [vmem:[%s9716_s1 + $0xcc0] sm:$0xff]  ;;  %v1232_v4 = vpack.c.b16 %v1168_v58, %v1168_v58 }
 0x17e   :  { %4961 = vmatpush.bf16.msrb.mxu0 %v7793_v1  ;;  %v4755_v25 = vpop.f32.mrf.mxu0  ;;  %v7880_v1 = vld [vmem:[%s9716_s1 + $0xdb8] sm:$0xff] }
 0x17f   :  { %4974 = vmatpush.bf16.msrb.mxu1 %v7801_v2  ;;  %v4756_v26 = vadd.f32 %v4755_v25, %v9218_v51  ;;  %v4768_v29 = vpop.f32.mrf.mxu1  ;;  %v50_v51 = vld [vmem:[%s9717_s0 + $0xc0] sm:$0xff]  ;;  %v7888_v2 = vld [vmem:[%s9716_s1 + $0xdf8] sm:$0xff] }
 0x180   :  { %4987 = vmatpush.bf16.msrb.mxu2 %v7809_v5  ;;  %v1166_v57 = vunpack.c.l.b16 %v50_v51  ;;  %v1167_v61 = vunpack.c.h.b16 %v50_v51  ;;  %v7876_v25 = vld [vmem:[%s9716_s1 + $0xd98] sm:$0xff] }
 0x181   :  { %5000 = vmatpush.bf16.msrb.mxu3 %v7817_v6  ;;  %4962 = vmatmul.bf16.vlgmr.msrb.gmra.mxu0 %v1226_v13  ;;  %v4769_v32 = vadd.f32 %v4768_v29, %v4756_v26  ;;  %v1233_v6 = vpack.c.b16 %v1169_v62, %v1169_v62  ;;  %v7878_v13 = vld [vmem:[%s9716_s1 + $0xda8] sm:$0xff]  ;;  %v7884_v26 = vld [vmem:[%s9716_s1 + $0xdd8] sm:$0xff]  ;;  %v7903_v62 = vld [vmem:[%s9716_s1 + $0xe70] sm:$0xff] }
 0x182   :  { %5006 = vmatpush.bf16.msra.mxu0 %v7832_v9  ;;  %4975 = vmatmul.bf16.vlgmr.msrb.gmra.mxu1 %v1227_v15  ;;  %v1230_v3 = vpack.c.b16 %v1166_v57, %v1166_v57  ;;  %v1231_v5 = vpack.c.b16 %v1167_v61, %v1167_v61  ;;  %v7879_v9 = vld [vmem:[%s9716_s1 + $0xdb0] sm:$0xff] }
 0x183   :  { %5019 = vmatpush.bf16.msra.mxu1 %v7840_v10  ;;  %4988 = vmatmul.bf16.vlgmr.msrb.gmra.mxu2 %v1228_v14  ;;  %v7887_v10 = vld [vmem:[%s9716_s1 + $0xdf0] sm:$0xff]  ;;  %v7886_v14 = vld [vmem:[%s9716_s1 + $0xde8] sm:$0xff] }
 0x184   :  { %5032 = vmatpush.bf16.msra.mxu2 %v7848_v11  ;;  %5001 = vmatmul.bf16.vlgmr.msrb.gmra.mxu3 %v1229_v16  ;;  %v7862_v11 = vld [vmem:[%s9716_s1 + $0xd28] sm:$0xff]  ;;  %v7895_v61 = vld [vmem:[%s9716_s1 + $0xe30] sm:$0xff] }
 0x185   :  { %5045 = vmatpush.bf16.msra.mxu3 %v7856_v12  ;;  %v7870_v12 = vld [vmem:[%s9716_s1 + $0xd68] sm:$0xff] }
 0x186   :  { %5007 = vmatpush.bf16.msra.mxu0 %v7831_v17  ;;  %v4781_v37 = vpop.f32.mrf.mxu2  ;;  %v4757_v40 = vpop.f32.mrf.mxu0  ;;  %v7861_v17 = vld [vmem:[%s9716_s1 + $0xd20] sm:$0xff] }
 0x187   :  { %5020 = vmatpush.bf16.msra.mxu1 %v7839_v18  ;;  %v4782_v38 = vadd.f32 %v4781_v37, %v4769_v32  ;;  %v4794_v39 = vpop.f32.mrf.mxu3  ;;  %v4770_v44 = vpop.f32.mrf.mxu1  ;;  %v7869_v18 = vld [vmem:[%s9716_s1 + $0xd60] sm:$0xff]  ;;  %v7859_v32 = vld [vmem:[%s9716_s1 + $0xd10] sm:$0xff]  ;;  %v7858_v37 = vld [vmem:[%s9716_s1 + $0xd08] sm:$0xff] }
 0x188   :  { %5033 = vmatpush.bf16.msra.mxu2 %v7847_v19  ;;  %v7882_v40 = vld [vmem:[%s9716_s1 + $0xdc8] sm:$0xff] }
 0x189   :  { %5046 = vmatpush.bf16.msra.mxu3 %v7855_v20  ;;  %v9323_v41 = vadd.f32 %v4794_v39, %v4782_v38  ;;  %v7877_v20 = vld [vmem:[%s9716_s1 + $0xda0] sm:$0xff]  ;;  %v7866_v38 = vld [vmem:[%s9716_s1 + $0xd48] sm:$0xff] }
 0x18a   :  { %5008 = vmatpush.bf16.msra.mxu0 %v7830_v21  ;;  %v7885_v21 = vld [vmem:[%s9716_s1 + $0xde0] sm:$0xff]  ;;  %v7874_v39 = vld [vmem:[%s9716_s1 + $0xd88] sm:$0xff] }
 0x18b   :  { %5021 = vmatpush.bf16.msra.mxu1 %v7838_v22 }
 0x18c   :  { %5034 = vmatpush.bf16.msra.mxu2 %v7846_v23  ;;  %v7860_v23 = vld [vmem:[%s9716_s1 + $0xd18] sm:$0xff] }
 0x18d   :  { %5047 = vmatpush.bf16.msra.mxu3 %v7854_v24  ;;  %v7868_v24 = vld [vmem:[%s9716_s1 + $0xd58] sm:$0xff] }
 0x18e   :  { %5009 = vmatpush.bf16.msra.mxu0 %v7829_v27  ;;  %v4783_v53 = vpop.f32.mrf.mxu2 }
 0x18f   :  { %5022 = vmatpush.bf16.msra.mxu1 %v7837_v28  ;;  %v4796_v54 = vpop.f32.mrf.mxu3  ;;  %v7896_v53 = vld [vmem:[%s9716_s1 + $0xe38] sm:$0xff] }
 0x190   :  { %5035 = vmatpush.bf16.msra.mxu2 %v7845_v30  ;;  %v7904_v54 = vld [vmem:[%s9716_s1 + $0xe78] sm:$0xff] }
 0x191   :  { %5048 = vmatpush.bf16.msra.mxu3 %v7853_v31 }
 0x192   :  { %5010 = vmatpush.bf16.msra.mxu0 %v7828_v33  ;;  %v7867_v33 = vld [vmem:[%s9716_s1 + $0xd50] sm:$0xff] }
 0x193   :  { %5023 = vmatpush.bf16.msra.mxu1 %v7836_v34 }
 0x194   :  { %5036 = vmatpush.bf16.msra.mxu2 %v7844_v35  ;;  %v7875_v35 = vld [vmem:[%s9716_s1 + $0xd90] sm:$0xff] }
 0x195   :  { %5049 = vmatpush.bf16.msra.mxu3 %v7852_v36  ;;  %v7883_v36 = vld [vmem:[%s9716_s1 + $0xdd0] sm:$0xff] }
 0x196   :  { %5011 = vmatpush.bf16.msra.mxu0 %v7827_v42  ;;  %v53_v42 = vld [vmem:[%s9717_s0 + $0xd8] sm:$0xff] }
 0x197   :  { %5024 = vmatpush.bf16.msra.mxu1 %v7835_v43  ;;  %v1173_v52 = vunpack.c.h.b16 %v53_v42 }
 0x198   :  { %5037 = vmatpush.bf16.msra.mxu2 %v7843_v45  ;;  %v7857_v45 = vld [vmem:[%s9716_s1 + $0xd00] sm:$0xff] }
 0x199   :  { %5050 = vmatpush.bf16.msra.mxu3 %v7851_v46  ;;  %v7865_v46 = vld [vmem:[%s9716_s1 + $0xd40] sm:$0xff] }
 0x19a   :  { %5012 = vmatpush.bf16.msra.mxu0 %v7826_v47 }
 0x19b   :  { %5025 = vmatpush.bf16.msra.mxu1 %v7834_v48  ;;  %v1172_v48 = vunpack.c.l.b16 %v53_v42 }
 0x19c   :  { %5038 = vmatpush.bf16.msra.mxu2 %v7842_v49  ;;  %v7873_v49 = vld [vmem:[%s9716_s1 + $0xd80] sm:$0xff] }
 0x19d   :  { %5051 = vmatpush.bf16.msra.mxu3 %v7850_v50  ;;  %v7881_v50 = vld [vmem:[%s9716_s1 + $0xdc0] sm:$0xff]  ;;  %v1236_v58 = vpack.c.b16 %v1172_v48, %v1172_v48 }
 0x19e   :  { %5013 = vmatpush.bf16.msra.mxu0 %v7825_v55  ;;  %v4807_v15 = vpop.f32.mrf.mxu0  ;;  %v7912_v55 = vld [vmem:[%s9716_s1 + $0xeb8] sm:$0xff] }
 0x19f   :  { %5026 = vmatpush.bf16.msra.mxu1 %v7833_v56  ;;  %v4808_v16 = vadd.f32 %v4807_v15, %v9323_v41  ;;  %v4820_v19 = vpop.f32.mrf.mxu1  ;;  %v52_v41 = vld [vmem:[%s9717_s0 + $0xd0] sm:$0xff]  ;;  %v7920_v56 = vld [vmem:[%s9716_s1 + $0xef8] sm:$0xff] }
 0x1a0   :  { %5039 = vmatpush.bf16.msra.mxu2 %v7841_v59  ;;  %v1170_v47 = vunpack.c.l.b16 %v52_v41  ;;  %v1171_v51 = vunpack.c.h.b16 %v52_v41  ;;  %v7908_v15 = vld [vmem:[%s9716_s1 + $0xe98] sm:$0xff] }
 0x1a1   :  { %5052 = vmatpush.bf16.msra.mxu3 %v7849_v60  ;;  %5014 = vmatmul.bf16.vlgmr.msra.gmra.mxu0 %v1230_v3  ;;  %v4821_v22 = vadd.f32 %v4820_v19, %v4808_v16  ;;  %v1237_v60 = vpack.c.b16 %v1173_v52, %v1173_v52  ;;  %v7910_v3 = vld [vmem:[%s9716_s1 + $0xea8] sm:$0xff]  ;;  %v7916_v16 = vld [vmem:[%s9716_s1 + $0xed8] sm:$0xff]  ;;  %v7935_v52 = vld [vmem:[%s9716_s1 + $0xf70] sm:$0xff] }
 0x1a2   :  { %5058 = vmatpush.bf16.msrb.mxu0 %v7864_v63  ;;  %5027 = vmatmul.bf16.vlgmr.msra.gmra.mxu1 %v1231_v5  ;;  %v1234_v57 = vpack.c.b16 %v1170_v47, %v1170_v47  ;;  %v1235_v59 = vpack.c.b16 %v1171_v51, %v1171_v51  ;;  %v7911_v63 = vld [vmem:[%s9716_s1 + $0xeb0] sm:$0xff] }
 0x1a3   :  { %5071 = vmatpush.bf16.msrb.mxu1 %v7872_v0  ;;  %5040 = vmatmul.bf16.vlgmr.msra.gmra.mxu2 %v1232_v4  ;;  %v7919_v0 = vld [vmem:[%s9716_s1 + $0xef0] sm:$0xff]  ;;  %v7918_v4 = vld [vmem:[%s9716_s1 + $0xee8] sm:$0xff] }
 0x1a4   :  { %5084 = vmatpush.bf16.msrb.mxu2 %v7880_v1  ;;  %5053 = vmatmul.bf16.vlgmr.msra.gmra.mxu3 %v1233_v6  ;;  %v7894_v1 = vld [vmem:[%s9716_s1 + $0xe28] sm:$0xff]  ;;  %v7927_v51 = vld [vmem:[%s9716_s1 + $0xf30] sm:$0xff] }
 0x1a5   :  { %5097 = vmatpush.bf16.msrb.mxu3 %v7888_v2  ;;  %v7902_v2 = vld [vmem:[%s9716_s1 + $0xe68] sm:$0xff] }
 0x1a6   :  { %5059 = vmatpush.bf16.msrb.mxu0 %v7863_v7  ;;  %v4833_v27 = vpop.f32.mrf.mxu2  ;;  %v4809_v30 = vpop.f32.mrf.mxu0  ;;  %v7893_v7 = vld [vmem:[%s9716_s1 + $0xe20] sm:$0xff] }
 0x1a7   :  { %5072 = vmatpush.bf16.msrb.mxu1 %v7871_v8  ;;  %v4834_v28 = vadd.f32 %v4833_v27, %v4821_v22  ;;  %v4846_v29 = vpop.f32.mrf.mxu3  ;;  %v4822_v34 = vpop.f32.mrf.mxu1  ;;  %v7901_v8 = vld [vmem:[%s9716_s1 + $0xe60] sm:$0xff]  ;;  %v7891_v22 = vld [vmem:[%s9716_s1 + $0xe10] sm:$0xff]  ;;  %v7890_v27 = vld [vmem:[%s9716_s1 + $0xe08] sm:$0xff] }
 0x1a8   :  { %5085 = vmatpush.bf16.msrb.mxu2 %v7879_v9  ;;  %v7914_v30 = vld [vmem:[%s9716_s1 + $0xec8] sm:$0xff] }
 0x1a9   :  { %5098 = vmatpush.bf16.msrb.mxu3 %v7887_v10  ;;  %v9428_v31 = vadd.f32 %v4846_v29, %v4834_v28  ;;  %v7909_v10 = vld [vmem:[%s9716_s1 + $0xea0] sm:$0xff]  ;;  %v7898_v28 = vld [vmem:[%s9716_s1 + $0xe48] sm:$0xff] }
 0x1aa   :  { %5060 = vmatpush.bf16.msrb.mxu0 %v7862_v11  ;;  %v7917_v11 = vld [vmem:[%s9716_s1 + $0xee0] sm:$0xff]  ;;  %v7906_v29 = vld [vmem:[%s9716_s1 + $0xe88] sm:$0xff] }
 0x1ab   :  { %5073 = vmatpush.bf16.msrb.mxu1 %v7870_v12 }
 0x1ac   :  { %5086 = vmatpush.bf16.msrb.mxu2 %v7878_v13  ;;  %v7892_v13 = vld [vmem:[%s9716_s1 + $0xe18] sm:$0xff] }
 0x1ad   :  { %5099 = vmatpush.bf16.msrb.mxu3 %v7886_v14  ;;  %v7900_v14 = vld [vmem:[%s9716_s1 + $0xe58] sm:$0xff] }
 0x1ae   :  { %5061 = vmatpush.bf16.msrb.mxu0 %v7861_v17  ;;  %v4835_v43 = vpop.f32.mrf.mxu2 }
 0x1af   :  { %5074 = vmatpush.bf16.msrb.mxu1 %v7869_v18  ;;  %v4848_v44 = vpop.f32.mrf.mxu3  ;;  %v7928_v43 = vld [vmem:[%s9716_s1 + $0xf38] sm:$0xff] }
 0x1b0   :  { %5087 = vmatpush.bf16.msrb.mxu2 %v7877_v20  ;;  %v7936_v44 = vld [vmem:[%s9716_s1 + $0xf78] sm:$0xff] }
 0x1b1   :  { %5100 = vmatpush.bf16.msrb.mxu3 %v7885_v21 }
 0x1b2   :  { %5062 = vmatpush.bf16.msrb.mxu0 %v7860_v23  ;;  %v7899_v23 = vld [vmem:[%s9716_s1 + $0xe50] sm:$0xff] }
 0x1b3   :  { %5075 = vmatpush.bf16.msrb.mxu1 %v7868_v24 }
 0x1b4   :  { %5088 = vmatpush.bf16.msrb.mxu2 %v7876_v25  ;;  %v7907_v25 = vld [vmem:[%s9716_s1 + $0xe90] sm:$0xff] }
 0x1b5   :  { %5101 = vmatpush.bf16.msrb.mxu3 %v7884_v26  ;;  %v7915_v26 = vld [vmem:[%s9716_s1 + $0xed0] sm:$0xff] }
 0x1b6   :  { %5063 = vmatpush.bf16.msrb.mxu0 %v7859_v32  ;;  %v55_v32 = vld [vmem:[%s9717_s0 + $0xe8] sm:$0xff] }
 0x1b7   :  { %5076 = vmatpush.bf16.msrb.mxu1 %v7867_v33  ;;  %v1177_v42 = vunpack.c.h.b16 %v55_v32 }
 0x1b8   :  { %5089 = vmatpush.bf16.msrb.mxu2 %v7875_v35  ;;  %v7889_v35 = vld [vmem:[%s9716_s1 + $0xe00] sm:$0xff] }
 0x1b9   :  { %5102 = vmatpush.bf16.msrb.mxu3 %v7883_v36  ;;  %v7897_v36 = vld [vmem:[%s9716_s1 + $0xe40] sm:$0xff] }
 0x1ba   :  { %5064 = vmatpush.bf16.msrb.mxu0 %v7858_v37 }
 0x1bb   :  { %5077 = vmatpush.bf16.msrb.mxu1 %v7866_v38  ;;  %v1176_v38 = vunpack.c.l.b16 %v55_v32  ;;  %v7945_v32 = vld [vmem:[%s9716_s1 + $0xfc0] sm:$0xff] }
 0x1bc   :  { %5090 = vmatpush.bf16.msrb.mxu2 %v7874_v39  ;;  %v7905_v39 = vld [vmem:[%s9716_s1 + $0xe80] sm:$0xff] }
 0x1bd   :  { %5103 = vmatpush.bf16.msrb.mxu3 %v7882_v40  ;;  %v7913_v40 = vld [vmem:[%s9716_s1 + $0xec0] sm:$0xff]  ;;  %v1240_v48 = vpack.c.b16 %v1176_v38, %v1176_v38 }
 0x1be   :  { %5065 = vmatpush.bf16.msrb.mxu0 %v7857_v45  ;;  %v4859_v5 = vpop.f32.mrf.mxu0  ;;  %v7944_v45 = vld [vmem:[%s9716_s1 + $0xfb8] sm:$0xff] }
 0x1bf   :  { %5078 = vmatpush.bf16.msrb.mxu1 %v7865_v46  ;;  %v4860_v6 = vadd.f32 %v4859_v5, %v9428_v31  ;;  %v4872_v9 = vpop.f32.mrf.mxu1  ;;  %v54_v31 = vld [vmem:[%s9717_s0 + $0xe0] sm:$0xff]  ;;  %v7952_v46 = vld [vmem:[%s9716_s1 + $0xff8] sm:$0xff] }
 0x1c0   :  { %5091 = vmatpush.bf16.msrb.mxu2 %v7873_v49  ;;  %v1174_v37 = vunpack.c.l.b16 %v54_v31  ;;  %v1175_v41 = vunpack.c.h.b16 %v54_v31  ;;  %v7940_v5 = vld [vmem:[%s9716_s1 + $0xf98] sm:$0xff]  ;;  %v7937_v31 = vld [vmem:[%s9716_s1 + $0xf80] sm:$0xff] }
 0x1c1   :  { %5104 = vmatpush.bf16.msrb.mxu3 %v7881_v50  ;;  %5066 = vmatmul.bf16.vlgmr.msrb.gmra.mxu0 %v1234_v57  ;;  %v4873_v12 = vadd.f32 %v4872_v9, %v4860_v6  ;;  %v1241_v50 = vpack.c.b16 %v1177_v42, %v1177_v42  ;;  %v7942_v57 = vld [vmem:[%s9716_s1 + $0xfa8] sm:$0xff]  ;;  %v7948_v6 = vld [vmem:[%s9716_s1 + $0xfd8] sm:$0xff] }
 0x1c2   :  { %5110 = vmatpush.bf16.msra.mxu0 %v7896_v53  ;;  %5079 = vmatmul.bf16.vlgmr.msrb.gmra.mxu1 %v1235_v59  ;;  %v1238_v47 = vpack.c.b16 %v1174_v37, %v1174_v37  ;;  %v1239_v49 = vpack.c.b16 %v1175_v41, %v1175_v41  ;;  %v7943_v53 = vld [vmem:[%s9716_s1 + $0xfb0] sm:$0xff] }
 0x1c3   :  { %5123 = vmatpush.bf16.msra.mxu1 %v7904_v54  ;;  %5092 = vmatmul.bf16.vlgmr.msrb.gmra.mxu2 %v1236_v58  ;;  %v7951_v54 = vld [vmem:[%s9716_s1 + $0xff0] sm:$0xff]  ;;  %v7950_v58 = vld [vmem:[%s9716_s1 + $0xfe8] sm:$0xff] }
 0x1c4   :  { %5136 = vmatpush.bf16.msra.mxu2 %v7912_v55  ;;  %5105 = vmatmul.bf16.vlgmr.msrb.gmra.mxu3 %v1237_v60  ;;  %v7926_v55 = vld [vmem:[%s9716_s1 + $0xf28] sm:$0xff] }
 0x1c5   :  { %5149 = vmatpush.bf16.msra.mxu3 %v7920_v56  ;;  %v7934_v56 = vld [vmem:[%s9716_s1 + $0xf68] sm:$0xff] }
 0x1c6   :  { %5111 = vmatpush.bf16.msra.mxu0 %v7895_v61  ;;  %v4885_v17 = vpop.f32.mrf.mxu2  ;;  %v4861_v20 = vpop.f32.mrf.mxu0  ;;  %v7925_v61 = vld [vmem:[%s9716_s1 + $0xf20] sm:$0xff] }
 0x1c7   :  { %5124 = vmatpush.bf16.msra.mxu1 %v7903_v62  ;;  %v4886_v18 = vadd.f32 %v4885_v17, %v4873_v12  ;;  %v4898_v19 = vpop.f32.mrf.mxu3  ;;  %v4874_v24 = vpop.f32.mrf.mxu1  ;;  %v7933_v62 = vld [vmem:[%s9716_s1 + $0xf60] sm:$0xff]  ;;  %v7923_v12 = vld [vmem:[%s9716_s1 + $0xf10] sm:$0xff]  ;;  %v7922_v17 = vld [vmem:[%s9716_s1 + $0xf08] sm:$0xff] }
 0x1c8   :  { %5137 = vmatpush.bf16.msra.mxu2 %v7911_v63  ;;  %v7938_v20 = vld [vmem:[%s9716_s1 + $0xf88] sm:$0xff] }
 0x1c9   :  { %5150 = vmatpush.bf16.msra.mxu3 %v7919_v0  ;;  %v9533_v21 = vadd.f32 %v4898_v19, %v4886_v18  ;;  %v7941_v0 = vld [vmem:[%s9716_s1 + $0xfa0] sm:$0xff]  ;;  %v7930_v18 = vld [vmem:[%s9716_s1 + $0xf48] sm:$0xff]  ;;  %v56_v19 = vld [vmem:[%s9717_s0 + $0xf0] sm:$0xff] }
 0x1ca   :  { %5112 = vmatpush.bf16.msra.mxu0 %v7894_v1  ;;  %v7949_v1 = vld [vmem:[%s9716_s1 + $0xfe0] sm:$0xff] }
 0x1cb   :  { %5125 = vmatpush.bf16.msra.mxu1 %v7902_v2 }
 0x1cc   :  { %5138 = vmatpush.bf16.msra.mxu2 %v7910_v3  ;;  %v7924_v3 = vld [vmem:[%s9716_s1 + $0xf18] sm:$0xff] }
 0x1cd   :  { %5151 = vmatpush.bf16.msra.mxu3 %v7918_v4  ;;  %v7932_v4 = vld [vmem:[%s9716_s1 + $0xf58] sm:$0xff] }
 0x1ce   :  { %5113 = vmatpush.bf16.msra.mxu0 %v7893_v7  ;;  %v4887_v33 = vpop.f32.mrf.mxu2 }
 0x1cf   :  { %5126 = vmatpush.bf16.msra.mxu1 %v7901_v8  ;;  %v4900_v34 = vpop.f32.mrf.mxu3 }
 0x1d0   :  { %5139 = vmatpush.bf16.msra.mxu2 %v7909_v10 }
 0x1d1   :  { %5152 = vmatpush.bf16.msra.mxu3 %v7917_v11 }
 0x1d2   :  { %5114 = vmatpush.bf16.msra.mxu0 %v7892_v13  ;;  %v7931_v13 = vld [vmem:[%s9716_s1 + $0xf50] sm:$0xff] }
 0x1d3   :  { %5127 = vmatpush.bf16.msra.mxu1 %v7900_v14 }
 0x1d4   :  { %5140 = vmatpush.bf16.msra.mxu2 %v7908_v15  ;;  %v7939_v15 = vld [vmem:[%s9716_s1 + $0xf90] sm:$0xff] }
 0x1d5   :  { %5153 = vmatpush.bf16.msra.mxu3 %v7916_v16  ;;  %v7947_v16 = vld [vmem:[%s9716_s1 + $0xfd0] sm:$0xff] }
 0x1d6   :  { %5115 = vmatpush.bf16.msra.mxu0 %v7891_v22  ;;  %v57_v22 = vld [vmem:[%s9717_s0 + $0xf8] sm:$0xff] }
 0x1d7   :  { %5128 = vmatpush.bf16.msra.mxu1 %v7899_v23 }
 0x1d8   :  { %5141 = vmatpush.bf16.msra.mxu2 %v7907_v25  ;;  %v1178_v25 = vunpack.c.l.b16 %v56_v19 }
 0x1d9   :  { %5154 = vmatpush.bf16.msra.mxu3 %v7915_v26  ;;  %v1179_v26 = vunpack.c.h.b16 %v56_v19 }
 0x1da   :  { %5116 = vmatpush.bf16.msra.mxu0 %v7890_v27  ;;  %v7921_v27 = vld [vmem:[%s9716_s1 + $0xf00] sm:$0xff]  ;;  %v1242_v33 = vpack.c.b16 %v1178_v25, %v1178_v25  ;;  %v7959_v25 = vld [vmem:[%s9722_s5 + $0x30] sm:$0xff] }
 0x1db   :  { %5129 = vmatpush.bf16.msra.mxu1 %v7898_v28  ;;  %v7929_v28 = vld [vmem:[%s9716_s1 + $0xf40] sm:$0xff]  ;;  %v1243_v34 = vpack.c.b16 %v1179_v26, %v1179_v26 }
 0x1dc   :  { %5142 = vmatpush.bf16.msra.mxu2 %v7906_v29  ;;  %v1180_v29 = vunpack.c.l.b16 %v57_v22 }
 0x1dd   :  { %5155 = vmatpush.bf16.msra.mxu3 %v7914_v30  ;;  %v1181_v30 = vunpack.c.h.b16 %v57_v22 }
 0x1de   :  { %5117 = vmatpush.bf16.msra.mxu0 %v7889_v35  ;;  %v4911_v59 = vpop.f32.mrf.mxu0  ;;  %v1244_v35 = vpack.c.b16 %v1180_v29, %v1180_v29 }
 0x1df   :  { %5130 = vmatpush.bf16.msra.mxu1 %v7897_v36  ;;  %v4912_v60 = vadd.f32 %v4911_v59, %v9533_v21  ;;  %v4924_v63 = vpop.f32.mrf.mxu1  ;;  %v7946_v21 = vld [vmem:[%s9716_s1 + $0xfc8] sm:$0xff]  ;;  %v1245_v36 = vpack.c.b16 %v1181_v30, %v1181_v30 }
 0x1e0   :  { %5143 = vmatpush.bf16.msra.mxu2 %v7905_v39 }
 0x1e1   :  { %5156 = vmatpush.bf16.msra.mxu3 %v7913_v40  ;;  %5118 = vmatmul.bf16.vlgmr.msra.gmra.mxu0 %v1238_v47  ;;  %v4925_v2 = vadd.f32 %v4924_v63, %v4912_v60 }
 0x1e2   :  { %5162 = vmatpush.bf16.msrb.mxu0 %v7928_v43  ;;  %5131 = vmatmul.bf16.vlgmr.msra.gmra.mxu1 %v1239_v49 }
 0x1e3   :  { %5175 = vmatpush.bf16.msrb.mxu1 %v7936_v44  ;;  %5144 = vmatmul.bf16.vlgmr.msra.gmra.mxu2 %v1240_v48 }
 0x1e4   :  { %5188 = vmatpush.bf16.msrb.mxu2 %v7944_v45  ;;  %5157 = vmatmul.bf16.vlgmr.msra.gmra.mxu3 %v1241_v50 }
 0x1e5   :  { %5201 = vmatpush.bf16.msrb.mxu3 %v7952_v46 }
 0x1e6   :  { %5163 = vmatpush.bf16.msrb.mxu0 %v7927_v51  ;;  %v4937_v7 = vpop.f32.mrf.mxu2  ;;  %v4913_v10 = vpop.f32.mrf.mxu0 }
 0x1e7   :  { %5176 = vmatpush.bf16.msrb.mxu1 %v7935_v52  ;;  %v4938_v8 = vadd.f32 %v4937_v7, %v4925_v2  ;;  %v4950_v9 = vpop.f32.mrf.mxu3  ;;  %v4926_v14 = vpop.f32.mrf.mxu1 }
 0x1e8   :  { %5189 = vmatpush.bf16.msrb.mxu2 %v7943_v53 }
 0x1e9   :  { %5202 = vmatpush.bf16.msrb.mxu3 %v7951_v54  ;;  %v4951_v11 = vadd.f32 %v4950_v9, %v4938_v8 }
 0x1ea   :  { %5164 = vmatpush.bf16.msrb.mxu0 %v7926_v55 }
 0x1eb   :  { %5177 = vmatpush.bf16.msrb.mxu1 %v7934_v56 }
 0x1ec   :  { %5190 = vmatpush.bf16.msrb.mxu2 %v7942_v57 }
 0x1ed   :  { %5203 = vmatpush.bf16.msrb.mxu3 %v7950_v58 }
 0x1ee   :  { %5165 = vmatpush.bf16.msrb.mxu0 %v7925_v61  ;;  %v4939_v23 = vpop.f32.mrf.mxu2 }
 0x1ef   :  { %5178 = vmatpush.bf16.msrb.mxu1 %v7933_v62  ;;  %v4952_v24 = vpop.f32.mrf.mxu3 }
 0x1f0   :  { %5191 = vmatpush.bf16.msrb.mxu2 %v7941_v0 }
 0x1f1   :  { %5204 = vmatpush.bf16.msrb.mxu3 %v7949_v1 }
 0x1f2   :  { %5166 = vmatpush.bf16.msrb.mxu0 %v7924_v3 }
 0x1f3   :  { %5179 = vmatpush.bf16.msrb.mxu1 %v7932_v4 }
 0x1f4   :  { %5192 = vmatpush.bf16.msrb.mxu2 %v7940_v5 }
 0x1f5   :  { %5205 = vmatpush.bf16.msrb.mxu3 %v7948_v6 }
 0x1f6   :  { %5167 = vmatpush.bf16.msrb.mxu0 %v7923_v12 }
 0x1f7   :  { %5180 = vmatpush.bf16.msrb.mxu1 %v7931_v13 }
 0x1f8   :  { %5193 = vmatpush.bf16.msrb.mxu2 %v7939_v15 }
 0x1f9   :  { %5206 = vmatpush.bf16.msrb.mxu3 %v7947_v16 }
 0x1fa   :  { %5168 = vmatpush.bf16.msrb.mxu0 %v7922_v17 }
 0x1fb   :  { %5181 = vmatpush.bf16.msrb.mxu1 %v7930_v18 }
 0x1fc   :  { %5194 = vmatpush.bf16.msrb.mxu2 %v7938_v20  ;;  %v7974_v20 = vmov 8.0  }
 0x1fd   :  { %5207 = vmatpush.bf16.msrb.mxu3 %v7946_v21  ;;  %7966 = vrcp.f32 %v7974_v20  ;;  %v7960_v21 = vld [vmem:[%s9722_s5 + $0x38] sm:$0xff] }
 0x1fe   :  { %5169 = vmatpush.bf16.msrb.mxu0 %v7921_v27  ;;  %v4963_v37 = vpop.f32.mrf.mxu0 }
 0x1ff   :  { %5182 = vmatpush.bf16.msrb.mxu1 %v7929_v28  ;;  %v4964_v38 = vadd.f32 %v4963_v37, %v4951_v11  ;;  %v4976_v39 = vpop.f32.mrf.mxu1  ;;  %v7958_v28 = vld [vmem:[%s9722_s5 + $0x28] sm:$0xff] }
 0x200   :  { %5195 = vmatpush.bf16.msrb.mxu2 %v7937_v31 }
 0x201   :  { %5208 = vmatpush.bf16.msrb.mxu3 %v7945_v32  ;;  %5170 = vmatmul.bf16.vlgmr.msrb.gmra.mxu0 %v1242_v33  ;;  %v4977_v40 = vadd.f32 %v4976_v39, %v4964_v38 }
 0x202   :  { %5183 = vmatmul.bf16.vlgmr.msrb.gmra.mxu1 %v1243_v34  ;;  %5333 = vmatpush.bf16.msra.mxu0 %v7960_v21 }
 0x203   :  { %5196 = vmatmul.bf16.vlgmr.msrb.gmra.mxu2 %v1244_v35  ;;  %v7967_v26 = vpop.eup %7966 }
 0x204   :  { %5209 = vmatmul.bf16.vlgmr.msrb.gmra.mxu3 %v1245_v36  ;;  %v5228_v29 = vmul.f32 8.0, %v7967_v26  ;;  %v7957_v36 = vld [vmem:[%s9722_s5 + $0x20] sm:$0xff]  ;;  %vm5232_vm0 = vweird.f32 %v7967_v26 }
 0x206   :  { %v4989_v41 = vpop.f32.mrf.mxu2  ;;  %v4965_v44 = vpop.f32.mrf.mxu0  ;;  %5334 = vmatpush.bf16.msra.mxu0 %v7959_v25  ;;  %v5229_v37 = vsub.f32 1.0, %v5228_v29 }
 0x207   :  { %v4990_v42 = vadd.f32 %v4989_v41, %v4977_v40  ;;  %v5002_v43 = vpop.f32.mrf.mxu3  ;;  %v4978_v46 = vpop.f32.mrf.mxu1  ;;  %v7956_v41 = vld [vmem:[%s9722_s5 + $0x18] sm:$0xff] }
 0x209   :  { %v5003_v45 = vadd.f32 %v5002_v43, %v4990_v42  ;;  %v5230_v42 = vmul.f32 %v7967_v26, %v5229_v37 }
 0x20a   :  { %5335 = vmatpush.bf16.msra.mxu0 %v7958_v28 }
 0x20e   :  { %v4991_v47 = vpop.f32.mrf.mxu2  ;;  %5336 = vmatpush.bf16.msra.mxu0 %v7957_v36 }
 0x20f   :  { %v5004_v48 = vpop.f32.mrf.mxu3 }
 0x212   :  { %5337 = vmatpush.bf16.msra.mxu0 %v7956_v41 }
 0x21e   :  { %v5015_v49 = vpop.f32.mrf.mxu0 }
 0x21f   :  { %v5016_v50 = vadd.f32 %v5015_v49, %v5003_v45  ;;  %v5028_v51 = vpop.f32.mrf.mxu1  ;;  %v7955_v49 = vld [vmem:[%s9722_s5 + $0x10] sm:$0xff] }
 0x220   :  { %5338 = vmatpush.bf16.msra.mxu0 %v7955_v49 }
 0x221   :  { %v5029_v52 = vadd.f32 %v5028_v51, %v5016_v50  ;;  %v5231_v50 = vadd.f32 %v7967_v26, %v5230_v42 }
 0x226   :  { %v5041_v53 = vpop.f32.mrf.mxu2  ;;  %v5017_v56 = vpop.f32.mrf.mxu0 }
 0x227   :  { %v5042_v54 = vadd.f32 %v5041_v53, %v5029_v52  ;;  %v5054_v55 = vpop.f32.mrf.mxu3  ;;  %v5030_v58 = vpop.f32.mrf.mxu1  ;;  %v5233_v56 = vsel %vm5232_vm0, %v7967_v26, %v5231_v50 }
 0x229   :  { %v5055_v57 = vadd.f32 %v5054_v55, %v5042_v54  ;;  %v7954_v55 = vld [vmem:[%s9722_s5 + $0x8] sm:$0xff] }
 0x22a   :  { %5339 = vmatpush.bf16.msra.mxu0 %v7954_v55 }
 0x22e   :  { %v5043_v59 = vpop.f32.mrf.mxu2 }
 0x22f   :  { %v5056_v60 = vpop.f32.mrf.mxu3  ;;  %v7953_v59 = vld [vmem:[%s9722_s5] sm:$0xff] }
 0x230   :  { %5340 = vmatpush.bf16.msra.mxu0 %v7953_v59 }
 0x23e   :  { %v5067_v61 = vpop.f32.mrf.mxu0 }
 0x23f   :  { %v5080_v62 = vpop.f32.mrf.mxu1  ;;  %v5068_v8 = vadd.f32 %v5067_v61, %v5055_v57 }
 0x241   :  { %v5081_v12 = vadd.f32 %v5080_v62, %v5068_v8 }
 0x246   :  { %v5093_v63 = vpop.f32.mrf.mxu2  ;;  %v5069_v1 = vpop.f32.mrf.mxu0 }
 0x247   :  { %v5106_v0 = vpop.f32.mrf.mxu3  ;;  %v5082_v2 = vpop.f32.mrf.mxu1  ;;  %v5094_v13 = vadd.f32 %v5093_v63, %v5081_v12  ;;  %v7964_v12 = vld [vmem:[%s9720_s4] ss:$0 sm:$0xff] }
 0x249   :  { %v5107_v16 = vadd.f32 %v5106_v0, %v5094_v13 }
 0x24e   :  { %v5095_v3 = vpop.f32.mrf.mxu2 }
 0x24f   :  { %v5108_v4 = vpop.f32.mrf.mxu3 }
 0x25e   :  { %v5119_v5 = vpop.f32.mrf.mxu0 }
 0x25f   :  { %v5132_v6 = vpop.f32.mrf.mxu1  ;;  %v5120_v17 = vadd.f32 %v5119_v5, %v5107_v16 }
 0x261   :  { %v5133_v18 = vadd.f32 %v5132_v6, %v5120_v17 }
 0x266   :  { %v5145_v7 = vpop.f32.mrf.mxu2  ;;  %v5121_v10 = vpop.f32.mrf.mxu0 }
 0x267   :  { %v5158_v9 = vpop.f32.mrf.mxu3  ;;  %v5134_v11 = vpop.f32.mrf.mxu1  ;;  %v5146_v19 = vadd.f32 %v5145_v7, %v5133_v18  ;;  %v7965_v18 = vld [vmem:[%s9721_s6] ss:$0 sm:$0xff] }
 0x269   :  { %v5159_v22 = vadd.f32 %v5158_v9, %v5146_v19  ;;  %v7963_v9 = vld [vmem:[%s9719_s3] ss:$0 sm:$0xff] }
 0x26e   :  { %v5147_v14 = vpop.f32.mrf.mxu2 }
 0x26f   :  { %v5160_v15 = vpop.f32.mrf.mxu3 }
 0x27e   :  { %v5171_v23 = vpop.f32.mrf.mxu0 }
 0x27f   :  { %v5184_v24 = vpop.f32.mrf.mxu1  ;;  %v5172_v27 = vadd.f32 %v5171_v23, %v5159_v22 }
 0x281   :  { %v5185_v30 = vadd.f32 %v5184_v24, %v5172_v27  ;;  %v5346_v24 = vlaneseq }
 0x283   :  { %v5347_v27 = vand.u32 127, %v5346_v24 }
 0x285   :  { %vm5353_vm5 = vcmp.eq.s32.totalorder %v5347_v27, 0 }
 0x286   :  { %v5197_v31 = vpop.f32.mrf.mxu2  ;;  %v5173_v34 = vpop.f32.mrf.mxu0 }
 0x287   :  { %v5210_v32 = vpop.f32.mrf.mxu3  ;;  %v5198_v33 = vadd.f32 %v5197_v31, %v5185_v30  ;;  %v5186_v35 = vpop.f32.mrf.mxu1 }
 0x289   :  { %v5211_v38 = vadd.f32 %v5210_v32, %v5198_v33 }
 0x28b   :  { %v5214_v39 = vrot.slane %v5211_v38, 4  ;;  %v5220_v40 = vmul.f32 %v5211_v38, %v5211_v38 }
 0x28d   :  { %v5215_v43 = vadd.f32 %v5214_v39, %v5211_v38  ;;  %v5221_v44 = vrot.slane %v5220_v40, 4 }
 0x28e   :  { %v5199_v45 = vpop.f32.mrf.mxu2 }
 0x28f   :  { %v5212_v46 = vpop.f32.mrf.mxu3  ;;  %v5216_v47 = vrot.slane %v5215_v43, 2  ;;  %v5222_v48 = vadd.f32 %v5221_v44, %v5220_v40 }
 0x291   :  { %v5217_v51 = vadd.f32 %v5216_v47, %v5215_v43  ;;  %v5223_v52 = vrot.slane %v5222_v48, 2 }
 0x293   :  { %v5218_v53 = vrot.slane %v5217_v51, 1  ;;  %v5224_v54 = vadd.f32 %v5223_v52, %v5222_v48 }
 0x295   :  { %v5219_v57 = vadd.f32 %v5218_v53, %v5217_v51  ;;  %v5225_v58 = vrot.slane %v5224_v54, 1 }
 0x297   :  { %v5226_v60 = vadd.f32 %v5225_v58, %v5224_v54  ;;  %v5234_v61 = vmul.f32 %v5233_v56, %v5219_v57 }
 0x299   :  { %v5235_v62 = vmul.f32 %v5233_v56, %v5226_v60  ;;  %v5236_v63 = vmul.f32 %v5234_v61, %v5234_v61  ;;  %v5238_v8 = vsub.f32 %v5211_v38, %v5234_v61 }
 0x29b   :  { %v5237_v0 = vsub.f32 %v5235_v62, %v5236_v63 }
 0x29d   :  { %v5239_v1 = vadd.f32 1e-05, %v5237_v0 }
 0x29f   :  { %7968 = vrsqrt.f32 %v5239_v1  ;;  %vm5246_vm2 = vweird.f32 %v5239_v1 }
 0x2a5   :  { %v7969_v2 = vpop.eup %7968 }
 0x2a6   :  { %v5241_v3 = vmul.f32 %v7969_v2, %v5239_v1  ;;  %vm5247_vm1 = vweird.f32 %v7969_v2 }
 0x2a7   :  { %vm5248_vm3 = vmor %vm5246_vm2, %vm5247_vm1 }
 0x2a8   :  { %v5242_v4 = vmul.f32 %v7969_v2, %v5241_v3 }
 0x2aa   :  { %v5243_v5 = vmul.f32 0.5, %v5242_v4 }
 0x2ac   :  { %v5244_v6 = vsub.f32 1.5, %v5243_v5 }
 0x2ae   :  { %v5245_v7 = vmul.f32 %v7969_v2, %v5244_v6 }
 0x2b0   :  { %v5249_v10 = vsel %vm5248_vm3, %v7969_v2, %v5245_v7 }
 0x2b1   :  { %v5250_v11 = vmul.f32 %v5249_v10, %v5238_v8 }
 0x2b3   :  { %v5255_v13 = vmul.f32 %v7963_v9, %v5250_v11 }
 0x2b5   :  { %v5260_v14 = vadd.f32 %v7964_v12, %v5255_v13 }
 0x2b7   :  { %vm5261_vm4 = vcmp.ge.f32.partialorder %v5260_v14, 0.0  ;;  %v5262_v15 = vmul.f32 0.1, %v5260_v14 }
 0x2b9   :  { %v5263_v16 = vsel %vm5261_vm4, %v5260_v14, %v5262_v15 }
 0x2ba   :  { %v5264_v17 = vpack.c.bf16 %v5263_v16, %v5263_v16 }
 0x2bc   :  { %5341 = vmatmul.bf16.vlgmr.msra.gmra.mxu0 %v5264_v17 }
 0x339   :  { %v5342_v19 = vpop.f32.mrf.mxu0 }
 0x33a   :  { %v5343_v20 = vadd.f32 %v7965_v18, %v5342_v19 }
 0x33c   :  { %v5348_v21 = vsub.f32 0.0, %v5343_v20 }
 0x33e   :  { %v5349_v22 = vmul.f32 1.442695, %v5348_v21 }
 0x340   :  { %7970 = vpow2.f32 %v5349_v22 }
 0x341   :  { %v5344_v23 = vpop.f32.mrf.mxu0 }
 0x346   :  { %v7971_v25 = vpop.eup %7970 }
 0x347   :  { %v5351_v26 = vadd.f32 1.0, %v7971_v25 }
 0x349   :  { %7972 = vrcp.f32 %v5351_v26 }
 0x34f   :  { %v7973_v28 = vpop.eup %7972 }
 0x350   :  { %v5354_v29 = vsel %vm5353_vm5, %v7973_v28, %v5343_v20 }
 0x351   :  { %5356 = vst.msk [vmem:[%s9723_s7] sm:$0xff] %vm5355_vm6, %v5354_v29 }

</bundles_post_ra>
